<compile_context>
chip_gen: v7x
topology: tpu7x:2x2x1
jax: 0.10.0
libtpu: 0.0.40
codegen_flags: <defaults>
</compile_context>

<pallas_src>
import jax
import jax.numpy as jnp
from jax import lax
from jax.experimental import pallas as pl
from jax.experimental.pallas import tpu as pltpu

C_IN = 128      # W1 input channels / W2 output channels
C_MID = 256     # internal channel count
C_RED = 16      # CALayer reduction channels (256 // 16)
C_RED_PAD = 128  # lane-dense padding of the squeeze channels


# ---------------------------------------------------------------------------
# In-kernel helpers
# ---------------------------------------------------------------------------
def _wshift(xb, s):
    """Zero-filled shift along W (axis=1): out[:, j] = x[:, j - s], s in {+1,-1}."""
    H, W, C = xb.shape
    zc = jnp.zeros((H, 1, C), xb.dtype)
    if s == 1:
        return jnp.concatenate([zc, xb[:, :W - 1, :]], axis=1)
    return jnp.concatenate([xb[:, 1:, :], zc], axis=1)


def _hshift(xb, s):
    """Zero-filled shift along H (axis=0): out[h] = x[h - s], s in {+1,-1}."""
    H, W, C = xb.shape
    zr = jnp.zeros((1, W, C), xb.dtype)
    if s == 1:
        return jnp.concatenate([zr, xb[:H - 1]], axis=0)
    return jnp.concatenate([xb[1:], zr], axis=0)


def _conv3x3(x, w_ref):
    """3x3 'same' conv (stride 1, pad 1, no bias) on one (H, W, cin) tile.

    x: (H, W, cin) f32 value.  w_ref: (9*cin, cout) bf16 ref, rows ordered
    tap-major with tap = kh*3 + kw.  Returns (H, W, cout) f32.
    """
    H, W, cin = x.shape
    cout = w_ref.shape[1]
    xb = x.astype(jnp.bfloat16)
    # Concatenate the kw = 0/1/2 taps along channels once; this block is reused
    # (h-shifted) for all three kh rows -> only two sublane shifts per conv.
    xcat = jnp.concatenate([_wshift(xb, 1), xb, _wshift(xb, -1)], axis=-1)
    k3 = 3 * cin
    m = H * W
    y = jnp.dot(_hshift(xcat, 1).reshape(m, k3), w_ref[0:k3, :],
                preferred_element_type=jnp.float32)               # kh = 0
    y = y + jnp.dot(xcat.reshape(m, k3), w_ref[k3:2 * k3, :],
                    preferred_element_type=jnp.float32)           # kh = 1
    y = y + jnp.dot(_hshift(xcat, -1).reshape(m, k3), w_ref[2 * k3:3 * k3, :],
                    preferred_element_type=jnp.float32)           # kh = 2
    return y.reshape(H, W, cout)


def _conv1x1(x, w_ref):
    H, W, cin = x.shape
    y = jnp.dot(x.reshape(H * W, cin).astype(jnp.bfloat16), w_ref[...],
                preferred_element_type=jnp.float32)
    return y.reshape(H, W, w_ref.shape[1])


# ---------------------------------------------------------------------------
# Fused MySCN forward kernel (one batch element per grid step)
# ---------------------------------------------------------------------------
def myscn_kernel(x_ref, w1_ref, s_ref, w2_ref,
                 rw1a_ref, rw1b_ref, rw2a_ref, rw2b_ref,
                 rww1_ref, rww2_ref, t_ref,
                 out_ref,
                 z_ref, tmp_ref):

    def ca(v, wa_ref, wb_ref):   # CALayer: v * sigmoid(conv1x1(relu(conv1x1(v))))
        h = jnp.maximum(_conv1x1(v, wa_ref), 0.0)
        return v * jax.nn.sigmoid(_conv1x1(h, wb_ref))

    def caa(v, w_ref_1x1):       # CALayera: v * sigmoid(conv1x1(v))
        return v * jax.nn.sigmoid(_conv1x1(v, w_ref_1x1))

    z = _conv3x3(x_ref[0], w1_ref)          # (H, W, 256) f32
    z_ref[...] = z
    tmp_ref[...] = z

    @pl.loop(0, 5)
    def _(i):
        x = ca(tmp_ref[...], rw1a_ref, rw1b_ref)
        x = jnp.maximum(x - t_ref[0], 0.0)            # shlu(. - T)
        x = ca(x, rw2a_ref, rw2b_ref)
        x = _conv3x3(x, s_ref)
        tmp_ref[...] = x + z_ref[...]

    c = caa(tmp_ref[...], rww1_ref)                   # tmp == x + z after the loop
    c = jnp.maximum(c - t_ref[0], 0.0)
    c = caa(c, rww2_ref)
    out = _conv3x3(c, w2_ref)                         # (H, W, 128)
    out_ref[0] = jnp.maximum(out, 0.0).astype(out_ref.dtype)


def myscn_forward(x_nhwc, params):
    N, H, W, cin = x_nhwc.shape
    assert cin == C_IN
    w1, s, w2, rw1a, rw1b, rw2a, rw2b, rww1, rww2, t = params

    bf = jnp.bfloat16
    # bf16 MXU operands; 3x3 weights flattened tap-major to (9*Cin, Cout);
    # squeeze/excite 1x1 weights zero-padded to 128 lanes (mathematically exact).
    w1_k = w1.reshape(9 * C_IN, C_MID).astype(bf)
    s_k = s.reshape(9 * C_MID, C_MID).astype(bf)
    w2_k = w2.reshape(9 * C_MID, C_IN).astype(bf)
    rw1a_k = jnp.pad(rw1a, ((0, 0), (0, C_RED_PAD - C_RED))).astype(bf)
    rw2a_k = jnp.pad(rw2a, ((0, 0), (0, C_RED_PAD - C_RED))).astype(bf)
    rw1b_k = jnp.pad(rw1b, ((0, C_RED_PAD - C_RED), (0, 0))).astype(bf)
    rw2b_k = jnp.pad(rw2b, ((0, C_RED_PAD - C_RED), (0, 0))).astype(bf)
    rww1_k = rww1.astype(bf)
    rww2_k = rww2.astype(bf)

    def full_spec(arr):
        nd = arr.ndim
        return pl.BlockSpec(arr.shape, lambda n, _nd=nd: (0,) * _nd)

    grid_spec = pltpu.PrefetchScalarGridSpec(
        num_scalar_prefetch=0,
        grid=(N,),
        in_specs=[
            pl.BlockSpec((1, H, W, C_IN), lambda n: (n, 0, 0, 0)),   # input tile
            full_spec(w1_k), full_spec(s_k), full_spec(w2_k),
            full_spec(rw1a_k), full_spec(rw1b_k),
            full_spec(rw2a_k), full_spec(rw2b_k),
            full_spec(rww1_k), full_spec(rww2_k),
            pl.BlockSpec(memory_space=pltpu.MemorySpace.SMEM),       # scalar T
        ],
        out_specs=pl.BlockSpec((1, H, W, C_IN), lambda n: (n, 0, 0, 0)),
        scratch_shapes=[
            pltpu.VMEM((H, W, C_MID), jnp.float32),   # z  (residual)
            pltpu.VMEM((H, W, C_MID), jnp.float32),   # tmp (loop state)
        ],
    )
    return pl.pallas_call(
        myscn_kernel,
        out_shape=jax.ShapeDtypeStruct((N, H, W, C_IN), jnp.float32),
        grid_spec=grid_spec,
        compiler_params=pltpu.CompilerParams(
            dimension_semantics=("parallel",),        # batch across TCs on v7x
            vmem_limit_bytes=40 * 1024 * 1024,
        ),
    )(x_nhwc, w1_k, s_k, w2_k, rw1a_k, rw1b_k, rw2a_k, rw2b_k,
      rww1_k, rww2_k, t)


# ---------------------------------------------------------------------------
# Pure-JAX reference (same bf16-at-matmul-boundary numerics as the kernel)
# ---------------------------------------------------------------------------
def _conv3x3_ref(x, w9):
    w = w9.reshape(3, 3, w9.shape[1], w9.shape[2]).astype(jnp.bfloat16)
    return lax.conv_general_dilated(
        x.astype(jnp.bfloat16), w, window_strides=(1, 1),
        padding=((1, 1), (1, 1)),
        dimension_numbers=('NHWC', 'HWIO', 'NHWC'),
        preferred_element_type=jnp.float32)


def _conv1x1_ref(x, w):
    return jnp.einsum('nhwc,cd->nhwd', x.astype(jnp.bfloat16),
                      w.astype(jnp.bfloat16),
                      preferred_element_type=jnp.float32)


def myscn_ref(x, params):
    w1, s, w2, rw1a, rw1b, rw2a, rw2b, rww1, rww2, t = params
    T = t[0]

    def ca(v, wa, wb):
        h = jnp.maximum(_conv1x1_ref(v, wa), 0.0)
        return v * jax.nn.sigmoid(_conv1x1_ref(h, wb))

    def caa(v, w):
        return v * jax.nn.sigmoid(_conv1x1_ref(v, w))

    z = _conv3x3_ref(x, w1)
    tmp = z
    xx = z
    for _ in range(5):
        xx = ca(tmp, rw1a, rw1b)
        xx = jnp.maximum(xx - T, 0.0)
        xx = ca(xx, rw2a, rw2b)
        xx = _conv3x3_ref(xx, s)
        tmp = xx + z
    c = caa(xx + z, rww1)
    c = jnp.maximum(c - T, 0.0)
    c = caa(c, rww2)
    return jnp.maximum(_conv3x3_ref(c, w2), 0.0)


# ---------------------------------------------------------------------------
# Deterministic parameter init + driver
# ---------------------------------------------------------------------------
def make_params(key):
    ks = jax.random.split(key, 9)

    def conv3_w(k, cin, cout):
        std = (2.0 / (9 * cin)) ** 0.5
        return jax.random.normal(k, (9, cin, cout), jnp.float32) * std

    def conv1_w(k, cin, cout):
        std = (2.0 / cin) ** 0.5
        return jax.random.normal(k, (cin, cout), jnp.float32) * std

    w1 = conv3_w(ks[0], C_IN, C_MID)      # W1: 128 -> 256, 3x3
    s = conv3_w(ks[1], C_MID, C_MID)      # S : 256 -> 256, 3x3
    w2 = conv3_w(ks[2], C_MID, C_IN)      # W2: 256 -> 128, 3x3
    rw1a = conv1_w(ks[3], C_MID, C_RED)   # RW1 squeeze 256 -> 16
    rw1b = conv1_w(ks[4], C_RED, C_MID)   # RW1 excite  16 -> 256
    rw2a = conv1_w(ks[5], C_MID, C_RED)   # RW2 squeeze
    rw2b = conv1_w(ks[6], C_RED, C_MID)   # RW2 excite
    rww1 = conv1_w(ks[7], C_MID, C_MID)   # RWW1 1x1 256 -> 256
    rww2 = conv1_w(ks[8], C_MID, C_MID)   # RWW2 1x1 256 -> 256
    t = jnp.zeros((1,), jnp.float32)      # T parameter, nn.init.constant(T, 0)
    return (w1, s, w2, rw1a, rw1b, rw2a, rw2b, rww1, rww2, t)


if __name__ == "__main__":
    key = jax.random.PRNGKey(0)
    k_x, k_p = jax.random.split(key)

    N, H, W = 2, 8, 8
    # PyTorch module expects NCHW (2, 128, 8, 8); build NCHW then move to NHWC.
    x_nchw = jax.random.normal(k_x, (N, C_IN, H, W), jnp.float32)
    x_nhwc = jnp.transpose(x_nchw, (0, 2, 3, 1))

    params = make_params(k_p)

    out_nhwc = myscn_forward(x_nhwc, params)
    out_nhwc = jax.block_until_ready(out_nhwc)
    out_nchw = jnp.transpose(out_nhwc, (0, 3, 1, 2))   # back to PyTorch layout

    ref_nhwc = jax.block_until_ready(myscn_ref(x_nhwc, params))
    err = float(jnp.max(jnp.abs(out_nhwc - ref_nhwc)))
    scale = float(jnp.max(jnp.abs(ref_nhwc))) + 1e-6
    assert out_nchw.shape == (N, C_IN, H, W)
    assert err <= 2e-2 * scale, f"mismatch vs reference: {err} (scale {scale})"

    print("KERNEL_OK")
</pallas_src>

<mosaic_0001>
module attributes {stable_mosaic.version = 11 : i64} {
  func.func @myscn_kernel(%arg0: i32, %arg1: memref<1x8x8x128xf32, #tpu.memory_space<vmem>>, %arg2: memref<1152x256xbf16, #tpu.memory_space<vmem>>, %arg3: memref<2304x256xbf16, #tpu.memory_space<vmem>>, %arg4: memref<2304x128xbf16, #tpu.memory_space<vmem>>, %arg5: memref<256x128xbf16, #tpu.memory_space<vmem>>, %arg6: memref<128x256xbf16, #tpu.memory_space<vmem>>, %arg7: memref<256x128xbf16, #tpu.memory_space<vmem>>, %arg8: memref<128x256xbf16, #tpu.memory_space<vmem>>, %arg9: memref<256x256xbf16, #tpu.memory_space<vmem>>, %arg10: memref<256x256xbf16, #tpu.memory_space<vmem>>, %arg11: memref<1xf32, #tpu.memory_space<smem>>, %arg12: memref<1x8x8x128xf32, #tpu.memory_space<vmem>>, %arg13: memref<8x8x256xf32, #tpu.memory_space<vmem>>, %arg14: memref<8x8x256xf32, #tpu.memory_space<vmem>>) attributes {dimension_semantics = [#tpu.dimension_semantics<parallel>], iteration_bounds = array<i64: 2>, scalar_prefetch = 0 : i64, scratch_operands = 2 : i64, tpu.core_type = #tpu.core_type<tc>, window_params = [{transform_indices = @transform_0, window_bounds = array<i64: 1, 8, 8, 128>}, {pipeline_mode = #tpu.pipeline_mode<synchronous>, transform_indices = @transform_1, window_bounds = array<i64: 1152, 256>}, {pipeline_mode = #tpu.pipeline_mode<synchronous>, transform_indices = @transform_2, window_bounds = array<i64: 2304, 256>}, {pipeline_mode = #tpu.pipeline_mode<synchronous>, transform_indices = @transform_3, window_bounds = array<i64: 2304, 128>}, {pipeline_mode = #tpu.pipeline_mode<synchronous>, transform_indices = @transform_4, window_bounds = array<i64: 256, 128>}, {pipeline_mode = #tpu.pipeline_mode<synchronous>, transform_indices = @transform_5, window_bounds = array<i64: 128, 256>}, {pipeline_mode = #tpu.pipeline_mode<synchronous>, transform_indices = @transform_6, window_bounds = array<i64: 256, 128>}, {pipeline_mode = #tpu.pipeline_mode<synchronous>, transform_indices = @transform_7, window_bounds = array<i64: 128, 256>}, {pipeline_mode = #tpu.pipeline_mode<synchronous>, transform_indices = @transform_8, window_bounds = array<i64: 256, 256>}, {pipeline_mode = #tpu.pipeline_mode<synchronous>, transform_indices = @transform_9, window_bounds = array<i64: 256, 256>}, {transform_indices = @transform_10, window_bounds = array<i64: 1>}, {transform_indices = @transform_11, window_bounds = array<i64: 1, 8, 8, 128>}]} {
    %c0 = arith.constant 0 : index
    %c0_0 = arith.constant 0 : index
    %c0_1 = arith.constant 0 : index
    %c0_2 = arith.constant 0 : index
    %0 = vector.load %arg1[%c0, %c0_0, %c0_1, %c0_2] : memref<1x8x8x128xf32, #tpu.memory_space<vmem>>, vector<1x8x8x128xf32>
    %1 = vector.shape_cast %0 : vector<1x8x8x128xf32> to vector<8x8x128xf32>
    %2 = arith.truncf %1 : vector<8x8x128xf32> to vector<8x8x128xbf16>
    %cst = arith.constant 0.000000e+00 : bf16
    %3 = vector.broadcast %cst : bf16 to vector<8x1x128xbf16>
    %4 = vector.extract_strided_slice %2 {offsets = [0, 0, 0], sizes = [8, 7, 128], strides = [1, 1, 1]} : vector<8x8x128xbf16> to vector<8x7x128xbf16>
    %5 = tpu.concatenate %3, %4 in 1 : vector<8x1x128xbf16>, vector<8x7x128xbf16> -> vector<8x8x128xbf16>
    %cst_3 = arith.constant 0.000000e+00 : bf16
    %6 = vector.broadcast %cst_3 : bf16 to vector<8x1x128xbf16>
    %7 = vector.extract_strided_slice %2 {offsets = [0, 1, 0], sizes = [8, 7, 128], strides = [1, 1, 1]} : vector<8x8x128xbf16> to vector<8x7x128xbf16>
    %8 = tpu.concatenate %7, %6 in 1 : vector<8x7x128xbf16>, vector<8x1x128xbf16> -> vector<8x8x128xbf16>
    %9 = tpu.concatenate %5, %2, %8 in 2 : vector<8x8x128xbf16>, vector<8x8x128xbf16>, vector<8x8x128xbf16> -> vector<8x8x384xbf16>
    %cst_4 = arith.constant 0.000000e+00 : bf16
    %10 = vector.broadcast %cst_4 : bf16 to vector<1x8x384xbf16>
    %11 = vector.extract_strided_slice %9 {offsets = [0, 0, 0], sizes = [7, 8, 384], strides = [1, 1, 1]} : vector<8x8x384xbf16> to vector<7x8x384xbf16>
    %12 = tpu.concatenate %10, %11 in 0 : vector<1x8x384xbf16>, vector<7x8x384xbf16> -> vector<8x8x384xbf16>
    %13 = vector.shape_cast %12 : vector<8x8x384xbf16> to vector<64x384xbf16>
    %c0_5 = arith.constant 0 : index
    %c0_6 = arith.constant 0 : index
    %14 = vector.load %arg2[%c0_5, %c0_6] : memref<1152x256xbf16, #tpu.memory_space<vmem>>, vector<384x256xbf16>
    %cst_7 = arith.constant dense<0.000000e+00> : vector<64x256xf32>
    %15 = tpu.matmul %13, %14, %cst_7 {dimension_numbers = #tpu.dot_dimension_numbers<[1], [0], [0], [1], [0, 0, 1, 1], [], []>} : vector<64x384xbf16>, vector<384x256xbf16>, vector<64x256xf32> -> vector<64x256xf32>
    %16 = vector.shape_cast %9 : vector<8x8x384xbf16> to vector<64x384xbf16>
    %c384 = arith.constant 384 : index
    %c0_8 = arith.constant 0 : index
    %17 = vector.load %arg2[%c384, %c0_8] : memref<1152x256xbf16, #tpu.memory_space<vmem>>, vector<384x256xbf16>
    %cst_9 = arith.constant dense<0.000000e+00> : vector<64x256xf32>
    %18 = tpu.matmul %16, %17, %cst_9 {dimension_numbers = #tpu.dot_dimension_numbers<[1], [0], [0], [1], [0, 0, 1, 1], [], []>} : vector<64x384xbf16>, vector<384x256xbf16>, vector<64x256xf32> -> vector<64x256xf32>
    %19 = arith.addf %15, %18 : vector<64x256xf32>
    %cst_10 = arith.constant 0.000000e+00 : bf16
    %20 = vector.broadcast %cst_10 : bf16 to vector<1x8x384xbf16>
    %21 = vector.extract_strided_slice %9 {offsets = [1, 0, 0], sizes = [7, 8, 384], strides = [1, 1, 1]} : vector<8x8x384xbf16> to vector<7x8x384xbf16>
    %22 = tpu.concatenate %21, %20 in 0 : vector<7x8x384xbf16>, vector<1x8x384xbf16> -> vector<8x8x384xbf16>
    %23 = vector.shape_cast %22 : vector<8x8x384xbf16> to vector<64x384xbf16>
    %c768 = arith.constant 768 : index
    %c0_11 = arith.constant 0 : index
    %24 = vector.load %arg2[%c768, %c0_11] : memref<1152x256xbf16, #tpu.memory_space<vmem>>, vector<384x256xbf16>
    %cst_12 = arith.constant dense<0.000000e+00> : vector<64x256xf32>
    %25 = tpu.matmul %23, %24, %cst_12 {dimension_numbers = #tpu.dot_dimension_numbers<[1], [0], [0], [1], [0, 0, 1, 1], [], []>} : vector<64x384xbf16>, vector<384x256xbf16>, vector<64x256xf32> -> vector<64x256xf32>
    %26 = arith.addf %19, %25 : vector<64x256xf32>
    %27 = vector.shape_cast %26 : vector<64x256xf32> to vector<8x8x256xf32>
    %c0_13 = arith.constant 0 : index
    %c0_14 = arith.constant 0 : index
    %c0_15 = arith.constant 0 : index
    %28 = vector.load %arg13[%c0_13, %c0_14, %c0_15] : memref<8x8x256xf32, #tpu.memory_space<vmem>>, vector<8x8x256xf32>
    tpu.vector_store %arg13[%c0_13, %c0_14, %c0_15], %27 {strides = array<i32>} : memref<8x8x256xf32, #tpu.memory_space<vmem>>, vector<8x8x256xf32>,
    %c0_16 = arith.constant 0 : index
    %c0_17 = arith.constant 0 : index
    %c0_18 = arith.constant 0 : index
    %29 = vector.load %arg14[%c0_16, %c0_17, %c0_18] : memref<8x8x256xf32, #tpu.memory_space<vmem>>, vector<8x8x256xf32>
    tpu.vector_store %arg14[%c0_16, %c0_17, %c0_18], %27 {strides = array<i32>} : memref<8x8x256xf32, #tpu.memory_space<vmem>>, vector<8x8x256xf32>,
    %c0_i32 = arith.constant 0 : i32
    %c5_i32 = arith.constant 5 : i32
    %30 = arith.addi %c0_i32, %c5_i32 : i32
    %c1_i32 = arith.constant 1 : i32
    scf.for %arg15 = %c0_i32 to %30 step %c1_i32  : i32 {
      %c0_49 = arith.constant 0 : index
      %c0_50 = arith.constant 0 : index
      %c0_51 = arith.constant 0 : index
      %90 = vector.load %arg14[%c0_49, %c0_50, %c0_51] : memref<8x8x256xf32, #tpu.memory_space<vmem>>, vector<8x8x256xf32>
      %91 = vector.shape_cast %90 : vector<8x8x256xf32> to vector<64x256xf32>
      %92 = arith.truncf %91 : vector<64x256xf32> to vector<64x256xbf16>
      %c0_52 = arith.constant 0 : index
      %c0_53 = arith.constant 0 : index
      %93 = vector.load %arg5[%c0_52, %c0_53] : memref<256x128xbf16, #tpu.memory_space<vmem>>, vector<256x128xbf16>
      %cst_54 = arith.constant dense<0.000000e+00> : vector<64x128xf32>
      %94 = tpu.matmul %92, %93, %cst_54 {dimension_numbers = #tpu.dot_dimension_numbers<[1], [0], [0], [1], [0, 0, 1, 1], [], []>} : vector<64x256xbf16>, vector<256x128xbf16>, vector<64x128xf32> -> vector<64x128xf32>
      %95 = vector.shape_cast %94 : vector<64x128xf32> to vector<8x8x128xf32>
      %cst_55 = arith.constant 0.000000e+00 : f32
      %96 = vector.broadcast %cst_55 : f32 to vector<8x8x128xf32>
      %97 = arith.maximumf %95, %96 : vector<8x8x128xf32>
      %98 = vector.shape_cast %97 : vector<8x8x128xf32> to vector<64x128xf32>
      %99 = arith.truncf %98 : vector<64x128xf32> to vector<64x128xbf16>
      %c0_56 = arith.constant 0 : index
      %c0_57 = arith.constant 0 : index
      %100 = vector.load %arg6[%c0_56, %c0_57] : memref<128x256xbf16, #tpu.memory_space<vmem>>, vector<128x256xbf16>
      %cst_58 = arith.constant dense<0.000000e+00> : vector<64x256xf32>
      %101 = tpu.matmul %99, %100, %cst_58 {dimension_numbers = #tpu.dot_dimension_numbers<[1], [0], [0], [1], [0, 0, 1, 1], [], []>} : vector<64x128xbf16>, vector<128x256xbf16>, vector<64x256xf32> -> vector<64x256xf32>
      %102 = vector.shape_cast %101 : vector<64x256xf32> to vector<8x8x256xf32>
      %103 = arith.negf %102 : vector<8x8x256xf32>
      %104 = math.exp %103 : vector<8x8x256xf32>
      %cst_59 = arith.constant 1.000000e+00 : f32
      %105 = vector.broadcast %cst_59 : f32 to vector<8x8x256xf32>
      %106 = arith.addf %105, %104 : vector<8x8x256xf32>
      %107 = arith.divf %105, %106 : vector<8x8x256xf32>
      %108 = arith.mulf %90, %107 : vector<8x8x256xf32>
      %c0_60 = arith.constant 0 : index
      %109 = memref.load %arg11[%c0_60] : memref<1xf32, #tpu.memory_space<smem>>
      %110 = vector.broadcast %109 : f32 to vector<8x8x256xf32>
      %111 = arith.subf %108, %110 : vector<8x8x256xf32>
      %cst_61 = arith.constant 0.000000e+00 : f32
      %112 = vector.broadcast %cst_61 : f32 to vector<8x8x256xf32>
      %113 = arith.maximumf %111, %112 : vector<8x8x256xf32>
      %114 = vector.shape_cast %113 : vector<8x8x256xf32> to vector<64x256xf32>
      %115 = arith.truncf %114 : vector<64x256xf32> to vector<64x256xbf16>
      %c0_62 = arith.constant 0 : index
      %c0_63 = arith.constant 0 : index
      %116 = vector.load %arg7[%c0_62, %c0_63] : memref<256x128xbf16, #tpu.memory_space<vmem>>, vector<256x128xbf16>
      %cst_64 = arith.constant dense<0.000000e+00> : vector<64x128xf32>
      %117 = tpu.matmul %115, %116, %cst_64 {dimension_numbers = #tpu.dot_dimension_numbers<[1], [0], [0], [1], [0, 0, 1, 1], [], []>} : vector<64x256xbf16>, vector<256x128xbf16>, vector<64x128xf32> -> vector<64x128xf32>
      %118 = vector.shape_cast %117 : vector<64x128xf32> to vector<8x8x128xf32>
      %cst_65 = arith.constant 0.000000e+00 : f32
      %119 = vector.broadcast %cst_65 : f32 to vector<8x8x128xf32>
      %120 = arith.maximumf %118, %119 : vector<8x8x128xf32>
      %121 = vector.shape_cast %120 : vector<8x8x128xf32> to vector<64x128xf32>
      %122 = arith.truncf %121 : vector<64x128xf32> to vector<64x128xbf16>
      %c0_66 = arith.constant 0 : index
      %c0_67 = arith.constant 0 : index
      %123 = vector.load %arg8[%c0_66, %c0_67] : memref<128x256xbf16, #tpu.memory_space<vmem>>, vector<128x256xbf16>
      %cst_68 = arith.constant dense<0.000000e+00> : vector<64x256xf32>
      %124 = tpu.matmul %122, %123, %cst_68 {dimension_numbers = #tpu.dot_dimension_numbers<[1], [0], [0], [1], [0, 0, 1, 1], [], []>} : vector<64x128xbf16>, vector<128x256xbf16>, vector<64x256xf32> -> vector<64x256xf32>
      %125 = vector.shape_cast %124 : vector<64x256xf32> to vector<8x8x256xf32>
      %126 = arith.negf %125 : vector<8x8x256xf32>
      %127 = math.exp %126 : vector<8x8x256xf32>
      %cst_69 = arith.constant 1.000000e+00 : f32
      %128 = vector.broadcast %cst_69 : f32 to vector<8x8x256xf32>
      %129 = arith.addf %128, %127 : vector<8x8x256xf32>
      %130 = arith.divf %128, %129 : vector<8x8x256xf32>
      %131 = arith.mulf %113, %130 : vector<8x8x256xf32>
      %132 = arith.truncf %131 : vector<8x8x256xf32> to vector<8x8x256xbf16>
      %cst_70 = arith.constant 0.000000e+00 : bf16
      %133 = vector.broadcast %cst_70 : bf16 to vector<8x1x256xbf16>
      %134 = vector.extract_strided_slice %132 {offsets = [0, 0, 0], sizes = [8, 7, 256], strides = [1, 1, 1]} : vector<8x8x256xbf16> to vector<8x7x256xbf16>
      %135 = tpu.concatenate %133, %134 in 1 : vector<8x1x256xbf16>, vector<8x7x256xbf16> -> vector<8x8x256xbf16>
      %cst_71 = arith.constant 0.000000e+00 : bf16
      %136 = vector.broadcast %cst_71 : bf16 to vector<8x1x256xbf16>
      %137 = vector.extract_strided_slice %132 {offsets = [0, 1, 0], sizes = [8, 7, 256], strides = [1, 1, 1]} : vector<8x8x256xbf16> to vector<8x7x256xbf16>
      %138 = tpu.concatenate %137, %136 in 1 : vector<8x7x256xbf16>, vector<8x1x256xbf16> -> vector<8x8x256xbf16>
      %139 = tpu.concatenate %135, %132, %138 in 2 : vector<8x8x256xbf16>, vector<8x8x256xbf16>, vector<8x8x256xbf16> -> vector<8x8x768xbf16>
      %cst_72 = arith.constant 0.000000e+00 : bf16
      %140 = vector.broadcast %cst_72 : bf16 to vector<1x8x768xbf16>
      %141 = vector.extract_strided_slice %139 {offsets = [0, 0, 0], sizes = [7, 8, 768], strides = [1, 1, 1]} : vector<8x8x768xbf16> to vector<7x8x768xbf16>
      %142 = tpu.concatenate %140, %141 in 0 : vector<1x8x768xbf16>, vector<7x8x768xbf16> -> vector<8x8x768xbf16>
      %143 = vector.shape_cast %142 : vector<8x8x768xbf16> to vector<64x768xbf16>
      %c0_73 = arith.constant 0 : index
      %c0_74 = arith.constant 0 : index
      %144 = vector.load %arg3[%c0_73, %c0_74] : memref<2304x256xbf16, #tpu.memory_space<vmem>>, vector<768x256xbf16>
      %cst_75 = arith.constant dense<0.000000e+00> : vector<64x256xf32>
      %145 = tpu.matmul %143, %144, %cst_75 {dimension_numbers = #tpu.dot_dimension_numbers<[1], [0], [0], [1], [0, 0, 1, 1], [], []>} : vector<64x768xbf16>, vector<768x256xbf16>, vector<64x256xf32> -> vector<64x256xf32>
      %146 = vector.shape_cast %139 : vector<8x8x768xbf16> to vector<64x768xbf16>
      %c768_76 = arith.constant 768 : index
      %c0_77 = arith.constant 0 : index
      %147 = vector.load %arg3[%c768_76, %c0_77] : memref<2304x256xbf16, #tpu.memory_space<vmem>>, vector<768x256xbf16>
      %cst_78 = arith.constant dense<0.000000e+00> : vector<64x256xf32>
      %148 = tpu.matmul %146, %147, %cst_78 {dimension_numbers = #tpu.dot_dimension_numbers<[1], [0], [0], [1], [0, 0, 1, 1], [], []>} : vector<64x768xbf16>, vector<768x256xbf16>, vector<64x256xf32> -> vector<64x256xf32>
      %149 = arith.addf %145, %148 : vector<64x256xf32>
      %cst_79 = arith.constant 0.000000e+00 : bf16
      %150 = vector.broadcast %cst_79 : bf16 to vector<1x8x768xbf16>
      %151 = vector.extract_strided_slice %139 {offsets = [1, 0, 0], sizes = [7, 8, 768], strides = [1, 1, 1]} : vector<8x8x768xbf16> to vector<7x8x768xbf16>
      %152 = tpu.concatenate %151, %150 in 0 : vector<7x8x768xbf16>, vector<1x8x768xbf16> -> vector<8x8x768xbf16>
      %153 = vector.shape_cast %152 : vector<8x8x768xbf16> to vector<64x768xbf16>
      %c1536_80 = arith.constant 1536 : index
      %c0_81 = arith.constant 0 : index
      %154 = vector.load %arg3[%c1536_80, %c0_81] : memref<2304x256xbf16, #tpu.memory_space<vmem>>, vector<768x256xbf16>
      %cst_82 = arith.constant dense<0.000000e+00> : vector<64x256xf32>
      %155 = tpu.matmul %153, %154, %cst_82 {dimension_numbers = #tpu.dot_dimension_numbers<[1], [0], [0], [1], [0, 0, 1, 1], [], []>} : vector<64x768xbf16>, vector<768x256xbf16>, vector<64x256xf32> -> vector<64x256xf32>
      %156 = arith.addf %149, %155 : vector<64x256xf32>
      %157 = vector.shape_cast %156 : vector<64x256xf32> to vector<8x8x256xf32>
      %c0_83 = arith.constant 0 : index
      %c0_84 = arith.constant 0 : index
      %c0_85 = arith.constant 0 : index
      %158 = vector.load %arg13[%c0_83, %c0_84, %c0_85] : memref<8x8x256xf32, #tpu.memory_space<vmem>>, vector<8x8x256xf32>
      %159 = arith.addf %157, %158 : vector<8x8x256xf32>
      %c0_86 = arith.constant 0 : index
      %c0_87 = arith.constant 0 : index
      %c0_88 = arith.constant 0 : index
      %160 = vector.load %arg14[%c0_86, %c0_87, %c0_88] : memref<8x8x256xf32, #tpu.memory_space<vmem>>, vector<8x8x256xf32>
      tpu.vector_store %arg14[%c0_86, %c0_87, %c0_88], %159 {strides = array<i32>} : memref<8x8x256xf32, #tpu.memory_space<vmem>>, vector<8x8x256xf32>,
    }
    %c0_19 = arith.constant 0 : index
    %c0_20 = arith.constant 0 : index
    %c0_21 = arith.constant 0 : index
    %31 = vector.load %arg14[%c0_19, %c0_20, %c0_21] : memref<8x8x256xf32, #tpu.memory_space<vmem>>, vector<8x8x256xf32>
    %32 = vector.shape_cast %31 : vector<8x8x256xf32> to vector<64x256xf32>
    %33 = arith.truncf %32 : vector<64x256xf32> to vector<64x256xbf16>
    %c0_22 = arith.constant 0 : index
    %c0_23 = arith.constant 0 : index
    %34 = vector.load %arg9[%c0_22, %c0_23] : memref<256x256xbf16, #tpu.memory_space<vmem>>, vector<256x256xbf16>
    %cst_24 = arith.constant dense<0.000000e+00> : vector<64x256xf32>
    %35 = tpu.matmul %33, %34, %cst_24 {dimension_numbers = #tpu.dot_dimension_numbers<[1], [0], [0], [1], [0, 0, 1, 1], [], []>} : vector<64x256xbf16>, vector<256x256xbf16>, vector<64x256xf32> -> vector<64x256xf32>
    %36 = vector.shape_cast %35 : vector<64x256xf32> to vector<8x8x256xf32>
    %37 = arith.negf %36 : vector<8x8x256xf32>
    %38 = math.exp %37 : vector<8x8x256xf32>
    %cst_25 = arith.constant 1.000000e+00 : f32
    %39 = vector.broadcast %cst_25 : f32 to vector<8x8x256xf32>
    %40 = arith.addf %39, %38 : vector<8x8x256xf32>
    %41 = arith.divf %39, %40 : vector<8x8x256xf32>
    %42 = arith.mulf %31, %41 : vector<8x8x256xf32>
    %c0_26 = arith.constant 0 : index
    %43 = memref.load %arg11[%c0_26] : memref<1xf32, #tpu.memory_space<smem>>
    %44 = vector.broadcast %43 : f32 to vector<8x8x256xf32>
    %45 = arith.subf %42, %44 : vector<8x8x256xf32>
    %cst_27 = arith.constant 0.000000e+00 : f32
    %46 = vector.broadcast %cst_27 : f32 to vector<8x8x256xf32>
    %47 = arith.maximumf %45, %46 : vector<8x8x256xf32>
    %48 = vector.shape_cast %47 : vector<8x8x256xf32> to vector<64x256xf32>
    %49 = arith.truncf %48 : vector<64x256xf32> to vector<64x256xbf16>
    %c0_28 = arith.constant 0 : index
    %c0_29 = arith.constant 0 : index
    %50 = vector.load %arg10[%c0_28, %c0_29] : memref<256x256xbf16, #tpu.memory_space<vmem>>, vector<256x256xbf16>
    %cst_30 = arith.constant dense<0.000000e+00> : vector<64x256xf32>
    %51 = tpu.matmul %49, %50, %cst_30 {dimension_numbers = #tpu.dot_dimension_numbers<[1], [0], [0], [1], [0, 0, 1, 1], [], []>} : vector<64x256xbf16>, vector<256x256xbf16>, vector<64x256xf32> -> vector<64x256xf32>
    %52 = vector.shape_cast %51 : vector<64x256xf32> to vector<8x8x256xf32>
    %53 = arith.negf %52 : vector<8x8x256xf32>
    %54 = math.exp %53 : vector<8x8x256xf32>
    %cst_31 = arith.constant 1.000000e+00 : f32
    %55 = vector.broadcast %cst_31 : f32 to vector<8x8x256xf32>
    %56 = arith.addf %55, %54 : vector<8x8x256xf32>
    %57 = arith.divf %55, %56 : vector<8x8x256xf32>
    %58 = arith.mulf %47, %57 : vector<8x8x256xf32>
    %59 = arith.truncf %58 : vector<8x8x256xf32> to vector<8x8x256xbf16>
    %cst_32 = arith.constant 0.000000e+00 : bf16
    %60 = vector.broadcast %cst_32 : bf16 to vector<8x1x256xbf16>
    %61 = vector.extract_strided_slice %59 {offsets = [0, 0, 0], sizes = [8, 7, 256], strides = [1, 1, 1]} : vector<8x8x256xbf16> to vector<8x7x256xbf16>
    %62 = tpu.concatenate %60, %61 in 1 : vector<8x1x256xbf16>, vector<8x7x256xbf16> -> vector<8x8x256xbf16>
    %cst_33 = arith.constant 0.000000e+00 : bf16
    %63 = vector.broadcast %cst_33 : bf16 to vector<8x1x256xbf16>
    %64 = vector.extract_strided_slice %59 {offsets = [0, 1, 0], sizes = [8, 7, 256], strides = [1, 1, 1]} : vector<8x8x256xbf16> to vector<8x7x256xbf16>
    %65 = tpu.concatenate %64, %63 in 1 : vector<8x7x256xbf16>, vector<8x1x256xbf16> -> vector<8x8x256xbf16>
    %66 = tpu.concatenate %62, %59, %65 in 2 : vector<8x8x256xbf16>, vector<8x8x256xbf16>, vector<8x8x256xbf16> -> vector<8x8x768xbf16>
    %cst_34 = arith.constant 0.000000e+00 : bf16
    %67 = vector.broadcast %cst_34 : bf16 to vector<1x8x768xbf16>
    %68 = vector.extract_strided_slice %66 {offsets = [0, 0, 0], sizes = [7, 8, 768], strides = [1, 1, 1]} : vector<8x8x768xbf16> to vector<7x8x768xbf16>
    %69 = tpu.concatenate %67, %68 in 0 : vector<1x8x768xbf16>, vector<7x8x768xbf16> -> vector<8x8x768xbf16>
    %70 = vector.shape_cast %69 : vector<8x8x768xbf16> to vector<64x768xbf16>
    %c0_35 = arith.constant 0 : index
    %c0_36 = arith.constant 0 : index
    %71 = vector.load %arg4[%c0_35, %c0_36] : memref<2304x128xbf16, #tpu.memory_space<vmem>>, vector<768x128xbf16>
    %cst_37 = arith.constant dense<0.000000e+00> : vector<64x128xf32>
    %72 = tpu.matmul %70, %71, %cst_37 {dimension_numbers = #tpu.dot_dimension_numbers<[1], [0], [0], [1], [0, 0, 1, 1], [], []>} : vector<64x768xbf16>, vector<768x128xbf16>, vector<64x128xf32> -> vector<64x128xf32>
    %73 = vector.shape_cast %66 : vector<8x8x768xbf16> to vector<64x768xbf16>
    %c768_38 = arith.constant 768 : index
    %c0_39 = arith.constant 0 : index
    %74 = vector.load %arg4[%c768_38, %c0_39] : memref<2304x128xbf16, #tpu.memory_space<vmem>>, vector<768x128xbf16>
    %cst_40 = arith.constant dense<0.000000e+00> : vector<64x128xf32>
    %75 = tpu.matmul %73, %74, %cst_40 {dimension_numbers = #tpu.dot_dimension_numbers<[1], [0], [0], [1], [0, 0, 1, 1], [], []>} : vector<64x768xbf16>, vector<768x128xbf16>, vector<64x128xf32> -> vector<64x128xf32>
    %76 = arith.addf %72, %75 : vector<64x128xf32>
    %cst_41 = arith.constant 0.000000e+00 : bf16
    %77 = vector.broadcast %cst_41 : bf16 to vector<1x8x768xbf16>
    %78 = vector.extract_strided_slice %66 {offsets = [1, 0, 0], sizes = [7, 8, 768], strides = [1, 1, 1]} : vector<8x8x768xbf16> to vector<7x8x768xbf16>
    %79 = tpu.concatenate %78, %77 in 0 : vector<7x8x768xbf16>, vector<1x8x768xbf16> -> vector<8x8x768xbf16>
    %80 = vector.shape_cast %79 : vector<8x8x768xbf16> to vector<64x768xbf16>
    %c1536 = arith.constant 1536 : index
    %c0_42 = arith.constant 0 : index
    %81 = vector.load %arg4[%c1536, %c0_42] : memref<2304x128xbf16, #tpu.memory_space<vmem>>, vector<768x128xbf16>
    %cst_43 = arith.constant dense<0.000000e+00> : vector<64x128xf32>
    %82 = tpu.matmul %80, %81, %cst_43 {dimension_numbers = #tpu.dot_dimension_numbers<[1], [0], [0], [1], [0, 0, 1, 1], [], []>} : vector<64x768xbf16>, vector<768x128xbf16>, vector<64x128xf32> -> vector<64x128xf32>
    %83 = arith.addf %76, %82 : vector<64x128xf32>
    %84 = vector.shape_cast %83 : vector<64x128xf32> to vector<8x8x128xf32>
    %cst_44 = arith.constant 0.000000e+00 : f32
    %85 = vector.broadcast %cst_44 : f32 to vector<8x8x128xf32>
    %86 = arith.maximumf %84, %85 : vector<8x8x128xf32>
    %c0_45 = arith.constant 0 : index
    %c0_46 = arith.constant 0 : index
    %c0_47 = arith.constant 0 : index
    %c0_48 = arith.constant 0 : index
    %87 = vector.load %arg12[%c0_45, %c0_46, %c0_47, %c0_48] : memref<1x8x8x128xf32, #tpu.memory_space<vmem>>, vector<1x8x8x128xf32>
    %88 = vector.shape_cast %87 : vector<1x8x8x128xf32> to vector<8x8x128xf32>
    %89 = vector.shape_cast %86 : vector<8x8x128xf32> to vector<1x8x8x128xf32>
    tpu.vector_store %arg12[%c0_45, %c0_46, %c0_47, %c0_48], %89 {strides = array<i32>} : memref<1x8x8x128xf32, #tpu.memory_space<vmem>>, vector<1x8x8x128xf32>,
    return
  }
  func.func @transform_0(%arg0: i32) -> (i32, i32, i32, i32) {
    %c0_i32 = arith.constant 0 : i32
    %c0_i32_0 = arith.constant 0 : i32
    %c0_i32_1 = arith.constant 0 : i32
    %c0_i32_2 = arith.constant 0 : i32
    return %arg0, %c0_i32, %c0_i32_0, %c0_i32_1 : i32, i32, i32, i32
  }
  func.func @transform_1(%arg0: i32) -> (i32, i32) {
    %c0_i32 = arith.constant 0 : i32
    %c0_i32_0 = arith.constant 0 : i32
    %c0_i32_1 = arith.constant 0 : i32
    return %c0_i32, %c0_i32_0 : i32, i32
  }
  func.func @transform_2(%arg0: i32) -> (i32, i32) {
    %c0_i32 = arith.constant 0 : i32
    %c0_i32_0 = arith.constant 0 : i32
    %c0_i32_1 = arith.constant 0 : i32
    return %c0_i32, %c0_i32_0 : i32, i32
  }
  func.func @transform_3(%arg0: i32) -> (i32, i32) {
    %c0_i32 = arith.constant 0 : i32
    %c0_i32_0 = arith.constant 0 : i32
    %c0_i32_1 = arith.constant 0 : i32
    return %c0_i32, %c0_i32_0 : i32, i32
  }
  func.func @transform_4(%arg0: i32) -> (i32, i32) {
    %c0_i32 = arith.constant 0 : i32
    %c0_i32_0 = arith.constant 0 : i32
    %c0_i32_1 = arith.constant 0 : i32
    return %c0_i32, %c0_i32_0 : i32, i32
  }
  func.func @transform_5(%arg0: i32) -> (i32, i32) {
    %c0_i32 = arith.constant 0 : i32
    %c0_i32_0 = arith.constant 0 : i32
    %c0_i32_1 = arith.constant 0 : i32
    return %c0_i32, %c0_i32_0 : i32, i32
  }
  func.func @transform_6(%arg0: i32) -> (i32, i32) {
    %c0_i32 = arith.constant 0 : i32
    %c0_i32_0 = arith.constant 0 : i32
    %c0_i32_1 = arith.constant 0 : i32
    return %c0_i32, %c0_i32_0 : i32, i32
  }
  func.func @transform_7(%arg0: i32) -> (i32, i32) {
    %c0_i32 = arith.constant 0 : i32
    %c0_i32_0 = arith.constant 0 : i32
    %c0_i32_1 = arith.constant 0 : i32
    return %c0_i32, %c0_i32_0 : i32, i32
  }
  func.func @transform_8(%arg0: i32) -> (i32, i32) {
    %c0_i32 = arith.constant 0 : i32
    %c0_i32_0 = arith.constant 0 : i32
    %c0_i32_1 = arith.constant 0 : i32
    return %c0_i32, %c0_i32_0 : i32, i32
  }
  func.func @transform_9(%arg0: i32) -> (i32, i32) {
    %c0_i32 = arith.constant 0 : i32
    %c0_i32_0 = arith.constant 0 : i32
    %c0_i32_1 = arith.constant 0 : i32
    return %c0_i32, %c0_i32_0 : i32, i32
  }
  func.func @transform_10(%arg0: i32) -> i32 {
    %c0_i32 = arith.constant 0 : i32
    %c0_i32_0 = arith.constant 0 : i32
    return %c0_i32 : i32
  }
  func.func @transform_11(%arg0: i32) -> (i32, i32, i32, i32) {
    %c0_i32 = arith.constant 0 : i32
    %c0_i32_0 = arith.constant 0 : i32
    %c0_i32_1 = arith.constant 0 : i32
    %c0_i32_2 = arith.constant 0 : i32
    return %arg0, %c0_i32, %c0_i32_0, %c0_i32_1 : i32, i32, i32, i32
  }
}

</mosaic_0001>

<bundles_post_ra>
// kernel: tpu_custom_call.1
= control target key start
LH: loop header
LB: loop body
LE: loop exit
PB: predicated region body
PF: predicated region fallthrough
CT: control target
= control target key end

     0   :  { %s14877_s0 = inlined_call_operand.hbm [shape: f32[2,8,8,128], index: 0, kind: input, shape index: {}]   ;;  %s14878_s1 = inlined_call_operand.hbm [shape: bf16[1152,256], index: 1, kind: input, shape index: {}]   ;;  %s14879_s2 = inlined_call_operand.hbm [shape: bf16[2304,256], index: 2, kind: input, shape index: {}]   ;;  %s14880_s3 = inlined_call_operand.hbm [shape: bf16[2304,128], index: 3, kind: input, shape index: {}]   ;;  %s14881_s4 = inlined_call_operand.hbm [shape: bf16[256,128], index: 4, kind: input, shape index: {}]   ;;  %s14882_s5 = inlined_call_operand.hbm [shape: bf16[128,256], index: 5, kind: input, shape index: {}]   ;;  %s14883_s6 = inlined_call_operand.hbm [shape: bf16[256,128], index: 6, kind: input, shape index: {}]   ;;  %s14884_s7 = inlined_call_operand.hbm [shape: bf16[128,256], index: 7, kind: input, shape index: {}]   ;;  %s14885_s8 = inlined_call_operand.hbm [shape: bf16[256,256], index: 8, kind: input, shape index: {}]   ;;  %s14886_s9 = inlined_call_operand.hbm [shape: bf16[256,256], index: 9, kind: input, shape index: {}]   ;;  %s14887_s10 = inlined_call_operand.<no memory space> [shape: f32[1], index: 10, kind: input, shape index: {}]   ;;  %s14888_s11 = inlined_call_operand.hbm [shape: f32[2,8,8,128], index: 11, kind: output, shape index: {}]  }
   0x1   :  { %14970 = sst [smem:[#allocation42_spill]] %s14878_s1 }
   0x2   :  { %14971 = sst [smem:[#allocation43_spill]] %s14879_s2 }
   0x3   :  { %14972 = sst [smem:[#allocation44_spill]] %s14888_s11 }
   0x4   :  { %16 = sst [smem:[#allocation4]] %s14887_s10 }
   0x5   :  { %17 = vsyncpa [#allocation6], 0 }
   0x6   :  { %19 = vsyncpa [#allocation6 + $0x1], 0 }
   0x7   :  { %20 = vsyncpa [#allocation9], 0 }
   0x8   :  { %21 = vsyncpa [#allocation12], 0 }
   0x9   :  { %22 = vsyncpa [#allocation15], 0 }
   0xa   :  { %23 = vsyncpa [#allocation18], 0 }
   0xb   :  { %24 = vsyncpa [#allocation21], 0 }
   0xc   :  { %25 = vsyncpa [#allocation7], 0 }
   0xd   :  { %27 = vsyncpa [#allocation7 + $0x1], 0  ;;  %s12733_s19 = smov 0   ;;  %s12735_s20 = smov 0  }
   0xe   :  { %s12737_s21 = smov 0   ;;  %s12739_s22 = smov 0  }
   0xf LB: > { %s12651_s10 = smov [#allocation8]   ;;  %s12754_s24 = sadd.s32 4294967295, %s12645_s22   ;;  %s12645_s22 = sphi %s12739_s22, %s15111_s22   ;;  %s12641_s21 = sphi %s12737_s21, %s15110_s21   ;;  %s12637_s20 = sphi %s12735_s20, %s15109_s20   ;;  %s12633_s19 = sphi %s12733_s19, %s15108_s19  }
  0x10   : > { %s312_s23 = sshll.u32 %s12651_s10, 4  ;;  %p9227_p0 = scmp.ge.s32.totalorder %s12645_s22, 1  ;;  %s12759_s23 = int_to_ptr.vmem [resolvable:$true] %s312_s23 }
  0x11   : > { %p14893_p1 = scmp.eq.s32.totalorder %s12754_s24, 0  ;;  %p300_p2 = scmp.lt.s32.totalorder %s12645_s22, 3 }
  0x12   : > { %s12652_s26 = smov [#allocation11]   ;;  %s12653_s29 = smov [#allocation14]  }
  0x13   : > { %p12761_p3 = pnand %p9227_p0, %p300_p2  ;;  %s338_s27 = sshll.u32 %s12652_s26, 4  ;;  %s12774_s27 = int_to_ptr.vmem [resolvable:$true] %s338_s27 }
  0x14   : > { %s12776_s30 = sshll.u32 %s12653_s29, 4  ;;  %s14976_s1 = sld [smem:[#allocation42_spill]]  ;;  %s365_s30 = int_to_ptr.vmem [resolvable:$true] %s12776_s30 }
  0x15   : > { %s14973_s25 = scalar_select %p12761_p3, 1, 0 }
  0x16   : > { %p10918_p5 = pneg %p12761_p3 }
  0x17   : > { %14974 = sst [smem:[#allocation30_spill]] %s14973_s25 }
  0x18   : > { %p12770_p6 = pnand %p10918_p5, %p14893_p1 }
  0x1a   : > { %s12273_s14 = scalar_lea.hbm %s14976_s1, 18432  ;;  %p12786_p8 = pneg %p12770_p6 }
  0x1b   : > { %p12274_p7 = scmp.ne.s32.totalorder %s14976_s1, %s12273_s14  ;;  %p12280_p11 = scmp.lt.u32.totalorder %s12273_s14, %s14976_s1 }
  0x1d   : > { %p12276_p9 = pnand %p12786_p8, %p12274_p7 }
  0x1f   : > { %p12277_p10 = pneg %p12276_p9 }
  0x21   : > { %p12282_p12 = pnand %p12280_p11, %p12277_p10 }
  0x23   : > { %12285 = shalt.err (!%p12282_p12)
}
  0x24   : > { %s12286_s26 = scalar_lea.vmem %s12759_s23, 18432  ;;  %p12294_p5 = scmp.lt.s32.totalorder %s12759_s23, %s12759_s23 }
  0x25   : > { %p12287_p13 = scmp.ne.s32.totalorder %s12759_s23, %s12286_s26  ;;  %p12295_p4 = scmp.lt.s32.totalorder %s12286_s26, %s12286_s26 }
  0x27   : > { %p12289_p0 = pnand %p12287_p13, %p12786_p8  ;;  %p12296_p7 = por %p12295_p4, %p12294_p5 }
  0x29   : > { %p12290_p2 = pneg %p12289_p0 }
  0x2b   : > { %p12297_p9 = pnand %p12296_p7, %p12290_p2 }
  0x2d   : > { %12300 = shalt.err (!%p12297_p9)
}
  0x2e   : > { %s14891_s29 = smov 128   ;;  %s14899_s12 = smov 8  }
  0x2f   : > { %10921 = dma.hbm_to_vmem [thread:$0]  (!%p12770_p6), %s14976_s1, 18432, %s12759_s23, [#allocation9], %s14891_s29, %s14891_s29, %s14899_s12  }
  0x30   : > { %s12301_s18 = scalar_lea.hbm %s14880_s3, 18432 }
  0x31   : > { %p12302_p4 = scmp.ne.s32.totalorder %s14880_s3, %s12301_s18  ;;  %p12308_p12 = scmp.lt.u32.totalorder %s12301_s18, %s14880_s3 }
  0x33   : > { %p12304_p10 = pnand %p12302_p4, %p12786_p8 }
  0x35   : > { %p12305_p11 = pneg %p12304_p10 }
  0x37   : > { %p12310_p13 = pnand %p12308_p12, %p12305_p11 }
  0x39   : > { %12313 = shalt.err (!%p12310_p13)
}
  0x3a   : > { %s12314_s23 = scalar_lea.vmem %s12774_s27, 18432  ;;  %p12322_p7 = scmp.lt.s32.totalorder %s12774_s27, %s12774_s27 }
  0x3b   : > { %p12315_p0 = scmp.ne.s32.totalorder %s12774_s27, %s12314_s23  ;;  %p12323_p9 = scmp.lt.s32.totalorder %s12314_s23, %s12314_s23 }
  0x3d   : > { %p12317_p2 = pnand %p12315_p0, %p12786_p8  ;;  %p12324_p4 = por %p12323_p9, %p12322_p7 }
  0x3f   : > { %p12318_p5 = pneg %p12317_p2 }
  0x41   : > { %p12325_p10 = pnand %p12324_p4, %p12318_p5 }
  0x43   : > { %12328 = shalt.err (!%p12325_p10)
}
  0x44   : > { %s14895_s13 = smov 64   ;;  %s14897_s11 = smov 4  }
  0x45   : > { %10927 = dma.hbm_to_vmem [thread:$0]  (!%p12770_p6), %s14880_s3, 18432, %s12774_s27, [#allocation12], %s14895_s13, %s14895_s13, %s14897_s11  }
  0x46   : > { %s12329_s18 = scalar_lea.hbm %s14882_s5, 2048 }
  0x47   : > { %p12330_p11 = scmp.ne.s32.totalorder %s14882_s5, %s12329_s18  ;;  %p12336_p0 = scmp.lt.u32.totalorder %s12329_s18, %s14882_s5 }
  0x49   : > { %p12332_p12 = pnand %p12330_p11, %p12786_p8 }
  0x4b   : > { %p12333_p13 = pneg %p12332_p12 }
  0x4d   : > { %p12338_p2 = pnand %p12336_p0, %p12333_p13 }
  0x4f   : > { %12341 = shalt.err (!%p12338_p2)
}
  0x50   : > { %s12342_s25 = scalar_lea.vmem %s365_s30, 2048  ;;  %p12350_p4 = scmp.lt.s32.totalorder %s365_s30, %s365_s30 }
  0x51   : > { %p12343_p5 = scmp.ne.s32.totalorder %s365_s30, %s12342_s25  ;;  %p12351_p10 = scmp.lt.s32.totalorder %s12342_s25, %s12342_s25 }
  0x53   : > { %p12345_p7 = pnand %p12343_p5, %p12786_p8  ;;  %p12352_p1 = por %p12351_p10, %p12350_p4 }
  0x55   : > { %p12346_p9 = pneg %p12345_p7 }
  0x57   : > { %p12353_p3 = pnand %p12352_p1, %p12346_p9 }
  0x59   : > { %12356 = shalt.err (!%p12353_p3)
}
  0x5a   : > { %s14978_s27 = smov 128   ;;  %s12658_s15 = smov [#allocation17]  }
  0x5b   : > { %10933 = dma.hbm_to_vmem [thread:$0]  (!%p12770_p6), %s14882_s5, 2048, %s365_s30, [#allocation15], %s14978_s27, %s14978_s27, %s14899_s12  }
  0x5c   : > { %s390_s16 = sshll.u32 %s12658_s15, 4  ;;  %s12659_s18 = smov [#allocation10]   ;;  %s391_s16 = int_to_ptr.vmem [resolvable:$true] %s390_s16 }
  0x5d   : > { %s325_s10 = sshll.u32 %s12659_s18, 4  ;;  %s12357_s25 = scalar_lea.hbm %s14884_s7, 2048  ;;  %s326_s10 = int_to_ptr.vmem [resolvable:$true] %s325_s10 }
  0x5e   : > { %p12358_p1 = scmp.ne.s32.totalorder %s14884_s7, %s12357_s25  ;;  %p12364_p12 = scmp.lt.u32.totalorder %s12357_s25, %s14884_s7 }
  0x60   : > { %p12360_p3 = pnand %p12358_p1, %p12786_p8 }
  0x62   : > { %p12361_p11 = pneg %p12360_p3 }
  0x64   : > { %p12366_p13 = pnand %p12364_p12, %p12361_p11 }
  0x66   : > { %12369 = shalt.err (!%p12366_p13)
}
  0x67   : > { %s12370_s30 = scalar_lea.vmem %s391_s16, 2048  ;;  %p12378_p7 = scmp.lt.s32.totalorder %s391_s16, %s391_s16 }
  0x68   : > { %p12371_p0 = scmp.ne.s32.totalorder %s391_s16, %s12370_s30  ;;  %p12379_p9 = scmp.lt.s32.totalorder %s12370_s30, %s12370_s30 }
  0x6a   : > { %p12373_p2 = pnand %p12371_p0, %p12786_p8  ;;  %p12380_p4 = por %p12379_p9, %p12378_p7 }
  0x6c   : > { %p12374_p5 = pneg %p12373_p2 }
  0x6e   : > { %p12381_p10 = pnand %p12380_p4, %p12374_p5 }
  0x70   : > { %12384 = shalt.err (!%p12381_p10)
}
  0x71   : > { %10939 = dma.hbm_to_vmem [thread:$0]  (!%p12770_p6), %s14884_s7, 2048, %s391_s16, [#allocation18], %s14978_s27, %s14978_s27, %s14899_s12  }
  0x72   : > { %s14979_s2 = sld [smem:[#allocation43_spill]] }
  0x78   : > { %s12385_s15 = scalar_lea.hbm %s14979_s2, 36864 }
  0x79   : > { %p12386_p1 = scmp.ne.s32.totalorder %s14979_s2, %s12385_s15  ;;  %p12392_p12 = scmp.lt.u32.totalorder %s12385_s15, %s14979_s2 }
  0x7b   : > { %p12388_p3 = pnand %p12386_p1, %p12786_p8 }
  0x7d   : > { %p12389_p11 = pneg %p12388_p3 }
  0x7f   : > { %p12394_p13 = pnand %p12392_p12, %p12389_p11 }
  0x81   : > { %12397 = shalt.err (!%p12394_p13)
}
  0x82   : > { %s12398_s29 = scalar_lea.vmem %s326_s10, 36864  ;;  %p12406_p7 = scmp.lt.s32.totalorder %s326_s10, %s326_s10 }
  0x83   : > { %p12399_p0 = scmp.ne.s32.totalorder %s326_s10, %s12398_s29  ;;  %p12407_p9 = scmp.lt.s32.totalorder %s12398_s29, %s12398_s29 }
  0x85   : > { %p12401_p2 = pnand %p12399_p0, %p12786_p8  ;;  %p12408_p4 = por %p12407_p9, %p12406_p7 }
  0x87   : > { %p12402_p5 = pneg %p12401_p2 }
  0x89   : > { %p12409_p10 = pnand %p12408_p4, %p12402_p5 }
  0x8b   : > { %12412 = shalt.err (!%p12409_p10)
}
  0x8c   : > { %10924 = dma.hbm_to_vmem [thread:$0]  (!%p12770_p6), %s14979_s2, 36864, %s326_s10, [#allocation9], %s14978_s27, %s14978_s27, %s14899_s12  }
  0x8d   : > { %s12660_s1 = smov [#allocation13]   ;;  %s12661_s11 = smov [#allocation16]  }
  0x8e   : > { %s351_s13 = sshll.u32 %s12660_s1, 4  ;;  %s377_s14 = sshll.u32 %s12661_s11, 4  ;;  %s352_s13 = int_to_ptr.vmem [resolvable:$true] %s351_s13  ;;  %s378_s14 = int_to_ptr.vmem [resolvable:$true] %s377_s14 }
  0x8f   : > { %s12413_s26 = scalar_lea.hbm %s14881_s4, 2048 }
  0x90   : > { %p12414_p1 = scmp.ne.s32.totalorder %s14881_s4, %s12413_s26  ;;  %p12420_p12 = scmp.lt.u32.totalorder %s12413_s26, %s14881_s4 }
  0x92   : > { %p12416_p3 = pnand %p12414_p1, %p12786_p8 }
  0x94   : > { %p12417_p11 = pneg %p12416_p3 }
  0x96   : > { %p12422_p13 = pnand %p12420_p12, %p12417_p11 }
  0x98   : > { %12425 = shalt.err (!%p12422_p13)
}
  0x99   : > { %s12426_s10 = scalar_lea.vmem %s352_s13, 2048  ;;  %p12434_p7 = scmp.lt.s32.totalorder %s352_s13, %s352_s13 }
  0x9a   : > { %p12427_p0 = scmp.ne.s32.totalorder %s352_s13, %s12426_s10  ;;  %p12435_p9 = scmp.lt.s32.totalorder %s12426_s10, %s12426_s10 }
  0x9c   : > { %p12429_p2 = pnand %p12427_p0, %p12786_p8  ;;  %p12436_p4 = por %p12435_p9, %p12434_p7 }
  0x9e   : > { %p12430_p5 = pneg %p12429_p2 }
  0xa0   : > { %p12437_p10 = pnand %p12436_p4, %p12430_p5 }
  0xa2   : > { %12440 = shalt.err (!%p12437_p10)
}
  0xa3   : > { %s14980_s30 = smov 4   ;;  %s14981_s1 = smov 64  }
  0xa4   : > { %10930 = dma.hbm_to_vmem [thread:$0]  (!%p12770_p6), %s14881_s4, 2048, %s352_s13, [#allocation12], %s14981_s1, %s14981_s1, %s14980_s30  }
  0xa5   : > { %s12441_s23 = scalar_lea.hbm %s14883_s6, 2048 }
  0xa6   : > { %p12442_p1 = scmp.ne.s32.totalorder %s14883_s6, %s12441_s23  ;;  %p12448_p12 = scmp.lt.u32.totalorder %s12441_s23, %s14883_s6 }
  0xa8   : > { %p12444_p3 = pnand %p12442_p1, %p12786_p8 }
  0xaa   : > { %p12445_p11 = pneg %p12444_p3 }
  0xac   : > { %p12450_p13 = pnand %p12448_p12, %p12445_p11 }
  0xae   : > { %12453 = shalt.err (!%p12450_p13)
}
  0xaf   : > { %s12454_s11 = scalar_lea.vmem %s378_s14, 2048  ;;  %p12462_p7 = scmp.lt.s32.totalorder %s378_s14, %s378_s14 }
  0xb0   : > { %p12455_p0 = scmp.ne.s32.totalorder %s378_s14, %s12454_s11  ;;  %p12463_p9 = scmp.lt.s32.totalorder %s12454_s11, %s12454_s11 }
  0xb2   : > { %p12457_p2 = pnand %p12455_p0, %p12786_p8  ;;  %p12464_p4 = por %p12463_p9, %p12462_p7 }
  0xb4   : > { %p12458_p5 = pneg %p12457_p2 }
  0xb6   : > { %p12465_p10 = pnand %p12464_p4, %p12458_p5 }
  0xb8   : > { %12468 = shalt.err (!%p12465_p10)
}
  0xb9   : > { %10936 = dma.hbm_to_vmem [thread:$0]  (!%p12770_p6), %s14883_s6, 2048, %s378_s14, [#allocation15], %s14981_s1, %s14981_s1, %s14980_s30  }
  0xba   : > { %s12662_s18 = smov [#allocation19]   ;;  %s12663_s23 = smov [#allocation20]  }
  0xbb   : > { %s403_s26 = sshll.u32 %s12662_s18, 4  ;;  %s416_s25 = sshll.u32 %s12663_s23, 4  ;;  %s404_s26 = int_to_ptr.vmem [resolvable:$true] %s403_s26  ;;  %s417_s25 = int_to_ptr.vmem [resolvable:$true] %s416_s25 }
  0xbc   : > { %s12469_s10 = scalar_lea.hbm %s14885_s8, 4096 }
  0xbd   : > { %p12470_p1 = scmp.ne.s32.totalorder %s14885_s8, %s12469_s10  ;;  %p12476_p12 = scmp.lt.u32.totalorder %s12469_s10, %s14885_s8 }
  0xbf   : > { %p12472_p3 = pnand %p12470_p1, %p12786_p8 }
  0xc1   : > { %p12473_p11 = pneg %p12472_p3 }
  0xc3   : > { %p12478_p13 = pnand %p12476_p12, %p12473_p11 }
  0xc5   : > { %12481 = shalt.err (!%p12478_p13)
}
  0xc6   : > { %s12482_s14 = scalar_lea.vmem %s404_s26, 4096  ;;  %p12490_p7 = scmp.lt.s32.totalorder %s404_s26, %s404_s26 }
  0xc7   : > { %p12483_p0 = scmp.ne.s32.totalorder %s404_s26, %s12482_s14  ;;  %p12491_p9 = scmp.lt.s32.totalorder %s12482_s14, %s12482_s14 }
  0xc9   : > { %p12485_p2 = pnand %p12483_p0, %p12786_p8  ;;  %p12492_p4 = por %p12491_p9, %p12490_p7 }
  0xcb   : > { %p12486_p5 = pneg %p12485_p2 }
  0xcd   : > { %p12493_p10 = pnand %p12492_p4, %p12486_p5 }
  0xcf   : > { %12496 = shalt.err (!%p12493_p10)
}
  0xd0   : > { %s14982_s12 = smov 8   ;;  %s12497_s18 = scalar_lea.hbm %s14886_s9, 4096 }
  0xd1   : > { %10942 = dma.hbm_to_vmem [thread:$0]  (!%p12770_p6), %s14885_s8, 4096, %s404_s26, [#allocation18], %s14978_s27, %s14978_s27, %s14982_s12  }
  0xd2   : > { %p12498_p1 = scmp.ne.s32.totalorder %s14886_s9, %s12497_s18  ;;  %p12504_p12 = scmp.lt.u32.totalorder %s12497_s18, %s14886_s9 }
  0xd4   : > { %p12500_p3 = pnand %p12498_p1, %p12786_p8 }
  0xd6   : > { %p12501_p11 = pneg %p12500_p3 }
  0xd8   : > { %p12506_p13 = pnand %p12504_p12, %p12501_p11 }
  0xda   : > { %12509 = shalt.err (!%p12506_p13)
}
  0xdb   : > { %s12510_s11 = scalar_lea.vmem %s417_s25, 4096  ;;  %p12518_p7 = scmp.lt.s32.totalorder %s417_s25, %s417_s25 }
  0xdc   : > { %p12511_p0 = scmp.ne.s32.totalorder %s417_s25, %s12510_s11  ;;  %p12519_p9 = scmp.lt.s32.totalorder %s12510_s11, %s12510_s11 }
  0xde   : > { %p12513_p2 = pnand %p12511_p0, %p12786_p8  ;;  %p12520_p4 = por %p12519_p9, %p12518_p7 }
  0xe0   : > { %p12514_p5 = pneg %p12513_p2 }
  0xe2   : > { %p12521_p10 = pnand %p12520_p4, %p12514_p5 }
  0xe4   : > { %12524 = shalt.err (!%p12521_p10)
}
  0xe5   : > { %10945 = dma.hbm_to_vmem [thread:$0]  (!%p12770_p6), %s14886_s9, 4096, %s417_s25, [#allocation21], %s14978_s27, %s14978_s27, %s14982_s12  }
  0xe6   : > { %s9226_s28 = sadd.s32 4294967294, %s12645_s22   ;;  %s12986_s17 = sadd.s32 1, %s12645_s22  }
  0xe7   : > { %s40_s14 = sadd.s32 1, %s12641_s21  ;;  %s37_s2 = ssub.s32 %s12645_s22, %s12986_s17 }
  0xe8   : > { %p47_p8 = scmp.ne.s32.totalorder %s12641_s21, %s12637_s20  ;;  %p38_p1 = scmp.eq.s32.totalorder %s37_s2, 0 }
  0xe9   : > { %p48_p3 = scmp.eq.s32.totalorder %s12645_s22, 0  ;;  %p53_p11 = scmp.ne.s32.totalorder %s12637_s20, %s12633_s19 }
  0xea   : > { %p287_p12 = scmp.eq.s32.totalorder %s12754_s24, 1  ;;  %p14983_p0 = scmp.eq.s32.totalorder %s12754_s24, 0 }
  0xeb   : > { %s12998_s30 = scalar_select %p38_p1, %s12641_s21, %s40_s14  }
  0xec   : > { %p49_p13 = por %p48_p3, %p47_p8  ;;  %p13002_p2 = por %p14983_p0, %p53_p11 }
  0xed   : > { %p13006_p6 = por %p287_p12, %p47_p8  ;;  %p293_p5 = scmp.eq.s32.totalorder %s9226_s28, 1 }
  0xee   : > { %p10963_p7 = scmp.lt.s32.totalorder %s12645_s22, 2  ;;  %s433_s15 = sand.u32 1, %s12641_s21  }
  0xef   : > { %s14985_s25 = scalar_select %p13006_p6, 1, 0 }
  0xf0   : > { %p13012_p9 = por %p293_p5, %p53_p11  ;;  %s9238_s23 = sshll.u32 %s433_s15, 6 }
  0xf1   : > { %s10161_s29 = sshll.u32 %s12645_s22, 10  ;;  %s437_s26 = scalar_lea.vmem [#allocation5], %s9238_s23 }
  0xf2   : > { %s14986_s18 = scalar_select %p13012_p9, 1, 0 }
  0xf3   : > { %s13020_s11 = scalar_lea.hbm %s14877_s0, %s10161_s29  ;;  %s444_s13 = sshll.u32 %s437_s26, 4  ;;  %s13026_s13 = int_to_ptr.vmem [resolvable:$true] %s444_s13 }
  0xf4   : > { %p13022_p4 = pnand %p10963_p7, %p49_p13  ;;  %s13028_s14 = scalar_lea.sflag [#allocation6], %s433_s15 }
  0xf5   : > { %s12525_s2 = scalar_lea.hbm %s13020_s11, 1024  ;;  %s12530_s16 = scalar_lea.hbm %s14877_s0, 2048 }
  0xf6   : > { %p12526_p10 = scmp.ne.s32.totalorder %s13020_s11, %s12525_s2  ;;  %p12527_p8 = pneg %p13022_p4 }
  0xf7   : > { %p12531_p11 = scmp.lt.u32.totalorder %s13020_s11, %s14877_s0  ;;  %p12532_p12 = scmp.lt.u32.totalorder %s12530_s16, %s12525_s2 }
  0xf8   : > { %p12528_p1 = pnand %p12527_p8, %p12526_p10  ;;  %p12534_p0 = scmp.lt.u32.totalorder %s12525_s2, %s13020_s11 }
  0xf9   : > { %p12533_p13 = por %p12532_p12, %p12531_p11 }
  0xfa   : > { %p12529_p3 = pneg %p12528_p1 }
  0xfb   : > { %p12535_p5 = por %p12534_p0, %p12533_p13 }
  0xfd   : > { %p12536_p7 = pnand %p12535_p5, %p12529_p3 }
  0xff   : > { %12539 = shalt.err (!%p12536_p7)
}
 0x100   : > { %s12540_s15 = scalar_lea.vmem %s13026_s13, 1024  ;;  %s12664_s23 = smov [#allocation5]  }
 0x101   : > { %p12541_p10 = scmp.ne.s32.totalorder %s13026_s13, %s12540_s15  ;;  %s12545_s29 = sshll.u32 %s12664_s23, 4  ;;  %s12546_s29 = int_to_ptr.vmem [resolvable:$false] %s12545_s29 }
 0x102   : > { %s12547_s10 = scalar_lea.vmem %s12546_s29, 2048  ;;  %p12548_p6 = scmp.lt.s32.totalorder %s13026_s13, %s12546_s29 }
 0x103   : > { %p12543_p1 = pnand %p12541_p10, %p12527_p8  ;;  %p12549_p11 = scmp.lt.s32.totalorder %s12547_s10, %s12540_s15 }
 0x105   : > { %p12544_p9 = pneg %p12543_p1  ;;  %p12550_p12 = por %p12549_p11, %p12548_p6 }
 0x107   : > { %p12551_p13 = pnand %p12550_p12, %p12544_p9 }
 0x109   : > { %12554 = shalt.err (!%p12551_p13)
}
 0x10a   : > { %10949 = dma.hbm_to_vmem [thread:$0]  (!%p13022_p4), %s13020_s11, 1024, %s13026_s13, %s13028_s14, %s14978_s27, %s14978_s27, %s14982_s12  }
 0x10b   : > { %s14988_s2 = sld [smem:[#allocation30_spill]] }
 0x111   : > { %p14989_p8 = scmp.ne.s32.totalorder %s14988_s2, 0 }
 0x113   : > { %456 = sbr.rel (%p14989_p8) target bundleno = 3110 (0xc26), region = 64 }
 0x11a   : > { %s13062_s16 = sand.u32 1, %s12637_s20  }
 0x11b   : > { %s9242_s26 = sshll.u32 %s13062_s16, 6  ;;  %s459_s15 = scalar_lea.sflag [#allocation6], %s13062_s16 }
 0x11c   : > { %s13068_s28 = scalar_lea.vmem [#allocation5], %s9242_s26 }
 0x11d   : > { %12604 = dma.done.wait (%p13002_p2), %s459_s15, 1024  }
 0x11e   : > { %12606 = vsyncadd (%p13002_p2), %s459_s15, 4294966272  ;;  %p14990_p6 = scmp.eq.s32.totalorder %s12754_s24, 0 }
 0x120   : > { %12608 = dma.done.wait (%p14990_p6), [#allocation9], 55296   ;;  %p14991_p9 = pmov %p14990_p6 }
 0x121   : > { %p14992_p4 = pmov %p14990_p6 }
 0x122   : > { %12610 = vsyncadd (%p14991_p9), [#allocation9], 4294912000 }
 0x123   : > { %12612 = dma.done.wait (%p14992_p4), [#allocation12], 20480   ;;  %p14993_p3 = pmov %p14992_p4 }
 0x125   : > { %12614 = vsyncadd (%p14993_p3), [#allocation12], 4294946816  ;;  %p14994_p0 = pmov %p14993_p3 }
 0x127   : > { %12616 = dma.done.wait (%p14994_p0), [#allocation15], 4096   ;;  %p14995_p5 = pmov %p14994_p0 }
 0x128   : > { %p14996_p2 = pmov %p14994_p0 }
 0x129   : > { %12618 = vsyncadd (%p14995_p5), [#allocation15], 4294963200 }
 0x12a   : > { %12620 = dma.done.wait (%p14996_p2), [#allocation18], 6144   ;;  %p14997_p7 = pmov %p14994_p0 }
 0x12b   : > { %p14998_p10 = pmov %p14994_p0 }
 0x12c   : > { %12622 = vsyncadd (%p14997_p7), [#allocation18], 4294961152 }
 0x12d   : > { %12624 = dma.done.wait (%p14998_p10), [#allocation21], 4096   ;;  %p14999_p1 = pmov %p14994_p0 }
 0x12e   : > { %v14902_v0 = vmov 0   ;;  %v11031_v1 = vld [vmem:[#allocation8 + $0x184] ss:$8 sps:$4 sm:$0xff]   ;;  %v11035_v3 = vld [vmem:[#allocation8 + $0x180] ss:$8 sps:$4 sm:$0xff]   ;;  %vm653_vm1 = vcmask 1043456  }
 0x12f   : > { %12626 = vsyncadd (%p14999_p1), [#allocation21], 4294963200  ;;  %1179 = vmatprep.mubr.bf16.mxu0 %v14902_v0  ;;  %v11033_v2 = vld [vmem:[#allocation8 + $0x284] ss:$8 sps:$4 sm:$0xff]   ;;  %1074 = vmatprep.subr.bf16.mxu1 %v11031_v1  ;;  %v11036_v4 = vld [vmem:[#allocation8 + $0x280] ss:$8 sps:$4 sm:$0xff]  }
 0x130   : > { %1147 = vmatprep.subr.bf16.mxu0 %v11033_v2  ;;  %v11037_v5 = vld [vmem:[#allocation8 + $0x194] ss:$8 sps:$4 sm:$0xff]   ;;  %1075 = vmatpush1.bf16.msra.mxu1 %v11035_v3  ;;  %v11041_v7 = vld [vmem:[#allocation8 + $0x190] ss:$8 sps:$4 sm:$0xff]   ;;  %v11043_v9 = vld [vmem:[#allocation8 + $0x1a4] ss:$8 sps:$4 sm:$0xff]  }
 0x131   : > { %1148 = vmatpush1.bf16.msra.mxu0 %v11036_v4  ;;  %v11039_v6 = vld [vmem:[#allocation8 + $0x294] ss:$8 sps:$4 sm:$0xff]   ;;  %1076 = vmatprep.subr.bf16.mxu1 %v11037_v5  ;;  %v11042_v8 = vld [vmem:[#allocation8 + $0x290] ss:$8 sps:$4 sm:$0xff]   ;;  %v11045_v10 = vld [vmem:[#allocation8 + $0x2a4] ss:$8 sps:$4 sm:$0xff]  }
 0x132   : > { %1149 = vmatprep.subr.bf16.mxu0 %v11039_v6  ;;  %v11047_v11 = vld [vmem:[#allocation8 + $0x1a0] ss:$8 sps:$4 sm:$0xff]   ;;  %v11049_v13 = vld [vmem:[#allocation8 + $0x1b4] ss:$8 sps:$4 sm:$0xff]   ;;  %v11053_v15 = vld [vmem:[#allocation8 + $0x1b0] ss:$8 sps:$4 sm:$0xff]  }
 0x133   : > { %v11048_v12 = vld [vmem:[#allocation8 + $0x2a0] ss:$8 sps:$4 sm:$0xff]   ;;  %v11051_v14 = vld [vmem:[#allocation8 + $0x2b4] ss:$8 sps:$4 sm:$0xff]   ;;  %v11054_v16 = vld [vmem:[#allocation8 + $0x2b0] ss:$8 sps:$4 sm:$0xff]  }
 0x134   : > { %1077 = vmatpush1.bf16.msra.mxu1 %v11041_v7  ;;  %v11055_v17 = vld [vmem:[#allocation8 + $0x1c4] ss:$8 sps:$4 sm:$0xff]   ;;  %v11059_v19 = vld [vmem:[#allocation8 + $0x1c0] ss:$8 sps:$4 sm:$0xff]   ;;  %v11061_v21 = vld [vmem:[#allocation8 + $0x1d4] ss:$8 sps:$4 sm:$0xff]  }
 0x135   : > { %1150 = vmatpush1.bf16.msra.mxu0 %v11042_v8  ;;  %1078 = vmatprep.subr.bf16.mxu1 %v11043_v9  ;;  %v11057_v18 = vld [vmem:[#allocation8 + $0x2c4] ss:$8 sps:$4 sm:$0xff]   ;;  %v11060_v20 = vld [vmem:[#allocation8 + $0x2c0] ss:$8 sps:$4 sm:$0xff]   ;;  %v11063_v22 = vld [vmem:[#allocation8 + $0x2d4] ss:$8 sps:$4 sm:$0xff]  }
 0x136   : > { %1151 = vmatprep.subr.bf16.mxu0 %v11045_v10  ;;  %v11065_v23 = vld [vmem:[#allocation8 + $0x1d0] ss:$8 sps:$4 sm:$0xff]   ;;  %v11067_v25 = vld [vmem:[#allocation8 + $0x1e4] ss:$8 sps:$4 sm:$0xff]   ;;  %v11071_v27 = vld [vmem:[#allocation8 + $0x1e0] ss:$8 sps:$4 sm:$0xff]  }
 0x137   : > { %v11066_v24 = vld [vmem:[#allocation8 + $0x2d0] ss:$8 sps:$4 sm:$0xff]   ;;  %v11069_v26 = vld [vmem:[#allocation8 + $0x2e4] ss:$8 sps:$4 sm:$0xff]   ;;  %v11072_v30 = vld [vmem:[#allocation8 + $0x2e0] ss:$8 sps:$4 sm:$0xff]  }
 0x138   : > { %1079 = vmatpush1.bf16.msra.mxu1 %v11047_v11  ;;  %v538_v28 = vld [vmem:[%s13068_s28] sm:$0xff]  ;;  %v13097_v29 = vld [vmem:[%s13068_s28 + $0x8] sm:$0xff]  ;;  %vm654_vm0 = vsmask.f32 3328  ;;  %v11073_v34 = vld [vmem:[#allocation8 + $0x1f4] ss:$8 sps:$4 sm:$0xff]  }
 0x139   : > { %1152 = vmatpush1.bf16.msra.mxu0 %v11048_v12  ;;  %1080 = vmatprep.subr.bf16.mxu1 %v11049_v13  ;;  %v13099_v31 = vpack.c.bf16 %v538_v28, %v538_v28  ;;  %v13103_v32 = vpack.c.bf16 %v13097_v29, %v13097_v29  ;;  %v10162_v33 = vpack.c.bf16 %v13097_v29, %v538_v28  ;;  %v11075_v35 = vld [vmem:[#allocation8 + $0x2f4] ss:$8 sps:$4 sm:$0xff]   ;;  %v11077_v40 = vld [vmem:[#allocation8 + $0x1f0] ss:$8 sps:$4 sm:$0xff]   ;;  %v11079_v42 = vld [vmem:[#allocation8 + $0x204] ss:$8 sps:$4 sm:$0xff]  }
 0x13a   : > { %1153 = vmatprep.subr.bf16.mxu0 %v11051_v14  ;;  %v11078_v41 = vld [vmem:[#allocation8 + $0x2f0] ss:$8 sps:$4 sm:$0xff]   ;;  %vm13115_vm2 = vmand %vm653_vm1, %vm654_vm0  ;;  %v11083_v46 = vld [vmem:[#allocation8 + $0x104] ss:$8 sps:$4 sm:$0xff]   ;;  %vm618_vm3 = vcmask 1040384   ;;  %s13407_s27 = scalar_lea.vmem [#allocation22], %s9242_s26 }
 0x13b   : > { %v555_v36 = vshrl.u32 %v13099_v31, 16  ;;  %v558_v37 = vshll.u32 %v13099_v31, 16  ;;  %v562_v38 = vshrl.u32 %v13103_v32, 16  ;;  %v565_v39 = vshll.u32 %v13103_v32, 16  ;;  %1106 = vmatprep.mubr.bf16.mxu1 %v10162_v33  ;;  %v13124_v49 = vld [vmem:[%s13068_s28 + $0x10] sm:$0xff]  ;;  %v13127_v50 = vld [vmem:[%s13068_s28 + $0x18] sm:$0xff] }
 0x13c   : > { %1081 = vmatpush1.bf16.msra.mxu1 %v11053_v15  ;;  %v13131_v51 = vpack.c.bf16 %v13124_v49, %v13124_v49  ;;  %v13135_v52 = vpack.c.bf16 %v13127_v50, %v13127_v50  ;;  %v11081_v55 = vld [vmem:[#allocation8 + $0x100] ss:$8 sps:$4 sm:$0xff]   ;;  %v11085_v60 = vld [vmem:[#allocation8 + $0x214] ss:$8 sps:$4 sm:$0xff]   ;;  %v11087_v2 = vld [vmem:[#allocation8 + $0x110] ss:$8 sps:$4 sm:$0xff]  }
 0x13d   : > { %1154 = vmatpush1.bf16.msra.mxu0 %v11054_v16  ;;  %1082 = vmatprep.subr.bf16.mxu1 %v11055_v17  ;;  %v629_v43 = vrot.slane %v558_v37, 1  ;;  %v631_v44 = vrot.slane %v565_v39, 1  ;;  %v11084_v57 = vld [vmem:[#allocation8 + $0x200] ss:$8 sps:$4 sm:$0xff]   ;;  %v11089_v61 = vld [vmem:[#allocation8 + $0x114] ss:$8 sps:$4 sm:$0xff]  }
 0x13e   : > { %1155 = vmatprep.subr.bf16.mxu0 %v11057_v18  ;;  %v569_v58 = vshrl.u32 %v13131_v51, 16  ;;  %v572_v59 = vshll.u32 %v13131_v51, 16  ;;  %v576_v62 = vshrl.u32 %v13135_v52, 16  ;;  %v579_v63 = vshll.u32 %v13135_v52, 16  ;;  %v13156_v4 = vld [vmem:[%s13068_s28 + $0x20] sm:$0xff]  ;;  %v13159_v5 = vld [vmem:[%s13068_s28 + $0x28] sm:$0xff] }
 0x13f   : > { %v630_v47 = vor.u32 %v629_v43, %v555_v36  ;;  %v632_v48 = vor.u32 %v631_v44, %v562_v38  ;;  %v11090_v6 = vld [vmem:[#allocation8 + $0x210] ss:$8 sps:$4 sm:$0xff]   ;;  %v13165_v8 = vpack.c.bf16 %v13156_v4, %v13156_v4  ;;  %v13169_v9 = vpack.c.bf16 %v13159_v5, %v13159_v5  ;;  %v11091_v10 = vld [vmem:[#allocation8 + $0x224] ss:$8 sps:$4 sm:$0xff]   ;;  %s13409_s12 = smov 0  }
 0x140   : > { %1083 = vmatpush1.bf16.msra.mxu1 %v11059_v19  ;;  %v633_v1 = vrot.slane %v572_v59, 1  ;;  %v635_v3 = vrot.slane %v579_v63, 1  ;;  %v11095_v12 = vld [vmem:[#allocation8 + $0x124] ss:$8 sps:$4 sm:$0xff]   ;;  %vm619_vm4 = vsmask.f32 256 }
 0x141   : > { %1156 = vmatpush1.bf16.msra.mxu0 %v11060_v20  ;;  %1084 = vmatprep.subr.bf16.mxu1 %v11061_v21  ;;  %v13139_v53 = vsel %vm13115_vm2, %v630_v47, 0  ;;  %v13143_v54 = vsel %vm13115_vm2, %v632_v48, 0  ;;  %v583_v14 = vshrl.u32 %v13165_v8, 16  ;;  %v586_v15 = vshll.u32 %v13165_v8, 16  ;;  %v11093_v20 = vld [vmem:[#allocation8 + $0x120] ss:$8 sps:$4 sm:$0xff]   ;;  %vm13256_vm5 = vmand %vm618_vm3, %vm619_vm4 }
 0x142   : > { %1157 = vmatprep.subr.bf16.mxu0 %v11063_v22  ;;  %v9255_v56 = vcombine.low %v13139_v53, %v13143_v54  ;;  %v634_v7 = vor.u32 %v633_v1, %v569_v58  ;;  %v636_v11 = vor.u32 %v635_v3, %v576_v62  ;;  %v590_v17 = vshrl.u32 %v13169_v9, 16  ;;  %v11096_v21 = vld [vmem:[#allocation8 + $0x220] ss:$8 sps:$4 sm:$0xff]   ;;  %v11107_v48 = vld [vmem:[#allocation8 + $0x144] ss:$8 sps:$4 sm:$0xff]  }
 0x143   : > { %v593_v18 = vshll.u32 %v13169_v9, 16  ;;  %v637_v22 = vrot.slane %v586_v15, 1  ;;  %v11105_v1 = vld [vmem:[#allocation8 + $0x140] ss:$8 sps:$4 sm:$0xff]   ;;  %v11148_v8 = vld [vmem:[#allocation8 + $0x330] ss:$8 sps:$4 sm:$0xff]  }
 0x144   : > { %1085 = vmatpush1.bf16.msra.mxu1 %v11065_v23  ;;  %v13176_v13 = vsel %vm13115_vm2, %v634_v7, 0  ;;  %v13182_v16 = vsel %vm13115_vm2, %v636_v11, 0  ;;  %v13192_v23 = vpack.c.bf16 %v13156_v4, %v13127_v50  ;;  %v11108_v3 = vld [vmem:[#allocation8 + $0x240] ss:$8 sps:$4 sm:$0xff]   ;;  %v11109_v7 = vld [vmem:[#allocation8 + $0x254] ss:$8 sps:$4 sm:$0xff]  }
 0x145   : > { %1158 = vmatpush1.bf16.msra.mxu0 %v11066_v24  ;;  %1086 = vmatprep.subr.bf16.mxu1 %v11067_v25  ;;  %v9258_v19 = vcombine.low %v13176_v13, %v13182_v16  ;;  %v11097_v24 = vld [vmem:[#allocation8 + $0x234] ss:$8 sps:$4 sm:$0xff]   ;;  %v638_v28 = vor.u32 %v637_v22, %v583_v14 }
 0x146   : > { %1159 = vmatprep.subr.bf16.mxu0 %v11069_v26  ;;  %v11101_v25 = vld [vmem:[#allocation8 + $0x134] ss:$8 sps:$4 sm:$0xff]   ;;  %v639_v26 = vrot.slane %v593_v18, 1 }
 0x147   : > { %v13216_v43 = vsel %vm13115_vm2, %v638_v28, 0  ;;  %v11117_v28 = vld [vmem:[#allocation8 + $0x160] ss:$8 sps:$4 sm:$0xff]  }
 0x148   : > { %1087 = vmatpush1.bf16.msra.mxu1 %v11071_v27  ;;  %v13197_v27 = vld [vmem:[%s13068_s28 + $0x30] sm:$0xff] }
 0x149   : > { %1160 = vmatpush1.bf16.msra.mxu0 %v11072_v30  ;;  %1088 = vmatprep.subr.bf16.mxu1 %v11073_v34  ;;  %v13202_v30 = vld [vmem:[%s13068_s28 + $0x38] sm:$0xff]  ;;  %v13206_v33 = vpack.c.bf16 %v13197_v27, %v13197_v27 }
 0x14a   : > { %1161 = vmatprep.subr.bf16.mxu0 %v11075_v35  ;;  %v11099_v34 = vld [vmem:[#allocation8 + $0x130] ss:$8 sps:$4 sm:$0xff]  }
 0x14b   : > { %v11102_v35 = vld [vmem:[#allocation8 + $0x230] ss:$8 sps:$4 sm:$0xff]   ;;  %v597_v44 = vshrl.u32 %v13206_v33, 16 }
 0x14c   : > { %1089 = vmatpush1.bf16.msra.mxu1 %v11077_v40  ;;  %v11103_v40 = vld [vmem:[#allocation8 + $0x244] ss:$8 sps:$4 sm:$0xff]  }
 0x14d   : > { %1162 = vmatpush1.bf16.msra.mxu0 %v11078_v41  ;;  %1090 = vmatprep.subr.bf16.mxu1 %v11079_v42  ;;  %v640_v41 = vor.u32 %v639_v26, %v590_v17  ;;  %v13212_v42 = vpack.c.bf16 %v13202_v30, %v13202_v30  ;;  %v11119_v26 = vld [vmem:[#allocation8 + $0x164] ss:$8 sps:$4 sm:$0xff]  }
 0x14e   : > { %1557 = vmatprep.subr.bf16.mxu0 %v11083_v46  ;;  %v600_v46 = vshll.u32 %v13206_v33, 16 }
 0x14f   : > { %v13222_v47 = vsel %vm13115_vm2, %v640_v41, 0  ;;  %v11121_v41 = vld [vmem:[#allocation8 + $0x274] ss:$8 sps:$4 sm:$0xff]  }
 0x150   : > { %1180 = vmatmul.mubr.bf16.vlgmr.msra.gmra.mrb[0].mxu0 %v9255_v56  ;;  %1091 = vmatpush1.bf16.msra.mxu1 %v11084_v57  ;;  %v607_v56 = vshll.u32 %v13212_v42, 16  ;;  %v641_v57 = vrot.slane %v600_v46, 1 }
 0x151   : > { %1558 = vmatpush1.bf16.msra.mxu0 %v11081_v55  ;;  %1092 = vmatprep.subr.bf16.mxu1 %v11085_v60  ;;  %v604_v55 = vshrl.u32 %v13212_v42, 16  ;;  %v13231_v60 = vpack.c.bf16 %v13197_v27, %v13159_v5 }
 0x152   : > { %1559 = vmatprep.subr.bf16.mxu0 %v11089_v61  ;;  %1189 = vmatprep.mubr.bf16.mxu0 %v14902_v0  ;;  %v9261_v61 = vcombine.low %v13216_v43, %v13222_v47 }
 0x154   : > { %1093 = vmatpush1.bf16.msra.mxu1 %v11090_v6  ;;  %v642_v6 = vor.u32 %v641_v57, %v597_v44  ;;  %v11123_v57 = vld [vmem:[#allocation8 + $0x170] ss:$8 sps:$4 sm:$0xff]  }
 0x155   : > { %1560 = vmatpush1.bf16.msra.mxu0 %v11087_v2  ;;  %1094 = vmatprep.subr.bf16.mxu1 %v11091_v10  ;;  %v643_v2 = vrot.slane %v607_v56, 1  ;;  %v11113_v10 = vld [vmem:[#allocation8 + $0x154] ss:$8 sps:$4 sm:$0xff]  }
 0x156   : > { %1561 = vmatprep.subr.bf16.mxu0 %v11095_v12  ;;  %v11111_v12 = vld [vmem:[#allocation8 + $0x150] ss:$8 sps:$4 sm:$0xff]   ;;  %v13247_v22 = vsel %vm13115_vm2, %v642_v6, 0  ;;  %v11127_v6 = vld [vmem:[#allocation8] ss:$8 sps:$4 sm:$0xff]  }
 0x157   : > { %v644_v11 = vor.u32 %v643_v2, %v604_v55  ;;  %v11126_v2 = vld [vmem:[#allocation8 + $0x270] ss:$8 sps:$4 sm:$0xff]  }
 0x158   : > { %1190 = vmatmul.mubr.bf16.gmra.mrb[4].mxu0 %v9258_v19  ;;  %1095 = vmatpush1.bf16.msra.mxu1 %v11096_v21  ;;  %v557_v19 = vrot.slane %v555_v36, 7  ;;  %v11114_v21 = vld [vmem:[#allocation8 + $0x250] ss:$8 sps:$4 sm:$0xff]   ;;  %v15002_v36 = vmov 0 }
 0x159   : > { %1562 = vmatpush1.bf16.msra.mxu0 %v11093_v20  ;;  %1096 = vmatprep.subr.bf16.mxu1 %v11097_v24  ;;  %v564_v20 = vrot.slane %v562_v38, 7  ;;  %v13251_v24 = vsel %vm13115_vm2, %v644_v11, 0  ;;  %v15003_v36 = vsel %vm13256_vm5, 4294967295, %v15002_v36  ;;  %v11130_v11 = vld [vmem:[#allocation8 + $0x300] ss:$8 sps:$4 sm:$0xff]  }
 0x15a   : > { %1563 = vmatprep.subr.bf16.mxu0 %v11101_v25  ;;  %1199 = vmatprep.mubr.bf16.mxu0 %v14902_v0  ;;  %v11115_v25 = vld [vmem:[#allocation8 + $0x264] ss:$8 sps:$4 sm:$0xff]   ;;  %15004 = vst [vmem:[#allocation31_spill] sm:$0xff] %v15003_v36  ;;  %v9264_v38 = vcombine.low %v13247_v22, %v13251_v24 }
 0x15c   : > { %1097 = vmatpush1.bf16.msra.mxu1 %v11102_v35  ;;  %v560_v35 = vor.u32 %v558_v37, %v557_v19  ;;  %v11138_v19 = vld [vmem:[#allocation8 + $0x314] ss:$8 sps:$4 sm:$0xff]  }
 0x15d   : > { %1564 = vmatpush1.bf16.msra.mxu0 %v11099_v34  ;;  %1098 = vmatprep.subr.bf16.mxu1 %v11103_v40  ;;  %v11120_v34 = vld [vmem:[#allocation8 + $0x260] ss:$8 sps:$4 sm:$0xff]   ;;  %v567_v40 = vor.u32 %v565_v39, %v564_v20  ;;  %v11129_v39 = vld [vmem:[#allocation8 + $0x4] ss:$8 sps:$4 sm:$0xff]   ;;  %v11133_v20 = vld [vmem:[#allocation8 + $0x10] ss:$8 sps:$4 sm:$0xff]  }
 0x15e   : > { %1565 = vmatprep.subr.bf16.mxu0 %v11107_v48  ;;  %v11125_v48 = vld [vmem:[#allocation8 + $0x174] ss:$8 sps:$4 sm:$0xff]   ;;  %v13272_v37 = vsel %vm13256_vm5, 0, %v560_v35 }
 0x15f   : > { %v13276_v32 = vsel %vm13256_vm5, 0, %v567_v40  ;;  %v11147_v35 = vld [vmem:[#allocation8 + $0x34] ss:$8 sps:$4 sm:$0xff]  }
 0x160   : > { %1200 = vmatmul.mubr.bf16.gmra.mrb[8].mxu0 %v9261_v61  ;;  %1099 = vmatpush1.bf16.msra.mxu1 %v11108_v3  ;;  %v571_v61 = vrot.slane %v569_v58, 7  ;;  %v11132_v3 = vld [vmem:[#allocation8 + $0x304] ss:$8 sps:$4 sm:$0xff]   ;;  %v9315_v58 = vcombine.low %v14902_v0, %v13139_v53  ;;  %v10163_v53 = vpack.c.bf16 %v13127_v50, %v13124_v49  ;;  %v592_v50 = vrot.slane %v590_v17, 7  ;;  %v11150_v40 = vld [vmem:[#allocation8 + $0x334] ss:$8 sps:$4 sm:$0xff]  }
 0x161   : > { %1566 = vmatpush1.bf16.msra.mxu0 %v11105_v1  ;;  %1100 = vmatprep.subr.bf16.mxu1 %v11109_v7  ;;  %v578_v1 = vrot.slane %v576_v62, 7  ;;  %v9253_v62 = vcombine.low %v13272_v37, %v13276_v32 }
 0x162   : > { %1567 = vmatprep.subr.bf16.mxu0 %v11113_v10  ;;  %1209 = vmatprep.mubr.bf16.mxu0 %v14902_v0  ;;  %v574_v7 = vor.u32 %v572_v59, %v571_v61  ;;  %v11136_v59 = vld [vmem:[#allocation8 + $0x310] ss:$8 sps:$4 sm:$0xff]  }
 0x163   : > { %v581_v10 = vor.u32 %v579_v63, %v578_v1  ;;  %v585_v63 = vrot.slane %v583_v14, 7  ;;  %v11142_v14 = vld [vmem:[#allocation8 + $0x320] ss:$8 sps:$4 sm:$0xff]  }
 0x164   : > { %1101 = vmatpush1.bf16.msra.mxu1 %v11114_v21  ;;  %v13291_v51 = vsel %vm13256_vm5, 0, %v574_v7  ;;  %v11141_v21 = vld [vmem:[#allocation8 + $0x24] ss:$8 sps:$4 sm:$0xff]   ;;  %v11171_v7 = vld [vmem:[#allocation8 + $0x74] ss:$8 sps:$4 sm:$0xff]  }
 0x165   : > { %1568 = vmatpush1.bf16.msra.mxu0 %v11111_v12  ;;  %1102 = vmatprep.subr.bf16.mxu1 %v11115_v25  ;;  %v11135_v12 = vld [vmem:[#allocation8 + $0x14] ss:$8 sps:$4 sm:$0xff]   ;;  %v13295_v52 = vsel %vm13256_vm5, 0, %v581_v10  ;;  %v11144_v25 = vld [vmem:[#allocation8 + $0x324] ss:$8 sps:$4 sm:$0xff]   ;;  %v588_v17 = vor.u32 %v586_v15, %v585_v63 }
 0x166   : > { %1569 = vmatprep.subr.bf16.mxu0 %v11119_v26  ;;  %v9256_v26 = vcombine.low %v13291_v51, %v13295_v52  ;;  %v11156_v15 = vld [vmem:[#allocation8 + $0x344] ss:$8 sps:$4 sm:$0xff]   ;;  %v11174_v10 = vld [vmem:[#allocation8 + $0x374] ss:$8 sps:$4 sm:$0xff]   ;;  %v11184_v63 = vld [vmem:[#allocation8 + $0x390] ss:$8 sps:$4 sm:$0xff]  }
 0x167   : > { %v13321_v9 = vsel %vm13256_vm5, 0, %v588_v17  ;;  %v11193_v17 = vld [vmem:[#allocation8 + $0xb0] ss:$8 sps:$4 sm:$0xff]  }
 0x168   : > { %1210 = vmatmul.mubr.bf16.gmra.mrb[12].mxu0 %v9264_v38  ;;  %1103 = vmatpush1.bf16.msra.mxu1 %v11120_v34  ;;  %v11139_v38 = vld [vmem:[#allocation8 + $0x20] ss:$8 sps:$4 sm:$0xff]   ;;  %v595_v34 = vor.u32 %v593_v18, %v592_v50  ;;  %v11189_v50 = vld [vmem:[#allocation8 + $0xa4] ss:$8 sps:$4 sm:$0xff]  }
 0x169   : > { %1570 = vmatpush1.bf16.msra.mxu0 %v11117_v28  ;;  %1104 = vmatprep.subr.bf16.mxu1 %v11121_v41  ;;  %v13306_v28 = vcombine.low %v13143_v54, %v13176_v13  ;;  %v10164_v41 = vpack.c.bf16 %v13159_v5, %v13156_v4  ;;  %v599_v54 = vrot.slane %v597_v44, 7  ;;  %v606_v13 = vrot.slane %v604_v55, 7  ;;  %v11153_v5 = vld [vmem:[#allocation8 + $0x44] ss:$8 sps:$4 sm:$0xff]   ;;  %v11151_v44 = vld [vmem:[#allocation8 + $0x40] ss:$8 sps:$4 sm:$0xff]  }
 0x16a   : > { %1571 = vmatprep.subr.bf16.mxu0 %v11125_v48  ;;  %1589 = vmatprep.mubr.bf16.mxu0 %v14902_v0  ;;  %v11145_v48 = vld [vmem:[#allocation8 + $0x30] ss:$8 sps:$4 sm:$0xff]   ;;  %v13325_v4 = vsel %vm13256_vm5, 0, %v595_v34  ;;  %v13332_v55 = vcombine.low %v13182_v16, %v13216_v43 }
 0x16b   : > { %v9259_v18 = vcombine.low %v13321_v9, %v13325_v4  ;;  %v602_v61 = vor.u32 %v600_v46, %v599_v54  ;;  %v609_v1 = vor.u32 %v607_v56, %v606_v13  ;;  %v11160_v16 = vld [vmem:[#allocation8 + $0x350] ss:$8 sps:$4 sm:$0xff]   ;;  %v11165_v46 = vld [vmem:[#allocation8 + $0x64] ss:$8 sps:$4 sm:$0xff]   ;;  %v11207_v54 = vld [vmem:[#allocation8 + $0xd4] ss:$8 sps:$4 sm:$0xff]  }
 0x16c   : > { %1105 = vmatpush1.bf16.msra.mxu1 %v11126_v2  ;;  %v11159_v2 = vld [vmem:[#allocation8 + $0x54] ss:$8 sps:$4 sm:$0xff]   ;;  %v11168_v56 = vld [vmem:[#allocation8 + $0x364] ss:$8 sps:$4 sm:$0xff]   ;;  %v11196_v34 = vld [vmem:[#allocation8 + $0x3b0] ss:$8 sps:$4 sm:$0xff]  }
 0x16d   : > { %1572 = vmatpush1.bf16.msra.mxu0 %v11123_v57  ;;  %1484 = vmatprep.subr.bf16.mxu1 %v11129_v39  ;;  %v11154_v57 = vld [vmem:[#allocation8 + $0x340] ss:$8 sps:$4 sm:$0xff]   ;;  %v11162_v39 = vld [vmem:[#allocation8 + $0x354] ss:$8 sps:$4 sm:$0xff]   ;;  %v13343_v33 = vsel %vm13256_vm5, 0, %v602_v61  ;;  %v13347_v43 = vsel %vm13256_vm5, 0, %v609_v1 }
 0x16e   : > { %1924 = vmatprep.subr.bf16.mxu0 %v11132_v3  ;;  %v10165_v3 = vpack.c.bf16 %v13202_v30, %v13197_v27  ;;  %v9262_v27 = vcombine.low %v13343_v33, %v13347_v43  ;;  %v11163_v30 = vld [vmem:[#allocation8 + $0x60] ss:$8 sps:$4 sm:$0xff]   ;;  %v11210_v13 = vld [vmem:[#allocation8 + $0x3d4] ss:$8 sps:$4 sm:$0xff]  }
 0x16f   : > { %1107 = vmatmul.mubr.bf16.vlgmr.msra.gmra.mrb[0].mxu1 %v9253_v62  ;;  %v13354_v62 = vcombine.low %v13222_v47, %v13247_v22  ;;  %v11172_v47 = vld [vmem:[#allocation8 + $0x370] ss:$8 sps:$4 sm:$0xff]   ;;  %v11177_v22 = vld [vmem:[#allocation8 + $0x84] ss:$8 sps:$4 sm:$0xff]   ;;  %v11219_v61 = vld [vmem:[#allocation8 + $0xf4] ss:$8 sps:$4 sm:$0xff]  }
 0x170   : > { %1590 = vmatmul.mubr.bf16.vlgmr.msra.gmra.mrb[16].mxu0 %v9315_v58  ;;  %1485 = vmatpush1.bf16.msra.mxu1 %v11127_v6  ;;  %v11157_v58 = vld [vmem:[#allocation8 + $0x50] ss:$8 sps:$4 sm:$0xff]   ;;  %v11166_v6 = vld [vmem:[#allocation8 + $0x360] ss:$8 sps:$4 sm:$0xff]   ;;  %v11222_v1 = vld [vmem:[#allocation8 + $0x3f4] ss:$8 sps:$4 sm:$0xff]  }
 0x171   : > { %1925 = vmatpush1.bf16.msra.mxu0 %v11130_v11  ;;  %1486 = vmatprep.subr.bf16.mxu1 %v11135_v12  ;;  %v9314_v11 = vcombine.low %v14902_v0, %v13099_v31  ;;  %v13360_v12 = vpack.c.bf16 %v13124_v49, %v13097_v29  ;;  %v11178_v31 = vld [vmem:[#allocation8 + $0x380] ss:$8 sps:$4 sm:$0xff]   ;;  %v11183_v29 = vld [vmem:[#allocation8 + $0x94] ss:$8 sps:$4 sm:$0xff]  }
 0x172   : > { %1926 = vmatprep.subr.bf16.mxu0 %v11138_v19  ;;  %1116 = vmatprep.mubr.bf16.mxu1 %v10163_v53  ;;  %v11169_v19 = vld [vmem:[#allocation8 + $0x70] ss:$8 sps:$4 sm:$0xff]   ;;  %v11180_v53 = vld [vmem:[#allocation8 + $0x384] ss:$8 sps:$4 sm:$0xff]   ;;  %v11186_v49 = vld [vmem:[#allocation8 + $0x394] ss:$8 sps:$4 sm:$0xff]  }
 0x173   : > { %1599 = vmatprep.mubr.bf16.mxu0 %v14902_v0 }
 0x174   : > { %1487 = vmatpush1.bf16.msra.mxu1 %v11133_v20  ;;  %v11175_v20 = vld [vmem:[#allocation8 + $0x80] ss:$8 sps:$4 sm:$0xff]  }
 0x175   : > { %1927 = vmatpush1.bf16.msra.mxu0 %v11136_v59  ;;  %1488 = vmatprep.subr.bf16.mxu1 %v11141_v21  ;;  %v11181_v59 = vld [vmem:[#allocation8 + $0x90] ss:$8 sps:$4 sm:$0xff]   ;;  %v11192_v21 = vld [vmem:[#allocation8 + $0x3a4] ss:$8 sps:$4 sm:$0xff]  }
 0x176   : > { %1928 = vmatprep.subr.bf16.mxu0 %v11144_v25  ;;  %v11187_v25 = vld [vmem:[#allocation8 + $0xa0] ss:$8 sps:$4 sm:$0xff]  }
 0x177   : > { %1117 = vmatmul.mubr.bf16.gmra.mrb[4].mxu1 %v9256_v26  ;;  %v11190_v26 = vld [vmem:[#allocation8 + $0x3a0] ss:$8 sps:$4 sm:$0xff]  }
 0x178   : > { %1600 = vmatmul.mubr.bf16.gmra.mrb[20].mxu0 %v13306_v28  ;;  %1489 = vmatpush1.bf16.msra.mxu1 %v11139_v38  ;;  %v11195_v38 = vld [vmem:[#allocation8 + $0xb4] ss:$8 sps:$4 sm:$0xff]  }
 0x179   : > { %1929 = vmatpush1.bf16.msra.mxu0 %v11142_v14  ;;  %1490 = vmatprep.subr.bf16.mxu1 %v11147_v35  ;;  %v11198_v14 = vld [vmem:[#allocation8 + $0x3b4] ss:$8 sps:$4 sm:$0xff]   ;;  %v11201_v35 = vld [vmem:[#allocation8 + $0xc4] ss:$8 sps:$4 sm:$0xff]  }
 0x17a   : > { %1930 = vmatprep.subr.bf16.mxu0 %v11150_v40  ;;  %1126 = vmatprep.mubr.bf16.mxu1 %v10164_v41  ;;  %v11204_v40 = vld [vmem:[#allocation8 + $0x3c4] ss:$8 sps:$4 sm:$0xff]   ;;  %v11199_v41 = vld [vmem:[#allocation8 + $0xc0] ss:$8 sps:$4 sm:$0xff]  }
 0x17b   : > { %1609 = vmatprep.mubr.bf16.mxu0 %v14902_v0 }
 0x17c   : > { %1491 = vmatpush1.bf16.msra.mxu1 %v11145_v48  ;;  %v11202_v48 = vld [vmem:[#allocation8 + $0x3c0] ss:$8 sps:$4 sm:$0xff]  }
 0x17d   : > { %1931 = vmatpush1.bf16.msra.mxu0 %v11148_v8  ;;  %1492 = vmatprep.subr.bf16.mxu1 %v11153_v5  ;;  %v11205_v8 = vld [vmem:[#allocation8 + $0xd0] ss:$8 sps:$4 sm:$0xff]  }
 0x17e   : > { %1932 = vmatprep.subr.bf16.mxu0 %v11156_v15  ;;  %v11208_v5 = vld [vmem:[#allocation8 + $0x3d0] ss:$8 sps:$4 sm:$0xff]   ;;  %v11213_v15 = vld [vmem:[#allocation8 + $0xe4] ss:$8 sps:$4 sm:$0xff]  }
 0x17f   : > { %1127 = vmatmul.mubr.bf16.gmra.mrb[8].mxu1 %v9259_v18  ;;  %v11216_v18 = vld [vmem:[#allocation8 + $0x3e4] ss:$8 sps:$4 sm:$0xff]  }
 0x180   : > { %1610 = vmatmul.mubr.bf16.gmra.mrb[24].mxu0 %v13332_v55  ;;  %1493 = vmatpush1.bf16.msra.mxu1 %v11151_v44  ;;  %v11211_v44 = vld [vmem:[#allocation8 + $0xe0] ss:$8 sps:$4 sm:$0xff]  }
 0x181   : > { %1933 = vmatpush1.bf16.msra.mxu0 %v11154_v57  ;;  %1494 = vmatprep.subr.bf16.mxu1 %v11159_v2  ;;  %v11214_v57 = vld [vmem:[#allocation8 + $0x3e0] ss:$8 sps:$4 sm:$0xff]   ;;  %v11217_v2 = vld [vmem:[#allocation8 + $0xf0] ss:$8 sps:$4 sm:$0xff]  }
 0x182   : > { %1934 = vmatprep.subr.bf16.mxu0 %v11162_v39  ;;  %1136 = vmatprep.mubr.bf16.mxu1 %v10165_v3  ;;  %v11220_v39 = vld [vmem:[#allocation8 + $0x3f0] ss:$8 sps:$4 sm:$0xff]   ;;  %v11225_v3 = vld [vmem:[#allocation8 + $0x404] ss:$8 sps:$4 sm:$0xff]  }
 0x183   : > { %1619 = vmatprep.mubr.bf16.mxu0 %v14902_v0 }
 0x184   : > { %1495 = vmatpush1.bf16.msra.mxu1 %v11157_v58  ;;  %v9313_v58 = vcombine.low %v14902_v0, %v13272_v37  ;;  %v9319_v37 = vcombine.low %v13295_v52, %v13321_v9  ;;  %v9322_v52 = vcombine.low %v13325_v4, %v13343_v33  ;;  %v11235_v9 = vld [vmem:[#allocation8 + $0x440] ss:$8 sps:$4 sm:$0xff]   ;;  %v9373_v4 = vcombine.low %v13347_v43, %v14902_v0 }
 0x185   : > { %1935 = vmatpush1.bf16.msra.mxu0 %v11160_v16  ;;  %1496 = vmatprep.subr.bf16.mxu1 %v11165_v46  ;;  %v9316_v16 = vcombine.low %v13276_v32, %v13291_v51  ;;  %v11223_v46 = vld [vmem:[#allocation8 + $0x400] ss:$8 sps:$4 sm:$0xff]   ;;  %v11234_v51 = vld [vmem:[#allocation8 + $0x434] ss:$8 sps:$4 sm:$0xff]  }
 0x186   : > { %1936 = vmatprep.subr.bf16.mxu0 %v11168_v56  ;;  %v11228_v56 = vld [vmem:[#allocation8 + $0x414] ss:$8 sps:$4 sm:$0xff]   ;;  %v11229_v32 = vld [vmem:[#allocation8 + $0x420] ss:$8 sps:$4 sm:$0xff]  }
 0x187   : > { %1137 = vmatmul.mubr.bf16.gmra.mrb[12].mxu1 %v9262_v27  ;;  %v11226_v27 = vld [vmem:[#allocation8 + $0x410] ss:$8 sps:$4 sm:$0xff]   ;;  %v11241_v33 = vld [vmem:[#allocation8 + $0x460] ss:$8 sps:$4 sm:$0xff]  }
 0x188   : > { %1620 = vmatmul.mubr.bf16.gmra.mrb[28].mxu0 %v13354_v62  ;;  %1497 = vmatpush1.bf16.msra.mxu1 %v11163_v30  ;;  %v11231_v30 = vld [vmem:[#allocation8 + $0x424] ss:$8 sps:$4 sm:$0xff]  }
 0x189   : > { %1937 = vmatpush1.bf16.msra.mxu0 %v11166_v6  ;;  %1498 = vmatprep.subr.bf16.mxu1 %v11171_v7  ;;  %v11232_v6 = vld [vmem:[#allocation8 + $0x430] ss:$8 sps:$4 sm:$0xff]   ;;  %v11237_v7 = vld [vmem:[#allocation8 + $0x444] ss:$8 sps:$4 sm:$0xff]  }
 0x18a   : > { %1938 = vmatprep.subr.bf16.mxu0 %v11174_v10  ;;  %1516 = vmatprep.mubr.bf16.mxu1 %v9314_v11  ;;  %v11240_v10 = vld [vmem:[#allocation8 + $0x454] ss:$8 sps:$4 sm:$0xff]   ;;  %v9374_v11 = vcombine.low %v13212_v42, %v14902_v0 }
 0x18b   : > { %1956 = vmatprep.mubr.bf16.mxu0 %v13360_v12  ;;  %v11246_v42 = vld [vmem:[#allocation8 + $0x474] ss:$8 sps:$4 sm:$0xff]  }
 0x18c   : > { %1499 = vmatpush1.bf16.msra.mxu1 %v11169_v19  ;;  %v11244_v19 = vld [vmem:[#allocation8 + $0x470] ss:$8 sps:$4 sm:$0xff]  }
 0x18d   : > { %1939 = vmatpush1.bf16.msra.mxu0 %v11172_v47  ;;  %1500 = vmatprep.subr.bf16.mxu1 %v11177_v22 }
 0x18e   : > { %1940 = vmatprep.subr.bf16.mxu0 %v11180_v53 }
 0x190   : > { %1501 = vmatpush1.bf16.msra.mxu1 %v11175_v20 }
 0x191   : > { %1941 = vmatpush1.bf16.msra.mxu0 %v11178_v31  ;;  %1502 = vmatprep.subr.bf16.mxu1 %v11183_v29 }
 0x192   : > { %1942 = vmatprep.subr.bf16.mxu0 %v11186_v49 }
 0x194   : > { %1503 = vmatpush1.bf16.msra.mxu1 %v11181_v59 }
 0x195   : > { %1943 = vmatpush1.bf16.msra.mxu0 %v11184_v63  ;;  %1504 = vmatprep.subr.bf16.mxu1 %v11189_v50 }
 0x196   : > { %1944 = vmatprep.subr.bf16.mxu0 %v11192_v21 }
 0x198   : > { %1505 = vmatpush1.bf16.msra.mxu1 %v11187_v25 }
 0x199   : > { %1945 = vmatpush1.bf16.msra.mxu0 %v11190_v26  ;;  %1506 = vmatprep.subr.bf16.mxu1 %v11195_v38 }
 0x19a   : > { %1946 = vmatprep.subr.bf16.mxu0 %v11198_v14 }
 0x19c   : > { %1507 = vmatpush1.bf16.msra.mxu1 %v11193_v17 }
 0x19d   : > { %1947 = vmatpush1.bf16.msra.mxu0 %v11196_v34  ;;  %1508 = vmatprep.subr.bf16.mxu1 %v11201_v35 }
 0x19e   : > { %1948 = vmatprep.subr.bf16.mxu0 %v11204_v40 }
 0x1a0   : > { %1509 = vmatpush1.bf16.msra.mxu1 %v11199_v41 }
 0x1a1   : > { %1949 = vmatpush1.bf16.msra.mxu0 %v11202_v48  ;;  %1510 = vmatprep.subr.bf16.mxu1 %v11207_v54 }
 0x1a2   : > { %1950 = vmatprep.subr.bf16.mxu0 %v11210_v13 }
 0x1a4   : > { %1511 = vmatpush1.bf16.msra.mxu1 %v11205_v8 }
 0x1a5   : > { %1951 = vmatpush1.bf16.msra.mxu0 %v11208_v5  ;;  %1512 = vmatprep.subr.bf16.mxu1 %v11213_v15 }
 0x1a6   : > { %1952 = vmatprep.subr.bf16.mxu0 %v11216_v18 }
 0x1a8   : > { %1513 = vmatpush1.bf16.msra.mxu1 %v11211_v44 }
 0x1a9   : > { %1953 = vmatpush1.bf16.msra.mxu0 %v11214_v57  ;;  %1514 = vmatprep.subr.bf16.mxu1 %v11219_v61 }
 0x1aa   : > { %1954 = vmatprep.subr.bf16.mxu0 %v11222_v1 }
 0x1ac   : > { %1515 = vmatpush1.bf16.msra.mxu1 %v11217_v2 }
 0x1ad   : > { %1955 = vmatpush1.bf16.msra.mxu0 %v11220_v39  ;;  %10638 = vmatprep.subr.bf16.mxu1 %v11225_v3 }
 0x1ae   : > { %1997 = vmatprep.subr.bf16.mxu0 %v11225_v3 }
 0x1af   : > { %1517 = vmatmul.mubr.bf16.vlgmr.msra.gmra.mrb[16].mxu1 %v9313_v58 }
 0x1b0   : > { %1957 = vmatmul.mubr.bf16.vlgmr.msra.gmra.mrb[16].mxu0 %v9316_v16  ;;  %10646 = vmatpush1.bf16.msra.mxu1 %v11223_v46 }
 0x1b1   : > { %1998 = vmatpush1.bf16.msra.mxu0 %v11223_v46  ;;  %10639 = vmatprep.subr.bf16.mxu1 %v11228_v56 }
 0x1b2   : > { %1999 = vmatprep.subr.bf16.mxu0 %v11228_v56  ;;  %1526 = vmatprep.mubr.bf16.mxu1 %v13360_v12  ;;  %v11238_v12 = vld [vmem:[#allocation8 + $0x450] ss:$8 sps:$4 sm:$0xff]  }
 0x1b3   : > { %1966 = vmatprep.mubr.bf16.mxu0 %v13192_v23 }
 0x1b4   : > { %10647 = vmatpush1.bf16.msra.mxu1 %v11226_v27 }
 0x1b5   : > { %2000 = vmatpush1.bf16.msra.mxu0 %v11226_v27  ;;  %10640 = vmatprep.subr.bf16.mxu1 %v11231_v30 }
 0x1b6   : > { %2001 = vmatprep.subr.bf16.mxu0 %v11231_v30 }
 0x1b7   : > { %1527 = vmatmul.mubr.bf16.gmra.mrb[20].mxu1 %v9316_v16 }
 0x1b8   : > { %1967 = vmatmul.mubr.bf16.gmra.mrb[20].mxu0 %v9319_v37  ;;  %10648 = vmatpush1.bf16.msra.mxu1 %v11229_v32 }
 0x1b9   : > { %2002 = vmatpush1.bf16.msra.mxu0 %v11229_v32  ;;  %10641 = vmatprep.subr.bf16.mxu1 %v11234_v51 }
 0x1ba   : > { %2003 = vmatprep.subr.bf16.mxu0 %v11234_v51  ;;  %1536 = vmatprep.mubr.bf16.mxu1 %v13192_v23  ;;  %v11243_v23 = vld [vmem:[#allocation8 + $0x464] ss:$8 sps:$4 sm:$0xff]  }
 0x1bb   : > { %1976 = vmatprep.mubr.bf16.mxu0 %v13231_v60 }
 0x1bc   : > { %10649 = vmatpush1.bf16.msra.mxu1 %v11232_v6 }
 0x1bd   : > { %2004 = vmatpush1.bf16.msra.mxu0 %v11232_v6  ;;  %10642 = vmatprep.subr.bf16.mxu1 %v11237_v7 }
 0x1be   : > { %2005 = vmatprep.subr.bf16.mxu0 %v11237_v7 }
 0x1bf   : > { %1537 = vmatmul.mubr.bf16.gmra.mrb[24].mxu1 %v9319_v37 }
 0x1c0   : > { %1977 = vmatmul.mubr.bf16.gmra.mrb[24].mxu0 %v9322_v52  ;;  %10650 = vmatpush1.bf16.msra.mxu1 %v11235_v9 }
 0x1c1   : > { %2006 = vmatpush1.bf16.msra.mxu0 %v11235_v9  ;;  %10643 = vmatprep.subr.bf16.mxu1 %v11240_v10 }
 0x1c2   : > { %2007 = vmatprep.subr.bf16.mxu0 %v11240_v10  ;;  %1546 = vmatprep.mubr.bf16.mxu1 %v13231_v60  ;;  %v9375_v60 = vcombine.low %v13251_v24, %v14902_v0 }
 0x1c3   : > { %1986 = vmatprep.mubr.bf16.mxu0 %v9374_v11 }
 0x1c4   : > { %10651 = vmatpush1.bf16.msra.mxu1 %v11238_v12 }
 0x1c5   : > { %2008 = vmatpush1.bf16.msra.mxu0 %v11238_v12  ;;  %10644 = vmatprep.subr.bf16.mxu1 %v11243_v23 }
 0x1c6   : > { %2009 = vmatprep.subr.bf16.mxu0 %v11243_v23 }
 0x1c7   : > { %1547 = vmatmul.mubr.bf16.gmra.mrb[28].mxu1 %v9322_v52 }
 0x1c8   : > { %1987 = vmatmul.mubr.bf16.gmra.mrb[28].mxu0 %v9373_v4  ;;  %10652 = vmatpush1.bf16.msra.mxu1 %v11241_v33 }
 0x1c9   : > { %2010 = vmatpush1.bf16.msra.mxu0 %v11241_v33  ;;  %10645 = vmatprep.subr.bf16.mxu1 %v11246_v42 }
 0x1ca   : > { %2011 = vmatprep.subr.bf16.mxu0 %v11246_v42  ;;  %2029 = vmatprep.mubr.bf16.mxu0 %v14902_v0 }
 0x1cb   : > { %2049 = vmatprep.mubr.bf16.mxu1 %v14902_v0 }
 0x1cc   : > { %10653 = vmatpush1.bf16.msra.mxu1 %v11244_v19 }
 0x1cd   : > { %2012 = vmatpush1.bf16.msra.mxu0 %v11244_v19 }
 0x1cf   : > { %2050 = vmatmul.mubr.bf16.vlgmr.msra.gmra.mrb[32].mxu1 %v13354_v62 }
 0x1d0   : > { %2030 = vmatmul.mubr.bf16.vlgmr.msra.gmra.mrb[16].mxu0 %v13306_v28  ;;  %2059 = vmatprep.mubr.bf16.mxu1 %v14902_v0 }
 0x1d1   : > { %2039 = vmatprep.mubr.bf16.mxu0 %v14902_v0 }
 0x1d7   : > { %2060 = vmatmul.mubr.bf16.gmra.mrb[36].mxu1 %v9375_v60 }
 0x1d8   : > { %2040 = vmatmul.mubr.bf16.gmra.mrb[20].mxu0 %v13332_v55 }
 0x223   : > { %v1181_v43 = vpop.f32.mrb[0].mxu0 }
 0x224   : > { %v1183_v47 = vpop.f32.mrb[1].mxu0 }
 0x225   : > { %v1185_v22 = vpop.f32.mrb[2].mxu0 }
 0x226   : > { %v1187_v53 = vpop.f32.mrb[3].mxu0 }
 0x22b   : > { %v1191_v20 = vpop.f32.mrb[4].mxu0 }
 0x22c   : > { %v1193_v31 = vpop.f32.mrb[5].mxu0 }
 0x22d   : > { %v1195_v29 = vpop.f32.mrb[6].mxu0 }
 0x22e   : > { %v1197_v28 = vpop.f32.mrb[7].mxu0 }
 0x233   : > { %v1201_v49 = vpop.f32.mrb[8].mxu0 }
 0x234   : > { %v1203_v62 = vpop.f32.mrb[9].mxu0 }
 0x235   : > { %v1205_v59 = vpop.f32.mrb[10].mxu0 }
 0x236   : > { %v1207_v63 = vpop.f32.mrb[11].mxu0 }
 0x23b   : > { %v1211_v50 = vpop.f32.mrb[12].mxu0 }
 0x23c   : > { %v1213_v21 = vpop.f32.mrb[13].mxu0 }
 0x23d   : > { %v1215_v25 = vpop.f32.mrb[14].mxu0 }
 0x23e   : > { %v1217_v26 = vpop.f32.mrb[15].mxu0 }
 0x242   : > { %v1108_v24 = vpop.f32.mrb[0].mxu1 }
 0x243   : > { %v1182_v38 = vadd.f32 %v1181_v43, %v1108_v24  ;;  %v1110_v55 = vpop.f32.mrb[1].mxu1 }
 0x244   : > { %v1184_v14 = vadd.f32 %v1183_v47, %v1110_v55  ;;  %v1112_v17 = vpop.f32.mrb[2].mxu1 }
 0x245   : > { %v1186_v34 = vadd.f32 %v1185_v22, %v1112_v17  ;;  %v1114_v35 = vpop.f32.mrb[3].mxu1 }
 0x246   : > { %v1188_v40 = vadd.f32 %v1187_v53, %v1114_v35 }
 0x24a   : > { %v1118_v41 = vpop.f32.mrb[4].mxu1 }
 0x24b   : > { %v1192_v48 = vadd.f32 %v1191_v20, %v1118_v41  ;;  %v1120_v54 = vpop.f32.mrb[5].mxu1 }
 0x24c   : > { %v1194_v13 = vadd.f32 %v1193_v31, %v1120_v54  ;;  %v1122_v8 = vpop.f32.mrb[6].mxu1 }
 0x24d   : > { %v1196_v5 = vadd.f32 %v1195_v29, %v1122_v8  ;;  %v1124_v15 = vpop.f32.mrb[7].mxu1 }
 0x24e   : > { %v1198_v18 = vadd.f32 %v1197_v28, %v1124_v15 }
 0x252   : > { %v1128_v44 = vpop.f32.mrb[8].mxu1 }
 0x253   : > { %v1202_v57 = vadd.f32 %v1201_v49, %v1128_v44  ;;  %v1130_v61 = vpop.f32.mrb[9].mxu1 }
 0x254   : > { %v1204_v1 = vadd.f32 %v1203_v62, %v1130_v61  ;;  %v1132_v2 = vpop.f32.mrb[10].mxu1 }
 0x255   : > { %v1206_v39 = vadd.f32 %v1205_v59, %v1132_v2  ;;  %v1134_v3 = vpop.f32.mrb[11].mxu1 }
 0x256   : > { %v1208_v58 = vadd.f32 %v1207_v63, %v1134_v3 }
 0x25a   : > { %v1138_v16 = vpop.f32.mrb[12].mxu1 }
 0x25b   : > { %v1212_v46 = vadd.f32 %v1211_v50, %v1138_v16  ;;  %v1140_v56 = vpop.f32.mrb[13].mxu1 }
 0x25c   : > { %v1214_v27 = vadd.f32 %v1213_v21, %v1140_v56  ;;  %v1142_v30 = vpop.f32.mrb[14].mxu1 }
 0x25d   : > { %v1216_v37 = vadd.f32 %v1215_v25, %v1142_v30  ;;  %v1144_v32 = vpop.f32.mrb[15].mxu1 }
 0x25e   : > { %v1218_v51 = vadd.f32 %v1217_v26, %v1144_v32 }
 0x282   : > { %v1518_v6 = vpop.f32.mrb[16].mxu1 }
 0x283   : > { %v1519_v7 = vadd.f32 %v1518_v6, %v1182_v38  ;;  %v1520_v52 = vpop.f32.mrb[17].mxu1 }
 0x284   : > { %v1521_v9 = vadd.f32 %v1520_v52, %v1184_v14  ;;  %v1522_v10 = vpop.f32.mrb[18].mxu1 }
 0x285   : > { %v1523_v11 = vadd.f32 %v1522_v10, %v1186_v34  ;;  %v1524_v12 = vpop.f32.mrb[19].mxu1 }
 0x286   : > { %v13390_v23 = vadd.f32 %v1524_v12, %v1188_v40 }
 0x28a   : > { %v1528_v4 = vpop.f32.mrb[20].mxu1 }
 0x28b   : > { %v13392_v33 = vadd.f32 %v1528_v4, %v1192_v48  ;;  %v1530_v42 = vpop.f32.mrb[21].mxu1 }
 0x28c   : > { %v13394_v19 = vadd.f32 %v1530_v42, %v1194_v13  ;;  %v1532_v60 = vpop.f32.mrb[22].mxu1 }
 0x28d   : > { %v13396_v43 = vadd.f32 %v1532_v60, %v1196_v5  ;;  %v1534_v47 = vpop.f32.mrb[23].mxu1 }
 0x28e   : > { %v13398_v22 = vadd.f32 %v1534_v47, %v1198_v18 }
 0x292   : > { %v1538_v53 = vpop.f32.mrb[24].mxu1 }
 0x293   : > { %v1978_v20 = vpop.f32.mrb[24].mxu0  ;;  %v1539_v31 = vadd.f32 %v1538_v53, %v1202_v57  ;;  %v1540_v29 = vpop.f32.mrb[25].mxu1 }
 0x294   : > { %v1980_v28 = vpop.f32.mrb[25].mxu0  ;;  %v1541_v49 = vadd.f32 %v1540_v29, %v1204_v1  ;;  %v1542_v62 = vpop.f32.mrb[26].mxu1 }
 0x295   : > { %v1982_v59 = vpop.f32.mrb[26].mxu0  ;;  %v10680_v63 = vadd.f32 %v1978_v20, %v1539_v31  ;;  %v1543_v50 = vadd.f32 %v1542_v62, %v1206_v39  ;;  %v1544_v21 = vpop.f32.mrb[27].mxu1 }
 0x296   : > { %v1984_v25 = vpop.f32.mrb[27].mxu0  ;;  %v10684_v26 = vadd.f32 %v1980_v28, %v1541_v49  ;;  %v1545_v24 = vadd.f32 %v1544_v21, %v1208_v58 }
 0x297   : > { %v10688_v38 = vadd.f32 %v1982_v59, %v1543_v50 }
 0x298   : > { %v10692_v55 = vadd.f32 %v1984_v25, %v1545_v24 }
 0x29a   : > { %v1548_v14 = vpop.f32.mrb[28].mxu1 }
 0x29b   : > { %v1988_v17 = vpop.f32.mrb[28].mxu0  ;;  %v1549_v34 = vadd.f32 %v1548_v14, %v1212_v46  ;;  %v1550_v35 = vpop.f32.mrb[29].mxu1 }
 0x29c   : > { %v1990_v40 = vpop.f32.mrb[29].mxu0  ;;  %v1551_v41 = vadd.f32 %v1550_v35, %v1214_v27  ;;  %v1552_v48 = vpop.f32.mrb[30].mxu1 }
 0x29d   : > { %v1992_v54 = vpop.f32.mrb[30].mxu0  ;;  %v10696_v13 = vadd.f32 %v1988_v17, %v1549_v34  ;;  %v1553_v8 = vadd.f32 %v1552_v48, %v1216_v37  ;;  %v1554_v5 = vpop.f32.mrb[31].mxu1 }
 0x29e   : > { %v1994_v15 = vpop.f32.mrb[31].mxu0  ;;  %v10700_v18 = vadd.f32 %v1990_v40, %v1551_v41  ;;  %v1555_v44 = vadd.f32 %v1554_v5, %v1218_v51 }
 0x29f   : > { %v10704_v57 = vadd.f32 %v1992_v54, %v1553_v8 }
 0x2a0   : > { %v10708_v61 = vadd.f32 %v1994_v15, %v1555_v44 }
 0x2a2   : > { %v2051_v2 = vpop.f32.mrb[32].mxu1 }
 0x2a3   : > { %v2031_v1 = vpop.f32.mrb[16].mxu0  ;;  %v10681_v3 = vadd.f32 %v10680_v63, %v2051_v2  ;;  %v2053_v16 = vpop.f32.mrb[33].mxu1 }
 0x2a4   : > { %v10656_v39 = vadd.f32 %v2031_v1, %v1519_v7  ;;  %v2033_v58 = vpop.f32.mrb[17].mxu0  ;;  %v10685_v56 = vadd.f32 %v10684_v26, %v2053_v16  ;;  %v2055_v27 = vpop.f32.mrb[34].mxu1 }
 0x2a5   : > { %v10659_v46 = vadd.f32 %v2033_v58, %v1521_v9  ;;  %v2035_v30 = vpop.f32.mrb[18].mxu0  ;;  %2094 = vst [vmem:[#allocation2 + $0x40] sm:$0xff] %v10681_v3  ;;  %2110 = vst [vmem:[#allocation3 + $0x40] sm:$0xff] %v10681_v3  ;;  %v10689_v32 = vadd.f32 %v10688_v38, %v2055_v27  ;;  %v2057_v51 = vpop.f32.mrb[35].mxu1 }
 0x2a6   : > { %2086 = vst [vmem:[#allocation2] sm:$0xff] %v10656_v39  ;;  %2102 = vst [vmem:[#allocation3] sm:$0xff] %v10656_v39  ;;  %v10662_v37 = vadd.f32 %v2035_v30, %v1523_v11  ;;  %v2037_v6 = vpop.f32.mrb[19].mxu0  ;;  %v10693_v52 = vadd.f32 %v10692_v55, %v2057_v51 }
 0x2a7   : > { %2087 = vst [vmem:[#allocation2 + $0x8] sm:$0xff] %v10659_v46  ;;  %2103 = vst [vmem:[#allocation3 + $0x8] sm:$0xff] %v10659_v46  ;;  %v10665_v7 = vadd.f32 %v2037_v6, %v13390_v23 }
 0x2a8   : > { %2095 = vst [vmem:[#allocation2 + $0x48] sm:$0xff] %v10685_v56  ;;  %2111 = vst [vmem:[#allocation3 + $0x48] sm:$0xff] %v10685_v56 }
 0x2a9   : > { %2088 = vst [vmem:[#allocation2 + $0x10] sm:$0xff] %v10662_v37  ;;  %2104 = vst [vmem:[#allocation3 + $0x10] sm:$0xff] %v10662_v37 }
 0x2aa   : > { %2096 = vst [vmem:[#allocation2 + $0x50] sm:$0xff] %v10689_v32  ;;  %2112 = vst [vmem:[#allocation3 + $0x50] sm:$0xff] %v10689_v32  ;;  %v2061_v10 = vpop.f32.mrb[36].mxu1 }
 0x2ab   : > { %2089 = vst [vmem:[#allocation2 + $0x18] sm:$0xff] %v10665_v7  ;;  %2105 = vst [vmem:[#allocation3 + $0x18] sm:$0xff] %v10665_v7  ;;  %v2041_v9 = vpop.f32.mrb[20].mxu0  ;;  %v10697_v12 = vadd.f32 %v10696_v13, %v2061_v10  ;;  %v2063_v42 = vpop.f32.mrb[37].mxu1 }
 0x2ac   : > { %2097 = vst [vmem:[#allocation2 + $0x58] sm:$0xff] %v10693_v52  ;;  %2113 = vst [vmem:[#allocation3 + $0x58] sm:$0xff] %v10693_v52  ;;  %v10668_v11 = vadd.f32 %v2041_v9, %v13392_v33  ;;  %v2043_v4 = vpop.f32.mrb[21].mxu0  ;;  %v10701_v47 = vadd.f32 %v10700_v18, %v2063_v42  ;;  %v2065_v53 = vpop.f32.mrb[38].mxu1 }
 0x2ad   : > { %v10671_v60 = vadd.f32 %v2043_v4, %v13394_v19  ;;  %v2045_v23 = vpop.f32.mrb[22].mxu0  ;;  %2098 = vst [vmem:[#allocation2 + $0x60] sm:$0xff] %v10697_v12  ;;  %2114 = vst [vmem:[#allocation3 + $0x60] sm:$0xff] %v10697_v12  ;;  %v10705_v31 = vadd.f32 %v10704_v57, %v2065_v53  ;;  %v2067_v28 = vpop.f32.mrb[39].mxu1 }
 0x2ae   : > { %2090 = vst [vmem:[#allocation2 + $0x20] sm:$0xff] %v10668_v11  ;;  %2106 = vst [vmem:[#allocation3 + $0x20] sm:$0xff] %v10668_v11  ;;  %v10674_v20 = vadd.f32 %v2045_v23, %v13396_v43  ;;  %v2047_v29 = vpop.f32.mrb[23].mxu0  ;;  %v10709_v19 = vadd.f32 %v10708_v61, %v2067_v28 }
 0x2af   : > { %2091 = vst [vmem:[#allocation2 + $0x28] sm:$0xff] %v10671_v60  ;;  %2107 = vst [vmem:[#allocation3 + $0x28] sm:$0xff] %v10671_v60  ;;  %v10677_v33 = vadd.f32 %v2047_v29, %v13398_v22 }
 0x2b0   : > { %2099 = vst [vmem:[#allocation2 + $0x68] sm:$0xff] %v10701_v47  ;;  %2115 = vst [vmem:[#allocation3 + $0x68] sm:$0xff] %v10701_v47 }
 0x2b1   : > { %2092 = vst [vmem:[#allocation2 + $0x30] sm:$0xff] %v10674_v20  ;;  %2108 = vst [vmem:[#allocation3 + $0x30] sm:$0xff] %v10674_v20 }
 0x2b2   : > { %2100 = vst [vmem:[#allocation2 + $0x70] sm:$0xff] %v10705_v31  ;;  %2116 = vst [vmem:[#allocation3 + $0x70] sm:$0xff] %v10705_v31 }
 0x2b3   : > { %2093 = vst [vmem:[#allocation2 + $0x38] sm:$0xff] %v10677_v33  ;;  %2109 = vst [vmem:[#allocation3 + $0x38] sm:$0xff] %v10677_v33 }
 0x2b4   : > { %2101 = vst [vmem:[#allocation2 + $0x78] sm:$0xff] %v10709_v19  ;;  %2117 = vst [vmem:[#allocation3 + $0x78] sm:$0xff] %v10709_v19 }
 0x2b5 LB: >> { %v11247_v43 = vld [vmem:[#allocation13 + $0x40] sm:$0xff]   ;;  %v11249_v49 = vld [vmem:[#allocation13 + $0x48] sm:$0xff]   ;;  %v11251_v59 = vld [vmem:[#allocation13 + $0x50] sm:$0xff]   ;;  %v14919_v31 = vmov 0   ;;  %s2634_s1 = sld [smem:[#allocation4]]  ;;  %s2123_s12 = sadd.s32 1, %s12649_s12   ;;  %s12649_s12 = sphi %s13409_s12, %s2123_s12  }
 0x2b6   : >> { %v11248_v22 = vld [vmem:[#allocation13] sm:$0xff]   ;;  %10198 = vmatprep.subr.bf16.mxu1 %v11247_v43  ;;  %v11250_v62 = vld [vmem:[#allocation13 + $0x8] sm:$0xff]   ;;  %v11252_v63 = vld [vmem:[#allocation13 + $0x10] sm:$0xff]   ;;  %p2120_p11 = scmp.ge.s32.totalorder %s2123_s12, 5  }
 0x2b7   : >> { %10199 = vmatpush3.bf16.msra.mxu1 %v11248_v22  ;;  %v11253_v50 = vld [vmem:[#allocation13 + $0x58] sm:$0xff]   ;;  %v11255_v25 = vld [vmem:[#allocation13 + $0x60] sm:$0xff]   ;;  %v11257_v24 = vld [vmem:[#allocation13 + $0x68] sm:$0xff]   ;;  %s6440_s11 = sld [smem:[#allocation4]] (%p2120_p11)  ;;  %s10197_s13 = sshll.u32 (%p2120_p11), %s12754_s24, 10 }
 0x2b8   : >> { %10200 = vmatprep.subr.bf16.mxu1 %v11249_v49  ;;  %v11254_v21 = vld [vmem:[#allocation13 + $0x18] sm:$0xff]   ;;  %v11256_v26 = vld [vmem:[#allocation13 + $0x20] sm:$0xff]   ;;  %v2125_v38 = vld [vmem:[#allocation3 + $0x8] sm:$0xff]  ;;  %s9062_s14 = sshll.u32 (%p2120_p11), %s13407_s27, 4  ;;  %s15104_s10 = sld [smem:[#allocation44_spill]] (%p2120_p11)  ;;  %s14831_s14 = int_to_ptr.vmem [resolvable:$true] %s9062_s14 }
 0x2b9   : >> { %v2127_v55 = vld [vmem:[#allocation3 + $0x18] sm:$0xff]  ;;  %v11258_v17 = vld [vmem:[#allocation13 + $0x28] sm:$0xff]   ;;  %v11259_v34 = vld [vmem:[#allocation13 + $0x70] sm:$0xff]   ;;  %s9049_s26 = scalar_lea.sflag (%p2120_p11), [#allocation7], %s13062_s16  ;;  %s12555_s15 = scalar_lea.vmem (%p2120_p11), %s14831_s14, 1024 }
 0x2ba   : >> { %v2141_v14 = vpack.c.bf16 %v2127_v55, %v2125_v38  ;;  %v11260_v35 = vld [vmem:[#allocation13 + $0x30] sm:$0xff]   ;;  %v11261_v40 = vld [vmem:[#allocation13 + $0x78] sm:$0xff]   ;;  %v2124_v48 = vld [vmem:[#allocation3] sm:$0xff]  ;;  %p12556_p12 = scmp.ne.s32.totalorder (%p2120_p11), %s14831_s14, %s12555_s15  ;;  %p15105_p13 = scmp.ne.s32.totalorder (%p2120_p11), %s14985_s25, 0 }
 0x2bb   : >> { %10201 = vmatpush3.bf16.msra.mxu1 %v11250_v62  ;;  %v11262_v41 = vld [vmem:[#allocation13 + $0x38] sm:$0xff]   ;;  %v2126_v54 = vld [vmem:[#allocation3 + $0x10] sm:$0xff]  ;;  %v2129_v13 = vld [vmem:[#allocation3 + $0x28] sm:$0xff]  ;;  %s12667_s24 = smov (%p2120_p11), [#allocation22]  }
 0x2bc   : >> { %10202 = vmatprep.subr.bf16.mxu1 %v11251_v59  ;;  %2308 = vmatprep.mubr.bf16.mxu1 %v2141_v14  ;;  %v2131_v8 = vld [vmem:[#allocation3 + $0x38] sm:$0xff]  ;;  %v11265_v5 = vld [vmem:[#allocation14 + $0x4] ss:$8 sps:$4 sm:$0xff]   ;;  %v11263_v15 = vld [vmem:[#allocation14] ss:$8 sps:$4 sm:$0xff]   ;;  %v2140_v18 = vpack.c.bf16 %v2126_v54, %v2124_v48  ;;  %p12557_p8 = pnand (%p2120_p11), %p12556_p12, %p15105_p13  ;;  %s12559_s28 = sshll.u32 (%p2120_p11), %s12667_s24, 4  ;;  %s12560_s28 = int_to_ptr.vmem [resolvable:$false] %s12559_s28 }
 0x2bd   : >> { %v11268_v44 = vld [vmem:[#allocation14 + $0x14] ss:$8 sps:$4 sm:$0xff]   ;;  %v2143_v57 = vpack.c.bf16 %v2131_v8, %v2129_v13  ;;  %v2128_v61 = vld [vmem:[#allocation3 + $0x20] sm:$0xff]  ;;  %v11266_v2 = vld [vmem:[#allocation14 + $0x10] ss:$8 sps:$4 sm:$0xff]   ;;  %s12561_s12 = scalar_lea.vmem (%p2120_p11), %s12560_s28, 2048  ;;  %p12562_p9 = scmp.lt.s32.totalorder (%p2120_p11), %s14831_s14, %s12560_s28 }
 0x2be   : >> { %v2130_v1 = vld [vmem:[#allocation3 + $0x30] sm:$0xff]  ;;  %v2133_v39 = vld [vmem:[#allocation3 + $0x48] sm:$0xff]  ;;  %v2135_v3 = vld [vmem:[#allocation3 + $0x58] sm:$0xff]  ;;  %s14829_s2 = scalar_lea.hbm (%p2120_p11), %s15104_s10, %s10197_s13  ;;  %p12558_p6 = pneg (%p2120_p11), %p12557_p8 }
 0x2bf   : >> { %10203 = vmatpush3.bf16.msra.mxu1 %v11252_v63  ;;  %v11271_v58 = vld [vmem:[#allocation14 + $0x24] ss:$8 sps:$4 sm:$0xff]   ;;  %v11269_v16 = vld [vmem:[#allocation14 + $0x20] ss:$8 sps:$4 sm:$0xff]   ;;  %v2142_v46 = vpack.c.bf16 %v2130_v1, %v2128_v61  ;;  %v11274_v56 = vld [vmem:[#allocation14 + $0x34] ss:$8 sps:$4 sm:$0xff]   ;;  %v2145_v30 = vpack.c.bf16 %v2135_v3, %v2133_v39  ;;  %p12563_p4 = scmp.lt.s32.totalorder (%p2120_p11), %s12561_s12, %s12555_s15 }
 0x2c0   : >> { %10204 = vmatprep.subr.bf16.mxu1 %v11253_v50  ;;  %v2132_v27 = vld [vmem:[#allocation3 + $0x40] sm:$0xff]  ;;  %v2134_v37 = vld [vmem:[#allocation3 + $0x50] sm:$0xff]  ;;  %v2137_v6 = vld [vmem:[#allocation3 + $0x68] sm:$0xff] }
 0x2c1   : >> { %v11272_v32 = vld [vmem:[#allocation14 + $0x30] ss:$8 sps:$4 sm:$0xff]   ;;  %v11277_v7 = vld [vmem:[#allocation14 + $0x44] ss:$8 sps:$4 sm:$0xff]   ;;  %v11275_v52 = vld [vmem:[#allocation14 + $0x40] ss:$8 sps:$4 sm:$0xff]   ;;  %v2144_v9 = vpack.c.bf16 %v2134_v37, %v2132_v27  ;;  %p12564_p3 = por (%p2120_p11), %p12563_p4, %p12562_p9 }
 0x2c2   : >> { %v2139_v51 = vld [vmem:[#allocation3 + $0x78] sm:$0xff]  ;;  %v2136_v12 = vld [vmem:[#allocation3 + $0x60] sm:$0xff]  ;;  %v2138_v4 = vld [vmem:[#allocation3 + $0x70] sm:$0xff] }
 0x2c3   : >> { %10205 = vmatpush3.bf16.msra.mxu1 %v11254_v21  ;;  %v11280_v10 = vld [vmem:[#allocation14 + $0x54] ss:$8 sps:$4 sm:$0xff]   ;;  %v2147_v11 = vpack.c.bf16 %v2139_v51, %v2137_v6  ;;  %v11278_v42 = vld [vmem:[#allocation14 + $0x50] ss:$8 sps:$4 sm:$0xff]   ;;  %v2146_v60 = vpack.c.bf16 %v2138_v4, %v2136_v12  ;;  %v11283_v47 = vld [vmem:[#allocation14 + $0x64] ss:$8 sps:$4 sm:$0xff]   ;;  %p12565_p0 = pnand (%p2120_p11), %p12564_p3, %p12558_p6 }
 0x2c4   : >> { %10206 = vmatprep.subr.bf16.mxu1 %v11255_v25  ;;  %v11281_v23 = vld [vmem:[#allocation14 + $0x60] ss:$8 sps:$4 sm:$0xff]   ;;  %v11286_v53 = vld [vmem:[#allocation14 + $0x74] ss:$8 sps:$4 sm:$0xff]   ;;  %v11284_v20 = vld [vmem:[#allocation14 + $0x70] ss:$8 sps:$4 sm:$0xff]  }
 0x2c5   : >> { %v11287_v3 = vld [vmem:[#allocation16 + $0x40] sm:$0xff]   ;;  %v11293_v27 = vld [vmem:[#allocation16 + $0x58] sm:$0xff]   ;;  %v11297_v51 = vld [vmem:[#allocation16 + $0x68] sm:$0xff]  }
 0x2c6   : >> { %10238 = vmatprep.subr.bf16.mxu0 %v11287_v3  ;;  %v11294_v37 = vld [vmem:[#allocation16 + $0x18] sm:$0xff]   ;;  %v11296_v6 = vld [vmem:[#allocation16 + $0x20] sm:$0xff]  }
 0x2c7   : >> { %10207 = vmatpush3.bf16.msra.mxu1 %v11256_v26  ;;  %v11303_v12 = vld [vmem:[#allocation17] ss:$8 sps:$4 sm:$0xff]   ;;  %v11305_v4 = vld [vmem:[#allocation17 + $0x4] ss:$8 sps:$4 sm:$0xff]   ;;  %v11449_v0 = vld [vmem:[#allocation10 + $0x254] ss:$8 sps:$4 sm:$0xff]  }
 0x2c8   : >> { %10208 = vmatprep.subr.bf16.mxu1 %v11257_v24 }
 0x2cb   : >> { %10209 = vmatpush3.bf16.msra.mxu1 %v11258_v17 }
 0x2cc   : >> { %10210 = vmatprep.subr.bf16.mxu1 %v11259_v34 }
 0x2cf   : >> { %10211 = vmatpush3.bf16.msra.mxu1 %v11260_v35 }
 0x2d0   : >> { %10212 = vmatprep.subr.bf16.mxu1 %v11261_v40 }
 0x2d3   : >> { %10213 = vmatpush3.bf16.msra.mxu1 %v11262_v41 }
 0x2d4   : >> { %2449 = vmatprep.subr.bf16.mxu1 %v11265_v5 }
 0x2d6   : >> { %2309 = vmatmul.mubr.bf16.vlgmr.msra.gmra.mrb[0].mxu1 %v2140_v18 }
 0x2d7   : >> { %2316 = vmatprep.mubr.bf16.mxu1 %v2143_v57  ;;  %2450 = vmatpush1.bf16.msra.mxu1 %v11263_v15 }
 0x2d8   : >> { %2451 = vmatprep.subr.bf16.mxu1 %v11268_v44 }
 0x2db   : >> { %2452 = vmatpush1.bf16.msra.mxu1 %v11266_v2 }
 0x2dc   : >> { %2453 = vmatprep.subr.bf16.mxu1 %v11271_v58  ;;  %v11288_v58 = vld [vmem:[#allocation16] sm:$0xff]  }
 0x2dd   : >> { %10239 = vmatpush3.bf16.msra.mxu0 %v11288_v58 }
 0x2de   : >> { %2317 = vmatmul.mubr.bf16.gmra.mrb[4].mxu1 %v2142_v46  ;;  %v11290_v46 = vld [vmem:[#allocation16 + $0x8] sm:$0xff]  }
 0x2df   : >> { %2324 = vmatprep.mubr.bf16.mxu1 %v2145_v30  ;;  %2454 = vmatpush1.bf16.msra.mxu1 %v11269_v16  ;;  %v11289_v16 = vld [vmem:[#allocation16 + $0x48] sm:$0xff]   ;;  %v11292_v30 = vld [vmem:[#allocation16 + $0x10] sm:$0xff]  }
 0x2e0   : >> { %2455 = vmatprep.subr.bf16.mxu1 %v11274_v56  ;;  %10240 = vmatprep.subr.bf16.mxu0 %v11289_v16  ;;  %v11291_v56 = vld [vmem:[#allocation16 + $0x50] sm:$0xff]  }
 0x2e1   : >> { %10241 = vmatpush3.bf16.msra.mxu0 %v11290_v46 }
 0x2e2   : >> { %10242 = vmatprep.subr.bf16.mxu0 %v11291_v56 }
 0x2e3   : >> { %2456 = vmatpush1.bf16.msra.mxu1 %v11272_v32  ;;  %v11295_v32 = vld [vmem:[#allocation16 + $0x60] sm:$0xff]  }
 0x2e4   : >> { %2457 = vmatprep.subr.bf16.mxu1 %v11277_v7  ;;  %v11298_v7 = vld [vmem:[#allocation16 + $0x28] sm:$0xff]  }
 0x2e5   : >> { %10243 = vmatpush3.bf16.msra.mxu0 %v11292_v30 }
 0x2e6   : >> { %2325 = vmatmul.mubr.bf16.gmra.mrb[8].mxu1 %v2144_v9  ;;  %10244 = vmatprep.subr.bf16.mxu0 %v11293_v27  ;;  %v11300_v9 = vld [vmem:[#allocation16 + $0x30] sm:$0xff]  }
 0x2e7   : >> { %2332 = vmatprep.mubr.bf16.mxu1 %v2147_v11  ;;  %2458 = vmatpush1.bf16.msra.mxu1 %v11275_v52  ;;  %v11299_v52 = vld [vmem:[#allocation16 + $0x70] sm:$0xff]   ;;  %v11302_v11 = vld [vmem:[#allocation16 + $0x38] sm:$0xff]  }
 0x2e8   : >> { %2459 = vmatprep.subr.bf16.mxu1 %v11280_v10  ;;  %v11301_v10 = vld [vmem:[#allocation16 + $0x78] sm:$0xff]  }
 0x2e9   : >> { %10245 = vmatpush3.bf16.msra.mxu0 %v11294_v37 }
 0x2ea   : >> { %10246 = vmatprep.subr.bf16.mxu0 %v11295_v32 }
 0x2eb   : >> { %2460 = vmatpush1.bf16.msra.mxu1 %v11278_v42  ;;  %v11308_v42 = vld [vmem:[#allocation17 + $0x14] ss:$8 sps:$4 sm:$0xff]  }
 0x2ec   : >> { %2461 = vmatprep.subr.bf16.mxu1 %v11283_v47  ;;  %v11311_v47 = vld [vmem:[#allocation17 + $0x24] ss:$8 sps:$4 sm:$0xff]  }
 0x2ed   : >> { %10247 = vmatpush3.bf16.msra.mxu0 %v11296_v6 }
 0x2ee   : >> { %2333 = vmatmul.mubr.bf16.gmra.mrb[12].mxu1 %v2146_v60  ;;  %10248 = vmatprep.subr.bf16.mxu0 %v11297_v51  ;;  %v11306_v60 = vld [vmem:[#allocation17 + $0x10] ss:$8 sps:$4 sm:$0xff]  }
 0x2ef   : >> { %2462 = vmatpush1.bf16.msra.mxu1 %v11281_v23  ;;  %2481 = vmatprep.mubr.bf16.mxu1 %v14919_v31  ;;  %v11309_v23 = vld [vmem:[#allocation17 + $0x20] ss:$8 sps:$4 sm:$0xff]  }
 0x2f0   : >> { %2463 = vmatprep.subr.bf16.mxu1 %v11286_v53  ;;  %v11314_v53 = vld [vmem:[#allocation17 + $0x34] ss:$8 sps:$4 sm:$0xff]  }
 0x2f1   : >> { %10249 = vmatpush3.bf16.msra.mxu0 %v11298_v7 }
 0x2f2   : >> { %10250 = vmatprep.subr.bf16.mxu0 %v11299_v52 }
 0x2f3   : >> { %2464 = vmatpush1.bf16.msra.mxu1 %v11284_v20  ;;  %v11312_v20 = vld [vmem:[#allocation17 + $0x30] ss:$8 sps:$4 sm:$0xff]  }
 0x2f4   : >> { %2977 = vmatprep.subr.bf16.mxu1 %v11305_v4  ;;  %v13419_v4 = vstv %s2634_s1 }
 0x2f5   : >> { %10251 = vmatpush3.bf16.msra.mxu0 %v11300_v9 }
 0x2f6   : >> { %10252 = vmatprep.subr.bf16.mxu0 %v11301_v10 }
 0x2f9   : >> { %10253 = vmatpush3.bf16.msra.mxu0 %v11302_v11 }
 0x3a9   : >> { %v10214_v29 = vpop.f32.mrb[0].mxu1 }
 0x3aa   : >> { %v10215_v28 = vpop.f32.mrb[1].mxu1 }
 0x3ab   : >> { %v10216_v33 = vadd.f32 %v10215_v28, %v10214_v29  ;;  %v10217_v19 = vpop.f32.mrb[2].mxu1  ;;  %v11317_v29 = vld [vmem:[#allocation17 + $0x44] ss:$8 sps:$4 sm:$0xff]   ;;  %v11315_v28 = vld [vmem:[#allocation17 + $0x40] ss:$8 sps:$4 sm:$0xff]  }
 0x3ac   : >> { %v10218_v43 = vpop.f32.mrb[3].mxu1 }
 0x3ad   : >> { %v10219_v22 = vadd.f32 %v10218_v43, %v10217_v19  ;;  %v2341_v49 = vmax.f32 %v10216_v33, 0.0  ;;  %v11320_v33 = vld [vmem:[#allocation17 + $0x54] ss:$8 sps:$4 sm:$0xff]   ;;  %v11318_v19 = vld [vmem:[#allocation17 + $0x50] ss:$8 sps:$4 sm:$0xff]  }
 0x3af   : >> { %v2342_v62 = vmax.f32 %v10219_v22, 0.0 }
 0x3b1   : >> { %v2349_v59 = vpack.c.bf16 %v2342_v62, %v2341_v49  ;;  %v10220_v63 = vpop.f32.mrb[4].mxu1 }
 0x3b2   : >> { %v10221_v50 = vpop.f32.mrb[5].mxu1 }
 0x3b3   : >> { %v10222_v21 = vadd.f32 %v10221_v50, %v10220_v63  ;;  %v10223_v25 = vpop.f32.mrb[6].mxu1  ;;  %2482 = vmatmul.mubr.bf16.vlgmr.msra.gmra.mrb[16].mxu1 %v2349_v59 }
 0x3b4   : >> { %v10224_v26 = vpop.f32.mrb[7].mxu1  ;;  %2491 = vmatprep.mubr.bf16.mxu1 %v14919_v31  ;;  %2978 = vmatpush1.bf16.msra.mxu1 %v11303_v12 }
 0x3b5   : >> { %v2343_v24 = vmax.f32 %v10222_v21, 0.0  ;;  %v10225_v38 = vadd.f32 %v10224_v26, %v10223_v25  ;;  %2979 = vmatprep.subr.bf16.mxu1 %v11308_v42  ;;  %v11887_v42 = vld [vmem:[#allocation3] sm:$0xff] }
 0x3b7   : >> { %v2344_v55 = vmax.f32 %v10225_v38, 0.0 }
 0x3b8   : >> { %2980 = vmatpush1.bf16.msra.mxu1 %v11306_v60 }
 0x3b9   : >> { %v2350_v14 = vpack.c.bf16 %v2344_v55, %v2343_v24  ;;  %v10226_v17 = vpop.f32.mrb[8].mxu1  ;;  %2981 = vmatprep.subr.bf16.mxu1 %v11311_v47 }
 0x3ba   : >> { %v10227_v34 = vpop.f32.mrb[9].mxu1 }
 0x3bb   : >> { %v10228_v35 = vadd.f32 %v10227_v34, %v10226_v17  ;;  %v10229_v40 = vpop.f32.mrb[10].mxu1  ;;  %2492 = vmatmul.mubr.bf16.gmra.mrb[20].mxu1 %v2350_v14 }
 0x3bc   : >> { %v10230_v41 = vpop.f32.mrb[11].mxu1  ;;  %2501 = vmatprep.mubr.bf16.mxu1 %v14919_v31  ;;  %2982 = vmatpush1.bf16.msra.mxu1 %v11309_v23 }
 0x3bd   : >> { %v2345_v48 = vmax.f32 %v10228_v35, 0.0  ;;  %v10231_v54 = vadd.f32 %v10230_v41, %v10229_v40  ;;  %2983 = vmatprep.subr.bf16.mxu1 %v11314_v53  ;;  %v11888_v53 = vld [vmem:[#allocation3 + $0x8] sm:$0xff] }
 0x3bf   : >> { %v2346_v13 = vmax.f32 %v10231_v54, 0.0 }
 0x3c0   : >> { %2984 = vmatpush1.bf16.msra.mxu1 %v11312_v20 }
 0x3c1   : >> { %v2351_v8 = vpack.c.bf16 %v2346_v13, %v2345_v48  ;;  %v10232_v5 = vpop.f32.mrb[12].mxu1  ;;  %2985 = vmatprep.subr.bf16.mxu1 %v11317_v29 }
 0x3c2   : >> { %v10233_v15 = vpop.f32.mrb[13].mxu1 }
 0x3c3   : >> { %v10234_v18 = vadd.f32 %v10233_v15, %v10232_v5  ;;  %v10235_v44 = vpop.f32.mrb[14].mxu1  ;;  %2502 = vmatmul.mubr.bf16.gmra.mrb[24].mxu1 %v2351_v8 }
 0x3c4   : >> { %v10236_v57 = vpop.f32.mrb[15].mxu1  ;;  %2511 = vmatprep.mubr.bf16.mxu1 %v14919_v31  ;;  %2986 = vmatpush1.bf16.msra.mxu1 %v11315_v28  ;;  %v11889_v28 = vld [vmem:[#allocation3 + $0x10] sm:$0xff] }
 0x3c5   : >> { %v2347_v61 = vmax.f32 %v10234_v18, 0.0  ;;  %v10237_v1 = vadd.f32 %v10236_v57, %v10235_v44  ;;  %2987 = vmatprep.subr.bf16.mxu1 %v11320_v33 }
 0x3c7   : >> { %v2348_v2 = vmax.f32 %v10237_v1, 0.0 }
 0x3c8   : >> { %2988 = vmatpush1.bf16.msra.mxu1 %v11318_v19 }
 0x3c9   : >> { %v2352_v39 = vpack.c.bf16 %v2348_v2, %v2347_v61 }
 0x3cb   : >> { %2512 = vmatmul.mubr.bf16.gmra.mrb[28].mxu1 %v2352_v39 }
 0x3cc   : >> { %3009 = vmatprep.mubr.bf16.mxu1 %v14919_v31 }
 0x486   : >> { %v2483_v43 = vpop.f32.mrb[16].mxu1 }
 0x487   : >> { %v9456_v22 = vmul.f32 -1.442695, %v2483_v43  ;;  %v2485_v49 = vpop.f32.mrb[17].mxu1  ;;  %v11890_v43 = vld [vmem:[#allocation3 + $0x18] sm:$0xff] }
 0x488   : >> { %v9457_v62 = vmul.f32 -1.442695, %v2485_v49  ;;  %v2487_v59 = vpop.f32.mrb[18].mxu1 }
 0x489   : >> { %11759 = vpow2.f32 %v9456_v22  ;;  %v9458_v63 = vmul.f32 -1.442695, %v2487_v59  ;;  %v2489_v50 = vpop.f32.mrb[19].mxu1 }
 0x48a   : >> { %11761 = vpow2.f32 %v9457_v62  ;;  %v9459_v21 = vmul.f32 -1.442695, %v2489_v50 }
 0x48b   : >> { %11763 = vpow2.f32 %v9458_v63 }
 0x48c   : >> { %11765 = vpow2.f32 %v9459_v21 }
 0x48e   : >> { %v2493_v25 = vpop.f32.mrb[20].mxu1 }
 0x48f   : >> { %v9460_v26 = vmul.f32 -1.442695, %v2493_v25  ;;  %v2495_v24 = vpop.f32.mrb[21].mxu1 }
 0x490   : >> { %v9461_v38 = vmul.f32 -1.442695, %v2495_v24  ;;  %v2497_v55 = vpop.f32.mrb[22].mxu1 }
 0x491   : >> { %11767 = vpow2.f32 %v9460_v26  ;;  %v9462_v14 = vmul.f32 -1.442695, %v2497_v55  ;;  %v2499_v17 = vpop.f32.mrb[23].mxu1 }
 0x492   : >> { %11769 = vpow2.f32 %v9461_v38  ;;  %v9463_v34 = vmul.f32 -1.442695, %v2499_v17 }
 0x493   : >> { %v11760_v35 = vpop.eup %11759  ;;  %11771 = vpow2.f32 %v9462_v14 }
 0x494   : >> { %v11762_v40 = vpop.eup %11761  ;;  %v2570_v41 = vadd.f32 1.0, %v11760_v35  ;;  %11773 = vpow2.f32 %v9463_v34 }
 0x495   : >> { %v11764_v48 = vpop.eup %11763  ;;  %v2571_v54 = vadd.f32 1.0, %v11762_v40 }
 0x496   : >> { %v11766_v13 = vpop.eup %11765  ;;  %11775 = vrcp.f32 %v2570_v41  ;;  %v2572_v8 = vadd.f32 1.0, %v11764_v48  ;;  %v2503_v5 = vpop.f32.mrb[24].mxu1  ;;  %v11891_v48 = vld [vmem:[#allocation3 + $0x20] sm:$0xff] }
 0x497   : >> { %11777 = vrcp.f32 %v2571_v54  ;;  %v2573_v15 = vadd.f32 1.0, %v11766_v13  ;;  %v9464_v18 = vmul.f32 -1.442695, %v2503_v5  ;;  %v2505_v44 = vpop.f32.mrb[25].mxu1  ;;  %v11892_v5 = vld [vmem:[#allocation3 + $0x28] sm:$0xff] }
 0x498   : >> { %11779 = vrcp.f32 %v2572_v8  ;;  %v9465_v57 = vmul.f32 -1.442695, %v2505_v44  ;;  %v2507_v61 = vpop.f32.mrb[26].mxu1 }
 0x499   : >> { %11781 = vrcp.f32 %v2573_v15  ;;  %v9466_v1 = vmul.f32 -1.442695, %v2507_v61  ;;  %v2509_v2 = vpop.f32.mrb[27].mxu1 }
 0x49a   : >> { %11783 = vpow2.f32 %v9464_v18  ;;  %v9467_v39 = vmul.f32 -1.442695, %v2509_v2 }
 0x49b   : >> { %v11768_v3 = vpop.eup %11767  ;;  %11785 = vpow2.f32 %v9465_v57  ;;  %v11893_v57 = vld [vmem:[#allocation3 + $0x30] sm:$0xff] }
 0x49c   : >> { %v11770_v58 = vpop.eup %11769  ;;  %v2574_v16 = vadd.f32 1.0, %v11768_v3  ;;  %11787 = vpow2.f32 %v9466_v1 }
 0x49d   : >> { %v11772_v46 = vpop.eup %11771  ;;  %v2575_v56 = vadd.f32 1.0, %v11770_v58  ;;  %11789 = vpow2.f32 %v9467_v39  ;;  %v11894_v39 = vld [vmem:[#allocation3 + $0x38] sm:$0xff] }
 0x49e   : >> { %v11774_v30 = vpop.eup %11773  ;;  %11791 = vrcp.f32 %v2574_v16  ;;  %v2576_v27 = vadd.f32 1.0, %v11772_v46  ;;  %v2513_v37 = vpop.f32.mrb[28].mxu1 }
 0x49f   : >> { %11793 = vrcp.f32 %v2575_v56  ;;  %v2577_v32 = vadd.f32 1.0, %v11774_v30  ;;  %v9468_v6 = vmul.f32 -1.442695, %v2513_v37  ;;  %v2515_v51 = vpop.f32.mrb[29].mxu1 }
 0x4a0   : >> { %v11776_v7 = vpop.eup %11775  ;;  %11795 = vrcp.f32 %v2576_v27  ;;  %v9469_v52 = vmul.f32 -1.442695, %v2515_v51  ;;  %v2517_v9 = vpop.f32.mrb[30].mxu1 }
 0x4a1   : >> { %v11778_v10 = vpop.eup %11777  ;;  %11797 = vrcp.f32 %v2577_v32  ;;  %v9470_v11 = vmul.f32 -1.442695, %v2517_v9  ;;  %v2519_v12 = vpop.f32.mrb[31].mxu1  ;;  %v2618_v60 = vmul.f32 %v11887_v42, %v11776_v7 }
 0x4a2   : >> { %v11780_v47 = vpop.eup %11779  ;;  %11799 = vpow2.f32 %v9468_v6  ;;  %v9471_v23 = vmul.f32 -1.442695, %v2519_v12  ;;  %v2619_v20 = vmul.f32 %v11888_v53, %v11778_v10 }
 0x4a3   : >> { %v11782_v29 = vpop.eup %11781  ;;  %11801 = vpow2.f32 %v9469_v52  ;;  %v2620_v33 = vmul.f32 %v11889_v28, %v11780_v47  ;;  %v2636_v63 = vsub.f32 %v2618_v60, %v13419_v4  ;;  %v11895_v47 = vld [vmem:[#allocation3 + $0x40] sm:$0xff] }
 0x4a4   : >> { %v11784_v19 = vpop.eup %11783  ;;  %11803 = vpow2.f32 %v9470_v11  ;;  %v2621_v22 = vmul.f32 %v11890_v43, %v11782_v29  ;;  %v2637_v49 = vsub.f32 %v2619_v20, %v13419_v4  ;;  %v11896_v20 = vld [vmem:[#allocation3 + $0x48] sm:$0xff] }
 0x4a5   : >> { %v11786_v62 = vpop.eup %11785  ;;  %v2578_v59 = vadd.f32 1.0, %v11784_v19  ;;  %11805 = vpow2.f32 %v9471_v23  ;;  %v2638_v50 = vsub.f32 %v2620_v33, %v13419_v4  ;;  %v13431_v41 = vmax.f32 %v2636_v63, 0.0  ;;  %v11897_v33 = vld [vmem:[#allocation3 + $0x50] sm:$0xff] }
 0x4a6   : >> { %v11788_v21 = vpop.eup %11787  ;;  %v2579_v25 = vadd.f32 1.0, %v11786_v62  ;;  %v2639_v26 = vsub.f32 %v2621_v22, %v13419_v4  ;;  %v13427_v34 = vmax.f32 %v2637_v49, 0.0  ;;  %v11898_v22 = vld [vmem:[#allocation3 + $0x58] sm:$0xff] }
 0x4a7   : >> { %v11790_v24 = vpop.eup %11789  ;;  %11807 = vrcp.f32 %v2578_v59  ;;  %v2580_v38 = vadd.f32 1.0, %v11788_v21  ;;  %v13425_v55 = vmax.f32 %v2638_v50, 0.0 }
 0x4a8   : >> { %v11792_v14 = vpop.eup %11791  ;;  %11809 = vrcp.f32 %v2579_v25  ;;  %v2581_v17 = vadd.f32 1.0, %v11790_v24  ;;  %v13429_v35 = vmax.f32 %v2639_v26, 0.0 }
 0x4a9   : >> { %v11794_v40 = vpop.eup %11793  ;;  %11811 = vrcp.f32 %v2580_v38  ;;  %v2622_v54 = vmul.f32 %v11891_v48, %v11792_v14  ;;  %v2668_v44 = vpack.c.bf16 %v13425_v55, %v13431_v41 }
 0x4aa   : >> { %v11796_v13 = vpop.eup %11795  ;;  %11813 = vrcp.f32 %v2581_v17  ;;  %v2669_v8 = vpack.c.bf16 %v13429_v35, %v13427_v34  ;;  %v2623_v15 = vmul.f32 %v11892_v5, %v11794_v40  ;;  %v11899_v17 = vld [vmem:[#allocation3 + $0x60] sm:$0xff] }
 0x4ab   : >> { %v11798_v18 = vpop.eup %11797  ;;  %v2624_v61 = vmul.f32 %v11893_v57, %v11796_v13  ;;  %v2640_v1 = vsub.f32 %v2622_v54, %v13419_v4  ;;  %v11900_v13 = vld [vmem:[#allocation3 + $0x68] sm:$0xff]  ;;  %v11902_v57 = vld [vmem:[#allocation3 + $0x78] sm:$0xff] }
 0x4ac   : >> { %v11800_v2 = vpop.eup %11799  ;;  %2836 = vmatprep.mubr.bf16.mxu0 %v2669_v8  ;;  %v2625_v3 = vmul.f32 %v11894_v39, %v11798_v18  ;;  %v2641_v58 = vsub.f32 %v2623_v15, %v13419_v4  ;;  %v11901_v15 = vld [vmem:[#allocation3 + $0x70] sm:$0xff] }
 0x4ad   : >> { %v11802_v16 = vpop.eup %11801  ;;  %v2582_v46 = vadd.f32 1.0, %v11800_v2  ;;  %2837 = vmatmul.mubr.bf16.vlgmr.msra.gmra.mrb[0].mxu0 %v2668_v44  ;;  %v2642_v56 = vsub.f32 %v2624_v61, %v13419_v4  ;;  %v13440_v30 = vmax.f32 %v2640_v1, 0.0 }
 0x4ae   : >> { %v11804_v27 = vpop.eup %11803  ;;  %v2583_v37 = vadd.f32 1.0, %v11802_v16  ;;  %v2643_v32 = vsub.f32 %v2625_v3, %v13419_v4  ;;  %v13443_v6 = vmax.f32 %v2641_v58, 0.0 }
 0x4af   : >> { %v11806_v51 = vpop.eup %11805  ;;  %11815 = vrcp.f32 %v2582_v46  ;;  %v2584_v7 = vadd.f32 1.0, %v11804_v27  ;;  %v13445_v52 = vmax.f32 %v2642_v56, 0.0 }
 0x4b0   : >> { %11817 = vrcp.f32 %v2583_v37  ;;  %v2585_v9 = vadd.f32 1.0, %v11806_v51  ;;  %v13447_v10 = vmax.f32 %v2643_v32, 0.0  ;;  %v11323_v37 = vld [vmem:[#allocation17 + $0x64] ss:$8 sps:$4 sm:$0xff]   ;;  %v11321_v32 = vld [vmem:[#allocation17 + $0x60] ss:$8 sps:$4 sm:$0xff]  }
 0x4b1   : >> { %v11808_v11 = vpop.eup %11807  ;;  %11819 = vrcp.f32 %v2584_v7  ;;  %v2670_v12 = vpack.c.bf16 %v13445_v52, %v13440_v30  ;;  %2989 = vmatprep.subr.bf16.mxu1 %v11323_v37  ;;  %v11326_v51 = vld [vmem:[#allocation17 + $0x74] ss:$8 sps:$4 sm:$0xff]   ;;  %v11327_v7 = vld [vmem:[#allocation10 + $0x100] ss:$8 sps:$4 sm:$0xff]  }
 0x4b2   : >> { %v11810_v42 = vpop.eup %11809  ;;  %11821 = vrcp.f32 %v2585_v9  ;;  %v2671_v60 = vpack.c.bf16 %v13447_v10, %v13443_v6  ;;  %v2626_v23 = vmul.f32 %v11895_v47, %v11808_v11  ;;  %2990 = vmatpush1.bf16.msra.mxu1 %v11321_v32  ;;  %v11329_v9 = vld [vmem:[#allocation10 + $0x104] ss:$8 sps:$4 sm:$0xff]   ;;  %v11332_v11 = vld [vmem:[#allocation10 + $0x114] ss:$8 sps:$4 sm:$0xff]   ;;  %v11333_v47 = vld [vmem:[#allocation10 + $0x120] ss:$8 sps:$4 sm:$0xff]  }
 0x4b3   : >> { %v11812_v53 = vpop.eup %11811  ;;  %v2627_v29 = vmul.f32 %v11896_v20, %v11810_v42  ;;  %2991 = vmatprep.subr.bf16.mxu1 %v11326_v51  ;;  %5022 = vmatprep.subr.bf16.mxu0 %v11329_v9  ;;  %v11330_v42 = vld [vmem:[#allocation10 + $0x110] ss:$8 sps:$4 sm:$0xff]   ;;  %v11347_v20 = vld [vmem:[#allocation10 + $0x144] ss:$8 sps:$4 sm:$0xff]   ;;  %v11356_v37 = vld [vmem:[#allocation10 + $0x334] ss:$8 sps:$4 sm:$0xff]  }
 0x4b4   : >> { %v11814_v28 = vpop.eup %11813  ;;  %2844 = vmatprep.mubr.bf16.mxu0 %v2671_v60  ;;  %v2628_v19 = vmul.f32 %v11897_v33, %v11812_v53  ;;  %v2644_v43 = vsub.f32 %v2626_v23, %v13419_v4  ;;  %5023 = vmatpush1.bf16.msra.mxu0 %v11327_v7  ;;  %v11335_v60 = vld [vmem:[#allocation10 + $0x124] ss:$8 sps:$4 sm:$0xff]   ;;  %v11341_v23 = vld [vmem:[#allocation10 + $0x134] ss:$8 sps:$4 sm:$0xff]   ;;  %v11339_v53 = vld [vmem:[#allocation10 + $0x130] ss:$8 sps:$4 sm:$0xff]  }
 0x4b5   : >> { %2845 = vmatmul.mubr.bf16.gmra.mrb[4].mxu0 %v2670_v12  ;;  %v2629_v49 = vmul.f32 %v11898_v22, %v11814_v28  ;;  %v2645_v62 = vsub.f32 %v2627_v29, %v13419_v4  ;;  %v11338_v12 = vld [vmem:[#allocation10 + $0x304] ss:$8 sps:$4 sm:$0xff]   ;;  %5024 = vmatprep.subr.bf16.mxu0 %v11332_v11  ;;  %v11345_v29 = vld [vmem:[#allocation10 + $0x140] ss:$8 sps:$4 sm:$0xff]   ;;  %v11353_v28 = vld [vmem:[#allocation10 + $0x154] ss:$8 sps:$4 sm:$0xff]  }
 0x4b6   : >> { %v2646_v59 = vsub.f32 %v2628_v19, %v13419_v4  ;;  %v13456_v63 = vmax.f32 %v2644_v43, 0.0  ;;  %v11351_v33 = vld [vmem:[#allocation10 + $0x150] ss:$8 sps:$4 sm:$0xff]   ;;  %v11359_v19 = vld [vmem:[#allocation10 + $0x164] ss:$8 sps:$4 sm:$0xff]  }
 0x4b7   : >> { %v2647_v50 = vsub.f32 %v2629_v49, %v13419_v4  ;;  %v13459_v21 = vmax.f32 %v2645_v62, 0.0  ;;  %v11357_v43 = vld [vmem:[#allocation10 + $0x160] ss:$8 sps:$4 sm:$0xff]   ;;  %v11365_v22 = vld [vmem:[#allocation10 + $0x174] ss:$8 sps:$4 sm:$0xff]  }
 0x4b8   : >> { %v13461_v25 = vmax.f32 %v2646_v59, 0.0  ;;  %5025 = vmatpush1.bf16.msra.mxu0 %v11330_v42  ;;  %v11363_v49 = vld [vmem:[#allocation10 + $0x170] ss:$8 sps:$4 sm:$0xff]  }
 0x4b9   : >> { %v11816_v26 = vpop.eup %11815  ;;  %v13463_v24 = vmax.f32 %v2647_v50, 0.0  ;;  %5026 = vmatprep.subr.bf16.mxu0 %v11335_v60  ;;  %v11354_v9 = vld [vmem:[#allocation10 + $0x330] ss:$8 sps:$4 sm:$0xff]  }
 0x4ba   : >> { %v11818_v38 = vpop.eup %11817  ;;  %v2672_v14 = vpack.c.bf16 %v13461_v25, %v13456_v63  ;;  %v2630_v40 = vmul.f32 %v11899_v17, %v11816_v26 }
 0x4bb   : >> { %v11820_v48 = vpop.eup %11819  ;;  %v2673_v54 = vpack.c.bf16 %v13463_v24, %v13459_v21  ;;  %v2631_v8 = vmul.f32 %v11900_v13, %v11818_v38 }
 0x4bc   : >> { %v11822_v5 = vpop.eup %11821  ;;  %v2632_v18 = vmul.f32 %v11901_v15, %v11820_v48  ;;  %v2648_v44 = vsub.f32 %v2630_v40, %v13419_v4  ;;  %5027 = vmatpush1.bf16.msra.mxu0 %v11333_v47  ;;  %v11336_v48 = vld [vmem:[#allocation10 + $0x300] ss:$8 sps:$4 sm:$0xff]  }
 0x4bd   : >> { %2852 = vmatprep.mubr.bf16.mxu0 %v2673_v54  ;;  %v2633_v61 = vmul.f32 %v11902_v57, %v11822_v5  ;;  %v2649_v1 = vsub.f32 %v2631_v8, %v13419_v4  ;;  %5028 = vmatprep.subr.bf16.mxu0 %v11341_v23  ;;  %v11344_v8 = vld [vmem:[#allocation10 + $0x314] ss:$8 sps:$4 sm:$0xff]   ;;  %v11342_v57 = vld [vmem:[#allocation10 + $0x310] ss:$8 sps:$4 sm:$0xff]   ;;  %v11360_v23 = vld [vmem:[#allocation10 + $0x340] ss:$8 sps:$4 sm:$0xff]  }
 0x4be   : >> { %2853 = vmatmul.mubr.bf16.gmra.mrb[8].mxu0 %v2672_v14  ;;  %v2650_v2 = vsub.f32 %v2632_v18, %v13419_v4  ;;  %v13472_v39 = vmax.f32 %v2648_v44, 0.0 }
 0x4bf   : >> { %v2651_v3 = vsub.f32 %v2633_v61, %v13419_v4  ;;  %v13475_v58 = vmax.f32 %v2649_v1, 0.0  ;;  %v11324_v4 = vld [vmem:[#allocation17 + $0x70] ss:$8 sps:$4 sm:$0xff]  }
 0x4c0   : >> { %v13477_v16 = vmax.f32 %v2650_v2, 0.0  ;;  %2992 = vmatpush1.bf16.msra.mxu1 %v11324_v4  ;;  %5029 = vmatpush1.bf16.msra.mxu0 %v11339_v53  ;;  %v11350_v2 = vld [vmem:[#allocation10 + $0x324] ss:$8 sps:$4 sm:$0xff]  }
 0x4c1   : >> { %v13479_v46 = vmax.f32 %v2651_v3, 0.0  ;;  %4202 = vmatprep.subr.bf16.mxu1 %v11338_v12  ;;  %5030 = vmatprep.subr.bf16.mxu0 %v11347_v20  ;;  %v11362_v12 = vld [vmem:[#allocation10 + $0x344] ss:$8 sps:$4 sm:$0xff]  }
 0x4c2   : >> { %v2674_v56 = vpack.c.bf16 %v13477_v16, %v13472_v39 }
 0x4c3   : >> { %v2675_v27 = vpack.c.bf16 %v13479_v46, %v13475_v58 }
 0x4c4   : >> { %5031 = vmatpush1.bf16.msra.mxu0 %v11345_v29  ;;  %v11368_v29 = vld [vmem:[#allocation10 + $0x354] ss:$8 sps:$4 sm:$0xff]  }
 0x4c5   : >> { %2860 = vmatprep.mubr.bf16.mxu0 %v2675_v27  ;;  %5032 = vmatprep.subr.bf16.mxu0 %v11353_v28 }
 0x4c6   : >> { %2861 = vmatmul.mubr.bf16.gmra.mrb[12].mxu0 %v2674_v56  ;;  %v11348_v56 = vld [vmem:[#allocation10 + $0x320] ss:$8 sps:$4 sm:$0xff]  }
 0x4c8   : >> { %5033 = vmatpush1.bf16.msra.mxu0 %v11351_v33 }
 0x4c9   : >> { %5034 = vmatprep.subr.bf16.mxu0 %v11359_v19 }
 0x4cc   : >> { %5035 = vmatpush1.bf16.msra.mxu0 %v11357_v43 }
 0x4cd   : >> { %5036 = vmatprep.subr.bf16.mxu0 %v11365_v22  ;;  %v11366_v22 = vld [vmem:[#allocation10 + $0x350] ss:$8 sps:$4 sm:$0xff]  }
 0x4d0   : >> { %5037 = vmatpush1.bf16.msra.mxu0 %v11363_v49 }
 0x580   : >> { %v10254_v62 = vpop.f32.mrb[0].mxu0 }
 0x581   : >> { %v10255_v59 = vpop.f32.mrb[1].mxu0 }
 0x582   : >> { %v10256_v50 = vadd.f32 %v10255_v59, %v10254_v62  ;;  %v10257_v26 = vpop.f32.mrb[2].mxu0 }
 0x583   : >> { %v10258_v38 = vpop.f32.mrb[3].mxu0 }
 0x584   : >> { %v10259_v14 = vadd.f32 %v10258_v38, %v10257_v26  ;;  %v2869_v17 = vmax.f32 %v10256_v50, 0.0  ;;  %v11371_v26 = vld [vmem:[#allocation10 + $0x184] ss:$8 sps:$4 sm:$0xff]   ;;  %v11369_v38 = vld [vmem:[#allocation10 + $0x180] ss:$8 sps:$4 sm:$0xff]  }
 0x585   : >> { %5038 = vmatprep.subr.bf16.mxu0 %v11371_v26 }
 0x586   : >> { %v2870_v40 = vmax.f32 %v10259_v14, 0.0  ;;  %v11374_v14 = vld [vmem:[#allocation10 + $0x364] ss:$8 sps:$4 sm:$0xff]   ;;  %5039 = vmatpush1.bf16.msra.mxu0 %v11369_v38 }
 0x588   : >> { %v2877_v54 = vpack.c.bf16 %v2870_v40, %v2869_v17  ;;  %v10260_v13 = vpop.f32.mrb[4].mxu0  ;;  %v11372_v17 = vld [vmem:[#allocation10 + $0x360] ss:$8 sps:$4 sm:$0xff]   ;;  %v11377_v40 = vld [vmem:[#allocation10 + $0x194] ss:$8 sps:$4 sm:$0xff]  }
 0x589   : >> { %v10261_v5 = vpop.f32.mrb[5].mxu0  ;;  %5040 = vmatprep.subr.bf16.mxu0 %v11377_v40 }
 0x58a   : >> { %v10262_v15 = vadd.f32 %v10261_v5, %v10260_v13  ;;  %v10263_v18 = vpop.f32.mrb[6].mxu0  ;;  %3010 = vmatmul.mubr.bf16.vlgmr.msra.gmra.mrb[32].mxu1 %v2877_v54  ;;  %v11380_v54 = vld [vmem:[#allocation10 + $0x374] ss:$8 sps:$4 sm:$0xff]   ;;  %v11378_v13 = vld [vmem:[#allocation10 + $0x370] ss:$8 sps:$4 sm:$0xff]  }
 0x58b   : >> { %v10264_v44 = vpop.f32.mrb[7].mxu0  ;;  %3019 = vmatprep.mubr.bf16.mxu1 %v14919_v31  ;;  %4203 = vmatpush1.bf16.msra.mxu1 %v11336_v48  ;;  %v11375_v48 = vld [vmem:[#allocation10 + $0x190] ss:$8 sps:$4 sm:$0xff]   ;;  %v11381_v5 = vld [vmem:[#allocation10 + $0x1a0] ss:$8 sps:$4 sm:$0xff]  }
 0x58c   : >> { %v2871_v61 = vmax.f32 %v10262_v15, 0.0  ;;  %v10265_v1 = vadd.f32 %v10264_v44, %v10263_v18  ;;  %4204 = vmatprep.subr.bf16.mxu1 %v11344_v8  ;;  %5041 = vmatpush1.bf16.msra.mxu0 %v11375_v48  ;;  %v11383_v8 = vld [vmem:[#allocation10 + $0x1a4] ss:$8 sps:$4 sm:$0xff]   ;;  %v11384_v18 = vld [vmem:[#allocation10 + $0x380] ss:$8 sps:$4 sm:$0xff]  }
 0x58d   : >> { %v11386_v15 = vld [vmem:[#allocation10 + $0x384] ss:$8 sps:$4 sm:$0xff]   ;;  %5042 = vmatprep.subr.bf16.mxu0 %v11383_v8  ;;  %v11389_v44 = vld [vmem:[#allocation10 + $0x1b4] ss:$8 sps:$4 sm:$0xff]  }
 0x58e   : >> { %v2872_v3 = vmax.f32 %v10265_v1, 0.0  ;;  %v11390_v1 = vld [vmem:[#allocation10 + $0x390] ss:$8 sps:$4 sm:$0xff]  }
 0x58f   : >> { %4205 = vmatpush1.bf16.msra.mxu1 %v11342_v57  ;;  %v11387_v57 = vld [vmem:[#allocation10 + $0x1b0] ss:$8 sps:$4 sm:$0xff]  }
 0x590   : >> { %v2878_v27 = vpack.c.bf16 %v2872_v3, %v2871_v61  ;;  %4206 = vmatprep.subr.bf16.mxu1 %v11350_v2  ;;  %5043 = vmatpush1.bf16.msra.mxu0 %v11381_v5  ;;  %v11392_v61 = vld [vmem:[#allocation10 + $0x394] ss:$8 sps:$4 sm:$0xff]   ;;  %v11395_v2 = vld [vmem:[#allocation10 + $0x1c4] ss:$8 sps:$4 sm:$0xff]   ;;  %v11393_v3 = vld [vmem:[#allocation10 + $0x1c0] ss:$8 sps:$4 sm:$0xff]  }
 0x591   : >> { %v10266_v32 = vpop.f32.mrb[8].mxu0  ;;  %5044 = vmatprep.subr.bf16.mxu0 %v11389_v44 }
 0x592   : >> { %v10267_v51 = vpop.f32.mrb[9].mxu0  ;;  %3020 = vmatmul.mubr.bf16.gmra.mrb[36].mxu1 %v2878_v27  ;;  %v11396_v27 = vld [vmem:[#allocation10 + $0x3a0] ss:$8 sps:$4 sm:$0xff]  }
 0x593   : >> { %v10268_v4 = vadd.f32 %v10267_v51, %v10266_v32  ;;  %v10269_v7 = vpop.f32.mrb[10].mxu0  ;;  %3029 = vmatprep.mubr.bf16.mxu1 %v14919_v31  ;;  %4207 = vmatpush1.bf16.msra.mxu1 %v11348_v56  ;;  %v11398_v56 = vld [vmem:[#allocation10 + $0x3a4] ss:$8 sps:$4 sm:$0xff]   ;;  %v11399_v32 = vld [vmem:[#allocation10 + $0x1d0] ss:$8 sps:$4 sm:$0xff]  }
 0x594   : >> { %v10270_v11 = vpop.f32.mrb[11].mxu0  ;;  %4208 = vmatprep.subr.bf16.mxu1 %v11356_v37  ;;  %5045 = vmatpush1.bf16.msra.mxu0 %v11387_v57  ;;  %v11401_v37 = vld [vmem:[#allocation10 + $0x1d4] ss:$8 sps:$4 sm:$0xff]  }
 0x595   : >> { %v2873_v42 = vmax.f32 %v10268_v4, 0.0  ;;  %v10271_v60 = vadd.f32 %v10270_v11, %v10269_v7  ;;  %5046 = vmatprep.subr.bf16.mxu0 %v11395_v2  ;;  %v11404_v51 = vld [vmem:[#allocation10 + $0x3b4] ss:$8 sps:$4 sm:$0xff]   ;;  %v11402_v4 = vld [vmem:[#allocation10 + $0x3b0] ss:$8 sps:$4 sm:$0xff]  }
 0x596   : >> { %v11407_v7 = vld [vmem:[#allocation10 + $0x1e4] ss:$8 sps:$4 sm:$0xff]  }
 0x597   : >> { %v2874_v47 = vmax.f32 %v10271_v60, 0.0  ;;  %4209 = vmatpush1.bf16.msra.mxu1 %v11354_v9  ;;  %v11405_v9 = vld [vmem:[#allocation10 + $0x1e0] ss:$8 sps:$4 sm:$0xff]   ;;  %v11410_v11 = vld [vmem:[#allocation10 + $0x3c4] ss:$8 sps:$4 sm:$0xff]  }
 0x598   : >> { %4210 = vmatprep.subr.bf16.mxu1 %v11362_v12  ;;  %5047 = vmatpush1.bf16.msra.mxu0 %v11393_v3  ;;  %v11408_v12 = vld [vmem:[#allocation10 + $0x3c0] ss:$8 sps:$4 sm:$0xff]   ;;  %v11411_v60 = vld [vmem:[#allocation10 + $0x1f0] ss:$8 sps:$4 sm:$0xff]  }
 0x599   : >> { %v2879_v53 = vpack.c.bf16 %v2874_v47, %v2873_v42  ;;  %v10272_v20 = vpop.f32.mrb[12].mxu0  ;;  %5048 = vmatprep.subr.bf16.mxu0 %v11401_v37  ;;  %v11413_v42 = vld [vmem:[#allocation10 + $0x1f4] ss:$8 sps:$4 sm:$0xff]  }
 0x59a   : >> { %v10273_v28 = vpop.f32.mrb[13].mxu0  ;;  %v11416_v47 = vld [vmem:[#allocation10 + $0x3d4] ss:$8 sps:$4 sm:$0xff]  }
 0x59b   : >> { %v10274_v33 = vadd.f32 %v10273_v28, %v10272_v20  ;;  %v10275_v19 = vpop.f32.mrb[14].mxu0  ;;  %3030 = vmatmul.mubr.bf16.gmra.mrb[40].mxu1 %v2879_v53  ;;  %v11419_v53 = vld [vmem:[#allocation10 + $0x204] ss:$8 sps:$4 sm:$0xff]   ;;  %v11428_v28 = vld [vmem:[#allocation10 + $0x3f4] ss:$8 sps:$4 sm:$0xff]  }
 0x59c   : >> { %v10276_v43 = vpop.f32.mrb[15].mxu0  ;;  %3039 = vmatprep.mubr.bf16.mxu1 %v14919_v31  ;;  %4211 = vmatpush1.bf16.msra.mxu1 %v11360_v23  ;;  %v11414_v23 = vld [vmem:[#allocation10 + $0x3d0] ss:$8 sps:$4 sm:$0xff]   ;;  %v11422_v20 = vld [vmem:[#allocation10 + $0x3e4] ss:$8 sps:$4 sm:$0xff]  }
 0x59d   : >> { %v2875_v49 = vmax.f32 %v10274_v33, 0.0  ;;  %v10277_v62 = vadd.f32 %v10276_v43, %v10275_v19  ;;  %4212 = vmatprep.subr.bf16.mxu1 %v11368_v29  ;;  %5049 = vmatpush1.bf16.msra.mxu0 %v11399_v32  ;;  %v11420_v29 = vld [vmem:[#allocation10 + $0x3e0] ss:$8 sps:$4 sm:$0xff]   ;;  %v11426_v33 = vld [vmem:[#allocation10 + $0x3f0] ss:$8 sps:$4 sm:$0xff]  }
 0x59e   : >> { %5050 = vmatprep.subr.bf16.mxu0 %v11407_v7  ;;  %v11434_v19 = vld [vmem:[#allocation10 + $0x404] ss:$8 sps:$4 sm:$0xff]  }
 0x59f   : >> { %v2876_v59 = vmax.f32 %v10277_v62, 0.0 }
 0x5a0   : >> { %4213 = vmatpush1.bf16.msra.mxu1 %v11366_v22 }
 0x5a1   : >> { %v2880_v50 = vpack.c.bf16 %v2876_v59, %v2875_v49  ;;  %4214 = vmatprep.subr.bf16.mxu1 %v11374_v14  ;;  %5051 = vmatpush1.bf16.msra.mxu0 %v11405_v9 }
 0x5a2   : >> { %5052 = vmatprep.subr.bf16.mxu0 %v11413_v42 }
 0x5a3   : >> { %3040 = vmatmul.mubr.bf16.gmra.mrb[44].mxu1 %v2880_v50 }
 0x5a4   : >> { %4215 = vmatpush1.bf16.msra.mxu1 %v11372_v17 }
 0x5a5   : >> { %4216 = vmatprep.subr.bf16.mxu1 %v11380_v54  ;;  %5053 = vmatpush1.bf16.msra.mxu0 %v11411_v60 }
 0x5a6   : >> { %5095 = vmatprep.subr.bf16.mxu0 %v11419_v53 }
 0x5a8   : >> { %4217 = vmatpush1.bf16.msra.mxu1 %v11378_v13 }
 0x5a9   : >> { %4218 = vmatprep.subr.bf16.mxu1 %v11386_v15 }
 0x5ac   : >> { %4219 = vmatpush1.bf16.msra.mxu1 %v11384_v18 }
 0x5ad   : >> { %4220 = vmatprep.subr.bf16.mxu1 %v11392_v61 }
 0x5b0   : >> { %4221 = vmatpush1.bf16.msra.mxu1 %v11390_v1 }
 0x5b1   : >> { %4222 = vmatprep.subr.bf16.mxu1 %v11398_v56 }
 0x5b4   : >> { %4223 = vmatpush1.bf16.msra.mxu1 %v11396_v27 }
 0x5b5   : >> { %4224 = vmatprep.subr.bf16.mxu1 %v11404_v51 }
 0x5b8   : >> { %4225 = vmatpush1.bf16.msra.mxu1 %v11402_v4 }
 0x5b9   : >> { %4226 = vmatprep.subr.bf16.mxu1 %v11410_v11 }
 0x5bc   : >> { %4227 = vmatpush1.bf16.msra.mxu1 %v11408_v12 }
 0x5bd   : >> { %4228 = vmatprep.subr.bf16.mxu1 %v11416_v47 }
 0x5c0   : >> { %4229 = vmatpush1.bf16.msra.mxu1 %v11414_v23 }
 0x5c1   : >> { %4230 = vmatprep.subr.bf16.mxu1 %v11422_v20 }
 0x5c4   : >> { %4231 = vmatpush1.bf16.msra.mxu1 %v11420_v29 }
 0x5c5   : >> { %4232 = vmatprep.subr.bf16.mxu1 %v11428_v28 }
 0x5c8   : >> { %4233 = vmatpush1.bf16.msra.mxu1 %v11426_v33 }
 0x5c9   : >> { %4275 = vmatprep.subr.bf16.mxu1 %v11434_v19 }
 0x65d   : >> { %v3011_v43 = vpop.f32.mrb[32].mxu1 }
 0x65e   : >> { %v9504_v22 = vmul.f32 -1.442695, %v3011_v43  ;;  %v3013_v49 = vpop.f32.mrb[33].mxu1 }
 0x65f   : >> { %v9505_v62 = vmul.f32 -1.442695, %v3013_v49  ;;  %v3015_v59 = vpop.f32.mrb[34].mxu1 }
 0x660   : >> { %11823 = vpow2.f32 %v9504_v22  ;;  %v9506_v50 = vmul.f32 -1.442695, %v3015_v59  ;;  %v3017_v26 = vpop.f32.mrb[35].mxu1 }
 0x661   : >> { %11825 = vpow2.f32 %v9505_v62  ;;  %v9507_v38 = vmul.f32 -1.442695, %v3017_v26 }
 0x662   : >> { %11827 = vpow2.f32 %v9506_v50 }
 0x663   : >> { %11829 = vpow2.f32 %v9507_v38 }
 0x665   : >> { %v3021_v14 = vpop.f32.mrb[36].mxu1 }
 0x666   : >> { %v9508_v17 = vmul.f32 -1.442695, %v3021_v14  ;;  %v3023_v40 = vpop.f32.mrb[37].mxu1 }
 0x667   : >> { %v9509_v48 = vmul.f32 -1.442695, %v3023_v40  ;;  %v3025_v54 = vpop.f32.mrb[38].mxu1 }
 0x668   : >> { %11831 = vpow2.f32 %v9508_v17  ;;  %v9510_v13 = vmul.f32 -1.442695, %v3025_v54  ;;  %v3027_v8 = vpop.f32.mrb[39].mxu1 }
 0x669   : >> { %11833 = vpow2.f32 %v9509_v48  ;;  %v9511_v5 = vmul.f32 -1.442695, %v3027_v8 }
 0x66a   : >> { %v11824_v15 = vpop.eup %11823  ;;  %11835 = vpow2.f32 %v9510_v13 }
 0x66b   : >> { %v11826_v18 = vpop.eup %11825  ;;  %v3098_v44 = vadd.f32 1.0, %v11824_v15  ;;  %11837 = vpow2.f32 %v9511_v5 }
 0x66c   : >> { %v11828_v57 = vpop.eup %11827  ;;  %v3099_v61 = vadd.f32 1.0, %v11826_v18 }
 0x66d   : >> { %v11830_v1 = vpop.eup %11829  ;;  %11839 = vrcp.f32 %v3098_v44  ;;  %v3100_v2 = vadd.f32 1.0, %v11828_v57  ;;  %v11417_v57 = vld [vmem:[#allocation10 + $0x200] ss:$8 sps:$4 sm:$0xff]  }
 0x66e   : >> { %11841 = vrcp.f32 %v3099_v61  ;;  %v3101_v3 = vadd.f32 1.0, %v11830_v1  ;;  %v3031_v56 = vpop.f32.mrb[40].mxu1 }
 0x66f   : >> { %11843 = vrcp.f32 %v3100_v2  ;;  %v9512_v27 = vmul.f32 -1.442695, %v3031_v56  ;;  %v3033_v37 = vpop.f32.mrb[41].mxu1 }
 0x670   : >> { %11845 = vrcp.f32 %v3101_v3  ;;  %v9513_v32 = vmul.f32 -1.442695, %v3033_v37  ;;  %v3035_v51 = vpop.f32.mrb[42].mxu1  ;;  %v11425_v3 = vld [vmem:[#allocation10 + $0x214] ss:$8 sps:$4 sm:$0xff]  }
 0x671   : >> { %11847 = vpow2.f32 %v9512_v27  ;;  %v9514_v4 = vmul.f32 -1.442695, %v3035_v51  ;;  %v3037_v7 = vpop.f32.mrb[43].mxu1 }
 0x672   : >> { %v11832_v9 = vpop.eup %11831  ;;  %11849 = vpow2.f32 %v9513_v32  ;;  %v9515_v11 = vmul.f32 -1.442695, %v3037_v7 }
 0x673   : >> { %v11834_v12 = vpop.eup %11833  ;;  %v3102_v42 = vadd.f32 1.0, %v11832_v9  ;;  %11851 = vpow2.f32 %v9514_v4 }
 0x674   : >> { %v11836_v60 = vpop.eup %11835  ;;  %v3103_v47 = vadd.f32 1.0, %v11834_v12  ;;  %11853 = vpow2.f32 %v9515_v11 }
 0x675   : >> { %v11838_v23 = vpop.eup %11837  ;;  %11855 = vrcp.f32 %v3102_v42  ;;  %v3104_v53 = vadd.f32 1.0, %v11836_v60  ;;  %v11423_v60 = vld [vmem:[#allocation10 + $0x210] ss:$8 sps:$4 sm:$0xff]  }
 0x676   : >> { %11857 = vrcp.f32 %v3103_v47  ;;  %v3105_v20 = vadd.f32 1.0, %v11838_v23  ;;  %v3041_v29 = vpop.f32.mrb[44].mxu1 }
 0x677   : >> { %v11840_v28 = vpop.eup %11839  ;;  %11859 = vrcp.f32 %v3104_v53  ;;  %v9516_v33 = vmul.f32 -1.442695, %v3041_v29  ;;  %v3043_v19 = vpop.f32.mrb[45].mxu1  ;;  %v11431_v29 = vld [vmem:[#allocation10 + $0x224] ss:$8 sps:$4 sm:$0xff]  }
 0x678   : >> { %v11842_v43 = vpop.eup %11841  ;;  %v13489_v22 = vmul.f32 %v11840_v28, %v13431_v41  ;;  %11861 = vrcp.f32 %v3105_v20  ;;  %v9517_v49 = vmul.f32 -1.442695, %v3043_v19  ;;  %v3045_v62 = vpop.f32.mrb[46].mxu1 }
 0x679   : >> { %v11844_v59 = vpop.eup %11843  ;;  %11863 = vpow2.f32 %v9516_v33  ;;  %v9518_v50 = vmul.f32 -1.442695, %v3045_v62  ;;  %v3047_v26 = vpop.f32.mrb[47].mxu1  ;;  %v13492_v38 = vmul.f32 %v11842_v43, %v13427_v34 }
 0x67a   : >> { %v11846_v14 = vpop.eup %11845  ;;  %11865 = vpow2.f32 %v9517_v49  ;;  %v9519_v17 = vmul.f32 -1.442695, %v3047_v26  ;;  %v13496_v40 = vpack.c.bf16 %v13489_v22, %v13489_v22  ;;  %v13499_v41 = vmul.f32 %v11844_v59, %v13425_v55 }
 0x67b   : >> { %v11848_v48 = vpop.eup %11847  ;;  %11867 = vpow2.f32 %v9518_v50  ;;  %v13503_v54 = vpack.c.bf16 %v13492_v38, %v13492_v38  ;;  %v13506_v13 = vmul.f32 %v11846_v14, %v13429_v35 }
 0x67c   : >> { %v11850_v34 = vpop.eup %11849  ;;  %v3106_v8 = vadd.f32 1.0, %v11848_v48  ;;  %11869 = vpow2.f32 %v9519_v17  ;;  %v9642_v5 = vcombine.low %v14919_v31, %v13496_v40  ;;  %v13512_v15 = vpack.c.bf16 %v13499_v41, %v13499_v41 }
 0x67d   : >> { %v11852_v55 = vpop.eup %11851  ;;  %v3107_v18 = vadd.f32 1.0, %v11850_v34  ;;  %v9643_v44 = vcombine.low %v14919_v31, %v13503_v54  ;;  %v13518_v35 = vpack.c.bf16 %v13506_v13, %v13506_v13  ;;  %v3186_v61 = vshrl.u32 %v13503_v54, 16 }
 0x67e   : >> { %v11854_v1 = vpop.eup %11853  ;;  %11871 = vrcp.f32 %v3106_v8  ;;  %v3108_v2 = vadd.f32 1.0, %v11852_v55  ;;  %v3189_v56 = vshll.u32 %v13503_v54, 16  ;;  %v14908_v27 = vshrl.u32 %v13512_v15, 16 }
 0x67f   : >> { %v11856_v37 = vpop.eup %11855  ;;  %11873 = vrcp.f32 %v3107_v18  ;;  %v3109_v32 = vadd.f32 1.0, %v11854_v1  ;;  %5054 = vmatprep.mubr.bf16.mxu0 %v9643_v44  ;;  %v3188_v51 = vrot.slane %v3186_v61, 7  ;;  %v14910_v4 = vshrl.u32 %v13518_v35, 16 }
 0x680   : >> { %v11858_v7 = vpop.eup %11857  ;;  %11875 = vrcp.f32 %v3108_v2  ;;  %5055 = vmatmul.mubr.bf16.vlgmr.msra.gmra.mrb[16].mxu0 %v9642_v5  ;;  %v14914_v9 = vshll.u32 %v13518_v35, 16  ;;  %v13528_v11 = vmul.f32 %v11856_v37, %v13440_v30  ;;  %v14911_v12 = vshll.u32 %v13512_v15, 16  ;;  %v11429_v5 = vld [vmem:[#allocation10 + $0x220] ss:$8 sps:$4 sm:$0xff]  }
 0x681   : >> { %v11860_v42 = vpop.eup %11859  ;;  %11877 = vrcp.f32 %v3109_v32  ;;  %5096 = vmatpush1.bf16.msra.mxu0 %v11417_v57  ;;  %v13532_v47 = vmul.f32 %v11858_v7, %v13443_v6  ;;  %v3191_v23 = vor.u32 %v3189_v56, %v3188_v51  ;;  %v3202_v53 = vrot.slane %v14910_v4, 7  ;;  %v11432_v7 = vld [vmem:[#allocation10 + $0x400] ss:$8 sps:$4 sm:$0xff]   ;;  %v11452_v4 = vld [vmem:[#allocation10 + $0x434] ss:$8 sps:$4 sm:$0xff]  }
 0x682   : >> { %v11862_v20 = vpop.eup %11861  ;;  %5097 = vmatprep.subr.bf16.mxu0 %v11425_v3  ;;  %v13540_v30 = vpack.c.bf16 %v13528_v11, %v13499_v41  ;;  %v14915_v28 = vshrl.u32 %v13496_v40, 16  ;;  %v14918_v33 = vshll.u32 %v13496_v40, 16  ;;  %v3195_v6 = vrot.slane %v14908_v27, 7  ;;  %v11437_v3 = vld [vmem:[#allocation10 + $0x234] ss:$8 sps:$4 sm:$0xff]  }
 0x683   : >> { %v11864_v19 = vpop.eup %11863  ;;  %v13548_v43 = vpack.c.bf16 %v13532_v47, %v13506_v13  ;;  %v3205_v49 = vor.u32 %v14914_v9, %v3202_v53  ;;  %v13554_v62 = vsel %vm13256_vm5, 0, %v3191_v23  ;;  %v13557_v59 = vmul.f32 %v11862_v20, %v13447_v10 }
 0x684   : >> { %15006 = vst [vmem:[#allocation32_spill] sm:$0xff] %v13540_v30  ;;  %15008 = vst [vmem:[#allocation34_spill] sm:$0xff] %v13554_v62  ;;  %v11866_v50 = vpop.eup %11865  ;;  %v3110_v26 = vadd.f32 1.0, %v11864_v19  ;;  %v3181_v14 = vrot.slane %v14915_v28, 7  ;;  %v3198_v17 = vor.u32 %v14911_v12, %v3195_v6  ;;  %v13565_v48 = vpack.c.bf16 %v13532_v47, %v13532_v47  ;;  %v11440_v6 = vld [vmem:[#allocation10 + $0x414] ss:$8 sps:$4 sm:$0xff]  }
 0x685   : >> { %15007 = vst [vmem:[#allocation33_spill] sm:$0xff] %v13548_v43  ;;  %v11868_v34 = vpop.eup %11867  ;;  %v3111_v8 = vadd.f32 1.0, %v11866_v50  ;;  %5098 = vmatpush1.bf16.msra.mxu0 %v11423_v60  ;;  %5064 = vmatprep.mubr.bf16.mxu0 %v13548_v43  ;;  %v13570_v10 = vsel %vm13256_vm5, 0, %v3205_v49  ;;  %v13574_v55 = vpack.c.bf16 %v13557_v59, %v13557_v59  ;;  %v13577_v18 = vmul.f32 %v11860_v42, %v13445_v52  ;;  %v11447_v28 = vld [vmem:[#allocation10 + $0x250] ss:$8 sps:$4 sm:$0xff]  }
 0x686   : >> { %v11870_v44 = vpop.eup %11869  ;;  %11879 = vrcp.f32 %v3110_v26  ;;  %v3112_v57 = vadd.f32 1.0, %v11868_v34  ;;  %5099 = vmatprep.subr.bf16.mxu0 %v11431_v29  ;;  %v9521_v1 = vcombine.low %v13554_v62, %v13570_v10  ;;  %v3184_v2 = vor.u32 %v14918_v33, %v3181_v14  ;;  %v11435_v29 = vld [vmem:[#allocation10 + $0x230] ss:$8 sps:$4 sm:$0xff]   ;;  %v11443_v14 = vld [vmem:[#allocation10 + $0x244] ss:$8 sps:$4 sm:$0xff]  }
 0x687   : >> { %11881 = vrcp.f32 %v3111_v8  ;;  %v3113_v37 = vadd.f32 1.0, %v11870_v44  ;;  %v13585_v32 = vsel %vm13256_vm5, 0, %v3198_v17  ;;  %v14909_v52 = vshrl.u32 %v13565_v48, 16 }
 0x688   : >> { %v11872_v51 = vpop.eup %11871  ;;  %11883 = vrcp.f32 %v3112_v57  ;;  %4234 = vmatprep.mubr.bf16.mxu1 %v9521_v1  ;;  %5065 = vmatmul.mubr.bf16.gmra.mrb[20].mxu0 %v13540_v30  ;;  %v13591_v42 = vsel %vm13256_vm5, 0, %v3184_v2  ;;  %v14913_v60 = vshll.u32 %v13565_v48, 16  ;;  %v14904_v23 = vshrl.u32 %v13574_v55, 16  ;;  %v11438_v1 = vld [vmem:[#allocation10 + $0x410] ss:$8 sps:$4 sm:$0xff]  }
 0x689   : >> { %15009 = vst [vmem:[#allocation35_spill] sm:$0xff] %v13591_v42  ;;  %v11874_v53 = vpop.eup %11873  ;;  %11885 = vrcp.f32 %v3113_v37  ;;  %5100 = vmatpush1.bf16.msra.mxu0 %v11429_v5  ;;  %v9520_v20 = vcombine.low %v13591_v42, %v13585_v32  ;;  %v3216_v19 = vrot.slane %v14909_v52, 7  ;;  %v14907_v49 = vshll.u32 %v13574_v55, 16 }
 0x68a   : >> { %v11876_v50 = vpop.eup %11875  ;;  %5101 = vmatprep.subr.bf16.mxu0 %v11437_v3  ;;  %v13601_v26 = vmul.f32 %v11874_v53, %v13459_v21  ;;  %v3230_v17 = vrot.slane %v14904_v23, 7  ;;  %v13606_v34 = vmul.f32 %v11872_v51, %v13456_v63  ;;  %v13610_v8 = vpack.c.bf16 %v13528_v11, %v13528_v11  ;;  %v11446_v51 = vld [vmem:[#allocation10 + $0x424] ss:$8 sps:$4 sm:$0xff]  }
 0x68b   : >> { %v11878_v5 = vpop.eup %11877  ;;  %4235 = vmatmul.mubr.bf16.vlgmr.msra.gmra.mrb[48].mxu1 %v9520_v20  ;;  %v3219_v44 = vor.u32 %v14913_v60, %v3216_v19  ;;  %v13616_v21 = vpack.c.bf16 %v13577_v18, %v13577_v18  ;;  %v13619_v57 = vmul.f32 %v11876_v50, %v13461_v25  ;;  %v13623_v63 = vrot.slane %v3189_v56, 1  ;;  %v11441_v19 = vld [vmem:[#allocation10 + $0x240] ss:$8 sps:$4 sm:$0xff]  }
 0x68c   : >> { %4276 = vmatpush1.bf16.msra.mxu1 %v11432_v7  ;;  %v13627_v2 = vpack.c.bf16 %v13601_v26, %v13557_v59  ;;  %v3233_v3 = vor.u32 %v14907_v49, %v3230_v17  ;;  %v13633_v37 = vpack.c.bf16 %v13606_v34, %v13577_v18  ;;  %v14905_v25 = vshrl.u32 %v13610_v8, 16 }
 0x68d   : >> { %4277 = vmatprep.subr.bf16.mxu1 %v11440_v6  ;;  %5102 = vmatpush1.bf16.msra.mxu0 %v11435_v29  ;;  %v13638_v56 = vsel %vm13256_vm5, 0, %v3219_v44  ;;  %v14912_v7 = vshll.u32 %v13610_v8, 16  ;;  %v14906_v53 = vshrl.u32 %v13616_v21, 16  ;;  %v14916_v20 = vshll.u32 %v13616_v21, 16 }
 0x68e   : >> { %15010 = vst [vmem:[#allocation36_spill] sm:$0xff] %v13627_v2  ;;  %15011 = vst [vmem:[#allocation37_spill] sm:$0xff] %v13633_v37  ;;  %5074 = vmatprep.mubr.bf16.mxu0 %v13627_v2  ;;  %5103 = vmatprep.subr.bf16.mxu0 %v11443_v14  ;;  %v13646_v50 = vsel %vm13256_vm5, 0, %v3233_v3  ;;  %v3209_v29 = vrot.slane %v14905_v25, 7  ;;  %v13651_v6 = vmul.f32 %v11878_v5, %v13463_v24  ;;  %v11444_v5 = vld [vmem:[#allocation10 + $0x420] ss:$8 sps:$4 sm:$0xff]  }
 0x68f   : >> { %v13655_v17 = vpack.c.bf16 %v13601_v26, %v13601_v26  ;;  %v9527_v44 = vcombine.low %v13638_v56, %v13646_v50  ;;  %v3223_v14 = vrot.slane %v14906_v53, 7  ;;  %v13663_v3 = vpack.c.bf16 %v13606_v34, %v13606_v34 }
 0x690   : >> { %v13667_v23 = vpack.c.bf16 %v13619_v57, %v13619_v57  ;;  %v11880_v24 = vpop.eup %11879  ;;  %4278 = vmatpush1.bf16.msra.mxu1 %v11438_v1  ;;  %5075 = vmatmul.mubr.bf16.gmra.mrb[24].mxu0 %v13633_v37  ;;  %v3212_v25 = vor.u32 %v14912_v7, %v3209_v29  ;;  %v13674_v53 = vpack.c.bf16 %v13651_v6, %v13651_v6  ;;  %v11470_v37 = vld [vmem:[#allocation10 + $0x464] ss:$8 sps:$4 sm:$0xff]  }
 0x691   : >> { %v14917_v49 = vshrl.u32 %v13655_v17, 16  ;;  %v14921_v27 = vshll.u32 %v13655_v17, 16  ;;  %v11882_v52 = vpop.eup %11881  ;;  %4244 = vmatprep.mubr.bf16.mxu1 %v9527_v44  ;;  %4279 = vmatprep.subr.bf16.mxu1 %v11446_v51  ;;  %v3226_v1 = vor.u32 %v14916_v20, %v3223_v14  ;;  %v13681_v12 = vmul.f32 %v11880_v24, %v13472_v39 }
 0x692   : >> { %v14923_v29 = vshrl.u32 %v13663_v3, 16  ;;  %v11884_v60 = vpop.eup %11883  ;;  %5104 = vmatpush1.bf16.msra.mxu0 %v11441_v19  ;;  %v3310_v9 = vsel %vm13256_vm5, 0, %v3212_v25  ;;  %v13688_v44 = vmul.f32 %v11882_v52, %v13475_v58  ;;  %v14922_v14 = vshrl.u32 %v13674_v53, 16  ;;  %v11455_v19 = vld [vmem:[#allocation10 + $0x264] ss:$8 sps:$4 sm:$0xff]  }
 0x693   : >> { %v3244_v51 = vrot.slane %v14917_v49, 7  ;;  %v11886_v39 = vpop.eup %11885  ;;  %v13695_v24 = vsel %vm13256_vm5, 0, %v3226_v1  ;;  %v13698_v20 = vcombine.low %v13585_v32, %v3310_v9  ;;  %5105 = vmatprep.subr.bf16.mxu0 %v11449_v0  ;;  %v13703_v58 = vpack.c.bf16 %v13681_v12, %v13619_v57  ;;  %v11450_v49 = vld [vmem:[#allocation10 + $0x430] ss:$8 sps:$4 sm:$0xff]   ;;  %v11458_v1 = vld [vmem:[#allocation10 + $0x444] ss:$8 sps:$4 sm:$0xff]  }
 0x694   : >> { %v9526_v52 = vcombine.low %v3310_v9, %v13695_v24  ;;  %4280 = vmatpush1.bf16.msra.mxu1 %v11444_v5  ;;  %v13708_v33 = vpack.c.bf16 %v13688_v44, %v13651_v6  ;;  %v3258_v0 = vrot.slane %v14922_v14, 7  ;;  %v3237_v31 = vrot.slane %v14923_v29, 7  ;;  %v11453_v25 = vld [vmem:[#allocation10 + $0x260] ss:$8 sps:$4 sm:$0xff]  }
 0x695   : >> { %15012 = vst [vmem:[#allocation38_spill] sm:$0xff] %v13698_v20  ;;  %15013 = vst [vmem:[#allocation39_spill] sm:$0xff] %v13703_v58  ;;  %v3247_v32 = vor.u32 %v14921_v27, %v3244_v51  ;;  %4281 = vmatprep.subr.bf16.mxu1 %v11452_v4  ;;  %v14924_v7 = vshrl.u32 %v13667_v23, 16  ;;  %v14927_v9 = vshll.u32 %v13667_v23, 16  ;;  %v3325_v5 = vor.u32 %v13623_v63, %v3186_v61 }
 0x696   : >> { %15014 = vst [vmem:[#allocation40_spill] sm:$0xff] %v13708_v33  ;;  %4245 = vmatmul.mubr.bf16.gmra.mrb[52].mxu1 %v9526_v52  ;;  %5106 = vmatpush1.bf16.msra.mxu0 %v11447_v28  ;;  %v15015_v51 = vshll.u32 %v13674_v53, 16  ;;  %v13728_v14 = vmul.f32 %v11886_v39, %v13479_v46  ;;  %v13732_v29 = vpack.c.bf16 %v13688_v44, %v13688_v44  ;;  %v15016_v54 = vshll.u32 %v13663_v3, 16  ;;  %v11461_v52 = vld [vmem:[#allocation10 + $0x274] ss:$8 sps:$4 sm:$0xff]  }
 0x697   : >> { %v13725_v4 = vsel %vm13256_vm5, 0, %v3247_v32  ;;  %5084 = vmatprep.mubr.bf16.mxu0 %v13708_v33  ;;  %5107 = vmatprep.subr.bf16.mxu0 %v11455_v19  ;;  %v3251_v28 = vrot.slane %v14924_v7, 7  ;;  %v13741_v63 = vsel %vm13115_vm2, %v3325_v5, 0  ;;  %v13744_v46 = vmul.f32 %v11884_v60, %v13477_v16  ;;  %v11456_v19 = vld [vmem:[#allocation10 + $0x440] ss:$8 sps:$4 sm:$0xff]  }
 0x698   : >> { %v3261_v27 = vor.u32 %v15015_v51, %v3258_v0  ;;  %v3240_v61 = vor.u32 %v15016_v54, %v3237_v31  ;;  %4282 = vmatpush1.bf16.msra.mxu1 %v11450_v49  ;;  %5085 = vmatmul.mubr.bf16.gmra.mrb[28].mxu0 %v13703_v58  ;;  %v15017_v31 = vmov 0   ;;  %v13755_v0 = vpack.c.bf16 %v13728_v14, %v13728_v14  ;;  %v11464_v49 = vld [vmem:[#allocation10 + $0x454] ss:$8 sps:$4 sm:$0xff]   ;;  %v11459_v54 = vld [vmem:[#allocation10 + $0x270] ss:$8 sps:$4 sm:$0xff]  }
 0x699   : >> { %v9645_v32 = vcombine.low %v15017_v31, %v13741_v63  ;;  %v14926_v5 = vshrl.u32 %v13732_v29, 16  ;;  %4283 = vmatprep.subr.bf16.mxu1 %v11458_v1  ;;  %v14934_v51 = vshll.u32 %v13732_v29, 16  ;;  %v15028_v20 = vshrl.u32 %v13565_v48, 16 }
 0x69a   : >> { %v13748_v39 = vsel %vm13256_vm5, 0, %v3261_v27  ;;  %v3254_v27 = vor.u32 %v14927_v9, %v3251_v28  ;;  %v13764_v60 = vsel %vm13256_vm5, 0, %v3240_v61  ;;  %5108 = vmatpush1.bf16.msra.mxu0 %v11453_v25  ;;  %v13773_v28 = vpack.c.bf16 %v13681_v12, %v13681_v12  ;;  %v11467_v25 = vld [vmem:[#allocation10 + $0x284] ss:$8 sps:$4 sm:$0xff]  }
 0x69b   : >> { %v9533_v16 = vcombine.low %v13725_v4, %v13748_v39  ;;  %5127 = vmatprep.mubr.bf16.mxu0 %v9645_v32  ;;  %v3272_v7 = vrot.slane %v14926_v5, 7  ;;  %5109 = vmatprep.subr.bf16.mxu0 %v11461_v52  ;;  %v13781_v32 = vpack.c.bf16 %v13744_v46, %v13744_v46  ;;  %v15018_v9 = vshll.u32 %v13496_v40, 16 }
 0x69c   : >> { %v13777_v61 = vsel %vm13256_vm5, 0, %v3254_v27  ;;  %4284 = vmatpush1.bf16.msra.mxu1 %v11456_v19  ;;  %v15019_v52 = vshrl.u32 %v13755_v0, 16  ;;  %v14936_v42 = vshrl.u32 %v13773_v28, 16  ;;  %v11465_v19 = vld [vmem:[#allocation10 + $0x280] ss:$8 sps:$4 sm:$0xff]   ;;  %v15021_v62 = vshll.u32 %v13755_v0, 16 }
 0x69d   : >> { %4254 = vmatprep.mubr.bf16.mxu1 %v9533_v16  ;;  %v3322_v1 = vrot.slane %v15018_v9, 1  ;;  %v9532_v58 = vcombine.low %v13764_v60, %v13777_v61  ;;  %v11462_v16 = vld [vmem:[#allocation10 + $0x450] ss:$8 sps:$4 sm:$0xff]   ;;  %v3275_v27 = vor.u32 %v14934_v51, %v3272_v7  ;;  %4285 = vmatprep.subr.bf16.mxu1 %v11464_v49  ;;  %v14937_v2 = vshrl.u32 %v13781_v32, 16 }
 0x69e   : >> { %v3286_v33 = vrot.slane %v15019_v52, 7  ;;  %v15020_v9 = vshrl.u32 %v13496_v40, 16  ;;  %5110 = vmatpush1.bf16.msra.mxu0 %v11459_v54  ;;  %v3265_v52 = vrot.slane %v14936_v42, 7  ;;  %v15022_v49 = vshll.u32 %v13518_v35, 16 }
 0x69f   : >> { %4255 = vmatmul.mubr.bf16.gmra.mrb[56].mxu1 %v9532_v58  ;;  %5111 = vmatprep.subr.bf16.mxu0 %v11467_v25  ;;  %v13807_v5 = vsel %vm13256_vm5, 0, %v3275_v27  ;;  %v3279_v40 = vrot.slane %v14937_v2, 7  ;;  %v11473_v58 = vld [vmem:[#allocation10 + $0x294] ss:$8 sps:$4 sm:$0xff]   ;;  %v15023_v54 = vshll.u32 %v13565_v48, 16  ;;  %v15026_v2 = vshrl.u32 %v13518_v35, 16 }
 0x6a0   : >> { %v3323_v30 = vor.u32 %v3322_v1, %v15020_v9  ;;  %v3289_v7 = vor.u32 %v15021_v62, %v3286_v33  ;;  %v3328_v43 = vrot.slane %v15022_v49, 1  ;;  %v15024_v62 = vshll.u32 %v13512_v15, 16  ;;  %4286 = vmatpush1.bf16.msra.mxu1 %v11462_v16  ;;  %v11468_v25 = vld [vmem:[#allocation10 + $0x460] ss:$8 sps:$4 sm:$0xff]   ;;  %v11471_v35 = vld [vmem:[#allocation10 + $0x290] ss:$8 sps:$4 sm:$0xff]  }
 0x6a1   : >> { %v3332_v33 = vrot.slane %v15023_v54, 1  ;;  %v15025_v49 = vshll.u32 %v13773_v28, 16  ;;  %4287 = vmatprep.subr.bf16.mxu1 %v11470_v37  ;;  %v15027_v16 = vshll.u32 %v13781_v32, 16  ;;  %v15036_v48 = vshll.u32 %v13616_v21, 16 }
 0x6a2   : >> { %v3326_v1 = vrot.slane %v15024_v62, 1  ;;  %v13817_v9 = vsel %vm13256_vm5, 0, %v3289_v7  ;;  %v13823_v42 = vsel %vm13115_vm2, %v3323_v30, 0  ;;  %v3329_v51 = vor.u32 %v3328_v43, %v15026_v2  ;;  %v11476_v7 = vld [vmem:[#allocation10 + $0x474] ss:$8 sps:$4 sm:$0xff]   ;;  %5112 = vmatpush1.bf16.msra.mxu0 %v11465_v19 }
 0x6a3   : >> { %v3268_v27 = vor.u32 %v15025_v49, %v3265_v52  ;;  %v9539_v54 = vcombine.low %v13807_v5, %v13817_v9  ;;  %v3282_v62 = vor.u32 %v15027_v16, %v3279_v40  ;;  %v3333_v31 = vor.u32 %v3332_v33, %v15028_v20  ;;  %5113 = vmatprep.subr.bf16.mxu0 %v11473_v58  ;;  %v11479_v20 = vld [vmem:[#allocation10 + $0x2a4] ss:$8 sps:$4 sm:$0xff]  }
 0x6a4   : >> { %v15029_v52 = vshrl.u32 %v13512_v15, 16  ;;  %v13841_v43 = vsel %vm13115_vm2, %v3329_v51, 0  ;;  %v15030_v2 = vshll.u32 %v13610_v8, 16  ;;  %v15032_v40 = vshll.u32 %v13574_v55, 16  ;;  %4288 = vmatpush1.bf16.msra.mxu1 %v11468_v25 }
 0x6a5   : >> { %v13837_v30 = vsel %vm13256_vm5, 0, %v3268_v27  ;;  %4264 = vmatprep.mubr.bf16.mxu1 %v9539_v54  ;;  %v13849_v15 = vsel %vm13256_vm5, 0, %v3282_v62  ;;  %v13853_v19 = vsel %vm13115_vm2, %v3333_v31, 0  ;;  %v11474_v27 = vld [vmem:[#allocation10 + $0x470] ss:$8 sps:$4 sm:$0xff]   ;;  %v15033_v54 = vshrl.u32 %v13610_v8, 16  ;;  %4289 = vmatprep.subr.bf16.mxu1 %v11476_v7 }
 0x6a6   : >> { %v3327_v49 = vor.u32 %v3326_v1, %v15029_v52  ;;  %v3330_v37 = vrot.slane %v15030_v2, 1  ;;  %15031 = vst [vmem:[#allocation41_spill] sm:$0xff] %v13849_v15  ;;  %v3336_v33 = vrot.slane %v15032_v40, 1  ;;  %v9538_v1 = vcombine.low %v13837_v30, %v13849_v15  ;;  %v11482_v62 = vld [vmem:[#allocation10 + $0x484] ss:$8 sps:$4 sm:$0xff]   ;;  %5114 = vmatpush1.bf16.msra.mxu0 %v11471_v35 }
 0x6a7   : >> { %v13865_v58 = vcombine.low %v13841_v43, %v13853_v19  ;;  %v15034_v52 = vshrl.u32 %v13574_v55, 16  ;;  %v15035_v2 = vshll.u32 %v13655_v17, 16  ;;  %v3334_v36 = vrot.slane %v15036_v48, 1  ;;  %v11477_v8 = vld [vmem:[#allocation10 + $0x2a0] ss:$8 sps:$4 sm:$0xff]   ;;  %5115 = vmatprep.subr.bf16.mxu0 %v11479_v20 }
 0x6a8   : >> { %v13857_v51 = vsel %vm13115_vm2, %v3327_v49, 0  ;;  %v3331_v31 = vor.u32 %v3330_v37, %v15033_v54  ;;  %4265 = vmatmul.mubr.bf16.gmra.mrb[60].mxu1 %v9538_v1  ;;  %v15037_v7 = vshll.u32 %v13663_v3, 16  ;;  %v15038_v54 = vshll.u32 %v13674_v53, 16  ;;  %v11485_v35 = vld [vmem:[#allocation10 + $0x2b4] ss:$8 sps:$4 sm:$0xff]  }
 0x6a9   : >> { %v3337_v49 = vor.u32 %v3336_v33, %v15034_v52  ;;  %v3340_v40 = vrot.slane %v15035_v2, 1  ;;  %v15039_v2 = vpack.c.bf16 %v13506_v13, %v13492_v38  ;;  %v15040_v1 = vshrl.u32 %v13655_v17, 16  ;;  %4290 = vmatpush1.bf16.msra.mxu1 %v11474_v27  ;;  %v11480_v33 = vld [vmem:[#allocation10 + $0x480] ss:$8 sps:$4 sm:$0xff]  }
 0x6aa   : >> { %v13881_v37 = vsel %vm13115_vm2, %v3331_v31, 0  ;;  %v3338_v55 = vrot.slane %v15037_v7, 1  ;;  %v3344_v52 = vrot.slane %v15038_v54, 1  ;;  %v15041_v16 = vshrl.u32 %v13616_v21, 16  ;;  %4291 = vmatprep.subr.bf16.mxu1 %v11482_v62  ;;  %5116 = vmatpush1.bf16.msra.mxu0 %v11477_v8 }
 0x6ab   : >> { %4307 = vmatprep.mubr.bf16.mxu1 %v15039_v2  ;;  %v13894_v48 = vcombine.low %v13857_v51, %v13881_v37  ;;  %v3341_v31 = vor.u32 %v3340_v40, %v15040_v1  ;;  %v13900_v7 = vsel %vm13115_vm2, %v3337_v49, 0  ;;  %v15042_v38 = vshrl.u32 %v13663_v3, 16  ;;  %v11488_v49 = vld [vmem:[#allocation10 + $0x494] ss:$8 sps:$4 sm:$0xff]   ;;  %v11483_v40 = vld [vmem:[#allocation10 + $0x2b0] ss:$8 sps:$4 sm:$0xff]   ;;  %5117 = vmatprep.subr.bf16.mxu0 %v11485_v35 }
 0x6ac   : >> { %v3335_v54 = vor.u32 %v3334_v36, %v15041_v16  ;;  %v15043_v20 = vshrl.u32 %v13674_v53, 16  ;;  %v15044_v25 = vshll.u32 %v13732_v29, 16  ;;  %v10174_v17 = vpack.c.bf16 %v13651_v6, %v13601_v26  ;;  %v11563_v26 = vld [vmem:[#allocation10 + $0x684] ss:$8 sps:$4 sm:$0xff]   ;;  %v11558_v6 = vld [vmem:[#allocation10 + $0x550] ss:$8 sps:$4 sm:$0xff]  }
 0x6ad   : >> { %v3339_v13 = vor.u32 %v3338_v55, %v15042_v38  ;;  %v13914_v21 = vsel %vm13115_vm2, %v3341_v31, 0  ;;  %v15045_v3 = vshll.u32 %v13667_v23, 16  ;;  %v15046_v27 = vshll.u32 %v13773_v28, 16  ;;  %v11491_v31 = vld [vmem:[#allocation10 + $0x2c4] ss:$8 sps:$4 sm:$0xff]   ;;  %4292 = vmatpush1.bf16.msra.mxu1 %v11480_v33 }
 0x6ae   : >> { %v3345_v2 = vor.u32 %v3344_v52, %v15043_v20  ;;  %v3348_v15 = vrot.slane %v15044_v25, 1  ;;  %v13918_v36 = vsel %vm13115_vm2, %v3335_v54, 0  ;;  %v13926_v62 = vcombine.low %v13900_v7, %v13914_v21  ;;  %4293 = vmatprep.subr.bf16.mxu1 %v11488_v49  ;;  %5118 = vmatpush1.bf16.msra.mxu0 %v11483_v40 }
 0x6af   : >> { %v3342_v53 = vrot.slane %v15045_v3, 1  ;;  %v3346_v16 = vrot.slane %v15046_v27, 1  ;;  %v13930_v25 = vsel %vm13115_vm2, %v3339_v13, 0  ;;  %v15047_v55 = vshrl.u32 %v13732_v29, 16  ;;  %v11494_v3 = vld [vmem:[#allocation10 + $0x4a4] ss:$8 sps:$4 sm:$0xff]   ;;  %5119 = vmatprep.subr.bf16.mxu0 %v11491_v31 }
 0x6b0   : >> { %v13936_v1 = vsel %vm13115_vm2, %v3345_v2, 0  ;;  %v13940_v8 = vcombine.low %v13918_v36, %v13930_v25  ;;  %v15048_v54 = vshrl.u32 %v13667_v23, 16  ;;  %v15049_v20 = vshrl.u32 %v13773_v28, 16  ;;  %v11489_v27 = vld [vmem:[#allocation10 + $0x2c0] ss:$8 sps:$4 sm:$0xff]  }
 0x6b1   : >> { %v3349_v52 = vor.u32 %v3348_v15, %v15047_v55  ;;  %v10173_v29 = vpack.c.bf16 %v13619_v57, %v13606_v34  ;;  %v11486_v15 = vld [vmem:[#allocation10 + $0x490] ss:$8 sps:$4 sm:$0xff]   ;;  %v13954_v35 = vcombine.low %v13570_v10, %v13638_v56  ;;  %v10176_v23 = vpack.c.bf16 %v13728_v14, %v13688_v44  ;;  %v11500_v31 = vld [vmem:[#allocation10 + $0x4b4] ss:$8 sps:$4 sm:$0xff]   ;;  %v11575_v57 = vld [vmem:[#allocation10 + $0x6a4] ss:$8 sps:$4 sm:$0xff]  }
 0x6b2   : >> { %v3343_v38 = vor.u32 %v3342_v53, %v15048_v54  ;;  %v3347_v13 = vor.u32 %v3346_v16, %v15049_v20  ;;  %v10175_v28 = vpack.c.bf16 %v13744_v46, %v13681_v12  ;;  %v13980_v16 = vcombine.low %v13646_v50, %v13725_v4  ;;  %v11497_v54 = vld [vmem:[#allocation10 + $0x2d4] ss:$8 sps:$4 sm:$0xff]   ;;  %4294 = vmatpush1.bf16.msra.mxu1 %v11486_v15  ;;  %v11492_v4 = vld [vmem:[#allocation10 + $0x4a0] ss:$8 sps:$4 sm:$0xff]   ;;  %v11503_v50 = vld [vmem:[#allocation10 + $0x2e4] ss:$8 sps:$4 sm:$0xff]  }
 0x6b3   : >> { %v13950_v2 = vsel %vm13115_vm2, %v3349_v52, 0  ;;  %v13984_v55 = vcombine.low %v13695_v24, %v13764_v60  ;;  %v13988_v52 = vcombine.low %v13748_v39, %v13807_v5  ;;  %v15050_v5 = vshll.u32 %v13755_v0, 16  ;;  %4295 = vmatprep.subr.bf16.mxu1 %v11494_v3  ;;  %5120 = vmatpush1.bf16.msra.mxu0 %v11489_v27  ;;  %v11498_v39 = vld [vmem:[#allocation10 + $0x4b0] ss:$8 sps:$4 sm:$0xff]   ;;  %v11506_v3 = vld [vmem:[#allocation10 + $0x4c4] ss:$8 sps:$4 sm:$0xff]  }
 0x6b4   : >> { %v13962_v33 = vcombine.low %v13936_v1, %v13950_v2  ;;  %v13966_v53 = vsel %vm13115_vm2, %v3343_v38, 0  ;;  %v13970_v10 = vsel %vm13115_vm2, %v3347_v13, 0  ;;  %v13994_v38 = vcombine.low %v13777_v61, %v13837_v30  ;;  %v11495_v30 = vld [vmem:[#allocation10 + $0x2d0] ss:$8 sps:$4 sm:$0xff]   ;;  %5121 = vmatprep.subr.bf16.mxu0 %v11497_v54  ;;  %v11501_v54 = vld [vmem:[#allocation10 + $0x2e0] ss:$8 sps:$4 sm:$0xff]  }
 0x6b5   : >> { %v13976_v49 = vcombine.low %v13966_v53, %v13970_v10  ;;  %v3352_v60 = vrot.slane %v15050_v5, 1  ;;  %v15051_v20 = vshll.u32 %v13781_v32, 16  ;;  %v15052_v13 = vshrl.u32 %v13755_v0, 16  ;;  %v11567_v34 = vld [vmem:[#allocation10 + $0x690] ss:$8 sps:$4 sm:$0xff]  }
 0x6b6   : >> { %v15053_v24 = vshrl.u32 %v13781_v32, 16  ;;  %4296 = vmatpush1.bf16.msra.mxu1 %v11492_v4  ;;  %v11509_v4 = vld [vmem:[#allocation10 + $0x2f4] ss:$8 sps:$4 sm:$0xff]   ;;  %v15054_v27 = vmov 0   ;;  %v15058_v44 = vcombine.low %v13741_v63, %v13841_v43  ;;  %v11570_v14 = vld [vmem:[#allocation10 + $0x570] ss:$8 sps:$4 sm:$0xff]  }
 0x6b7   : >> { %v3350_v61 = vrot.slane %v15051_v20, 1  ;;  %v3353_v15 = vor.u32 %v3352_v60, %v15052_v13  ;;  %4297 = vmatprep.subr.bf16.mxu1 %v11500_v31  ;;  %5122 = vmatpush1.bf16.msra.mxu0 %v11495_v30  ;;  %v11504_v60 = vld [vmem:[#allocation10 + $0x4c0] ss:$8 sps:$4 sm:$0xff]   ;;  %v11507_v31 = vld [vmem:[#allocation10 + $0x2f0] ss:$8 sps:$4 sm:$0xff]   ;;  %v9644_v56 = vcombine.low %v15054_v27, %v13823_v42 }
 0x6b8   : >> { %5123 = vmatprep.subr.bf16.mxu0 %v11503_v50  ;;  %v11515_v13 = vld [vmem:[#allocation10 + $0x604] ss:$8 sps:$4 sm:$0xff]   ;;  %v11513_v30 = vld [vmem:[#allocation10 + $0x600] ss:$8 sps:$4 sm:$0xff]   ;;  %v11521_v50 = vld [vmem:[#allocation10 + $0x614] ss:$8 sps:$4 sm:$0xff]  }
 0x6b9   : >> { %v3351_v40 = vor.u32 %v3350_v61, %v15053_v24  ;;  %v14012_v5 = vsel %vm13115_vm2, %v3353_v15, 0  ;;  %v11512_v61 = vld [vmem:[#allocation10 + $0x4d4] ss:$8 sps:$4 sm:$0xff]   ;;  %v11510_v15 = vld [vmem:[#allocation10 + $0x4d0] ss:$8 sps:$4 sm:$0xff]  }
 0x6ba   : >> { %4298 = vmatpush1.bf16.msra.mxu1 %v11498_v39  ;;  %v11516_v39 = vld [vmem:[#allocation10 + $0x4e0] ss:$8 sps:$4 sm:$0xff]   ;;  %v11579_v12 = vld [vmem:[#allocation10 + $0x6b0] ss:$8 sps:$4 sm:$0xff]   ;;  %v11587_v46 = vld [vmem:[#allocation10 + $0x6c4] ss:$8 sps:$4 sm:$0xff]  }
 0x6bb   : >> { %v14018_v20 = vsel %vm13115_vm2, %v3351_v40, 0  ;;  %4299 = vmatprep.subr.bf16.mxu1 %v11506_v3  ;;  %5124 = vmatpush1.bf16.msra.mxu0 %v11501_v54  ;;  %v11518_v40 = vld [vmem:[#allocation10 + $0x4e4] ss:$8 sps:$4 sm:$0xff]   ;;  %v11524_v3 = vld [vmem:[#allocation10 + $0x4f4] ss:$8 sps:$4 sm:$0xff]  }
 0x6bc   : >> { %v9542_v24 = vcombine.low %v13970_v10, %v14018_v20  ;;  %5125 = vmatprep.subr.bf16.mxu0 %v11509_v4  ;;  %v11519_v54 = vld [vmem:[#allocation10 + $0x610] ss:$8 sps:$4 sm:$0xff]   ;;  %v11527_v4 = vld [vmem:[#allocation10 + $0x624] ss:$8 sps:$4 sm:$0xff]   ;;  %v11585_v43 = vld [vmem:[#allocation10 + $0x6c0] ss:$8 sps:$4 sm:$0xff]  }
 0x6bd   : >> { %v11590_v63 = vld [vmem:[#allocation10 + $0x5a4] ss:$8 sps:$4 sm:$0xff]  }
 0x6be   : >> { %4300 = vmatpush1.bf16.msra.mxu1 %v11504_v60  ;;  %v11522_v60 = vld [vmem:[#allocation10 + $0x4f0] ss:$8 sps:$4 sm:$0xff]   ;;  %v11683_v10 = vld [vmem:[#allocation10 + $0x7c4] ss:$8 sps:$4 sm:$0xff]  }
 0x6bf   : >> { %4301 = vmatprep.subr.bf16.mxu1 %v11512_v61  ;;  %5126 = vmatpush1.bf16.msra.mxu0 %v11507_v31  ;;  %v11530_v61 = vld [vmem:[#allocation10 + $0x504] ss:$8 sps:$4 sm:$0xff]   ;;  %v11525_v31 = vld [vmem:[#allocation10 + $0x620] ss:$8 sps:$4 sm:$0xff]  }
 0x6c0   : >> { %5756 = vmatprep.subr.bf16.mxu0 %v11515_v13  ;;  %v11533_v13 = vld [vmem:[#allocation10 + $0x634] ss:$8 sps:$4 sm:$0xff]  }
 0x6c2   : >> { %4302 = vmatpush1.bf16.msra.mxu1 %v11510_v15  ;;  %5128 = vmatmul.mubr.bf16.vlgmr.msra.gmra.mrb[16].mxu0 %v9644_v56  ;;  %v11528_v15 = vld [vmem:[#allocation10 + $0x500] ss:$8 sps:$4 sm:$0xff]   ;;  %v11536_v56 = vld [vmem:[#allocation10 + $0x514] ss:$8 sps:$4 sm:$0xff]  }
 0x6c3   : >> { %4303 = vmatprep.subr.bf16.mxu1 %v11518_v40  ;;  %5137 = vmatprep.mubr.bf16.mxu0 %v13865_v58  ;;  %v11531_v40 = vld [vmem:[#allocation10 + $0x630] ss:$8 sps:$4 sm:$0xff]  }
 0x6c4   : >> { %5757 = vmatpush1.bf16.msra.mxu0 %v11513_v30  ;;  %v15055_v30 = vpack.c.bf16 %v13499_v41, %v13489_v22  ;;  %v11548_v22 = vld [vmem:[#allocation10 + $0x534] ss:$8 sps:$4 sm:$0xff]   ;;  %v11543_v41 = vld [vmem:[#allocation10 + $0x650] ss:$8 sps:$4 sm:$0xff]  }
 0x6c5   : >> { %5758 = vmatprep.subr.bf16.mxu0 %v11521_v50  ;;  %v11539_v50 = vld [vmem:[#allocation10 + $0x644] ss:$8 sps:$4 sm:$0xff]  }
 0x6c6   : >> { %4304 = vmatpush1.bf16.msra.mxu1 %v11516_v39  ;;  %v15056_v39 = vpack.c.bf16 %v13557_v59, %v13532_v47  ;;  %v15057_v47 = vpack.c.bf16 %v13577_v18, %v13528_v11  ;;  %v11551_v59 = vld [vmem:[#allocation10 + $0x664] ss:$8 sps:$4 sm:$0xff]   ;;  %v11560_v11 = vld [vmem:[#allocation10 + $0x554] ss:$8 sps:$4 sm:$0xff]   ;;  %v11555_v18 = vld [vmem:[#allocation10 + $0x670] ss:$8 sps:$4 sm:$0xff]  }
 0x6c7   : >> { %4305 = vmatprep.subr.bf16.mxu1 %v11524_v3  ;;  %v11534_v3 = vld [vmem:[#allocation10 + $0x510] ss:$8 sps:$4 sm:$0xff]  }
 0x6c8   : >> { %5759 = vmatpush1.bf16.msra.mxu0 %v11519_v54  ;;  %v11542_v54 = vld [vmem:[#allocation10 + $0x524] ss:$8 sps:$4 sm:$0xff]  }
 0x6c9   : >> { %5760 = vmatprep.subr.bf16.mxu0 %v11527_v4  ;;  %v11537_v4 = vld [vmem:[#allocation10 + $0x640] ss:$8 sps:$4 sm:$0xff]  }
 0x6ca   : >> { %4306 = vmatpush1.bf16.msra.mxu1 %v11522_v60  ;;  %5138 = vmatmul.mubr.bf16.gmra.mrb[20].mxu0 %v13894_v48  ;;  %v11545_v60 = vld [vmem:[#allocation10 + $0x654] ss:$8 sps:$4 sm:$0xff]  }
 0x6cb   : >> { %4348 = vmatprep.subr.bf16.mxu1 %v11530_v61  ;;  %5147 = vmatprep.mubr.bf16.mxu0 %v13926_v62  ;;  %v11540_v61 = vld [vmem:[#allocation10 + $0x520] ss:$8 sps:$4 sm:$0xff]  }
 0x6cc   : >> { %5761 = vmatpush1.bf16.msra.mxu0 %v11525_v31  ;;  %v11546_v31 = vld [vmem:[#allocation10 + $0x530] ss:$8 sps:$4 sm:$0xff]  }
 0x6cd   : >> { %4308 = vmatmul.mubr.bf16.vlgmr.msra.gmra.mrb[48].mxu1 %v15055_v30  ;;  %5762 = vmatprep.subr.bf16.mxu0 %v11533_v13  ;;  %v11554_v13 = vld [vmem:[#allocation10 + $0x544] ss:$8 sps:$4 sm:$0xff]   ;;  %v11561_v30 = vld [vmem:[#allocation10 + $0x680] ss:$8 sps:$4 sm:$0xff]  }
 0x6ce   : >> { %4317 = vmatprep.mubr.bf16.mxu1 %v15056_v39  ;;  %4349 = vmatpush1.bf16.msra.mxu1 %v11528_v15  ;;  %v11549_v15 = vld [vmem:[#allocation10 + $0x660] ss:$8 sps:$4 sm:$0xff]  }
 0x6cf   : >> { %4350 = vmatprep.subr.bf16.mxu1 %v11536_v56  ;;  %v11557_v56 = vld [vmem:[#allocation10 + $0x674] ss:$8 sps:$4 sm:$0xff]   ;;  %v11564_v39 = vld [vmem:[#allocation10 + $0x560] ss:$8 sps:$4 sm:$0xff]  }
 0x6d0   : >> { %5763 = vmatpush1.bf16.msra.mxu0 %v11531_v40  ;;  %v11552_v40 = vld [vmem:[#allocation10 + $0x540] ss:$8 sps:$4 sm:$0xff]  }
 0x6d1   : >> { %5764 = vmatprep.subr.bf16.mxu0 %v11539_v50  ;;  %v11569_v50 = vld [vmem:[#allocation10 + $0x694] ss:$8 sps:$4 sm:$0xff]  }
 0x6d2   : >> { %4351 = vmatpush1.bf16.msra.mxu1 %v11534_v3  ;;  %5148 = vmatmul.mubr.bf16.gmra.mrb[24].mxu0 %v13940_v8  ;;  %v11572_v3 = vld [vmem:[#allocation10 + $0x574] ss:$8 sps:$4 sm:$0xff]  }
 0x6d3   : >> { %4352 = vmatprep.subr.bf16.mxu1 %v11542_v54  ;;  %5157 = vmatprep.mubr.bf16.mxu0 %v13962_v33  ;;  %v11581_v54 = vld [vmem:[#allocation10 + $0x6b4] ss:$8 sps:$4 sm:$0xff]  }
 0x6d4   : >> { %5765 = vmatpush1.bf16.msra.mxu0 %v11537_v4  ;;  %v11576_v4 = vld [vmem:[#allocation10 + $0x580] ss:$8 sps:$4 sm:$0xff]  }
 0x6d5   : >> { %4318 = vmatmul.mubr.bf16.gmra.mrb[52].mxu1 %v15057_v47  ;;  %5766 = vmatprep.subr.bf16.mxu0 %v11545_v60  ;;  %v11584_v60 = vld [vmem:[#allocation10 + $0x594] ss:$8 sps:$4 sm:$0xff]   ;;  %v11591_v47 = vld [vmem:[#allocation10 + $0x6d0] ss:$8 sps:$4 sm:$0xff]  }
 0x6d6   : >> { %4327 = vmatprep.mubr.bf16.mxu1 %v10174_v17  ;;  %4353 = vmatpush1.bf16.msra.mxu1 %v11540_v61  ;;  %v11566_v17 = vld [vmem:[#allocation10 + $0x564] ss:$8 sps:$4 sm:$0xff]   ;;  %v11593_v61 = vld [vmem:[#allocation10 + $0x6d4] ss:$8 sps:$4 sm:$0xff]  }
 0x6d7   : >> { %4354 = vmatprep.subr.bf16.mxu1 %v11548_v22  ;;  %v11588_v22 = vld [vmem:[#allocation10 + $0x5a0] ss:$8 sps:$4 sm:$0xff]  }
 0x6d8   : >> { %5767 = vmatpush1.bf16.msra.mxu0 %v11543_v41  ;;  %v11596_v41 = vld [vmem:[#allocation10 + $0x5b4] ss:$8 sps:$4 sm:$0xff]  }
 0x6d9   : >> { %5768 = vmatprep.subr.bf16.mxu0 %v11551_v59  ;;  %v11599_v59 = vld [vmem:[#allocation10 + $0x6e4] ss:$8 sps:$4 sm:$0xff]  }
 0x6da   : >> { %4355 = vmatpush1.bf16.msra.mxu1 %v11546_v31  ;;  %5158 = vmatmul.mubr.bf16.gmra.mrb[28].mxu0 %v13976_v49  ;;  %v11594_v31 = vld [vmem:[#allocation10 + $0x5b0] ss:$8 sps:$4 sm:$0xff]  }
 0x6db   : >> { %4356 = vmatprep.subr.bf16.mxu1 %v11554_v13  ;;  %5788 = vmatprep.mubr.bf16.mxu0 %v13954_v35  ;;  %v11602_v13 = vld [vmem:[#allocation10 + $0x5c4] ss:$8 sps:$4 sm:$0xff]  }
 0x6dc   : >> { %5769 = vmatpush1.bf16.msra.mxu0 %v11549_v15  ;;  %v11597_v15 = vld [vmem:[#allocation10 + $0x6e0] ss:$8 sps:$4 sm:$0xff]  }
 0x6dd   : >> { %4328 = vmatmul.mubr.bf16.gmra.mrb[56].mxu1 %v10173_v29  ;;  %5770 = vmatprep.subr.bf16.mxu0 %v11557_v56  ;;  %v11578_v29 = vld [vmem:[#allocation10 + $0x584] ss:$8 sps:$4 sm:$0xff]   ;;  %v11605_v56 = vld [vmem:[#allocation10 + $0x6f4] ss:$8 sps:$4 sm:$0xff]  }
 0x6de   : >> { %4337 = vmatprep.mubr.bf16.mxu1 %v10176_v23  ;;  %4357 = vmatpush1.bf16.msra.mxu1 %v11552_v40  ;;  %v11573_v23 = vld [vmem:[#allocation10 + $0x6a0] ss:$8 sps:$4 sm:$0xff]  }
 0x6df   : >> { %4358 = vmatprep.subr.bf16.mxu1 %v11560_v11  ;;  %v11600_v40 = vld [vmem:[#allocation10 + $0x5c0] ss:$8 sps:$4 sm:$0xff]   ;;  %v11608_v11 = vld [vmem:[#allocation10 + $0x5d4] ss:$8 sps:$4 sm:$0xff]  }
 0x6e0   : >> { %5771 = vmatpush1.bf16.msra.mxu0 %v11555_v18  ;;  %v11603_v18 = vld [vmem:[#allocation10 + $0x6f0] ss:$8 sps:$4 sm:$0xff]  }
 0x6e1   : >> { %5772 = vmatprep.subr.bf16.mxu0 %v11563_v26  ;;  %v11611_v26 = vld [vmem:[#allocation10 + $0x704] ss:$8 sps:$4 sm:$0xff]  }
 0x6e2   : >> { %4359 = vmatpush1.bf16.msra.mxu1 %v11558_v6  ;;  %v11606_v6 = vld [vmem:[#allocation10 + $0x5d0] ss:$8 sps:$4 sm:$0xff]  }
 0x6e3   : >> { %4360 = vmatprep.subr.bf16.mxu1 %v11566_v17  ;;  %v11614_v17 = vld [vmem:[#allocation10 + $0x5e4] ss:$8 sps:$4 sm:$0xff]  }
 0x6e4   : >> { %5773 = vmatpush1.bf16.msra.mxu0 %v11561_v30  ;;  %v11609_v30 = vld [vmem:[#allocation10 + $0x700] ss:$8 sps:$4 sm:$0xff]  }
 0x6e5   : >> { %4338 = vmatmul.mubr.bf16.gmra.mrb[60].mxu1 %v10175_v28  ;;  %5774 = vmatprep.subr.bf16.mxu0 %v11569_v50  ;;  %v11582_v28 = vld [vmem:[#allocation10 + $0x590] ss:$8 sps:$4 sm:$0xff]   ;;  %v11617_v50 = vld [vmem:[#allocation10 + $0x714] ss:$8 sps:$4 sm:$0xff]  }
 0x6e6   : >> { %4361 = vmatpush1.bf16.msra.mxu1 %v11564_v39  ;;  %4380 = vmatprep.mubr.bf16.mxu1 %v15058_v44  ;;  %v11612_v39 = vld [vmem:[#allocation10 + $0x5e0] ss:$8 sps:$4 sm:$0xff]   ;;  %v11623_v44 = vld [vmem:[#allocation10 + $0x724] ss:$8 sps:$4 sm:$0xff]  }
 0x6e7   : >> { %4362 = vmatprep.subr.bf16.mxu1 %v11572_v3  ;;  %v15059_v3 = vld [vmem:[#allocation38_spill] sm:$0xff] }
 0x6e8   : >> { %5775 = vmatpush1.bf16.msra.mxu0 %v11567_v34  ;;  %v11620_v34 = vld [vmem:[#allocation10 + $0x5f4] ss:$8 sps:$4 sm:$0xff]  }
 0x6e9   : >> { %5776 = vmatprep.subr.bf16.mxu0 %v11575_v57  ;;  %v11615_v57 = vld [vmem:[#allocation10 + $0x710] ss:$8 sps:$4 sm:$0xff]  }
 0x6ea   : >> { %4363 = vmatpush1.bf16.msra.mxu1 %v11570_v14  ;;  %v11618_v14 = vld [vmem:[#allocation10 + $0x5f0] ss:$8 sps:$4 sm:$0xff]  }
 0x6eb   : >> { %4364 = vmatprep.subr.bf16.mxu1 %v11578_v29  ;;  %v11626_v29 = vld [vmem:[#allocation10 + $0x4] ss:$8 sps:$4 sm:$0xff]  }
 0x6ec   : >> { %5777 = vmatpush1.bf16.msra.mxu0 %v11573_v23  ;;  %v11621_v23 = vld [vmem:[#allocation10 + $0x720] ss:$8 sps:$4 sm:$0xff]  }
 0x6ed   : >> { %5778 = vmatprep.subr.bf16.mxu0 %v11581_v54  ;;  %v11629_v54 = vld [vmem:[#allocation10 + $0x734] ss:$8 sps:$4 sm:$0xff]  }
 0x6ee   : >> { %4365 = vmatpush1.bf16.msra.mxu1 %v11576_v4  ;;  %v11624_v4 = vld [vmem:[#allocation10] ss:$8 sps:$4 sm:$0xff]  }
 0x6ef   : >> { %4366 = vmatprep.subr.bf16.mxu1 %v11584_v60  ;;  %v11632_v60 = vld [vmem:[#allocation10 + $0x14] ss:$8 sps:$4 sm:$0xff]  }
 0x6f0   : >> { %5779 = vmatpush1.bf16.msra.mxu0 %v11579_v12  ;;  %v11627_v12 = vld [vmem:[#allocation10 + $0x730] ss:$8 sps:$4 sm:$0xff]  }
 0x6f1   : >> { %5780 = vmatprep.subr.bf16.mxu0 %v11587_v46  ;;  %v15060_v46 = vcombine.low %v13823_v42, %v13857_v51  ;;  %v9761_v42 = vcombine.low %v13817_v9, %v15054_v27  ;;  %v11644_v51 = vld [vmem:[#allocation10 + $0x34] ss:$8 sps:$4 sm:$0xff]   ;;  %v11650_v9 = vld [vmem:[#allocation10 + $0x44] ss:$8 sps:$4 sm:$0xff]  }
 0x6f2   : >> { %4367 = vmatpush1.bf16.msra.mxu1 %v11582_v28  ;;  %v11635_v28 = vld [vmem:[#allocation10 + $0x744] ss:$8 sps:$4 sm:$0xff]  }
 0x6f3   : >> { %4368 = vmatprep.subr.bf16.mxu1 %v11590_v63  ;;  %v15061_v63 = vcombine.low %v13853_v19, %v13900_v7  ;;  %v11639_v19 = vld [vmem:[#allocation10 + $0x750] ss:$8 sps:$4 sm:$0xff]   ;;  %v15062_v7 = vcombine.low %v13881_v37, %v13918_v36  ;;  %v11648_v37 = vld [vmem:[#allocation10 + $0x40] ss:$8 sps:$4 sm:$0xff]   ;;  %v11656_v36 = vld [vmem:[#allocation10 + $0x54] ss:$8 sps:$4 sm:$0xff]  }
 0x6f4   : >> { %5781 = vmatpush1.bf16.msra.mxu0 %v11585_v43  ;;  %v11630_v43 = vld [vmem:[#allocation10 + $0x10] ss:$8 sps:$4 sm:$0xff]  }
 0x6f5   : >> { %5782 = vmatprep.subr.bf16.mxu0 %v11593_v61  ;;  %v11638_v61 = vld [vmem:[#allocation10 + $0x24] ss:$8 sps:$4 sm:$0xff]  }
 0x6f6   : >> { %4369 = vmatpush1.bf16.msra.mxu1 %v11588_v22  ;;  %v11633_v22 = vld [vmem:[#allocation10 + $0x740] ss:$8 sps:$4 sm:$0xff]  }
 0x6f7   : >> { %4370 = vmatprep.subr.bf16.mxu1 %v11596_v41  ;;  %v11641_v41 = vld [vmem:[#allocation10 + $0x754] ss:$8 sps:$4 sm:$0xff]  }
 0x6f8   : >> { %5783 = vmatpush1.bf16.msra.mxu0 %v11591_v47  ;;  %v11636_v47 = vld [vmem:[#allocation10 + $0x20] ss:$8 sps:$4 sm:$0xff]  }
 0x6f9   : >> { %5784 = vmatprep.subr.bf16.mxu0 %v11599_v59  ;;  %v11647_v59 = vld [vmem:[#allocation10 + $0x764] ss:$8 sps:$4 sm:$0xff]  }
 0x6fa   : >> { %4371 = vmatpush1.bf16.msra.mxu1 %v11594_v31  ;;  %v15063_v31 = vcombine.low %v13914_v21, %v13936_v1  ;;  %v11651_v21 = vld [vmem:[#allocation10 + $0x770] ss:$8 sps:$4 sm:$0xff]   ;;  %v15066_v1 = vcombine.low %v13930_v25, %v13966_v53 }
 0x6fb   : >> { %4372 = vmatprep.subr.bf16.mxu1 %v11602_v13  ;;  %v11642_v13 = vld [vmem:[#allocation10 + $0x30] ss:$8 sps:$4 sm:$0xff]  }
 0x6fc   : >> { %5785 = vmatpush1.bf16.msra.mxu0 %v11597_v15  ;;  %v11645_v15 = vld [vmem:[#allocation10 + $0x760] ss:$8 sps:$4 sm:$0xff]   ;;  %v15068_v25 = vld [vmem:[#allocation34_spill] sm:$0xff] }
 0x6fd   : >> { %5786 = vmatprep.subr.bf16.mxu0 %v11605_v56  ;;  %v15064_v56 = vld [vmem:[#allocation41_spill] sm:$0xff]  ;;  %v9641_v53 = vcombine.low %v15054_v27, %v15068_v25  ;;  %v11725_v25 = vld [vmem:[#allocation10 + $0x844] ss:$8 sps:$4 sm:$0xff]  }
 0x6fe   : >> { %4373 = vmatpush1.bf16.msra.mxu1 %v11600_v40  ;;  %v9760_v40 = vcombine.low %v15064_v56, %v15054_v27  ;;  %v11705_v56 = vld [vmem:[#allocation10 + $0x800] ss:$8 sps:$4 sm:$0xff]  }
 0x6ff   : >> { %4374 = vmatprep.subr.bf16.mxu1 %v11608_v11  ;;  %v11653_v11 = vld [vmem:[#allocation10 + $0x774] ss:$8 sps:$4 sm:$0xff]  }
 0x700   : >> { %5787 = vmatpush1.bf16.msra.mxu0 %v11603_v18  ;;  %v15065_v18 = vld [vmem:[#allocation33_spill] sm:$0xff] }
 0x701   : >> { %5829 = vmatprep.subr.bf16.mxu0 %v11611_v26  ;;  %v11659_v26 = vld [vmem:[#allocation10 + $0x784] ss:$8 sps:$4 sm:$0xff]  }
 0x702   : >> { %4375 = vmatpush1.bf16.msra.mxu1 %v11606_v6  ;;  %v15067_v6 = vcombine.low %v13950_v2, %v14012_v5  ;;  %v11671_v2 = vld [vmem:[#allocation10 + $0x7a4] ss:$8 sps:$4 sm:$0xff]  }
 0x703   : >> { %5789 = vmatmul.mubr.bf16.vlgmr.msra.gmra.mrb[16].mxu0 %v15059_v3  ;;  %4376 = vmatprep.subr.bf16.mxu1 %v11614_v17  ;;  %v11654_v17 = vld [vmem:[#allocation10 + $0x50] ss:$8 sps:$4 sm:$0xff]  }
 0x704   : >> { %5798 = vmatprep.mubr.bf16.mxu0 %v13980_v16  ;;  %5830 = vmatpush1.bf16.msra.mxu0 %v11609_v30  ;;  %v11662_v30 = vld [vmem:[#allocation10 + $0x64] ss:$8 sps:$4 sm:$0xff]  }
 0x705   : >> { %5831 = vmatprep.subr.bf16.mxu0 %v11617_v50  ;;  %v11657_v50 = vld [vmem:[#allocation10 + $0x780] ss:$8 sps:$4 sm:$0xff]  }
 0x706   : >> { %4377 = vmatpush1.bf16.msra.mxu1 %v11612_v39  ;;  %v11665_v39 = vld [vmem:[#allocation10 + $0x794] ss:$8 sps:$4 sm:$0xff]  }
 0x707   : >> { %4378 = vmatprep.subr.bf16.mxu1 %v11620_v34  ;;  %v11660_v34 = vld [vmem:[#allocation10 + $0x60] ss:$8 sps:$4 sm:$0xff]  }
 0x708   : >> { %5832 = vmatpush1.bf16.msra.mxu0 %v11615_v57  ;;  %v11668_v57 = vld [vmem:[#allocation10 + $0x74] ss:$8 sps:$4 sm:$0xff]  }
 0x709   : >> { %5833 = vmatprep.subr.bf16.mxu0 %v11623_v44  ;;  %v11663_v44 = vld [vmem:[#allocation10 + $0x790] ss:$8 sps:$4 sm:$0xff]  }
 0x70a   : >> { %4379 = vmatpush1.bf16.msra.mxu1 %v11618_v14  ;;  %v11666_v14 = vld [vmem:[#allocation10 + $0x70] ss:$8 sps:$4 sm:$0xff]  }
 0x70b   : >> { %5799 = vmatmul.mubr.bf16.gmra.mrb[20].mxu0 %v13984_v55  ;;  %4949 = vmatprep.subr.bf16.mxu1 %v11626_v29  ;;  %v11674_v29 = vld [vmem:[#allocation10 + $0x84] ss:$8 sps:$4 sm:$0xff]  }
 0x70c   : >> { %5808 = vmatprep.mubr.bf16.mxu0 %v13988_v52  ;;  %5834 = vmatpush1.bf16.msra.mxu0 %v11621_v23  ;;  %v11669_v23 = vld [vmem:[#allocation10 + $0x7a0] ss:$8 sps:$4 sm:$0xff]  }
 0x70d   : >> { %4381 = vmatmul.mubr.bf16.vlgmr.msra.gmra.mrb[48].mxu1 %v15060_v46  ;;  %5835 = vmatprep.subr.bf16.mxu0 %v11629_v54  ;;  %v11677_v54 = vld [vmem:[#allocation10 + $0x7b4] ss:$8 sps:$4 sm:$0xff]   ;;  %v11686_v46 = vld [vmem:[#allocation10 + $0xa4] ss:$8 sps:$4 sm:$0xff]  }
 0x70e   : >> { %4390 = vmatprep.mubr.bf16.mxu1 %v15061_v63  ;;  %4950 = vmatpush1.bf16.msra.mxu1 %v11624_v4  ;;  %v11672_v4 = vld [vmem:[#allocation10 + $0x80] ss:$8 sps:$4 sm:$0xff]   ;;  %v11689_v63 = vld [vmem:[#allocation10 + $0x7d4] ss:$8 sps:$4 sm:$0xff]  }
 0x70f   : >> { %4951 = vmatprep.subr.bf16.mxu1 %v11632_v60  ;;  %v11680_v60 = vld [vmem:[#allocation10 + $0x94] ss:$8 sps:$4 sm:$0xff]  }
 0x710   : >> { %5836 = vmatpush1.bf16.msra.mxu0 %v11627_v12  ;;  %v11675_v12 = vld [vmem:[#allocation10 + $0x7b0] ss:$8 sps:$4 sm:$0xff]  }
 0x711   : >> { %5837 = vmatprep.subr.bf16.mxu0 %v11635_v28  ;;  %v11681_v28 = vld [vmem:[#allocation10 + $0x7c0] ss:$8 sps:$4 sm:$0xff]  }
 0x712   : >> { %4952 = vmatpush1.bf16.msra.mxu1 %v11630_v43  ;;  %v11684_v43 = vld [vmem:[#allocation10 + $0xa0] ss:$8 sps:$4 sm:$0xff]  }
 0x713   : >> { %5809 = vmatmul.mubr.bf16.gmra.mrb[24].mxu0 %v13994_v38  ;;  %4953 = vmatprep.subr.bf16.mxu1 %v11638_v61  ;;  %v11692_v61 = vld [vmem:[#allocation10 + $0xb4] ss:$8 sps:$4 sm:$0xff]  }
 0x714   : >> { %5818 = vmatprep.mubr.bf16.mxu0 %v9761_v42  ;;  %5838 = vmatpush1.bf16.msra.mxu0 %v11633_v22  ;;  %v11687_v22 = vld [vmem:[#allocation10 + $0x7d0] ss:$8 sps:$4 sm:$0xff]   ;;  %v11698_v42 = vld [vmem:[#allocation10 + $0xc4] ss:$8 sps:$4 sm:$0xff]  }
 0x715   : >> { %4391 = vmatmul.mubr.bf16.gmra.mrb[52].mxu1 %v15062_v7  ;;  %5839 = vmatprep.subr.bf16.mxu0 %v11641_v41  ;;  %v11695_v41 = vld [vmem:[#allocation10 + $0x7e4] ss:$8 sps:$4 sm:$0xff]   ;;  %v11696_v7 = vld [vmem:[#allocation10 + $0xc0] ss:$8 sps:$4 sm:$0xff]  }
 0x716   : >> { %4400 = vmatprep.mubr.bf16.mxu1 %v15063_v31  ;;  %4954 = vmatpush1.bf16.msra.mxu1 %v11636_v47  ;;  %v11690_v47 = vld [vmem:[#allocation10 + $0xb0] ss:$8 sps:$4 sm:$0xff]  }
 0x717   : >> { %4955 = vmatprep.subr.bf16.mxu1 %v11644_v51  ;;  %v11693_v51 = vld [vmem:[#allocation10 + $0x7e0] ss:$8 sps:$4 sm:$0xff]   ;;  %v11699_v31 = vld [vmem:[#allocation10 + $0x7f0] ss:$8 sps:$4 sm:$0xff]  }
 0x718   : >> { %5840 = vmatpush1.bf16.msra.mxu0 %v11639_v19  ;;  %v11701_v19 = vld [vmem:[#allocation10 + $0x7f4] ss:$8 sps:$4 sm:$0xff]  }
 0x719   : >> { %5841 = vmatprep.subr.bf16.mxu0 %v11647_v59  ;;  %v11704_v59 = vld [vmem:[#allocation10 + $0xd4] ss:$8 sps:$4 sm:$0xff]  }
 0x71a   : >> { %4956 = vmatpush1.bf16.msra.mxu1 %v11642_v13  ;;  %v11707_v13 = vld [vmem:[#allocation10 + $0x804] ss:$8 sps:$4 sm:$0xff]  }
 0x71b   : >> { %5819 = vmatmul.mubr.bf16.gmra.mrb[28].mxu0 %v9760_v40  ;;  %4957 = vmatprep.subr.bf16.mxu1 %v11650_v9  ;;  %v11702_v9 = vld [vmem:[#allocation10 + $0xd0] ss:$8 sps:$4 sm:$0xff]   ;;  %v11713_v40 = vld [vmem:[#allocation10 + $0x814] ss:$8 sps:$4 sm:$0xff]  }
 0x71c   : >> { %5842 = vmatpush1.bf16.msra.mxu0 %v11645_v15  ;;  %5861 = vmatprep.mubr.bf16.mxu0 %v15065_v18  ;;  %v11710_v15 = vld [vmem:[#allocation10 + $0xe4] ss:$8 sps:$4 sm:$0xff]  }
 0x71d   : >> { %4401 = vmatmul.mubr.bf16.gmra.mrb[56].mxu1 %v15066_v1  ;;  %5843 = vmatprep.subr.bf16.mxu0 %v11653_v11  ;;  %v11708_v11 = vld [vmem:[#allocation10 + $0xe0] ss:$8 sps:$4 sm:$0xff]   ;;  %v11719_v1 = vld [vmem:[#allocation10 + $0x824] ss:$8 sps:$4 sm:$0xff]  }
 0x71e   : >> { %4410 = vmatprep.mubr.bf16.mxu1 %v15067_v6  ;;  %4958 = vmatpush1.bf16.msra.mxu1 %v11648_v37  ;;  %v15069_v37 = vld [vmem:[#allocation32_spill] sm:$0xff] }
 0x71f   : >> { %4959 = vmatprep.subr.bf16.mxu1 %v11656_v36  ;;  %v11716_v36 = vld [vmem:[#allocation10 + $0xf4] ss:$8 sps:$4 sm:$0xff]   ;;  %v15070_v18 = vld [vmem:[#allocation36_spill] sm:$0xff] }
 0x720   : >> { %5844 = vmatpush1.bf16.msra.mxu0 %v11651_v21  ;;  %v11711_v21 = vld [vmem:[#allocation10 + $0x810] ss:$8 sps:$4 sm:$0xff]   ;;  %v11717_v6 = vld [vmem:[#allocation10 + $0x820] ss:$8 sps:$4 sm:$0xff]  }
 0x721   : >> { %5845 = vmatprep.subr.bf16.mxu0 %v11659_v26  ;;  %v11714_v26 = vld [vmem:[#allocation10 + $0xf0] ss:$8 sps:$4 sm:$0xff]  }
 0x722   : >> { %4960 = vmatpush1.bf16.msra.mxu1 %v11654_v17  ;;  %v11722_v17 = vld [vmem:[#allocation10 + $0x834] ss:$8 sps:$4 sm:$0xff]  }
 0x723   : >> { %4961 = vmatprep.subr.bf16.mxu1 %v11662_v30  ;;  %v15071_v30 = vld [vmem:[#allocation37_spill] sm:$0xff] }
 0x724   : >> { %5846 = vmatpush1.bf16.msra.mxu0 %v11657_v50  ;;  %v15072_v50 = vld [vmem:[#allocation35_spill] sm:$0xff] }
 0x725   : >> { %4411 = vmatmul.mubr.bf16.gmra.mrb[60].mxu1 %v9542_v24  ;;  %5847 = vmatprep.subr.bf16.mxu0 %v11665_v39  ;;  %v11678_v24 = vld [vmem:[#allocation10 + $0x90] ss:$8 sps:$4 sm:$0xff]   ;;  %v9640_v39 = vcombine.low %v15054_v27, %v15072_v50 }
 0x726   : >> { %4962 = vmatpush1.bf16.msra.mxu1 %v11660_v34  ;;  %4981 = vmatprep.mubr.bf16.mxu1 %v9641_v53  ;;  %v15073_v34 = vld [vmem:[#allocation40_spill] sm:$0xff] }
 0x727   : >> { %4963 = vmatprep.subr.bf16.mxu1 %v11668_v57  ;;  %v11720_v57 = vld [vmem:[#allocation10 + $0x830] ss:$8 sps:$4 sm:$0xff]   ;;  %v11723_v53 = vld [vmem:[#allocation10 + $0x840] ss:$8 sps:$4 sm:$0xff]  }
 0x728   : >> { %5848 = vmatpush1.bf16.msra.mxu0 %v11663_v44  ;;  %v11728_v44 = vld [vmem:[#allocation10 + $0x854] ss:$8 sps:$4 sm:$0xff]  }
 0x729   : >> { %5849 = vmatprep.subr.bf16.mxu0 %v11671_v2  ;;  %v9763_v2 = vcombine.low %v13755_v0, %v15054_v27  ;;  %v11732_v0 = vld [vmem:[#allocation10 + $0x870] ss:$8 sps:$4 sm:$0xff]  }
 0x72a   : >> { %4964 = vmatpush1.bf16.msra.mxu1 %v11666_v14  ;;  %v15074_v14 = vld [vmem:[#allocation39_spill] sm:$0xff] }
 0x72b   : >> { %4965 = vmatprep.subr.bf16.mxu1 %v11674_v29  ;;  %v11726_v29 = vld [vmem:[#allocation10 + $0x850] ss:$8 sps:$4 sm:$0xff]  }
 0x72c   : >> { %5850 = vmatpush1.bf16.msra.mxu0 %v11669_v23  ;;  %v11731_v23 = vld [vmem:[#allocation10 + $0x864] ss:$8 sps:$4 sm:$0xff]  }
 0x72d   : >> { %5851 = vmatprep.subr.bf16.mxu0 %v11677_v54  ;;  %v9762_v54 = vcombine.low %v13781_v32, %v15054_v27  ;;  %v11743_v32 = vld [vmem:[#allocation10 + $0x8a4] ss:$8 sps:$4 sm:$0xff]  }
 0x72e   : >> { %4966 = vmatpush1.bf16.msra.mxu1 %v11672_v4  ;;  %v11734_v4 = vld [vmem:[#allocation10 + $0x874] ss:$8 sps:$4 sm:$0xff]  }
 0x72f   : >> { %4967 = vmatprep.subr.bf16.mxu1 %v11680_v60  ;;  %v11740_v60 = vld [vmem:[#allocation10 + $0x894] ss:$8 sps:$4 sm:$0xff]  }
 0x730   : >> { %5852 = vmatpush1.bf16.msra.mxu0 %v11675_v12  ;;  %v11738_v12 = vld [vmem:[#allocation10 + $0x890] ss:$8 sps:$4 sm:$0xff]  }
 0x731   : >> { %5853 = vmatprep.subr.bf16.mxu0 %v11683_v10  ;;  %v11741_v10 = vld [vmem:[#allocation10 + $0x8a0] ss:$8 sps:$4 sm:$0xff]  }
 0x732   : >> { %4968 = vmatpush1.bf16.msra.mxu1 %v11678_v24  ;;  %v11749_v24 = vld [vmem:[#allocation10 + $0x8c4] ss:$8 sps:$4 sm:$0xff]  }
 0x733   : >> { %4969 = vmatprep.subr.bf16.mxu1 %v11686_v46  ;;  %v11752_v46 = vld [vmem:[#allocation10 + $0x8d4] ss:$8 sps:$4 sm:$0xff]  }
 0x734   : >> { %5854 = vmatpush1.bf16.msra.mxu0 %v11681_v28  ;;  %v11750_v28 = vld [vmem:[#allocation10 + $0x8d0] ss:$8 sps:$4 sm:$0xff]  }
 0x735   : >> { %5855 = vmatprep.subr.bf16.mxu0 %v11689_v63  ;;  %v11755_v63 = vld [vmem:[#allocation10 + $0x8e4] ss:$8 sps:$4 sm:$0xff]  }
 0x736   : >> { %4970 = vmatpush1.bf16.msra.mxu1 %v11684_v43  ;;  %v11758_v43 = vld [vmem:[#allocation10 + $0x8f4] ss:$8 sps:$4 sm:$0xff]  }
 0x737   : >> { %4971 = vmatprep.subr.bf16.mxu1 %v11692_v61  ;;  %v11756_v61 = vld [vmem:[#allocation10 + $0x8f0] ss:$8 sps:$4 sm:$0xff]  }
 0x738   : >> { %5856 = vmatpush1.bf16.msra.mxu0 %v11687_v22  ;;  %v9765_v22 = vcombine.low %v14012_v5, %v15054_v27 }
 0x739   : >> { %5857 = vmatprep.subr.bf16.mxu0 %v11695_v41  ;;  %v9764_v41 = vcombine.low %v14018_v20, %v15054_v27 }
 0x73a   : >> { %4972 = vmatpush1.bf16.msra.mxu1 %v11690_v47 }
 0x73b   : >> { %4973 = vmatprep.subr.bf16.mxu1 %v11698_v42 }
 0x73c   : >> { %5858 = vmatpush1.bf16.msra.mxu0 %v11693_v51 }
 0x73d   : >> { %5859 = vmatprep.subr.bf16.mxu0 %v11701_v19 }
 0x73e   : >> { %4974 = vmatpush1.bf16.msra.mxu1 %v11696_v7 }
 0x73f   : >> { %4975 = vmatprep.subr.bf16.mxu1 %v11704_v59 }
 0x740   : >> { %5860 = vmatpush1.bf16.msra.mxu0 %v11699_v31 }
 0x741   : >> { %5902 = vmatprep.subr.bf16.mxu0 %v11707_v13 }
 0x742   : >> { %4976 = vmatpush1.bf16.msra.mxu1 %v11702_v9 }
 0x743   : >> { %5862 = vmatmul.mubr.bf16.vlgmr.msra.gmra.mrb[16].mxu0 %v15069_v37  ;;  %4977 = vmatprep.subr.bf16.mxu1 %v11710_v15  ;;  %v5991_v15 = vld [vmem:[#allocation2] sm:$0xff] }
 0x744   : >> { %5871 = vmatprep.mubr.bf16.mxu0 %v15070_v18  ;;  %5903 = vmatpush1.bf16.msra.mxu0 %v11705_v56  ;;  %v5993_v18 = vld [vmem:[#allocation2 + $0x10] sm:$0xff] }
 0x745   : >> { %5904 = vmatprep.subr.bf16.mxu0 %v11713_v40 }
 0x746   : >> { %4978 = vmatpush1.bf16.msra.mxu1 %v11708_v11  ;;  %v5992_v11 = vld [vmem:[#allocation2 + $0x8] sm:$0xff] }
 0x747   : >> { %4979 = vmatprep.subr.bf16.mxu1 %v11716_v36 }
 0x748   : >> { %5905 = vmatpush1.bf16.msra.mxu0 %v11711_v21 }
 0x749   : >> { %5906 = vmatprep.subr.bf16.mxu0 %v11719_v1 }
 0x74a   : >> { %4980 = vmatpush1.bf16.msra.mxu1 %v11714_v26 }
 0x74b   : >> { %5872 = vmatmul.mubr.bf16.gmra.mrb[20].mxu0 %v15071_v30 }
 0x74c   : >> { %5881 = vmatprep.mubr.bf16.mxu0 %v15073_v34  ;;  %5907 = vmatpush1.bf16.msra.mxu0 %v11717_v6  ;;  %v5994_v6 = vld [vmem:[#allocation2 + $0x18] sm:$0xff] }
 0x74d   : >> { %4982 = vmatmul.mubr.bf16.vlgmr.msra.gmra.mrb[48].mxu1 %v9640_v39  ;;  %5908 = vmatprep.subr.bf16.mxu0 %v11722_v17 }
 0x74e   : >> { %4991 = vmatprep.mubr.bf16.mxu1 %v13954_v35  ;;  %v11729_v35 = vld [vmem:[#allocation10 + $0x860] ss:$8 sps:$4 sm:$0xff]  }
 0x750   : >> { %5909 = vmatpush1.bf16.msra.mxu0 %v11720_v57  ;;  %v5995_v57 = vld [vmem:[#allocation2 + $0x20] sm:$0xff] }
 0x751   : >> { %5910 = vmatprep.subr.bf16.mxu0 %v11725_v25 }
 0x753   : >> { %5882 = vmatmul.mubr.bf16.gmra.mrb[24].mxu0 %v15074_v14 }
 0x754   : >> { %5891 = vmatprep.mubr.bf16.mxu0 %v9763_v2  ;;  %5911 = vmatpush1.bf16.msra.mxu0 %v11723_v53 }
 0x755   : >> { %4992 = vmatmul.mubr.bf16.gmra.mrb[52].mxu1 %v15059_v3  ;;  %5912 = vmatprep.subr.bf16.mxu0 %v11728_v44  ;;  %v11737_v3 = vld [vmem:[#allocation10 + $0x884] ss:$8 sps:$4 sm:$0xff]  }
 0x756   : >> { %5001 = vmatprep.mubr.bf16.mxu1 %v13980_v16  ;;  %v11735_v16 = vld [vmem:[#allocation10 + $0x880] ss:$8 sps:$4 sm:$0xff]  }
 0x757   : >> { %v5996_v44 = vld [vmem:[#allocation2 + $0x28] sm:$0xff] }
 0x758   : >> { %5913 = vmatpush1.bf16.msra.mxu0 %v11726_v29  ;;  %v5997_v29 = vld [vmem:[#allocation2 + $0x30] sm:$0xff] }
 0x759   : >> { %5914 = vmatprep.subr.bf16.mxu0 %v11731_v23 }
 0x75b   : >> { %5892 = vmatmul.mubr.bf16.gmra.mrb[28].mxu0 %v9762_v54 }
 0x75c   : >> { %5915 = vmatpush1.bf16.msra.mxu0 %v11729_v35  ;;  %5934 = vmatprep.mubr.bf16.mxu0 %v13865_v58  ;;  %v11746_v58 = vld [vmem:[#allocation10 + $0x8b4] ss:$8 sps:$4 sm:$0xff]  }
 0x75d   : >> { %5002 = vmatmul.mubr.bf16.gmra.mrb[56].mxu1 %v13984_v55  ;;  %5916 = vmatprep.subr.bf16.mxu0 %v11734_v4  ;;  %v11744_v55 = vld [vmem:[#allocation10 + $0x8b0] ss:$8 sps:$4 sm:$0xff]  }
 0x75e   : >> { %5011 = vmatprep.mubr.bf16.mxu1 %v13988_v52  ;;  %v11747_v52 = vld [vmem:[#allocation10 + $0x8c0] ss:$8 sps:$4 sm:$0xff]   ;;  %v5998_v4 = vld [vmem:[#allocation2 + $0x38] sm:$0xff] }
 0x760   : >> { %5917 = vmatpush1.bf16.msra.mxu0 %v11732_v0 }
 0x761   : >> { %5918 = vmatprep.subr.bf16.mxu0 %v11737_v3 }
 0x764   : >> { %5919 = vmatpush1.bf16.msra.mxu0 %v11735_v16 }
 0x765   : >> { %5012 = vmatmul.mubr.bf16.gmra.mrb[60].mxu1 %v13994_v38  ;;  %5920 = vmatprep.subr.bf16.mxu0 %v11740_v60  ;;  %v11753_v38 = vld [vmem:[#allocation10 + $0x8e0] ss:$8 sps:$4 sm:$0xff]  }
 0x768   : >> { %5921 = vmatpush1.bf16.msra.mxu0 %v11738_v12 }
 0x769   : >> { %5922 = vmatprep.subr.bf16.mxu0 %v11743_v32  ;;  %v5999_v32 = vld [vmem:[#allocation2 + $0x40] sm:$0xff] }
 0x76c   : >> { %5923 = vmatpush1.bf16.msra.mxu0 %v11741_v10 }
 0x76d   : >> { %5924 = vmatprep.subr.bf16.mxu0 %v11746_v58 }
 0x770   : >> { %5925 = vmatpush1.bf16.msra.mxu0 %v11744_v55  ;;  %v6000_v55 = vld [vmem:[#allocation2 + $0x48] sm:$0xff] }
 0x771   : >> { %5926 = vmatprep.subr.bf16.mxu0 %v11749_v24 }
 0x774   : >> { %5927 = vmatpush1.bf16.msra.mxu0 %v11747_v52 }
 0x775   : >> { %5928 = vmatprep.subr.bf16.mxu0 %v11752_v46  ;;  %v6001_v46 = vld [vmem:[#allocation2 + $0x50] sm:$0xff] }
 0x778   : >> { %5929 = vmatpush1.bf16.msra.mxu0 %v11750_v28 }
 0x779   : >> { %5930 = vmatprep.subr.bf16.mxu0 %v11755_v63 }
 0x77c   : >> { %5931 = vmatpush1.bf16.msra.mxu0 %v11753_v38 }
 0x77d   : >> { %5932 = vmatprep.subr.bf16.mxu0 %v11758_v43  ;;  %v6002_v43 = vld [vmem:[#allocation2 + $0x58] sm:$0xff] }
 0x780   : >> { %5933 = vmatpush1.bf16.msra.mxu0 %v11756_v61 }
 0x783   : >> { %5935 = vmatmul.mubr.bf16.vlgmr.msra.gmra.mrb[16].mxu0 %v13894_v48 }
 0x784   : >> { %5944 = vmatprep.mubr.bf16.mxu0 %v13926_v62 }
 0x78b   : >> { %5945 = vmatmul.mubr.bf16.gmra.mrb[20].mxu0 %v13940_v8 }
 0x78c   : >> { %5954 = vmatprep.mubr.bf16.mxu0 %v13962_v33 }
 0x793   : >> { %5955 = vmatmul.mubr.bf16.gmra.mrb[24].mxu0 %v13976_v49 }
 0x794   : >> { %5964 = vmatprep.mubr.bf16.mxu0 %v9765_v22 }
 0x79b   : >> { %5965 = vmatmul.mubr.bf16.gmra.mrb[28].mxu0 %v9764_v41 }
 0x820   : >> { %v4983_v47 = vpop.f32.mrb[48].mxu1 }
 0x821   : >> { %v4985_v42 = vpop.f32.mrb[49].mxu1 }
 0x822   : >> { %v4987_v51 = vpop.f32.mrb[50].mxu1 }
 0x823   : >> { %v4989_v48 = vpop.f32.mrb[51].mxu1 }
 0x828   : >> { %v4993_v19 = vpop.f32.mrb[52].mxu1 }
 0x829   : >> { %v4995_v62 = vpop.f32.mrb[53].mxu1 }
 0x82a   : >> { %v4997_v7 = vpop.f32.mrb[54].mxu1 }
 0x82b   : >> { %v4999_v8 = vpop.f32.mrb[55].mxu1 }
 0x830   : >> { %v5003_v59 = vpop.f32.mrb[56].mxu1 }
 0x831   : >> { %v5005_v33 = vpop.f32.mrb[57].mxu1 }
 0x832   : >> { %v5007_v31 = vpop.f32.mrb[58].mxu1 }
 0x833   : >> { %v5009_v13 = vpop.f32.mrb[59].mxu1 }
 0x838   : >> { %v14115_v5 = vpop.f32.mrb[60].mxu1 }
 0x839   : >> { %v14117_v49 = vpop.f32.mrb[61].mxu1 }
 0x83a   : >> { %v14119_v9 = vpop.f32.mrb[62].mxu1 }
 0x83b   : >> { %v14121_v27 = vpop.f32.mrb[63].mxu1 }
 0x856   : >> { %v5936_v20 = vpop.f32.mrb[16].mxu0 }
 0x857   : >> { %v10734_v56 = vadd.f32 %v5936_v20, %v4983_v47  ;;  %v5938_v40 = vpop.f32.mrb[17].mxu0  ;;  %v6006_v20 = vld [vmem:[#allocation2 + $0x78] sm:$0xff] }
 0x858   : >> { %v10735_v37 = vadd.f32 %v5938_v40, %v4985_v42  ;;  %v5940_v36 = vpop.f32.mrb[18].mxu0 }
 0x859   : >> { %v6007_v21 = vadd.f32 %v10734_v56, %v5991_v15  ;;  %v10736_v1 = vadd.f32 %v5940_v36, %v4987_v51  ;;  %v5942_v26 = vpop.f32.mrb[19].mxu0  ;;  %v6003_v51 = vld [vmem:[#allocation2 + $0x60] sm:$0xff] }
 0x85a   : >> { %v6008_v17 = vadd.f32 %v10735_v37, %v5992_v11  ;;  %v10737_v30 = vadd.f32 %v5942_v26, %v4989_v48  ;;  %v11908_v37 = vld [vmem:[#allocation19 + $0x10] ss:$8 sps:$4 sm:$0xff] (%p2120_p11)   ;;  %v11911_v36 = vld [vmem:[#allocation19 + $0x20] ss:$8 sps:$4 sm:$0xff] (%p2120_p11)  }
 0x85b   : >> { %6023 = vst [vmem:[#allocation3] sm:$0xff] %v6007_v21  ;;  %v6009_v50 = vadd.f32 %v10736_v1, %v5993_v18  ;;  %v11912_v18 = vld [vmem:[#allocation19 + $0x34] ss:$8 sps:$4 sm:$0xff] (%p2120_p11)   ;;  %v11914_v21 = vld [vmem:[#allocation19 + $0x30] ss:$8 sps:$4 sm:$0xff] (%p2120_p11)  }
 0x85c   : >> { %6024 = vst [vmem:[#allocation3 + $0x8] sm:$0xff] %v6008_v17  ;;  %v6010_v39 = vadd.f32 %v10737_v30, %v5994_v6  ;;  %v11915_v1 = vld [vmem:[#allocation19 + $0x44] ss:$8 sps:$4 sm:$0xff] (%p2120_p11)   ;;  %v11917_v26 = vld [vmem:[#allocation19 + $0x40] ss:$8 sps:$4 sm:$0xff] (%p2120_p11)  }
 0x85d   : >> { %6025 = vst [vmem:[#allocation3 + $0x10] sm:$0xff] %v6009_v50  ;;  %v11918_v6 = vld [vmem:[#allocation19 + $0x54] ss:$8 sps:$4 sm:$0xff] (%p2120_p11)   ;;  %v11920_v17 = vld [vmem:[#allocation19 + $0x50] ss:$8 sps:$4 sm:$0xff] (%p2120_p11)  }
 0x85e   : >> { %6026 = vst [vmem:[#allocation3 + $0x18] sm:$0xff] %v6010_v39  ;;  %v5946_v34 = vpop.f32.mrb[20].mxu0  ;;  %v11921_v30 = vld [vmem:[#allocation19 + $0x64] ss:$8 sps:$4 sm:$0xff] (%p2120_p11)  }
 0x85f   : >> { %v10738_v25 = vadd.f32 %v5946_v34, %v4993_v19  ;;  %v5948_v53 = vpop.f32.mrb[21].mxu0 }
 0x860   : >> { %v10739_v2 = vadd.f32 %v5948_v53, %v4995_v62  ;;  %v5950_v14 = vpop.f32.mrb[22].mxu0  ;;  %v6004_v62 = vld [vmem:[#allocation2 + $0x68] sm:$0xff]  ;;  %v11926_v53 = vld [vmem:[#allocation19 + $0x70] ss:$8 sps:$4 sm:$0xff] (%p2120_p11)  }
 0x861   : >> { %v6011_v23 = vadd.f32 %v10738_v25, %v5995_v57  ;;  %v10740_v35 = vadd.f32 %v5950_v14, %v4997_v7  ;;  %v5952_v54 = vpop.f32.mrb[23].mxu0  ;;  %v11923_v57 = vld [vmem:[#allocation19 + $0x60] ss:$8 sps:$4 sm:$0xff] (%p2120_p11)   ;;  %v11924_v25 = vld [vmem:[#allocation19 + $0x74] ss:$8 sps:$4 sm:$0xff] (%p2120_p11)  }
 0x862   : >> { %v6012_v0 = vadd.f32 %v10739_v2, %v5996_v44  ;;  %v10741_v3 = vadd.f32 %v5952_v54, %v4999_v8  ;;  %v11927_v44 = vld [vmem:[#allocation19 + $0x84] ss:$8 sps:$4 sm:$0xff] (%p2120_p11)   ;;  %v11953_v14 = vld [vmem:[#allocation20] ss:$8 sps:$4 sm:$0xff] (%p2120_p11)  }
 0x863   : >> { %6027 = vst [vmem:[#allocation3 + $0x20] sm:$0xff] %v6011_v23  ;;  %v6013_v16 = vadd.f32 %v10740_v35, %v5997_v29  ;;  %v6040_v50 = vld [vmem:[#allocation3 + $0x8] sm:$0xff] (%p2120_p11)  ;;  %v11954_v29 = vld [vmem:[#allocation20 + $0x14] ss:$8 sps:$4 sm:$0xff] (%p2120_p11)   ;;  %v11956_v23 = vld [vmem:[#allocation20 + $0x10] ss:$8 sps:$4 sm:$0xff] (%p2120_p11)  }
 0x864   : >> { %6028 = vst [vmem:[#allocation3 + $0x28] sm:$0xff] %v6012_v0  ;;  %v6014_v60 = vadd.f32 %v10741_v3, %v5998_v4  ;;  %v11951_v2 = vld [vmem:[#allocation20 + $0x4] ss:$8 sps:$4 sm:$0xff] (%p2120_p11)   ;;  %v11929_v35 = vld [vmem:[#allocation19 + $0x80] ss:$8 sps:$4 sm:$0xff] (%p2120_p11)  }
 0x865   : >> { %6029 = vst [vmem:[#allocation3 + $0x30] sm:$0xff] %v6013_v16  ;;  %v6042_v39 = vld [vmem:[#allocation3 + $0x18] sm:$0xff] (%p2120_p11)  ;;  %6674 = vmatprep.subr.bf16.mxu1 (%p2120_p11), %v11951_v2  ;;  %v11957_v54 = vld [vmem:[#allocation20 + $0x24] ss:$8 sps:$4 sm:$0xff] (%p2120_p11)   ;;  %v11959_v16 = vld [vmem:[#allocation20 + $0x20] ss:$8 sps:$4 sm:$0xff] (%p2120_p11)  }
 0x866   : >> { %6030 = vst [vmem:[#allocation3 + $0x38] sm:$0xff] %v6014_v60  ;;  %v5956_v12 = vpop.f32.mrb[24].mxu0  ;;  %v6056_v34 = vpack.c.bf16 (%p2120_p11), %v6042_v39, %v6040_v50  ;;  %6675 = vmatpush1.bf16.msra.mxu1 (%p2120_p11), %v11953_v14  ;;  %v11930_v4 = vld [vmem:[#allocation19 + $0x94] ss:$8 sps:$4 sm:$0xff] (%p2120_p11)   ;;  %v11932_v0 = vld [vmem:[#allocation19 + $0x90] ss:$8 sps:$4 sm:$0xff] (%p2120_p11)  }
 0x867   : >> { %v10742_v10 = vadd.f32 %v5956_v12, %v5003_v59  ;;  %v5958_v58 = vpop.f32.mrb[25].mxu0  ;;  %v6005_v59 = vld [vmem:[#allocation2 + $0x70] sm:$0xff]  ;;  %6676 = vmatprep.subr.bf16.mxu1 (%p2120_p11), %v11954_v29  ;;  %v11933_v3 = vld [vmem:[#allocation19 + $0xa4] ss:$8 sps:$4 sm:$0xff] (%p2120_p11)   ;;  %v11983_v39 = vld [vmem:[#allocation20 + $0xa0] ss:$8 sps:$4 sm:$0xff] (%p2120_p11)  }
 0x868   : >> { %v10743_v24 = vadd.f32 %v5958_v58, %v5005_v33  ;;  %v5960_v52 = vpop.f32.mrb[26].mxu0  ;;  %6287 = vmatprep.mubr.bf16.mxu0 (%p2120_p11), %v6056_v34  ;;  %v11960_v60 = vld [vmem:[#allocation20 + $0x34] ss:$8 sps:$4 sm:$0xff] (%p2120_p11)   ;;  %v11962_v12 = vld [vmem:[#allocation20 + $0x30] ss:$8 sps:$4 sm:$0xff] (%p2120_p11)  }
 0x869   : >> { %v6015_v28 = vadd.f32 %v10742_v10, %v5999_v32  ;;  %v10744_v63 = vadd.f32 %v5960_v52, %v5007_v31  ;;  %v5962_v38 = vpop.f32.mrb[27].mxu0  ;;  %v11935_v32 = vld [vmem:[#allocation19 + $0xa0] ss:$8 sps:$4 sm:$0xff] (%p2120_p11)   ;;  %v11963_v10 = vld [vmem:[#allocation20 + $0x44] ss:$8 sps:$4 sm:$0xff] (%p2120_p11)  }
 0x86a   : >> { %v6016_v61 = vadd.f32 %v10743_v24, %v6000_v55  ;;  %v10745_v22 = vadd.f32 %v5962_v38, %v5009_v13  ;;  %6677 = vmatpush1.bf16.msra.mxu1 (%p2120_p11), %v11956_v23  ;;  %v11936_v58 = vld [vmem:[#allocation19 + $0xb4] ss:$8 sps:$4 sm:$0xff] (%p2120_p11)   ;;  %v11965_v55 = vld [vmem:[#allocation20 + $0x40] ss:$8 sps:$4 sm:$0xff] (%p2120_p11)   ;;  %v11938_v24 = vld [vmem:[#allocation19 + $0xb0] ss:$8 sps:$4 sm:$0xff] (%p2120_p11)  }
 0x86b   : >> { %6031 = vst [vmem:[#allocation3 + $0x40] sm:$0xff] %v6015_v28  ;;  %v6017_v41 = vadd.f32 %v10744_v63, %v6001_v46  ;;  %6678 = vmatprep.subr.bf16.mxu1 (%p2120_p11), %v11957_v54  ;;  %v11966_v52 = vld [vmem:[#allocation20 + $0x54] ss:$8 sps:$4 sm:$0xff] (%p2120_p11)   ;;  %v11939_v46 = vld [vmem:[#allocation19 + $0xc4] ss:$8 sps:$4 sm:$0xff] (%p2120_p11)  }
 0x86c   : >> { %6032 = vst [vmem:[#allocation3 + $0x48] sm:$0xff] %v6016_v61  ;;  %v6018_v47 = vadd.f32 %v10745_v22, %v6002_v43  ;;  %v11968_v28 = vld [vmem:[#allocation20 + $0x50] ss:$8 sps:$4 sm:$0xff] (%p2120_p11)   ;;  %v11941_v63 = vld [vmem:[#allocation19 + $0xc0] ss:$8 sps:$4 sm:$0xff] (%p2120_p11)  }
 0x86d   : >> { %6033 = vst [vmem:[#allocation3 + $0x50] sm:$0xff] %v6017_v41  ;;  %v11969_v38 = vld [vmem:[#allocation20 + $0x64] ss:$8 sps:$4 sm:$0xff] (%p2120_p11)   ;;  %v11942_v43 = vld [vmem:[#allocation19 + $0xd4] ss:$8 sps:$4 sm:$0xff] (%p2120_p11)  }
 0x86e   : >> { %6034 = vst [vmem:[#allocation3 + $0x58] sm:$0xff] %v6018_v47  ;;  %v5966_v42 = vpop.f32.mrb[28].mxu0  ;;  %6679 = vmatpush1.bf16.msra.mxu1 (%p2120_p11), %v11959_v16  ;;  %v11944_v61 = vld [vmem:[#allocation19 + $0xd0] ss:$8 sps:$4 sm:$0xff] (%p2120_p11)   ;;  %v11945_v22 = vld [vmem:[#allocation19 + $0xe4] ss:$8 sps:$4 sm:$0xff] (%p2120_p11)  }
 0x86f   : >> { %v10746_v48 = vadd.f32 %v5966_v42, %v14115_v5  ;;  %v5968_v19 = vpop.f32.mrb[29].mxu0  ;;  %v11903_v5 = vld [vmem:[#allocation19 + $0x4] ss:$8 sps:$4 sm:$0xff] (%p2120_p11)   ;;  %6680 = vmatprep.subr.bf16.mxu1 (%p2120_p11), %v11960_v60  ;;  %v11947_v41 = vld [vmem:[#allocation19 + $0xe0] ss:$8 sps:$4 sm:$0xff] (%p2120_p11)  }
 0x870   : >> { %v10747_v7 = vadd.f32 %v5968_v19, %v14117_v49  ;;  %v5970_v8 = vpop.f32.mrb[30].mxu0  ;;  %2122 = sbr.rel (!%p2120_p11) target bundleno = 693 (0x2b5), region = 152  ;;  %v11905_v49 = vld [vmem:[#allocation19] ss:$8 sps:$4 sm:$0xff] (%p2120_p11)   ;;  %6255 = vmatprep.subr.bf16.mxu0 (%p2120_p11), %v11903_v5  ;;  %v11948_v47 = vld [vmem:[#allocation19 + $0xf4] ss:$8 sps:$4 sm:$0xff] (%p2120_p11)  }
 0x871   : >> { %v6019_v33 = vadd.f32 %v10746_v48, %v6003_v51  ;;  %v10748_v31 = vadd.f32 %v5970_v8, %v14119_v9  ;;  %v5972_v13 = vpop.f32.mrb[31].mxu0  ;;  %v11906_v9 = vld [vmem:[#allocation19 + $0x14] ss:$8 sps:$4 sm:$0xff] (%p2120_p11)   ;;  %6256 = vmatpush1.bf16.msra.mxu0 (%p2120_p11), %v11905_v49  ;;  %v11950_v42 = vld [vmem:[#allocation19 + $0xf0] ss:$8 sps:$4 sm:$0xff] (%p2120_p11)   ;;  %v14130_v51 = vld [vmem:[#allocation3] sm:$0xff] (%p2120_p11) }
 0x872   : >> { %v6020_v15 = vadd.f32 %v10747_v7, %v6004_v62  ;;  %v10749_v56 = vadd.f32 %v5972_v13, %v14121_v27  ;;  %6257 = vmatprep.subr.bf16.mxu0 (%p2120_p11), %v11906_v9  ;;  %v11909_v27 = vld [vmem:[#allocation19 + $0x24] ss:$8 sps:$4 sm:$0xff] (%p2120_p11)   ;;  %6681 = vmatpush1.bf16.msra.mxu1 (%p2120_p11), %v11962_v12  ;;  %v14132_v48 = vld [vmem:[#allocation3 + $0x10] sm:$0xff] (%p2120_p11)  ;;  %v14136_v62 = vld [vmem:[#allocation3 + $0x38] sm:$0xff] (%p2120_p11) }
 0x873   : >> { %6035 = vst [vmem:[#allocation3 + $0x60] sm:$0xff] %v6019_v33  ;;  %v6021_v40 = vadd.f32 %v10748_v31, %v6005_v59  ;;  %6682 = vmatprep.subr.bf16.mxu1 (%p2120_p11), %v11963_v10  ;;  %v14134_v19 = vld [vmem:[#allocation3 + $0x28] sm:$0xff] (%p2120_p11)  ;;  %v6055_v7 = vpack.c.bf16 (%p2120_p11), %v14132_v48, %v14130_v51  ;;  %v14142_v59 = vld [vmem:[#allocation3 + $0x20] sm:$0xff] (%p2120_p11)  ;;  %v14144_v33 = vld [vmem:[#allocation3 + $0x30] sm:$0xff] (%p2120_p11) }
 0x874   : >> { %6036 = vst [vmem:[#allocation3 + $0x68] sm:$0xff] %v6020_v15  ;;  %v6022_v11 = vadd.f32 %v10749_v56, %v6006_v20  ;;  %v6058_v8 = vpack.c.bf16 (%p2120_p11), %v14136_v62, %v14134_v19  ;;  %v14146_v31 = vld [vmem:[#allocation3 + $0x48] sm:$0xff] (%p2120_p11)  ;;  %v6057_v20 = vpack.c.bf16 (%p2120_p11), %v14144_v33, %v14142_v59  ;;  %v14154_v56 = vld [vmem:[#allocation3 + $0x40] sm:$0xff] (%p2120_p11)  ;;  %v11984_v34 = vld [vmem:[#allocation20 + $0xb4] ss:$8 sps:$4 sm:$0xff] (%p2120_p11)  }
 0x875   : >> { %6037 = vst [vmem:[#allocation3 + $0x70] sm:$0xff] %v6021_v40  ;;  %6258 = vmatpush1.bf16.msra.mxu0 (%p2120_p11), %v11908_v37  ;;  %v14148_v13 = vld [vmem:[#allocation3 + $0x58] sm:$0xff] (%p2120_p11)  ;;  %v14156_v40 = vld [vmem:[#allocation3 + $0x50] sm:$0xff] (%p2120_p11)  ;;  %v11981_v50 = vld [vmem:[#allocation20 + $0xa4] ss:$8 sps:$4 sm:$0xff] (%p2120_p11)  }
 0x876   : >> { %6038 = vst [vmem:[#allocation3 + $0x78] sm:$0xff] %v6022_v11  ;;  %6259 = vmatprep.subr.bf16.mxu0 (%p2120_p11), %v11909_v27  ;;  %6683 = vmatpush1.bf16.msra.mxu1 (%p2120_p11), %v11965_v55  ;;  %v6060_v15 = vpack.c.bf16 (%p2120_p11), %v14148_v13, %v14146_v31  ;;  %v6059_v49 = vpack.c.bf16 (%p2120_p11), %v14156_v40, %v14154_v56  ;;  %v11992_v2 = vld [vmem:[#allocation20 + $0xd0] ss:$8 sps:$4 sm:$0xff] (%p2120_p11)   ;;  %v11993_v14 = vld [vmem:[#allocation20 + $0xe4] ss:$8 sps:$4 sm:$0xff] (%p2120_p11)  }
 0x877   : > { %6684 = vmatprep.subr.bf16.mxu1 %v11966_v52  ;;  %v11995_v29 = vld [vmem:[#allocation20 + $0xe0] ss:$8 sps:$4 sm:$0xff]   ;;  %v11996_v23 = vld [vmem:[#allocation20 + $0xf4] ss:$8 sps:$4 sm:$0xff]  }
 0x879   : > { %6260 = vmatpush1.bf16.msra.mxu0 %v11911_v36 }
 0x87a   : > { %6261 = vmatprep.subr.bf16.mxu0 %v11912_v18  ;;  %6685 = vmatpush1.bf16.msra.mxu1 %v11968_v28  ;;  %v14166_v37 = vld [vmem:[#allocation3 + $0x60] sm:$0xff] }
 0x87b   : > { %6686 = vmatprep.subr.bf16.mxu1 %v11969_v38  ;;  %v14158_v11 = vld [vmem:[#allocation3 + $0x68] sm:$0xff] }
 0x87c   : > { %v14168_v27 = vld [vmem:[#allocation3 + $0x70] sm:$0xff]  ;;  %v11971_v18 = vld [vmem:[#allocation20 + $0x60] ss:$8 sps:$4 sm:$0xff]  }
 0x87d   : > { %6262 = vmatpush1.bf16.msra.mxu0 %v11914_v21  ;;  %v14160_v5 = vld [vmem:[#allocation3 + $0x78] sm:$0xff]  ;;  %v6061_v36 = vpack.c.bf16 %v14168_v27, %v14166_v37 }
 0x87e   : > { %6263 = vmatprep.subr.bf16.mxu0 %v11915_v1  ;;  %v6062_v9 = vpack.c.bf16 %v14160_v5, %v14158_v11  ;;  %6687 = vmatpush1.bf16.msra.mxu1 %v11971_v18  ;;  %v11972_v21 = vld [vmem:[#allocation20 + $0x74] ss:$8 sps:$4 sm:$0xff]   ;;  %v11974_v1 = vld [vmem:[#allocation20 + $0x70] ss:$8 sps:$4 sm:$0xff]  }
 0x87f   : > { %6688 = vmatprep.subr.bf16.mxu1 %v11972_v21 }
 0x881   : > { %6264 = vmatpush1.bf16.msra.mxu0 %v11917_v26  ;;  %v11975_v26 = vld [vmem:[#allocation20 + $0x84] ss:$8 sps:$4 sm:$0xff]  }
 0x882   : > { %6265 = vmatprep.subr.bf16.mxu0 %v11918_v6  ;;  %6689 = vmatpush1.bf16.msra.mxu1 %v11974_v1  ;;  %v11977_v6 = vld [vmem:[#allocation20 + $0x80] ss:$8 sps:$4 sm:$0xff]  }
 0x883   : > { %6690 = vmatprep.subr.bf16.mxu1 %v11975_v26 }
 0x885   : > { %6266 = vmatpush1.bf16.msra.mxu0 %v11920_v17  ;;  %v11978_v17 = vld [vmem:[#allocation20 + $0x94] ss:$8 sps:$4 sm:$0xff]  }
 0x886   : > { %6267 = vmatprep.subr.bf16.mxu0 %v11921_v30  ;;  %6691 = vmatpush1.bf16.msra.mxu1 %v11977_v6  ;;  %v11980_v30 = vld [vmem:[#allocation20 + $0x90] ss:$8 sps:$4 sm:$0xff]  }
 0x887   : > { %6692 = vmatprep.subr.bf16.mxu1 %v11978_v17 }
 0x889   : > { %6268 = vmatpush1.bf16.msra.mxu0 %v11923_v57  ;;  %v11986_v57 = vld [vmem:[#allocation20 + $0xb0] ss:$8 sps:$4 sm:$0xff]  }
 0x88a   : > { %6269 = vmatprep.subr.bf16.mxu0 %v11924_v25  ;;  %6693 = vmatpush1.bf16.msra.mxu1 %v11980_v30  ;;  %v11987_v25 = vld [vmem:[#allocation20 + $0xc4] ss:$8 sps:$4 sm:$0xff]  }
 0x88b   : > { %6694 = vmatprep.subr.bf16.mxu1 %v11981_v50 }
 0x88d   : > { %6270 = vmatpush1.bf16.msra.mxu0 %v11926_v53  ;;  %v11989_v53 = vld [vmem:[#allocation20 + $0xc0] ss:$8 sps:$4 sm:$0xff]  }
 0x88e   : > { %6271 = vmatprep.subr.bf16.mxu0 %v11927_v44  ;;  %6695 = vmatpush1.bf16.msra.mxu1 %v11983_v39  ;;  %v11990_v44 = vld [vmem:[#allocation20 + $0xd4] ss:$8 sps:$4 sm:$0xff]  }
 0x88f   : > { %6696 = vmatprep.subr.bf16.mxu1 %v11984_v34 }
 0x891   : > { %6272 = vmatpush1.bf16.msra.mxu0 %v11929_v35  ;;  %v11998_v35 = vld [vmem:[#allocation20 + $0xf0] ss:$8 sps:$4 sm:$0xff]  }
 0x892   : > { %6273 = vmatprep.subr.bf16.mxu0 %v11930_v4  ;;  %6697 = vmatpush1.bf16.msra.mxu1 %v11986_v57 }
 0x893   : > { %6698 = vmatprep.subr.bf16.mxu1 %v11987_v25 }
 0x895   : > { %6274 = vmatpush1.bf16.msra.mxu0 %v11932_v0 }
 0x896   : > { %6275 = vmatprep.subr.bf16.mxu0 %v11933_v3  ;;  %6699 = vmatpush1.bf16.msra.mxu1 %v11989_v53 }
 0x897   : > { %6700 = vmatprep.subr.bf16.mxu1 %v11990_v44 }
 0x899   : > { %6276 = vmatpush1.bf16.msra.mxu0 %v11935_v32 }
 0x89a   : > { %6277 = vmatprep.subr.bf16.mxu0 %v11936_v58  ;;  %6701 = vmatpush1.bf16.msra.mxu1 %v11992_v2 }
 0x89b   : > { %6702 = vmatprep.subr.bf16.mxu1 %v11993_v14 }
 0x89d   : > { %6278 = vmatpush1.bf16.msra.mxu0 %v11938_v24 }
 0x89e   : > { %6279 = vmatprep.subr.bf16.mxu0 %v11939_v46  ;;  %6703 = vmatpush1.bf16.msra.mxu1 %v11995_v29 }
 0x89f   : > { %6704 = vmatprep.subr.bf16.mxu1 %v11996_v23 }
 0x8a1   : > { %6280 = vmatpush1.bf16.msra.mxu0 %v11941_v63 }
 0x8a2   : > { %6281 = vmatprep.subr.bf16.mxu0 %v11942_v43  ;;  %6705 = vmatpush1.bf16.msra.mxu1 %v11998_v35 }
 0x8a5   : > { %6282 = vmatpush1.bf16.msra.mxu0 %v11944_v61 }
 0x8a6   : > { %6283 = vmatprep.subr.bf16.mxu0 %v11945_v22 }
 0x8a9   : > { %6284 = vmatpush1.bf16.msra.mxu0 %v11947_v41 }
 0x8aa   : > { %6285 = vmatprep.subr.bf16.mxu0 %v11948_v47 }
 0x8ad   : > { %6286 = vmatpush1.bf16.msra.mxu0 %v11950_v42 }
 0x8b0   : > { %6288 = vmatmul.mubr.bf16.vlgmr.msra.gmra.mrb[0].mxu0 %v6055_v7 }
 0x8b1   : > { %6297 = vmatprep.mubr.bf16.mxu0 %v6058_v8 }
 0x8b8   : > { %6298 = vmatmul.mubr.bf16.gmra.mrb[4].mxu0 %v6057_v20 }
 0x8b9   : > { %6307 = vmatprep.mubr.bf16.mxu0 %v6060_v15 }
 0x8c0   : > { %6308 = vmatmul.mubr.bf16.gmra.mrb[8].mxu0 %v6059_v49 }
 0x8c1   : > { %6317 = vmatprep.mubr.bf16.mxu0 %v6062_v9 }
 0x8c8   : > { %6318 = vmatmul.mubr.bf16.gmra.mrb[12].mxu0 %v6061_v36 }
 0x983   : > { %v6289_v54 = vpop.f32.mrb[0].mxu0 }
 0x984   : > { %v9894_v4 = vmul.f32 -1.442695, %v6289_v54  ;;  %v6291_v0 = vpop.f32.mrb[1].mxu0  ;;  %v14172_v54 = vstv %s6440_s11 }
 0x985   : > { %v9895_v3 = vmul.f32 -1.442695, %v6291_v0  ;;  %v6293_v16 = vpop.f32.mrb[2].mxu0 }
 0x986   : > { %12143 = vpow2.f32 %v9894_v4  ;;  %v9896_v60 = vmul.f32 -1.442695, %v6293_v16  ;;  %v6295_v12 = vpop.f32.mrb[3].mxu0  ;;  %v12271_v16 = vld [vmem:[#allocation3 + $0x8] sm:$0xff] }
 0x987   : > { %12145 = vpow2.f32 %v9895_v3  ;;  %v9897_v32 = vmul.f32 -1.442695, %v6295_v12 }
 0x988   : > { %12147 = vpow2.f32 %v9896_v60 }
 0x989   : > { %12149 = vpow2.f32 %v9897_v32 }
 0x98b   : > { %v6299_v10 = vpop.f32.mrb[4].mxu0 }
 0x98c   : > { %v9898_v58 = vmul.f32 -1.442695, %v6299_v10  ;;  %v6301_v55 = vpop.f32.mrb[5].mxu0 }
 0x98d   : > { %v9899_v24 = vmul.f32 -1.442695, %v6301_v55  ;;  %v6303_v52 = vpop.f32.mrb[6].mxu0 }
 0x98e   : > { %12151 = vpow2.f32 %v9898_v58  ;;  %v9900_v46 = vmul.f32 -1.442695, %v6303_v52  ;;  %v6305_v28 = vpop.f32.mrb[7].mxu0  ;;  %v12272_v58 = vld [vmem:[#allocation3 + $0x18] sm:$0xff] }
 0x98f   : > { %12153 = vpow2.f32 %v9899_v24  ;;  %v9901_v63 = vmul.f32 -1.442695, %v6305_v28 }
 0x990   : > { %v12144_v38 = vpop.eup %12143  ;;  %12155 = vpow2.f32 %v9900_v46 }
 0x991   : > { %v12146_v43 = vpop.eup %12145  ;;  %v6376_v61 = vadd.f32 1.0, %v12144_v38  ;;  %12157 = vpow2.f32 %v9901_v63 }
 0x992   : > { %v12148_v22 = vpop.eup %12147  ;;  %v6377_v41 = vadd.f32 1.0, %v12146_v43 }
 0x993   : > { %v12150_v47 = vpop.eup %12149  ;;  %12159 = vrcp.f32 %v6376_v61  ;;  %v6378_v42 = vadd.f32 1.0, %v12148_v22  ;;  %v6309_v7 = vpop.f32.mrb[8].mxu0 }
 0x994   : > { %12161 = vrcp.f32 %v6377_v41  ;;  %v6379_v8 = vadd.f32 1.0, %v12150_v47  ;;  %v9902_v20 = vmul.f32 -1.442695, %v6309_v7  ;;  %v6311_v15 = vpop.f32.mrb[9].mxu0 }
 0x995   : > { %12163 = vrcp.f32 %v6378_v42  ;;  %v9903_v49 = vmul.f32 -1.442695, %v6311_v15  ;;  %v6313_v9 = vpop.f32.mrb[10].mxu0 }
 0x996   : > { %12165 = vrcp.f32 %v6379_v8  ;;  %v9904_v36 = vmul.f32 -1.442695, %v6313_v9  ;;  %v6315_v18 = vpop.f32.mrb[11].mxu0 }
 0x997   : > { %12167 = vpow2.f32 %v9902_v20  ;;  %v9905_v21 = vmul.f32 -1.442695, %v6315_v18 }
 0x998   : > { %v12152_v1 = vpop.eup %12151  ;;  %12169 = vpow2.f32 %v9903_v49 }
 0x999   : > { %v12154_v26 = vpop.eup %12153  ;;  %v6380_v6 = vadd.f32 1.0, %v12152_v1  ;;  %12171 = vpow2.f32 %v9904_v36 }
 0x99a   : > { %v12156_v17 = vpop.eup %12155  ;;  %v6381_v30 = vadd.f32 1.0, %v12154_v26  ;;  %12173 = vpow2.f32 %v9905_v21 }
 0x99b   : > { %v12158_v50 = vpop.eup %12157  ;;  %12175 = vrcp.f32 %v6380_v6  ;;  %v6382_v39 = vadd.f32 1.0, %v12156_v17  ;;  %v6319_v34 = vpop.f32.mrb[12].mxu0 }
 0x99c   : > { %12177 = vrcp.f32 %v6381_v30  ;;  %v6383_v57 = vadd.f32 1.0, %v12158_v50  ;;  %v9906_v25 = vmul.f32 -1.442695, %v6319_v34  ;;  %v6321_v53 = vpop.f32.mrb[13].mxu0 }
 0x99d   : > { %v12160_v44 = vpop.eup %12159  ;;  %12179 = vrcp.f32 %v6382_v39  ;;  %v9907_v2 = vmul.f32 -1.442695, %v6321_v53  ;;  %v6323_v14 = vpop.f32.mrb[14].mxu0 }
 0x99e   : > { %v12162_v29 = vpop.eup %12161  ;;  %12181 = vrcp.f32 %v6383_v57  ;;  %v9908_v23 = vmul.f32 -1.442695, %v6323_v14  ;;  %v6325_v35 = vpop.f32.mrb[15].mxu0  ;;  %v6424_v4 = vmul.f32 %v12160_v44, %v14130_v51 }
 0x99f   : > { %v12164_v0 = vpop.eup %12163  ;;  %12183 = vpow2.f32 %v9906_v25  ;;  %v9909_v3 = vmul.f32 -1.442695, %v6325_v35  ;;  %v6425_v60 = vmul.f32 %v12271_v16, %v12162_v29 }
 0x9a0   : > { %v12166_v12 = vpop.eup %12165  ;;  %12185 = vpow2.f32 %v9907_v2  ;;  %v6426_v32 = vmul.f32 %v12164_v0, %v14132_v48  ;;  %v6442_v51 = vsub.f32 %v6424_v4, %v14172_v54 }
 0x9a1   : > { %v12168_v10 = vpop.eup %12167  ;;  %12187 = vpow2.f32 %v9908_v23  ;;  %v6427_v55 = vmul.f32 %v12272_v58, %v12166_v12  ;;  %v6443_v24 = vsub.f32 %v6425_v60, %v14172_v54 }
 0x9a2   : > { %v12170_v52 = vpop.eup %12169  ;;  %v6384_v46 = vadd.f32 1.0, %v12168_v10  ;;  %12189 = vpow2.f32 %v9909_v3  ;;  %v6444_v28 = vsub.f32 %v6426_v32, %v14172_v54  ;;  %v14186_v20 = vmax.f32 %v6442_v51, 0.0 }
 0x9a3   : > { %v12172_v63 = vpop.eup %12171  ;;  %v6385_v38 = vadd.f32 1.0, %v12170_v52  ;;  %v6445_v43 = vsub.f32 %v6427_v55, %v14172_v54  ;;  %v14182_v42 = vmax.f32 %v6443_v24, 0.0 }
 0x9a4   : > { %v12174_v61 = vpop.eup %12173  ;;  %12191 = vrcp.f32 %v6384_v46  ;;  %v6386_v48 = vadd.f32 1.0, %v12172_v63  ;;  %v14180_v22 = vmax.f32 %v6444_v28, 0.0 }
 0x9a5   : > { %v12176_v41 = vpop.eup %12175  ;;  %12193 = vrcp.f32 %v6385_v38  ;;  %v6387_v47 = vadd.f32 1.0, %v12174_v61  ;;  %v14184_v7 = vmax.f32 %v6445_v43, 0.0 }
 0x9a6   : > { %v12178_v8 = vpop.eup %12177  ;;  %12195 = vrcp.f32 %v6386_v48  ;;  %v6428_v15 = vmul.f32 %v12176_v41, %v14142_v59  ;;  %v6474_v21 = vpack.c.bf16 %v14180_v22, %v14186_v20 }
 0x9a7   : > { %v12180_v49 = vpop.eup %12179  ;;  %12197 = vrcp.f32 %v6387_v47  ;;  %v6475_v9 = vpack.c.bf16 %v14184_v7, %v14182_v42  ;;  %v6429_v36 = vmul.f32 %v12178_v8, %v14134_v19 }
 0x9a8   : > { %v12182_v18 = vpop.eup %12181  ;;  %v6430_v1 = vmul.f32 %v12180_v49, %v14144_v33  ;;  %v6446_v50 = vsub.f32 %v6428_v15, %v14172_v54 }
 0x9a9   : > { %v12184_v26 = vpop.eup %12183  ;;  %6706 = vmatprep.mubr.bf16.mxu1 %v6475_v9  ;;  %v6431_v6 = vmul.f32 %v12182_v18, %v14136_v62  ;;  %v6447_v17 = vsub.f32 %v6429_v36, %v14172_v54  ;;  %v11999_v18 = vld [vmem:[#allocation11 + $0x240] sm:$0xff]  }
 0x9aa   : > { %v12186_v59 = vpop.eup %12185  ;;  %v6388_v30 = vadd.f32 1.0, %v12184_v26  ;;  %6707 = vmatmul.mubr.bf16.vlgmr.msra.gmra.mrb[0].mxu1 %v6474_v21  ;;  %v6448_v39 = vsub.f32 %v6430_v1, %v14172_v54  ;;  %v14206_v29 = vmax.f32 %v6446_v50, 0.0  ;;  %v12000_v21 = vld [vmem:[#allocation11 + $0x200] sm:$0xff]   ;;  %10318 = vmatprep.subr.bf16.mxu1 %v11999_v18  ;;  %v12002_v1 = vld [vmem:[#allocation11 + $0x208] sm:$0xff]   ;;  %v12004_v26 = vld [vmem:[#allocation11 + $0x250] sm:$0xff]  }
 0x9ab   : > { %v12188_v19 = vpop.eup %12187  ;;  %v6389_v34 = vadd.f32 1.0, %v12186_v59  ;;  %v6449_v57 = vsub.f32 %v6431_v6, %v14172_v54  ;;  %v14202_v44 = vmax.f32 %v6447_v17, 0.0  ;;  %10319 = vmatpush3.bf16.msra.mxu1 %v12000_v21  ;;  %v12003_v6 = vld [vmem:[#allocation11 + $0x1c0] sm:$0xff]   ;;  %v12006_v17 = vld [vmem:[#allocation11 + $0x210] sm:$0xff]   ;;  %v12007_v50 = vld [vmem:[#allocation11 + $0x1c8] sm:$0xff]  }
 0x9ac   : > { %v12190_v25 = vpop.eup %12189  ;;  %12199 = vrcp.f32 %v6388_v30  ;;  %v6390_v33 = vadd.f32 1.0, %v12188_v19  ;;  %v14200_v53 = vmax.f32 %v6448_v39, 0.0  ;;  %v12005_v59 = vld [vmem:[#allocation11 + $0x180] sm:$0xff]   ;;  %10278 = vmatprep.subr.bf16.mxu0 %v12003_v6  ;;  %v12008_v30 = vld [vmem:[#allocation11 + $0x258] sm:$0xff]   ;;  %v12009_v19 = vld [vmem:[#allocation11 + $0x188] sm:$0xff]  }
 0x9ad   : > { %12201 = vrcp.f32 %v6389_v34  ;;  %v6391_v62 = vadd.f32 1.0, %v12190_v25  ;;  %v14204_v2 = vmax.f32 %v6449_v57, 0.0  ;;  %10279 = vmatpush3.bf16.msra.mxu0 %v12005_v59  ;;  %v12010_v39 = vld [vmem:[#allocation11 + $0x218] sm:$0xff]   ;;  %v12012_v34 = vld [vmem:[#allocation11 + $0x260] sm:$0xff]   ;;  %v12011_v57 = vld [vmem:[#allocation11 + $0x1d0] sm:$0xff]  }
 0x9ae   : > { %v12192_v14 = vpop.eup %12191  ;;  %12203 = vrcp.f32 %v6390_v33  ;;  %v6476_v3 = vpack.c.bf16 %v14200_v53, %v14206_v29  ;;  %10280 = vmatprep.subr.bf16.mxu0 %v12007_v50  ;;  %v12014_v25 = vld [vmem:[#allocation11 + $0x220] sm:$0xff]   ;;  %v12013_v33 = vld [vmem:[#allocation11 + $0x190] sm:$0xff]  }
 0x9af   : > { %v12194_v23 = vpop.eup %12193  ;;  %12205 = vrcp.f32 %v6391_v62  ;;  %v6477_v35 = vpack.c.bf16 %v14204_v2, %v14202_v44  ;;  %v6432_v4 = vmul.f32 %v12192_v14, %v14154_v56  ;;  %v12016_v62 = vld [vmem:[#allocation11 + $0x268] sm:$0xff]   ;;  %v12015_v14 = vld [vmem:[#allocation11 + $0x1d8] sm:$0xff]  }
 0x9b0   : > { %v12196_v0 = vpop.eup %12195  ;;  %v6433_v16 = vmul.f32 %v12194_v23, %v14146_v31  ;;  %v12018_v23 = vld [vmem:[#allocation11 + $0x228] sm:$0xff]  }
 0x9b1   : > { %v12198_v60 = vpop.eup %12197  ;;  %6716 = vmatprep.mubr.bf16.mxu1 %v6477_v35  ;;  %v6434_v12 = vmul.f32 %v12196_v0, %v14156_v40  ;;  %v6450_v58 = vsub.f32 %v6432_v4, %v14172_v54  ;;  %10281 = vmatpush3.bf16.msra.mxu0 %v12009_v19  ;;  %v12017_v35 = vld [vmem:[#allocation11 + $0x198] sm:$0xff]   ;;  %v12020_v4 = vld [vmem:[#allocation11 + $0x270] sm:$0xff]   ;;  %v12019_v0 = vld [vmem:[#allocation11 + $0x1e0] sm:$0xff]  }
 0x9b2   : > { %6717 = vmatmul.mubr.bf16.gmra.mrb[4].mxu1 %v6476_v3  ;;  %v6435_v32 = vmul.f32 %v12198_v60, %v14148_v13  ;;  %v6451_v10 = vsub.f32 %v6433_v16, %v14172_v54  ;;  %10282 = vmatprep.subr.bf16.mxu0 %v12011_v57  ;;  %v12022_v3 = vld [vmem:[#allocation11 + $0x230] sm:$0xff]   ;;  %v12021_v16 = vld [vmem:[#allocation11 + $0x1a0] sm:$0xff]   ;;  %v12024_v60 = vld [vmem:[#allocation11 + $0x278] sm:$0xff]  }
 0x9b3   : > { %v6452_v55 = vsub.f32 %v6434_v12, %v14172_v54  ;;  %v14226_v40 = vmax.f32 %v6450_v58, 0.0  ;;  %v12023_v12 = vld [vmem:[#allocation11 + $0x1e8] sm:$0xff]   ;;  %v12028_v58 = vld [vmem:[#allocation11 + $0x40] sm:$0xff]  }
 0x9b4   : > { %v6453_v56 = vsub.f32 %v6435_v32, %v14172_v54  ;;  %v14222_v46 = vmax.f32 %v6451_v10, 0.0  ;;  %v12026_v32 = vld [vmem:[#allocation11 + $0x238] sm:$0xff]   ;;  %v12025_v10 = vld [vmem:[#allocation11 + $0x1a8] sm:$0xff]  }
 0x9b5   : > { %v14220_v24 = vmax.f32 %v6452_v55, 0.0  ;;  %10283 = vmatpush3.bf16.msra.mxu0 %v12013_v33  ;;  %v12027_v55 = vld [vmem:[#allocation11 + $0x1f0] sm:$0xff]  }
 0x9b6   : > { %v12200_v52 = vpop.eup %12199  ;;  %v14224_v31 = vmax.f32 %v6453_v56, 0.0  ;;  %10284 = vmatprep.subr.bf16.mxu0 %v12015_v14  ;;  %v12029_v56 = vld [vmem:[#allocation11 + $0x1b0] sm:$0xff]  }
 0x9b7   : > { %v12202_v51 = vpop.eup %12201  ;;  %v6436_v13 = vmul.f32 %v12200_v52, %v14166_v37  ;;  %v6478_v61 = vpack.c.bf16 %v14220_v24, %v14226_v40  ;;  %v12031_v52 = vld [vmem:[#allocation11 + $0x1f8] sm:$0xff]  }
 0x9b8   : > { %v12204_v28 = vpop.eup %12203  ;;  %v6479_v63 = vpack.c.bf16 %v14224_v31, %v14222_v46  ;;  %v6437_v38 = vmul.f32 %v12202_v51, %v14158_v11  ;;  %v12033_v51 = vld [vmem:[#allocation11 + $0x1b8] sm:$0xff]  }
 0x9b9   : > { %v12206_v43 = vpop.eup %12205  ;;  %v6438_v48 = vmul.f32 %v12204_v28, %v14168_v27  ;;  %v6454_v37 = vsub.f32 %v6436_v13, %v14172_v54  ;;  %10285 = vmatpush3.bf16.msra.mxu0 %v12017_v35  ;;  %v12035_v13 = vld [vmem:[#allocation11 + $0x2c0] sm:$0xff]  }
 0x9ba   : > { %6726 = vmatprep.mubr.bf16.mxu1 %v6479_v63  ;;  %v6439_v41 = vmul.f32 %v12206_v43, %v14160_v5  ;;  %v6455_v47 = vsub.f32 %v6437_v38, %v14172_v54  ;;  %10286 = vmatprep.subr.bf16.mxu0 %v12019_v0 }
 0x9bb   : > { %6727 = vmatmul.mubr.bf16.gmra.mrb[8].mxu1 %v6478_v61  ;;  %v6456_v8 = vsub.f32 %v6438_v48, %v14172_v54  ;;  %v14246_v36 = vmax.f32 %v6454_v37, 0.0 }
 0x9bc   : > { %v6457_v15 = vsub.f32 %v6439_v41, %v14172_v54  ;;  %v14242_v11 = vmax.f32 %v6455_v47, 0.0  ;;  %v12001_v54 = vld [vmem:[#allocation11 + $0x248] sm:$0xff]  }
 0x9bd   : > { %v14240_v49 = vmax.f32 %v6456_v8, 0.0  ;;  %10320 = vmatprep.subr.bf16.mxu1 %v12001_v54  ;;  %10287 = vmatpush3.bf16.msra.mxu0 %v12021_v16 }
 0x9be   : > { %v14244_v9 = vmax.f32 %v6457_v15, 0.0  ;;  %10321 = vmatpush3.bf16.msra.mxu1 %v12002_v1  ;;  %10288 = vmatprep.subr.bf16.mxu0 %v12023_v12 }
 0x9bf   : > { %v6480_v27 = vpack.c.bf16 %v14240_v49, %v14246_v36  ;;  %10322 = vmatprep.subr.bf16.mxu1 %v12004_v26 }
 0x9c0   : > { %v6481_v5 = vpack.c.bf16 %v14244_v9, %v14242_v11 }
 0x9c1   : > { %10289 = vmatpush3.bf16.msra.mxu0 %v12025_v10 }
 0x9c2   : > { %6736 = vmatprep.mubr.bf16.mxu1 %v6481_v5  ;;  %10323 = vmatpush3.bf16.msra.mxu1 %v12006_v17 }
 0x9c3   : > { %6737 = vmatmul.mubr.bf16.gmra.mrb[12].mxu1 %v6480_v27  ;;  %10324 = vmatprep.subr.bf16.mxu1 %v12008_v30 }
 0x9c4   : > { %10290 = vmatprep.subr.bf16.mxu0 %v12027_v55 }
 0x9c5   : > { %10291 = vmatpush3.bf16.msra.mxu0 %v12029_v56 }
 0x9c6   : > { %10325 = vmatpush3.bf16.msra.mxu1 %v12010_v39  ;;  %10292 = vmatprep.subr.bf16.mxu0 %v12031_v52 }
 0x9c7   : > { %10326 = vmatprep.subr.bf16.mxu1 %v12012_v34 }
 0x9c9   : > { %10293 = vmatpush3.bf16.msra.mxu0 %v12033_v51 }
 0x9ca   : > { %10327 = vmatpush3.bf16.msra.mxu1 %v12014_v25  ;;  %10358 = vmatprep.subr.bf16.mxu0 %v12035_v13 }
 0x9cb   : > { %10328 = vmatprep.subr.bf16.mxu1 %v12016_v62 }
 0x9ce   : > { %10329 = vmatpush3.bf16.msra.mxu1 %v12018_v23 }
 0x9cf   : > { %10330 = vmatprep.subr.bf16.mxu1 %v12020_v4 }
 0x9d2   : > { %10331 = vmatpush3.bf16.msra.mxu1 %v12022_v3 }
 0x9d3   : > { %10332 = vmatprep.subr.bf16.mxu1 %v12024_v60 }
 0x9d6   : > { %10333 = vmatpush3.bf16.msra.mxu1 %v12026_v32 }
 0x9d7   : > { %10398 = vmatprep.subr.bf16.mxu1 %v12028_v58 }
 0xa7d   : > { %v6708_v28 = vpop.f32.mrb[0].mxu1 }
 0xa7e   : > { %v9942_v63 = vmul.f32 -1.442695, %v6708_v28  ;;  %v6710_v38 = vpop.f32.mrb[1].mxu1 }
 0xa7f   : > { %v9943_v43 = vmul.f32 -1.442695, %v6710_v38  ;;  %v6712_v61 = vpop.f32.mrb[2].mxu1 }
 0xa80   : > { %12207 = vpow2.f32 %v9942_v63  ;;  %v9944_v48 = vmul.f32 -1.442695, %v6712_v61  ;;  %v6714_v41 = vpop.f32.mrb[3].mxu1 }
 0xa81   : > { %12209 = vpow2.f32 %v9943_v43  ;;  %v9945_v47 = vmul.f32 -1.442695, %v6714_v41 }
 0xa82   : > { %12211 = vpow2.f32 %v9944_v48 }
 0xa83   : > { %12213 = vpow2.f32 %v9945_v47 }
 0xa85   : > { %v6718_v37 = vpop.f32.mrb[4].mxu1 }
 0xa86   : > { %v9946_v8 = vmul.f32 -1.442695, %v6718_v37  ;;  %v6720_v15 = vpop.f32.mrb[5].mxu1 }
 0xa87   : > { %v9947_v5 = vmul.f32 -1.442695, %v6720_v15  ;;  %v6722_v27 = vpop.f32.mrb[6].mxu1 }
 0xa88   : > { %12215 = vpow2.f32 %v9946_v8  ;;  %v9948_v18 = vmul.f32 -1.442695, %v6722_v27  ;;  %v6724_v21 = vpop.f32.mrb[7].mxu1 }
 0xa89   : > { %12217 = vpow2.f32 %v9947_v5  ;;  %v9949_v54 = vmul.f32 -1.442695, %v6724_v21 }
 0xa8a   : > { %v12208_v1 = vpop.eup %12207  ;;  %12219 = vpow2.f32 %v9948_v18 }
 0xa8b   : > { %v12210_v26 = vpop.eup %12209  ;;  %v6795_v6 = vadd.f32 1.0, %v12208_v1  ;;  %12221 = vpow2.f32 %v9949_v54  ;;  %v12030_v1 = vld [vmem:[#allocation11] sm:$0xff]  }
 0xa8c   : > { %v12212_v17 = vpop.eup %12211  ;;  %v6796_v59 = vadd.f32 1.0, %v12210_v26 }
 0xa8d   : > { %v12214_v30 = vpop.eup %12213  ;;  %12223 = vrcp.f32 %v6795_v6  ;;  %v6797_v50 = vadd.f32 1.0, %v12212_v17 }
 0xa8e   : > { %12225 = vrcp.f32 %v6796_v59  ;;  %v6798_v39 = vadd.f32 1.0, %v12214_v30  ;;  %v6728_v19 = vpop.f32.mrb[8].mxu1  ;;  %v12032_v59 = vld [vmem:[#allocation11 + $0x48] sm:$0xff]  }
 0xa8f   : > { %12227 = vrcp.f32 %v6797_v50  ;;  %v9950_v34 = vmul.f32 -1.442695, %v6728_v19  ;;  %v6730_v57 = vpop.f32.mrb[9].mxu1 }
 0xa90   : > { %12229 = vrcp.f32 %v6798_v39  ;;  %v9951_v25 = vmul.f32 -1.442695, %v6730_v57  ;;  %v6732_v33 = vpop.f32.mrb[10].mxu1 }
 0xa91   : > { %12231 = vpow2.f32 %v9950_v34  ;;  %v9952_v62 = vmul.f32 -1.442695, %v6732_v33  ;;  %v6734_v14 = vpop.f32.mrb[11].mxu1 }
 0xa92   : > { %v12216_v23 = vpop.eup %12215  ;;  %12233 = vpow2.f32 %v9951_v25  ;;  %v9953_v35 = vmul.f32 -1.442695, %v6734_v14 }
 0xa93   : > { %v12218_v4 = vpop.eup %12217  ;;  %v6799_v0 = vadd.f32 1.0, %v12216_v23  ;;  %12235 = vpow2.f32 %v9952_v62 }
 0xa94   : > { %v12220_v3 = vpop.eup %12219  ;;  %v6800_v16 = vadd.f32 1.0, %v12218_v4  ;;  %12237 = vpow2.f32 %v9953_v35  ;;  %v12034_v35 = vld [vmem:[#allocation11 + $0x8] sm:$0xff]  }
 0xa95   : > { %v12222_v60 = vpop.eup %12221  ;;  %12239 = vrcp.f32 %v6799_v0  ;;  %v6801_v12 = vadd.f32 1.0, %v12220_v3 }
 0xa96   : > { %12241 = vrcp.f32 %v6800_v16  ;;  %v6802_v32 = vadd.f32 1.0, %v12222_v60  ;;  %v6738_v10 = vpop.f32.mrb[12].mxu1  ;;  %v12036_v60 = vld [vmem:[#allocation11 + $0x50] sm:$0xff]  }
 0xa97   : > { %v12224_v58 = vpop.eup %12223  ;;  %12243 = vrcp.f32 %v6801_v12  ;;  %v9954_v55 = vmul.f32 -1.442695, %v6738_v10  ;;  %v6740_v56 = vpop.f32.mrb[13].mxu1 }
 0xa98   : > { %v12226_v52 = vpop.eup %12225  ;;  %12245 = vrcp.f32 %v6802_v32  ;;  %v9955_v51 = vmul.f32 -1.442695, %v6740_v56  ;;  %v6742_v13 = vpop.f32.mrb[14].mxu1  ;;  %v6843_v28 = vmul.f32 %v12224_v58, %v14186_v20 }
 0xa99   : > { %v12228_v63 = vpop.eup %12227  ;;  %12247 = vpow2.f32 %v9954_v55  ;;  %v9956_v38 = vmul.f32 -1.442695, %v6742_v13  ;;  %v6744_v43 = vpop.f32.mrb[15].mxu1  ;;  %v6844_v61 = vmul.f32 %v12226_v52, %v14182_v42 }
 0xa9a   : > { %v12230_v48 = vpop.eup %12229  ;;  %v14255_v41 = vmul.f32 %v12228_v63, %v14180_v22  ;;  %12249 = vpow2.f32 %v9955_v51  ;;  %v9957_v47 = vmul.f32 -1.442695, %v6744_v43  ;;  %v14257_v37 = vpack.c.bf16 %v6843_v28, %v6843_v28 }
 0xa9b   : > { %v12232_v8 = vpop.eup %12231  ;;  %12251 = vpow2.f32 %v9956_v38  ;;  %v14260_v15 = vmul.f32 %v12230_v48, %v14184_v7  ;;  %v14262_v20 = vpack.c.bf16 %v6844_v61, %v6844_v61 }
 0xa9c   : > { %v12234_v5 = vpop.eup %12233  ;;  %v6803_v27 = vadd.f32 1.0, %v12232_v8  ;;  %12253 = vpow2.f32 %v9957_v47  ;;  %v10183_v42 = vpack.c.bf16 %v14255_v41, %v6843_v28  ;;  %v14267_v22 = vpack.c.bf16 %v14255_v41, %v14255_v41  ;;  %v12038_v47 = vld [vmem:[#allocation11 + $0x10] sm:$0xff]  }
 0xa9d   : > { %v12236_v18 = vpop.eup %12235  ;;  %v6804_v21 = vadd.f32 1.0, %v12234_v5  ;;  %v10184_v54 = vpack.c.bf16 %v14260_v15, %v6844_v61  ;;  %v14272_v7 = vpack.c.bf16 %v14260_v15, %v14260_v15  ;;  %v6883_v26 = vshrl.u32 %v14262_v20, 16 }
 0xa9e   : > { %v12238_v6 = vpop.eup %12237  ;;  %12255 = vrcp.f32 %v6803_v27  ;;  %v6805_v17 = vadd.f32 1.0, %v12236_v18  ;;  %v6886_v30 = vshll.u32 %v14262_v20, 16  ;;  %v14962_v50 = vshrl.u32 %v14257_v37, 16 }
 0xa9f   : > { %v12240_v39 = vpop.eup %12239  ;;  %12257 = vrcp.f32 %v6804_v21  ;;  %v6806_v19 = vadd.f32 1.0, %v12238_v6  ;;  %7804 = vmatprep.mubr.bf16.mxu1 %v10184_v54  ;;  %v6885_v34 = vrot.slane %v6883_v26, 7  ;;  %v14964_v57 = vshrl.u32 %v14272_v7, 16  ;;  %v12040_v21 = vld [vmem:[#allocation11 + $0x58] sm:$0xff]  }
 0xaa0   : > { %v12242_v25 = vpop.eup %12241  ;;  %12259 = vrcp.f32 %v6805_v17  ;;  %7805 = vmatmul.mubr.bf16.vlgmr.msra.gmra.mrb[16].mxu1 %v10183_v42  ;;  %v6900_v33 = vshll.u32 %v14272_v7, 16  ;;  %v14282_v62 = vmul.f32 %v12240_v39, %v14206_v29  ;;  %v6878_v14 = vrot.slane %v14962_v50, 7  ;;  %v12037_v39 = vld [vmem:[#allocation11 + $0x280] sm:$0xff]  }
 0xaa1   : > { %v12244_v23 = vpop.eup %12243  ;;  %12261 = vrcp.f32 %v6806_v19  ;;  %10399 = vmatpush3.bf16.msra.mxu1 %v12030_v1  ;;  %v14287_v4 = vmul.f32 %v12242_v25, %v14202_v44  ;;  %v6888_v0 = vor.u32 %v6886_v30, %v6885_v34  ;;  %v6899_v3 = vrot.slane %v14964_v57, 7 }
 0xaa2   : > { %v12246_v16 = vpop.eup %12245  ;;  %10400 = vmatprep.subr.bf16.mxu1 %v12032_v59  ;;  %v14294_v29 = vmul.f32 %v12244_v23, %v14200_v53  ;;  %v6879_v12 = vshll.u32 %v14257_v37, 16  ;;  %v14950_v32 = vshrl.u32 %v14267_v22, 16  ;;  %v14959_v10 = vshll.u32 %v14267_v22, 16  ;;  %v12039_v23 = vld [vmem:[#allocation11 + $0x2c8] sm:$0xff]  }
 0xaa3   : > { %v12248_v44 = vpop.eup %12247  ;;  %v14300_v58 = vmul.f32 %v12246_v16, %v14204_v2  ;;  %v6902_v55 = vor.u32 %v6900_v33, %v6899_v3  ;;  %v7004_v52 = vsel %vm13256_vm5, 0, %v6888_v0  ;;  %v14308_v53 = vpack.c.bf16 %v14287_v4, %v14287_v4 }
 0xaa4   : > { %v12250_v51 = vpop.eup %12249  ;;  %v6807_v13 = vadd.f32 1.0, %v12248_v44  ;;  %v10185_v28 = vpack.c.bf16 %v14294_v29, %v14282_v62  ;;  %v6881_v63 = vor.u32 %v6879_v12, %v6878_v14  ;;  %v6892_v2 = vrot.slane %v14950_v32, 7 }
 0xaa5   : > { %v12252_v38 = vpop.eup %12251  ;;  %v6808_v43 = vadd.f32 1.0, %v12250_v51  ;;  %10401 = vmatpush3.bf16.msra.mxu1 %v12034_v35  ;;  %v10186_v61 = vpack.c.bf16 %v14300_v58, %v14287_v4  ;;  %v14320_v48 = vsel %vm13256_vm5, 0, %v6902_v55  ;;  %v14324_v8 = vpack.c.bf16 %v14300_v58, %v14300_v58  ;;  %v12042_v35 = vld [vmem:[#allocation11 + $0x18] sm:$0xff]   ;;  %v12044_v51 = vld [vmem:[#allocation11 + $0x60] sm:$0xff]  }
 0xaa6   : > { %v12254_v5 = vpop.eup %12253  ;;  %12263 = vrcp.f32 %v6807_v13  ;;  %v6809_v27 = vadd.f32 1.0, %v12252_v38  ;;  %v9959_v42 = vcombine.low %v7004_v52, %v14320_v48  ;;  %10402 = vmatprep.subr.bf16.mxu1 %v12036_v60  ;;  %v6895_v18 = vor.u32 %v14959_v10, %v6892_v2 }
 0xaa7   : > { %12265 = vrcp.f32 %v6808_v43  ;;  %v6810_v54 = vadd.f32 1.0, %v12254_v5  ;;  %7812 = vmatprep.mubr.bf16.mxu1 %v10186_v61  ;;  %v14331_v1 = vsel %vm13256_vm5, 0, %v6881_v63  ;;  %v14948_v6 = vshrl.u32 %v14308_v53, 16  ;;  %v12041_v43 = vld [vmem:[#allocation11 + $0x288] sm:$0xff]  }
 0xaa8   : > { %v12256_v17 = vpop.eup %12255  ;;  %12267 = vrcp.f32 %v6809_v27  ;;  %7739 = vmatprep.mubr.bf16.mxu0 %v9959_v42  ;;  %7813 = vmatmul.mubr.bf16.gmra.mrb[20].mxu1 %v10185_v28  ;;  %v14336_v59 = vsel %vm13256_vm5, 0, %v6895_v18  ;;  %v14953_v19 = vshll.u32 %v14308_v53, 16  ;;  %v14945_v34 = vshrl.u32 %v14324_v8, 16 }
 0xaa9   : > { %v12258_v25 = vpop.eup %12257  ;;  %12269 = vrcp.f32 %v6810_v54  ;;  %v9958_v14 = vcombine.low %v14331_v1, %v14336_v59  ;;  %10403 = vmatpush3.bf16.msra.mxu1 %v12038_v47  ;;  %v6913_v0 = vrot.slane %v14948_v6, 7  ;;  %v14947_v3 = vshll.u32 %v14324_v8, 16  ;;  %v12043_v54 = vld [vmem:[#allocation11 + $0x2d0] sm:$0xff]  }
 0xaaa   : > { %v12260_v16 = vpop.eup %12259  ;;  %10404 = vmatprep.subr.bf16.mxu1 %v12040_v21  ;;  %v14346_v60 = vmul.f32 %v12258_v25, %v14222_v46  ;;  %v6927_v44 = vrot.slane %v14945_v34, 7  ;;  %v14351_v55 = vmul.f32 %v12256_v17, %v14226_v40  ;;  %v14355_v13 = vpack.c.bf16 %v14282_v62, %v14282_v62 }
 0xaab   : > { %v12262_v28 = vpop.eup %12261  ;;  %7740 = vmatmul.mubr.bf16.vlgmr.msra.gmra.mrb[16].mxu0 %v9958_v14  ;;  %v6916_v63 = vor.u32 %v14953_v19, %v6913_v0  ;;  %v14360_v2 = vmul.f32 %v12260_v16, %v14220_v24  ;;  %v14364_v46 = vpack.c.bf16 %v14294_v29, %v14294_v29  ;;  %v15076_v38 = vmov 0   ;;  %v12051_v19 = vld [vmem:[#allocation11 + $0x2e0] sm:$0xff]  }
 0xaac   : > { %v14367_v40 = vcombine.low %v15076_v38, %v7004_v52  ;;  %10359 = vmatpush3.bf16.msra.mxu0 %v12037_v39  ;;  %v14370_v61 = vmul.f32 %v12262_v28, %v14224_v31  ;;  %v6930_v47 = vor.u32 %v14947_v3, %v6927_v44  ;;  %v14944_v5 = vshrl.u32 %v14355_v13, 16  ;;  %v12046_v39 = vld [vmem:[#allocation11 + $0x20] sm:$0xff]   ;;  %v12045_v28 = vld [vmem:[#allocation11 + $0x290] sm:$0xff]  }
 0xaad   : > { %v14946_v24 = vshll.u32 %v14355_v13, 16  ;;  %10360 = vmatprep.subr.bf16.mxu0 %v12039_v23  ;;  %10405 = vmatpush3.bf16.msra.mxu1 %v12042_v35  ;;  %v14378_v27 = vsel %vm13256_vm5, 0, %v6916_v63  ;;  %v10187_v52 = vpack.c.bf16 %v14360_v2, %v14351_v55  ;;  %v14943_v42 = vshrl.u32 %v14364_v46, 16  ;;  %v12048_v35 = vld [vmem:[#allocation11 + $0x68] sm:$0xff]  }
 0xaae   : > { %v14949_v31 = vshll.u32 %v14364_v46, 16  ;;  %v10188_v18 = vpack.c.bf16 %v14370_v61, %v14346_v60  ;;  %v14388_v21 = vsel %vm13256_vm5, 0, %v6930_v47  ;;  %10406 = vmatprep.subr.bf16.mxu1 %v12044_v51  ;;  %v6906_v17 = vrot.slane %v14944_v5, 7 }
 0xaaf   : > { %v14394_v25 = vpack.c.bf16 %v14346_v60, %v14346_v60  ;;  %v9965_v14 = vcombine.low %v14378_v27, %v14388_v21  ;;  %v6920_v23 = vrot.slane %v14943_v42, 7  ;;  %v14402_v0 = vpack.c.bf16 %v14370_v61, %v14370_v61 }
 0xab0   : > { %v14406_v16 = vpack.c.bf16 %v14351_v55, %v14351_v55  ;;  %v12264_v44 = vpop.eup %12263  ;;  %10361 = vmatpush3.bf16.msra.mxu0 %v12041_v43  ;;  %7820 = vmatprep.mubr.bf16.mxu1 %v10188_v18  ;;  %v6909_v51 = vor.u32 %v14946_v24, %v6906_v17  ;;  %v14414_v42 = vpack.c.bf16 %v14360_v2, %v14360_v2  ;;  %v12047_v43 = vld [vmem:[#allocation11 + $0x2d8] sm:$0xff]  }
 0xab1   : > { %v14951_v63 = vshrl.u32 %v14394_v25, 16  ;;  %v14958_v47 = vshll.u32 %v14394_v25, 16  ;;  %v12266_v5 = vpop.eup %12265  ;;  %7747 = vmatprep.mubr.bf16.mxu0 %v9965_v14  ;;  %7821 = vmatmul.mubr.bf16.gmra.mrb[24].mxu1 %v10187_v52  ;;  %v6923_v34 = vor.u32 %v14949_v31, %v6920_v23  ;;  %v14952_v18 = vshrl.u32 %v14402_v0, 16  ;;  %v12050_v14 = vld [vmem:[#allocation11 + $0x28] sm:$0xff]  }
 0xab2   : > { %v14957_v17 = vshll.u32 %v14402_v0, 16  ;;  %v14421_v24 = vmul.f32 %v12264_v44, %v14246_v36  ;;  %v12268_v3 = vpop.eup %12267  ;;  %10362 = vmatprep.subr.bf16.mxu0 %v12043_v54  ;;  %v14425_v6 = vsel %vm13256_vm5, 0, %v6909_v51  ;;  %10407 = vmatpush3.bf16.msra.mxu1 %v12046_v39  ;;  %v14428_v52 = vmul.f32 %v12266_v5, %v14242_v11  ;;  %v12052_v44 = vld [vmem:[#allocation11 + $0x70] sm:$0xff]   ;;  %v12049_v51 = vld [vmem:[#allocation11 + $0x298] sm:$0xff]  }
 0xab3   : > { %v6941_v23 = vrot.slane %v14951_v63, 7  ;;  %v14954_v31 = vshrl.u32 %v14406_v16, 16  ;;  %v12270_v32 = vpop.eup %12269  ;;  %v14435_v36 = vsel %vm13256_vm5, 0, %v6923_v34  ;;  %10408 = vmatprep.subr.bf16.mxu1 %v12048_v35  ;;  %v6955_v54 = vrot.slane %v14952_v18, 7 }
 0xab4   : > { %v6857_v39 = vmul.f32 %v12268_v3, %v14240_v49  ;;  %v14956_v11 = vshll.u32 %v14406_v16, 16  ;;  %v9964_v5 = vcombine.low %v14425_v6, %v14435_v36  ;;  %10363 = vmatpush3.bf16.msra.mxu0 %v12045_v28  ;;  %v6858_v63 = vmul.f32 %v12270_v32, %v14244_v9 }
 0xab5   : > { %v6944_v34 = vor.u32 %v14958_v47, %v6941_v23  ;;  %v6934_v35 = vrot.slane %v14954_v31, 7  ;;  %10364 = vmatprep.subr.bf16.mxu0 %v12047_v43  ;;  %v6958_v49 = vor.u32 %v14957_v17, %v6955_v54  ;;  %v14955_v28 = vshrl.u32 %v14414_v42, 16  ;;  %v12054_v54 = vld [vmem:[#allocation11 + $0x30] sm:$0xff]   ;;  %v12056_v31 = vld [vmem:[#allocation11 + $0x78] sm:$0xff]   ;;  %v12055_v17 = vld [vmem:[#allocation11 + $0x2e8] sm:$0xff]  }
 0xab6   : > { %v14450_v3 = vpack.c.bf16 %v6857_v39, %v6857_v39  ;;  %v10189_v18 = vpack.c.bf16 %v6857_v39, %v14421_v24  ;;  %7748 = vmatmul.mubr.bf16.gmra.mrb[20].mxu0 %v9964_v5  ;;  %10409 = vmatpush3.bf16.msra.mxu1 %v12050_v14  ;;  %v14454_v9 = vpack.c.bf16 %v6858_v63, %v6858_v63  ;;  %v14960_v5 = vshll.u32 %v14414_v42, 16 }
 0xab7   : > { %v10190_v32 = vpack.c.bf16 %v6858_v63, %v14428_v52  ;;  %v14459_v23 = vsel %vm13256_vm5, 0, %v6944_v34  ;;  %v6937_v43 = vor.u32 %v14956_v11, %v6934_v35  ;;  %v14465_v39 = vsel %vm13256_vm5, 0, %v6958_v49  ;;  %10410 = vmatprep.subr.bf16.mxu1 %v12052_v44  ;;  %v12053_v44 = vld [vmem:[#allocation11 + $0x2a0] sm:$0xff]  }
 0xab8   : > { %v6948_v14 = vrot.slane %v14955_v28, 7  ;;  %v14472_v63 = vpack.c.bf16 %v14428_v52, %v14428_v52  ;;  %10365 = vmatpush3.bf16.msra.mxu0 %v12049_v51  ;;  %v9971_v34 = vcombine.low %v14459_v23, %v14465_v39  ;;  %v14961_v49 = vshrl.u32 %v14454_v9, 16 }
 0xab9   : > { %7828 = vmatprep.mubr.bf16.mxu1 %v10190_v32  ;;  %v14478_v35 = vsel %vm13256_vm5, 0, %v6937_v43  ;;  %v14969_v28 = vshll.u32 %v14454_v9, 16  ;;  %10366 = vmatprep.subr.bf16.mxu0 %v12051_v19  ;;  %v10030_v47 = vcombine.low %v15076_v38, %v14331_v1  ;;  %v12058_v43 = vld [vmem:[#allocation11 + $0x38] sm:$0xff]   ;;  %v14492_v19 = vpack.c.bf16 %v14421_v24, %v14421_v24 }
 0xaba   : > { %7829 = vmatmul.mubr.bf16.gmra.mrb[28].mxu1 %v10189_v18  ;;  %v6951_v11 = vor.u32 %v14960_v5, %v6948_v14  ;;  %v14963_v51 = vshrl.u32 %v14472_v63, 16  ;;  %v6970_v32 = vshll.u32 %v14472_v63, 16  ;;  %7755 = vmatprep.mubr.bf16.mxu0 %v9971_v34  ;;  %v6983_v10 = vrot.slane %v14961_v49, 7 }
 0xabb   : > { %10411 = vmatpush3.bf16.msra.mxu1 %v12054_v54  ;;  %v14965_v18 = vshrl.u32 %v14450_v3, 16  ;;  %v14967_v14 = vshll.u32 %v14450_v3, 16  ;;  %8270 = vmatprep.mubr.bf16.mxu1 %v14367_v40  ;;  %v12060_v54 = vld [vmem:[#allocation11 + $0x140] sm:$0xff]   ;;  %v14505_v34 = vcombine.low %v14320_v48, %v14378_v27  ;;  %v7021_v49 = vrot.slane %v6886_v30, 1  ;;  %v12059_v27 = vld [vmem:[#allocation11 + $0x2f0] sm:$0xff]  }
 0xabc   : > { %v14498_v5 = vsel %vm13256_vm5, 0, %v6951_v11  ;;  %10412 = vmatprep.subr.bf16.mxu1 %v12056_v31  ;;  %v6969_v1 = vrot.slane %v14963_v51, 7  ;;  %10367 = vmatpush3.bf16.msra.mxu0 %v12053_v44  ;;  %v12057_v11 = vld [vmem:[#allocation11 + $0x2a8] sm:$0xff]   ;;  %v6986_v40 = vor.u32 %v14969_v28, %v6983_v10  ;;  %v14966_v31 = vshrl.u32 %v14492_v19, 16 }
 0xabd   : > { %v9970_v50 = vcombine.low %v14478_v35, %v14498_v5  ;;  %v14968_v51 = vshll.u32 %v14492_v19, 16  ;;  %10368 = vmatprep.subr.bf16.mxu0 %v12055_v17  ;;  %v6976_v30 = vrot.slane %v14965_v18, 7  ;;  %v7022_v57 = vor.u32 %v7021_v49, %v6883_v26 }
 0xabe   : > { %v6972_v48 = vor.u32 %v6970_v32, %v6969_v1  ;;  %v7025_v44 = vrot.slane %v6900_v33, 1  ;;  %v14525_v10 = vsel %vm13256_vm5, 0, %v6986_v40  ;;  %v6962_v17 = vrot.slane %v14966_v31, 7  ;;  %v12062_v33 = vld [vmem:[#allocation11 + $0x100] sm:$0xff]  }
 0xabf   : > { %7756 = vmatmul.mubr.bf16.gmra.mrb[24].mxu0 %v9970_v50  ;;  %10413 = vmatpush3.bf16.msra.mxu1 %v12058_v43  ;;  %v14531_v1 = vcombine.low %v14336_v59, %v14425_v6  ;;  %v7019_v18 = vrot.slane %v6879_v12, 1  ;;  %v6979_v50 = vor.u32 %v14967_v14, %v6976_v30  ;;  %v15077_v49 = vshrl.u32 %v14272_v7, 16  ;;  %v12061_v59 = vld [vmem:[#allocation11 + $0x2b0] sm:$0xff]  }
 0xac0   : > { %v7016_v26 = vsel %vm13256_vm5, 0, %v6972_v48  ;;  %10478 = vmatprep.subr.bf16.mxu1 %v12060_v54  ;;  %v14543_v40 = vsel %vm13115_vm2, %v7022_v57, 0  ;;  %10369 = vmatpush3.bf16.msra.mxu0 %v12057_v11  ;;  %v6965_v12 = vor.u32 %v14968_v51, %v6962_v17  ;;  %v12064_v48 = vld [vmem:[#allocation11 + $0x148] sm:$0xff]   ;;  %v15078_v54 = vshrl.u32 %v14257_v37, 16  ;;  %v12063_v11 = vld [vmem:[#allocation11 + $0x2f8] sm:$0xff]  }
 0xac1   : > { %v7026_v43 = vor.u32 %v7025_v44, %v15077_v49  ;;  %v9977_v6 = vcombine.low %v7016_v26, %v14525_v10  ;;  %v15079_v30 = vshll.u32 %v14267_v22, 16  ;;  %10370 = vmatprep.subr.bf16.mxu0 %v12059_v27  ;;  %v14554_v7 = vsel %vm13256_vm5, 0, %v6979_v50 }
 0xac2   : > { %v7020_v31 = vor.u32 %v7019_v18, %v15078_v54  ;;  %8271 = vmatmul.mubr.bf16.vlgmr.msra.gmra.mrb[32].mxu1 %v10030_v47  ;;  %v14562_v44 = vcombine.low %v14388_v21, %v14459_v23  ;;  %v15080_v18 = vshll.u32 %v14308_v53, 16  ;;  %v7015_v47 = vsel %vm13256_vm5, 0, %v6965_v12  ;;  %v12066_v23 = vld [vmem:[#allocation11 + $0x108] sm:$0xff]  }
 0xac3   : > { %v7023_v14 = vrot.slane %v15079_v30, 1  ;;  %v14558_v57 = vsel %vm13115_vm2, %v7026_v43, 0  ;;  %7763 = vmatprep.mubr.bf16.mxu0 %v9977_v6  ;;  %8278 = vmatprep.mubr.bf16.mxu1 %v14505_v34  ;;  %v15081_v50 = vshrl.u32 %v14267_v22, 16  ;;  %v9976_v21 = vcombine.low %v7015_v47, %v14554_v7  ;;  %v12065_v22 = vld [vmem:[#allocation11 + $0x2b8] sm:$0xff]  }
 0xac4   : > { %v7029_v17 = vrot.slane %v15080_v18, 1  ;;  %v9963_v27 = vcombine.low %v14543_v40, %v14558_v57  ;;  %v14575_v43 = vsel %vm13115_vm2, %v7020_v31, 0  ;;  %10479 = vmatpush3.bf16.msra.mxu1 %v12062_v33  ;;  %v15082_v6 = vshrl.u32 %v14308_v53, 16  ;;  %10371 = vmatpush3.bf16.msra.mxu0 %v12061_v59 }
 0xac5   : > { %v7024_v49 = vor.u32 %v7023_v14, %v15081_v50  ;;  %v15083_v12 = vshll.u32 %v14324_v8, 16  ;;  %v14584_v30 = vcombine.low %v14435_v36, %v14478_v35  ;;  %10480 = vmatprep.subr.bf16.mxu1 %v12064_v48  ;;  %v12068_v14 = vld [vmem:[#allocation11 + $0x150] sm:$0xff]   ;;  %v15084_v33 = vshll.u32 %v14355_v13, 16  ;;  %10372 = vmatprep.subr.bf16.mxu0 %v12063_v11 }
 0xac6   : > { %v7030_v56 = vor.u32 %v7029_v17, %v15082_v6  ;;  %v15085_v53 = vshll.u32 %v14364_v46, 16  ;;  %v14593_v50 = vcombine.low %v14465_v39, %v7016_v26  ;;  %v12067_v6 = vld [vmem:[#allocation11 + $0xc0] sm:$0xff]   ;;  %v15086_v35 = vshrl.u32 %v14324_v8, 16  ;;  %v12070_v8 = vld [vmem:[#allocation11 + $0x110] sm:$0xff]  }
 0xac7   : > { %v7033_v54 = vrot.slane %v15083_v12, 1  ;;  %v7069_v31 = vsel %vm13115_vm2, %v7024_v49, 0  ;;  %v7027_v18 = vrot.slane %v15084_v33, 1  ;;  %v15087_v49 = vshll.u32 %v14394_v25, 16  ;;  %7764 = vmatmul.mubr.bf16.gmra.mrb[28].mxu0 %v9976_v21 }
 0xac8   : > { %v7031_v17 = vrot.slane %v15085_v53, 1  ;;  %v9962_v36 = vcombine.low %v14575_v43, %v7069_v31  ;;  %v7072_v48 = vsel %vm13115_vm2, %v7030_v56, 0  ;;  %v15088_v33 = vshrl.u32 %v14355_v13, 16  ;;  %7869 = vmatprep.mubr.bf16.mxu0 %v9963_v27  ;;  %10481 = vmatpush3.bf16.msra.mxu1 %v12066_v23 }
 0xac9   : > { %v7034_v59 = vor.u32 %v7033_v54, %v15086_v35  ;;  %v7037_v12 = vrot.slane %v15087_v49, 1  ;;  %v15089_v39 = vshrl.u32 %v14364_v46, 16  ;;  %v15090_v11 = vshll.u32 %v14402_v0, 16  ;;  %10373 = vmatpush3.bf16.msra.mxu0 %v12065_v22  ;;  %10482 = vmatprep.subr.bf16.mxu1 %v12068_v14 }
 0xaca   : > { %v7028_v53 = vor.u32 %v7027_v18, %v15088_v33  ;;  %v14609_v28 = vcombine.low %v14498_v5, %v7015_v47  ;;  %v15091_v21 = vshrl.u32 %v14394_v25, 16  ;;  %v15092_v13 = vshll.u32 %v14406_v16, 16  ;;  %v12072_v5 = vld [vmem:[#allocation11 + $0x158] sm:$0xff]   ;;  %8279 = vmatmul.mubr.bf16.gmra.mrb[36].mxu1 %v14531_v1  ;;  %10438 = vmatprep.subr.bf16.mxu0 %v12067_v6 }
 0xacb   : > { %v7032_v26 = vor.u32 %v7031_v17, %v15089_v39  ;;  %v7041_v51 = vrot.slane %v15090_v11, 1  ;;  %v7074_v56 = vsel %vm13115_vm2, %v7034_v59, 0  ;;  %v15093_v46 = vshll.u32 %v14414_v42, 16  ;;  %8286 = vmatprep.mubr.bf16.mxu1 %v14562_v44  ;;  %v12069_v39 = vld [vmem:[#allocation11 + $0x80] sm:$0xff]   ;;  %v12071_v11 = vld [vmem:[#allocation11 + $0xc8] sm:$0xff]  }
 0xacc   : > { %v7038_v54 = vor.u32 %v7037_v12, %v15091_v21  ;;  %v7035_v18 = vrot.slane %v15092_v13, 1  ;;  %v9969_v35 = vcombine.low %v7072_v48, %v7074_v56  ;;  %v14621_v47 = vsel %vm13115_vm2, %v7028_v53, 0  ;;  %10483 = vmatpush3.bf16.msra.mxu1 %v12070_v8  ;;  %v12074_v21 = vld [vmem:[#allocation11 + $0x118] sm:$0xff]  }
 0xacd   : > { %v7039_v17 = vrot.slane %v15093_v46, 1  ;;  %v14625_v27 = vsel %vm13115_vm2, %v7032_v26, 0  ;;  %v15094_v25 = vshrl.u32 %v14402_v0, 16  ;;  %v15095_v14 = vshrl.u32 %v14406_v16, 16  ;;  %10484 = vmatprep.subr.bf16.mxu1 %v12072_v5 }
 0xace   : > { %v9968_v22 = vcombine.low %v14621_v47, %v14625_v27  ;;  %v15096_v49 = vshrl.u32 %v14414_v42, 16  ;;  %v7076_v33 = vsel %vm13115_vm2, %v7038_v54, 0  ;;  %v15097_v6 = vshll.u32 %v14454_v9, 16 }
 0xacf   : > { %v7042_v23 = vor.u32 %v7041_v51, %v15094_v25  ;;  %v7036_v59 = vor.u32 %v7035_v18, %v15095_v14  ;;  %v7045_v51 = vrot.slane %v6970_v32, 1  ;;  %v15098_v54 = vshrl.u32 %v14472_v63, 16  ;;  %v12076_v25 = vld [vmem:[#allocation11 + $0x160] sm:$0xff]   ;;  %7870 = vmatmul.mubr.bf16.vlgmr.msra.gmra.mrb[32].mxu0 %v9962_v36  ;;  %v12075_v36 = vld [vmem:[#allocation11 + $0xd0] sm:$0xff]  }
 0xad0   : > { %v7040_v12 = vor.u32 %v7039_v17, %v15096_v49  ;;  %v7049_v53 = vrot.slane %v15097_v6, 1  ;;  %v15099_v8 = vshrl.u32 %v14454_v9, 16  ;;  %v15100_v46 = vshll.u32 %v14492_v19, 16  ;;  %10439 = vmatpush3.bf16.msra.mxu0 %v12069_v39  ;;  %7877 = vmatprep.mubr.bf16.mxu0 %v9969_v35  ;;  %v12073_v6 = vld [vmem:[#allocation11 + $0x88] sm:$0xff]  }
 0xad1   : > { %v7078_v0 = vsel %vm13115_vm2, %v7042_v23, 0  ;;  %v14647_v42 = vsel %vm13115_vm2, %v7036_v59, 0  ;;  %v7046_v13 = vor.u32 %v7045_v51, %v15098_v54  ;;  %v15101_v23 = vshll.u32 %v14450_v3, 16  ;;  %10440 = vmatprep.subr.bf16.mxu0 %v12071_v11  ;;  %10485 = vmatpush3.bf16.msra.mxu1 %v12074_v21  ;;  %v12084_v21 = vld [vmem:[#allocation11 + $0x170] sm:$0xff]  }
 0xad2   : > { %v9975_v16 = vcombine.low %v7076_v33, %v7078_v0  ;;  %v14651_v26 = vsel %vm13115_vm2, %v7040_v12, 0  ;;  %v7050_v18 = vor.u32 %v7049_v53, %v15099_v8  ;;  %v7043_v17 = vrot.slane %v15100_v46, 1  ;;  %v12078_v53 = vld [vmem:[#allocation11 + $0x120] sm:$0xff]   ;;  %8287 = vmatmul.mubr.bf16.gmra.mrb[40].mxu1 %v14584_v30  ;;  %10486 = vmatprep.subr.bf16.mxu1 %v12076_v25  ;;  %v12091_v8 = vld [vmem:[#allocation11 + $0xf0] sm:$0xff]  }
 0xad3   : > { %v9974_v32 = vcombine.low %v14647_v42, %v14651_v26  ;;  %v7047_v14 = vrot.slane %v15101_v23, 1  ;;  %v14664_v59 = vcombine.low %v14558_v57, %v7072_v48  ;;  %v14667_v5 = vcombine.low %v7069_v31, %v14621_v47  ;;  %8294 = vmatprep.mubr.bf16.mxu1 %v14593_v50  ;;  %v12094_v46 = vld [vmem:[#allocation11 + $0x380] sm:$0xff]   ;;  %v12093_v25 = vld [vmem:[#allocation11 + $0xb0] sm:$0xff]  }
 0xad4   : > { %v7080_v63 = vsel %vm13115_vm2, %v7046_v13, 0  ;;  %v14673_v49 = vsel %vm13115_vm2, %v7050_v18, 0  ;;  %v15102_v12 = vshrl.u32 %v14492_v19, 16  ;;  %v15103_v48 = vshrl.u32 %v14450_v3, 16  ;;  %10441 = vmatpush3.bf16.msra.mxu0 %v12073_v6  ;;  %v12090_v13 = vld [vmem:[#allocation11 + $0x138] sm:$0xff]   ;;  %v12100_v23 = vld [vmem:[#allocation11 + $0x3d0] sm:$0xff]  }
 0xad5   : > { %v9981_v57 = vcombine.low %v7080_v63, %v14673_v49  ;;  %v14680_v47 = vcombine.low %v7074_v56, %v7076_v33  ;;  %v14688_v19 = vpack.c.bf16 %v14287_v4, %v14260_v15  ;;  %v14692_v35 = vcombine.low %v14625_v27, %v14647_v42  ;;  %v12080_v33 = vld [vmem:[#allocation11 + $0x168] sm:$0xff]   ;;  %10442 = vmatprep.subr.bf16.mxu0 %v12075_v36  ;;  %v12079_v27 = vld [vmem:[#allocation11 + $0xd8] sm:$0xff]   ;;  %v12107_v36 = vld [vmem:[#allocation11 + $0x350] sm:$0xff]  }
 0xad6   : > { %v7044_v51 = vor.u32 %v7043_v17, %v15102_v12  ;;  %v7048_v31 = vor.u32 %v7047_v14, %v15103_v48  ;;  %v14696_v56 = vpack.c.bf16 %v14282_v62, %v14255_v41  ;;  %v14703_v11 = vcombine.low %v7078_v0, %v7080_v63  ;;  %10487 = vmatpush3.bf16.msra.mxu1 %v12078_v53  ;;  %v12082_v0 = vld [vmem:[#allocation11 + $0x128] sm:$0xff]   ;;  %v12095_v42 = vld [vmem:[#allocation11 + $0xf8] sm:$0xff]   ;;  %v12099_v14 = vld [vmem:[#allocation11 + $0x340] sm:$0xff]  }
 0xad7   : > { %v14707_v15 = vpack.c.bf16 %v14346_v60, %v14300_v58  ;;  %v14718_v45 = vpack.c.bf16 %v14351_v55, %v14294_v29  ;;  %v14722_v62 = vpack.c.bf16 %v14428_v52, %v14370_v61  ;;  %v14726_v58 = vpack.c.bf16 %v14421_v24, %v14360_v2  ;;  %v12077_v60 = vld [vmem:[#allocation11 + $0x90] sm:$0xff]   ;;  %10488 = vmatprep.subr.bf16.mxu1 %v12080_v33  ;;  %v12081_v29 = vld [vmem:[#allocation11 + $0x98] sm:$0xff]   ;;  %v12083_v55 = vld [vmem:[#allocation11 + $0xe0] sm:$0xff]  }
 0xad8   : > { %v14684_v54 = vsel %vm13115_vm2, %v7044_v51, 0  ;;  %v14701_v39 = vsel %vm13115_vm2, %v7048_v31, 0  ;;  %7878 = vmatmul.mubr.bf16.gmra.mrb[36].mxu0 %v9968_v22  ;;  %v12086_v61 = vld [vmem:[#allocation11 + $0x130] sm:$0xff]   ;;  %v10035_v2 = vcombine.low %v15076_v38, %v14543_v40  ;;  %v12088_v24 = vld [vmem:[#allocation11 + $0x178] sm:$0xff]   ;;  %v12085_v52 = vld [vmem:[#allocation11 + $0xa0] sm:$0xff]   ;;  %v10034_v18 = vcombine.low %v15076_v38, %v14575_v43 }
 0xad9   : > { %v14711_v4 = vcombine.low %v14651_v26, %v14684_v54  ;;  %v9980_v41 = vcombine.low %v14684_v54, %v14701_v39  ;;  %10443 = vmatpush3.bf16.msra.mxu0 %v12077_v60  ;;  %7885 = vmatprep.mubr.bf16.mxu0 %v9975_v16  ;;  %v12087_v22 = vld [vmem:[#allocation11 + $0xe8] sm:$0xff]   ;;  %v12092_v16 = vld [vmem:[#allocation11 + $0x3c0] sm:$0xff]   ;;  %v10033_v26 = vcombine.low %v15076_v38, %v14262_v20  ;;  %v12097_v43 = vld [vmem:[#allocation11 + $0xb8] sm:$0xff]  }
 0xada   : > { %10444 = vmatprep.subr.bf16.mxu0 %v12079_v27  ;;  %10489 = vmatpush3.bf16.msra.mxu1 %v12082_v0  ;;  %v12089_v40 = vld [vmem:[#allocation11 + $0xa8] sm:$0xff]   ;;  %v12102_v63 = vld [vmem:[#allocation11 + $0x390] sm:$0xff]   ;;  %v12104_v12 = vld [vmem:[#allocation11 + $0x3d8] sm:$0xff]   ;;  %v10032_v20 = vcombine.low %v15076_v38, %v14257_v37 }
 0xadb   : > { %8295 = vmatmul.mubr.bf16.gmra.mrb[44].mxu1 %v14609_v28  ;;  %10490 = vmatprep.subr.bf16.mxu1 %v12084_v21  ;;  %v12096_v17 = vld [vmem:[#allocation11 + $0x3c8] sm:$0xff]   ;;  %v12101_v51 = vld [vmem:[#allocation11 + $0x300] sm:$0xff]   ;;  %v12109_v37 = vld [vmem:[#allocation11 + $0x310] sm:$0xff]  }
 0xadc   : > { %8400 = vmatprep.mubr.bf16.mxu1 %v10035_v2  ;;  %v12103_v6 = vld [vmem:[#allocation11 + $0x348] sm:$0xff]   ;;  %v12108_v48 = vld [vmem:[#allocation11 + $0x3e0] sm:$0xff]   ;;  %v12111_v33 = vld [vmem:[#allocation11 + $0x358] sm:$0xff]  }
 0xadd   : > { %10445 = vmatpush3.bf16.msra.mxu0 %v12081_v29  ;;  %v12105_v31 = vld [vmem:[#allocation11 + $0x308] sm:$0xff]   ;;  %v12110_v53 = vld [vmem:[#allocation11 + $0x3a0] sm:$0xff]   ;;  %v12116_v60 = vld [vmem:[#allocation11 + $0x3f0] sm:$0xff]  }
 0xade   : > { %10446 = vmatprep.subr.bf16.mxu0 %v12083_v55  ;;  %10491 = vmatpush3.bf16.msra.mxu1 %v12086_v61  ;;  %v12112_v54 = vld [vmem:[#allocation11 + $0x3e8] sm:$0xff]   ;;  %v12113_v27 = vld [vmem:[#allocation11 + $0x318] sm:$0xff]   ;;  %v12115_v0 = vld [vmem:[#allocation11 + $0x360] sm:$0xff]  }
 0xadf   : > { %10492 = vmatprep.subr.bf16.mxu1 %v12088_v24  ;;  %v12118_v21 = vld [vmem:[#allocation11 + $0x3b0] sm:$0xff]   ;;  %v12120_v29 = vld [vmem:[#allocation11 + $0x3f8] sm:$0xff]   ;;  %v12117_v55 = vld [vmem:[#allocation11 + $0x320] sm:$0xff]  }
 0xae0   : > { %7886 = vmatmul.mubr.bf16.gmra.mrb[40].mxu0 %v9974_v32  ;;  %v12098_v32 = vld [vmem:[#allocation11 + $0x388] sm:$0xff]   ;;  %v12122_v2 = vld [vmem:[#allocation11 + $0x3b8] sm:$0xff]   ;;  %v12124_v24 = vld [vmem:[#allocation11 + $0x440] sm:$0xff]  }
 0xae1   : > { %10447 = vmatpush3.bf16.msra.mxu0 %v12085_v52  ;;  %7893 = vmatprep.mubr.bf16.mxu0 %v9981_v57  ;;  %v12106_v57 = vld [vmem:[#allocation11 + $0x398] sm:$0xff]   ;;  %v12119_v61 = vld [vmem:[#allocation11 + $0x368] sm:$0xff]  }
 0xae2   : > { %10448 = vmatprep.subr.bf16.mxu0 %v12087_v22  ;;  %10493 = vmatpush3.bf16.msra.mxu1 %v12090_v13  ;;  %v12121_v52 = vld [vmem:[#allocation11 + $0x328] sm:$0xff]   ;;  %v12123_v22 = vld [vmem:[#allocation11 + $0x370] sm:$0xff]   ;;  %v12126_v13 = vld [vmem:[#allocation11 + $0x400] sm:$0xff]  }
 0xae3   : > { %10558 = vmatprep.subr.bf16.mxu1 %v12092_v16  ;;  %v12128_v16 = vld [vmem:[#allocation11 + $0x448] sm:$0xff]  }
 0xae5   : > { %10449 = vmatpush3.bf16.msra.mxu0 %v12089_v40  ;;  %8401 = vmatmul.mubr.bf16.vlgmr.msra.gmra.mrb[48].mxu1 %v10034_v18  ;;  %v12125_v40 = vld [vmem:[#allocation11 + $0x330] sm:$0xff]  }
 0xae6   : > { %10450 = vmatprep.subr.bf16.mxu0 %v12091_v8  ;;  %8408 = vmatprep.mubr.bf16.mxu1 %v14664_v59  ;;  %v12130_v8 = vld [vmem:[#allocation11 + $0x408] sm:$0xff]   ;;  %v12131_v18 = vld [vmem:[#allocation11 + $0x450] sm:$0xff]  }
 0xae7   : > { %10559 = vmatpush3.bf16.msra.mxu1 %v12094_v46  ;;  %v12129_v46 = vld [vmem:[#allocation11 + $0x338] sm:$0xff]  }
 0xae8   : > { %7894 = vmatmul.mubr.bf16.gmra.mrb[44].mxu0 %v9980_v41  ;;  %10560 = vmatprep.subr.bf16.mxu1 %v12096_v17  ;;  %v12114_v41 = vld [vmem:[#allocation11 + $0x3a8] sm:$0xff]   ;;  %v12132_v17 = vld [vmem:[#allocation11 + $0x410] sm:$0xff]  }
 0xae9   : > { %10451 = vmatpush3.bf16.msra.mxu0 %v12093_v25  ;;  %8335 = vmatprep.mubr.bf16.mxu0 %v10033_v26  ;;  %v12133_v25 = vld [vmem:[#allocation11 + $0x458] sm:$0xff]   ;;  %v10104_v26 = vcombine.low %v14450_v3, %v15076_v38  ;;  %v10107_v3 = vcombine.low %v14673_v49, %v15076_v38 }
 0xaea   : > { %10452 = vmatprep.subr.bf16.mxu0 %v12095_v42  ;;  %v12137_v42 = vld [vmem:[#allocation11 + $0x468] sm:$0xff]  }
 0xaeb   : > { %10561 = vmatpush3.bf16.msra.mxu1 %v12098_v32 }
 0xaec   : > { %10562 = vmatprep.subr.bf16.mxu1 %v12100_v23 }
 0xaed   : > { %10453 = vmatpush3.bf16.msra.mxu0 %v12097_v43  ;;  %8409 = vmatmul.mubr.bf16.gmra.mrb[52].mxu1 %v14667_v5 }
 0xaee   : > { %10518 = vmatprep.subr.bf16.mxu0 %v12099_v14  ;;  %8416 = vmatprep.mubr.bf16.mxu1 %v14680_v47 }
 0xaef   : > { %10563 = vmatpush3.bf16.msra.mxu1 %v12102_v63 }
 0xaf0   : > { %8336 = vmatmul.mubr.bf16.vlgmr.msra.gmra.mrb[48].mxu0 %v10032_v20  ;;  %10564 = vmatprep.subr.bf16.mxu1 %v12104_v12 }
 0xaf1   : > { %10519 = vmatpush3.bf16.msra.mxu0 %v12101_v51  ;;  %8343 = vmatprep.mubr.bf16.mxu0 %v14688_v19 }
 0xaf2   : > { %10520 = vmatprep.subr.bf16.mxu0 %v12103_v6 }
 0xaf3   : > { %10565 = vmatpush3.bf16.msra.mxu1 %v12106_v57 }
 0xaf4   : > { %10566 = vmatprep.subr.bf16.mxu1 %v12108_v48 }
 0xaf5   : > { %10521 = vmatpush3.bf16.msra.mxu0 %v12105_v31  ;;  %8417 = vmatmul.mubr.bf16.gmra.mrb[56].mxu1 %v14692_v35 }
 0xaf6   : > { %10522 = vmatprep.subr.bf16.mxu0 %v12107_v36  ;;  %8424 = vmatprep.mubr.bf16.mxu1 %v14703_v11 }
 0xaf7   : > { %10567 = vmatpush3.bf16.msra.mxu1 %v12110_v53 }
 0xaf8   : > { %8344 = vmatmul.mubr.bf16.gmra.mrb[52].mxu0 %v14696_v56  ;;  %10568 = vmatprep.subr.bf16.mxu1 %v12112_v54 }
 0xaf9   : > { %10523 = vmatpush3.bf16.msra.mxu0 %v12109_v37  ;;  %8351 = vmatprep.mubr.bf16.mxu0 %v14707_v15 }
 0xafa   : > { %10524 = vmatprep.subr.bf16.mxu0 %v12111_v33 }
 0xafb   : > { %10569 = vmatpush3.bf16.msra.mxu1 %v12114_v41 }
 0xafc   : > { %10570 = vmatprep.subr.bf16.mxu1 %v12116_v60 }
 0xafd   : > { %10525 = vmatpush3.bf16.msra.mxu0 %v12113_v27  ;;  %8425 = vmatmul.mubr.bf16.gmra.mrb[60].mxu1 %v14711_v4 }
 0xafe   : > { %10526 = vmatprep.subr.bf16.mxu0 %v12115_v0  ;;  %8926 = vmatprep.mubr.bf16.mxu1 %v14688_v19  ;;  %v12127_v19 = vld [vmem:[#allocation11 + $0x378] sm:$0xff]  }
 0xaff   : > { %10571 = vmatpush3.bf16.msra.mxu1 %v12118_v21 }
 0xb00   : > { %8352 = vmatmul.mubr.bf16.gmra.mrb[56].mxu0 %v14718_v45  ;;  %10572 = vmatprep.subr.bf16.mxu1 %v12120_v29 }
 0xb01   : > { %10527 = vmatpush3.bf16.msra.mxu0 %v12117_v55  ;;  %8359 = vmatprep.mubr.bf16.mxu0 %v14722_v62 }
 0xb02   : > { %10528 = vmatprep.subr.bf16.mxu0 %v12119_v61 }
 0xb03   : > { %10573 = vmatpush3.bf16.msra.mxu1 %v12122_v2 }
 0xb04   : > { %10862 = vmatprep.subr.bf16.mxu1 %v12124_v24 }
 0xb05   : > { %10529 = vmatpush3.bf16.msra.mxu0 %v12121_v52 }
 0xb06   : > { %10530 = vmatprep.subr.bf16.mxu0 %v12123_v22  ;;  %8927 = vmatmul.mubr.bf16.vlgmr.msra.gmra.mrb[64].mxu1 %v14696_v56  ;;  %v12134_v56 = vld [vmem:[#allocation11 + $0x418] sm:$0xff]  }
 0xb07   : > { %8934 = vmatprep.mubr.bf16.mxu1 %v14707_v15  ;;  %10870 = vmatpush3.bf16.msra.mxu1 %v12126_v13  ;;  %v12135_v15 = vld [vmem:[#allocation11 + $0x460] sm:$0xff]  }
 0xb08   : > { %8360 = vmatmul.mubr.bf16.gmra.mrb[60].mxu0 %v14726_v58  ;;  %10863 = vmatprep.subr.bf16.mxu1 %v12128_v16 }
 0xb09   : > { %10531 = vmatpush3.bf16.msra.mxu0 %v12125_v40  ;;  %8861 = vmatprep.mubr.bf16.mxu0 %v14505_v34  ;;  %v12136_v34 = vld [vmem:[#allocation11 + $0x420] sm:$0xff]  }
 0xb0a   : > { %10532 = vmatprep.subr.bf16.mxu0 %v12127_v19 }
 0xb0b   : > { %10871 = vmatpush3.bf16.msra.mxu1 %v12130_v8 }
 0xb0c   : > { %10864 = vmatprep.subr.bf16.mxu1 %v12131_v18 }
 0xb0d   : > { %10533 = vmatpush3.bf16.msra.mxu0 %v12129_v46 }
 0xb0e   : > { %8935 = vmatmul.mubr.bf16.gmra.mrb[68].mxu1 %v14718_v45  ;;  %10598 = vmatprep.subr.bf16.mxu0 %v12124_v24  ;;  %v10105_v45 = vcombine.low %v14454_v9, %v15076_v38  ;;  %v12141_v9 = vld [vmem:[#allocation11 + $0x478] sm:$0xff]  }
 0xb0f   : > { %8942 = vmatprep.mubr.bf16.mxu1 %v14722_v62  ;;  %10872 = vmatpush3.bf16.msra.mxu1 %v12132_v17  ;;  %v12139_v62 = vld [vmem:[#allocation11 + $0x470] sm:$0xff]  }
 0xb10   : > { %8862 = vmatmul.mubr.bf16.vlgmr.msra.gmra.mrb[64].mxu0 %v14531_v1  ;;  %10865 = vmatprep.subr.bf16.mxu1 %v12133_v25  ;;  %v12138_v1 = vld [vmem:[#allocation11 + $0x428] sm:$0xff]  }
 0xb11   : > { %10599 = vmatpush3.bf16.msra.mxu0 %v12126_v13  ;;  %8869 = vmatprep.mubr.bf16.mxu0 %v14562_v44  ;;  %v12140_v44 = vld [vmem:[#allocation11 + $0x430] sm:$0xff]  }
 0xb12   : > { %10600 = vmatprep.subr.bf16.mxu0 %v12128_v16 }
 0xb13   : > { %10873 = vmatpush3.bf16.msra.mxu1 %v12134_v56 }
 0xb14   : > { %10866 = vmatprep.subr.bf16.mxu1 %v12135_v15 }
 0xb15   : > { %10601 = vmatpush3.bf16.msra.mxu0 %v12130_v8 }
 0xb16   : > { %8943 = vmatmul.mubr.bf16.gmra.mrb[72].mxu1 %v14726_v58  ;;  %10602 = vmatprep.subr.bf16.mxu0 %v12131_v18  ;;  %v12142_v58 = vld [vmem:[#allocation11 + $0x438] sm:$0xff]  }
 0xb17   : > { %8950 = vmatprep.mubr.bf16.mxu1 %v10105_v45  ;;  %10874 = vmatpush3.bf16.msra.mxu1 %v12136_v34 }
 0xb18   : > { %8870 = vmatmul.mubr.bf16.gmra.mrb[68].mxu0 %v14584_v30  ;;  %10867 = vmatprep.subr.bf16.mxu1 %v12137_v42  ;;  %v10103_v30 = vcombine.low %v14525_v10, %v15076_v38 }
 0xb19   : > { %10603 = vmatpush3.bf16.msra.mxu0 %v12132_v17  ;;  %8877 = vmatprep.mubr.bf16.mxu0 %v14593_v50  ;;  %v10102_v50 = vcombine.low %v14554_v7, %v15076_v38 }
 0xb1a   : > { %10604 = vmatprep.subr.bf16.mxu0 %v12133_v25 }
 0xb1b   : > { %10875 = vmatpush3.bf16.msra.mxu1 %v12138_v1 }
 0xb1c   : > { %10868 = vmatprep.subr.bf16.mxu1 %v12139_v62 }
 0xb1d   : > { %10605 = vmatpush3.bf16.msra.mxu0 %v12134_v56 }
 0xb1e   : > { %8951 = vmatmul.mubr.bf16.gmra.mrb[76].mxu1 %v10104_v26  ;;  %10606 = vmatprep.subr.bf16.mxu0 %v12135_v15 }
 0xb1f   : > { %10876 = vmatpush3.bf16.msra.mxu1 %v12140_v44  ;;  %9007 = vmatprep.mubr.bf16.mxu1 %v14703_v11 }
 0xb20   : > { %8878 = vmatmul.mubr.bf16.gmra.mrb[72].mxu0 %v14609_v28  ;;  %10869 = vmatprep.subr.bf16.mxu1 %v12141_v9  ;;  %v10106_v28 = vcombine.low %v14701_v39, %v15076_v38 }
 0xb21   : > { %10607 = vmatpush3.bf16.msra.mxu0 %v12136_v34  ;;  %8885 = vmatprep.mubr.bf16.mxu0 %v10103_v30 }
 0xb22   : > { %10608 = vmatprep.subr.bf16.mxu0 %v12137_v42 }
 0xb23   : > { %10877 = vmatpush3.bf16.msra.mxu1 %v12142_v58 }
 0xb25   : > { %10609 = vmatpush3.bf16.msra.mxu0 %v12138_v1 }
 0xb26   : > { %10610 = vmatprep.subr.bf16.mxu0 %v12139_v62  ;;  %9008 = vmatmul.mubr.bf16.vlgmr.msra.gmra.mrb[80].mxu1 %v14711_v4 }
 0xb27   : > { %9015 = vmatprep.mubr.bf16.mxu1 %v10107_v3 }
 0xb28   : > { %8886 = vmatmul.mubr.bf16.gmra.mrb[76].mxu0 %v10102_v50 }
 0xb29   : > { %10611 = vmatpush3.bf16.msra.mxu0 %v12140_v44  ;;  %8991 = vmatprep.mubr.bf16.mxu0 %v14664_v59 }
 0xb2a   : > { %10612 = vmatprep.subr.bf16.mxu0 %v12141_v9 }
 0xb2d   : > { %10613 = vmatpush3.bf16.msra.mxu0 %v12142_v58 }
 0xb2e   : > { %9016 = vmatmul.mubr.bf16.gmra.mrb[84].mxu1 %v10106_v28 }
 0xb30   : > { %8992 = vmatmul.mubr.bf16.vlgmr.msra.gmra.mrb[80].mxu0 %v14667_v5 }
 0xb31   : > { %8999 = vmatprep.mubr.bf16.mxu0 %v14680_v47 }
 0xb38   : > { %9000 = vmatmul.mubr.bf16.gmra.mrb[84].mxu0 %v14692_v35 }
 0xb73   : > { %v10334_v10 = vpop.f32.mrb[16].mxu1 }
 0xb74   : > { %v10335_v49 = vpop.f32.mrb[17].mxu1 }
 0xb75   : > { %v10336_v7 = vadd.f32 %v10335_v49, %v10334_v10  ;;  %v10337_v11 = vpop.f32.mrb[18].mxu1 }
 0xb76   : > { %v10338_v4 = vpop.f32.mrb[19].mxu1 }
 0xb77   : > { %v10339_v32 = vadd.f32 %v10338_v4, %v10337_v11 }
 0xb7b   : > { %v10340_v23 = vpop.f32.mrb[20].mxu1 }
 0xb7c   : > { %v10341_v59 = vpop.f32.mrb[21].mxu1 }
 0xb7d   : > { %v10342_v43 = vadd.f32 %v10341_v59, %v10340_v23  ;;  %v10343_v14 = vpop.f32.mrb[22].mxu1 }
 0xb7e   : > { %v10294_v63 = vpop.f32.mrb[16].mxu0  ;;  %v10344_v38 = vpop.f32.mrb[23].mxu1 }
 0xb7f   : > { %v10295_v39 = vpop.f32.mrb[17].mxu0  ;;  %v10345_v12 = vadd.f32 %v10344_v38, %v10343_v14 }
 0xb80   : > { %v10296_v51 = vadd.f32 %v10295_v39, %v10294_v63  ;;  %v10297_v5 = vpop.f32.mrb[18].mxu0 }
 0xb81   : > { %v10298_v20 = vpop.f32.mrb[19].mxu0 }
 0xb82   : > { %v7807_v47 = vadd.f32 %v10336_v7, %v10296_v51  ;;  %v10299_v6 = vadd.f32 %v10298_v20, %v10297_v5 }
 0xb84   : > { %v7810_v35 = vadd.f32 %v10339_v32, %v10299_v6  ;;  %v10346_v57 = vpop.f32.mrb[24].mxu1 }
 0xb85   : > { %v10347_v48 = vpop.f32.mrb[25].mxu1 }
 0xb86   : > { %v10348_v31 = vadd.f32 %v10347_v48, %v10346_v57  ;;  %v10349_v36 = vpop.f32.mrb[26].mxu1 }
 0xb87   : > { %v10350_v53 = vpop.f32.mrb[27].mxu1 }
 0xb88   : > { %v10351_v54 = vadd.f32 %v10350_v53, %v10349_v36 }
 0xb89   : > { %v10300_v37 = vpop.f32.mrb[20].mxu0 }
 0xb8a   : > { %v10301_v33 = vpop.f32.mrb[21].mxu0 }
 0xb8b   : > { %v10302_v41 = vadd.f32 %v10301_v33, %v10300_v37  ;;  %v10303_v60 = vpop.f32.mrb[22].mxu0 }
 0xb8c   : > { %v10304_v27 = vpop.f32.mrb[23].mxu0 }
 0xb8d   : > { %v10352_v0 = vpop.f32.mrb[28].mxu1  ;;  %v7815_v21 = vadd.f32 %v10342_v43, %v10302_v41  ;;  %v10305_v29 = vadd.f32 %v10304_v27, %v10303_v60 }
 0xb8e   : > { %v10353_v55 = vpop.f32.mrb[29].mxu1 }
 0xb8f   : > { %v10354_v61 = vadd.f32 %v10353_v55, %v10352_v0  ;;  %v10355_v2 = vpop.f32.mrb[30].mxu1  ;;  %v7818_v24 = vadd.f32 %v10345_v12, %v10305_v29 }
 0xb90   : > { %v10356_v52 = vpop.f32.mrb[31].mxu1 }
 0xb91   : > { %v10357_v22 = vadd.f32 %v10356_v52, %v10355_v2 }
 0xb92   : > { %v10306_v13 = vpop.f32.mrb[24].mxu0 }
 0xb93   : > { %v10307_v16 = vpop.f32.mrb[25].mxu0 }
 0xb94   : > { %v10308_v40 = vadd.f32 %v10307_v16, %v10306_v13  ;;  %v10309_v19 = vpop.f32.mrb[26].mxu0 }
 0xb95   : > { %v10310_v8 = vpop.f32.mrb[27].mxu0  ;;  %v10414_v18 = vpop.f32.mrb[32].mxu1 }
 0xb96   : > { %v7823_v46 = vadd.f32 %v10348_v31, %v10308_v40  ;;  %v10311_v17 = vadd.f32 %v10310_v8, %v10309_v19  ;;  %v10415_v25 = vpop.f32.mrb[33].mxu1 }
 0xb97   : > { %v10416_v56 = vadd.f32 %v10415_v25, %v10414_v18  ;;  %v10417_v15 = vpop.f32.mrb[34].mxu1 }
 0xb98   : > { %v7826_v34 = vadd.f32 %v10351_v54, %v10311_v17  ;;  %v10418_v42 = vpop.f32.mrb[35].mxu1 }
 0xb99   : > { %v10419_v45 = vadd.f32 %v10418_v42, %v10417_v15 }
 0xb9a   : > { %v10312_v1 = vpop.f32.mrb[28].mxu0 }
 0xb9b   : > { %v10313_v62 = vpop.f32.mrb[29].mxu0 }
 0xb9c   : > { %v10314_v44 = vadd.f32 %v10313_v62, %v10312_v1  ;;  %v10315_v26 = vpop.f32.mrb[30].mxu0 }
 0xb9d   : > { %v10316_v9 = vpop.f32.mrb[31].mxu0  ;;  %v10420_v30 = vpop.f32.mrb[36].mxu1 }
 0xb9e   : > { %v7831_v58 = vadd.f32 %v10354_v61, %v10314_v44  ;;  %v10317_v3 = vadd.f32 %v10316_v9, %v10315_v26  ;;  %v10421_v50 = vpop.f32.mrb[37].mxu1 }
 0xb9f   : > { %v10422_v28 = vadd.f32 %v10421_v50, %v10420_v30  ;;  %v10423_v10 = vpop.f32.mrb[38].mxu1 }
 0xba0   : > { %v7834_v49 = vadd.f32 %v10357_v22, %v10317_v3  ;;  %v10424_v7 = vpop.f32.mrb[39].mxu1 }
 0xba1   : > { %v10425_v11 = vadd.f32 %v10424_v7, %v10423_v10 }
 0xba2   : > { %v10374_v4 = vpop.f32.mrb[32].mxu0 }
 0xba3   : > { %v10375_v32 = vpop.f32.mrb[33].mxu0 }
 0xba4   : > { %v10376_v23 = vadd.f32 %v10375_v32, %v10374_v4  ;;  %v10377_v59 = vpop.f32.mrb[34].mxu0 }
 0xba5   : > { %v10378_v43 = vpop.f32.mrb[35].mxu0  ;;  %v10426_v14 = vpop.f32.mrb[40].mxu1 }
 0xba6   : > { %v7872_v63 = vadd.f32 %v10376_v23, %v7807_v47  ;;  %v10379_v38 = vadd.f32 %v10378_v43, %v10377_v59  ;;  %v10427_v39 = vpop.f32.mrb[41].mxu1 }
 0xba7   : > { %v10428_v12 = vadd.f32 %v10427_v39, %v10426_v14  ;;  %v10429_v51 = vpop.f32.mrb[42].mxu1 }
 0xba8   : > { %v7875_v5 = vadd.f32 %v10379_v38, %v7810_v35  ;;  %v10430_v20 = vpop.f32.mrb[43].mxu1  ;;  %v8273_v6 = vadd.f32 %v10416_v56, %v7872_v63 }
 0xba9   : > { %v10431_v57 = vadd.f32 %v10430_v20, %v10429_v51 }
 0xbaa   : > { %v8276_v31 = vadd.f32 %v10419_v45, %v7875_v5 }
 0xbab   : > { %v10380_v48 = vpop.f32.mrb[36].mxu0 }
 0xbac   : > { %v10381_v36 = vpop.f32.mrb[37].mxu0 }
 0xbad   : > { %v10382_v53 = vadd.f32 %v10381_v36, %v10380_v48  ;;  %v10383_v54 = vpop.f32.mrb[38].mxu0 }
 0xbae   : > { %v10384_v37 = vpop.f32.mrb[39].mxu0  ;;  %v10432_v33 = vpop.f32.mrb[44].mxu1 }
 0xbaf   : > { %v7880_v41 = vadd.f32 %v10382_v53, %v7815_v21  ;;  %v10385_v60 = vadd.f32 %v10384_v37, %v10383_v54  ;;  %v10433_v27 = vpop.f32.mrb[45].mxu1 }
 0xbb0   : > { %v10434_v0 = vadd.f32 %v10433_v27, %v10432_v33  ;;  %v10435_v47 = vpop.f32.mrb[46].mxu1 }
 0xbb1   : > { %v7883_v29 = vadd.f32 %v10385_v60, %v7818_v24  ;;  %v10436_v55 = vpop.f32.mrb[47].mxu1  ;;  %v8281_v61 = vadd.f32 %v10422_v28, %v7880_v41 }
 0xbb2   : > { %v10437_v2 = vadd.f32 %v10436_v55, %v10435_v47 }
 0xbb3   : > { %v10386_v35 = vpop.f32.mrb[40].mxu0  ;;  %v8284_v52 = vadd.f32 %v10425_v11, %v7883_v29 }
 0xbb4   : > { %v10387_v22 = vpop.f32.mrb[41].mxu0 }
 0xbb5   : > { %v10388_v13 = vadd.f32 %v10387_v22, %v10386_v35  ;;  %v10389_v16 = vpop.f32.mrb[42].mxu0 }
 0xbb6   : > { %v10390_v40 = vpop.f32.mrb[43].mxu0 }
 0xbb7   : > { %v7888_v19 = vadd.f32 %v10388_v13, %v7823_v46  ;;  %v10391_v8 = vadd.f32 %v10390_v40, %v10389_v16 }
 0xbb8   : > { %v10494_v18 = vpop.f32.mrb[48].mxu1 }
 0xbb9   : > { %v7891_v17 = vadd.f32 %v10391_v8, %v7826_v34  ;;  %v10495_v25 = vpop.f32.mrb[49].mxu1  ;;  %v8289_v21 = vadd.f32 %v10428_v12, %v7888_v19 }
 0xbba   : > { %v10496_v56 = vadd.f32 %v10495_v25, %v10494_v18  ;;  %v10497_v15 = vpop.f32.mrb[50].mxu1 }
 0xbbb   : > { %v10392_v42 = vpop.f32.mrb[44].mxu0  ;;  %v10498_v45 = vpop.f32.mrb[51].mxu1  ;;  %v8292_v24 = vadd.f32 %v10431_v57, %v7891_v17 }
 0xbbc   : > { %v10393_v1 = vpop.f32.mrb[45].mxu0  ;;  %v10499_v62 = vadd.f32 %v10498_v45, %v10497_v15 }
 0xbbd   : > { %v10394_v44 = vadd.f32 %v10393_v1, %v10392_v42  ;;  %v10395_v26 = vpop.f32.mrb[46].mxu0 }
 0xbbe   : > { %v10396_v9 = vpop.f32.mrb[47].mxu0 }
 0xbbf   : > { %v7896_v30 = vadd.f32 %v10394_v44, %v7831_v58  ;;  %v10397_v3 = vadd.f32 %v10396_v9, %v10395_v26 }
 0xbc0   : > { %v10500_v50 = vpop.f32.mrb[52].mxu1 }
 0xbc1   : > { %v7899_v28 = vadd.f32 %v10397_v3, %v7834_v49  ;;  %v10501_v46 = vpop.f32.mrb[53].mxu1  ;;  %v8297_v10 = vadd.f32 %v10434_v0, %v7896_v30 }
 0xbc2   : > { %v10502_v7 = vadd.f32 %v10501_v46, %v10500_v50  ;;  %v10503_v34 = vpop.f32.mrb[54].mxu1 }
 0xbc3   : > { %v10454_v11 = vpop.f32.mrb[48].mxu0  ;;  %v10504_v4 = vpop.f32.mrb[55].mxu1  ;;  %v8300_v32 = vadd.f32 %v10437_v2, %v7899_v28 }
 0xbc4   : > { %v10455_v23 = vpop.f32.mrb[49].mxu0  ;;  %v10505_v59 = vadd.f32 %v10504_v4, %v10503_v34 }
 0xbc5   : > { %v10456_v43 = vadd.f32 %v10455_v23, %v10454_v11  ;;  %v10457_v14 = vpop.f32.mrb[50].mxu0 }
 0xbc6   : > { %v10458_v63 = vpop.f32.mrb[51].mxu0 }
 0xbc7   : > { %v8338_v38 = vadd.f32 %v10456_v43, %v8273_v6  ;;  %v10459_v39 = vadd.f32 %v10458_v63, %v10457_v14 }
 0xbc8   : > { %v10506_v12 = vpop.f32.mrb[56].mxu1 }
 0xbc9   : > { %v14782_v51 = vadd.f32 %v10496_v56, %v8338_v38  ;;  %v8341_v58 = vadd.f32 %v10459_v39, %v8276_v31  ;;  %v10507_v5 = vpop.f32.mrb[57].mxu1 }
 0xbca   : > { %v10508_v49 = vadd.f32 %v10507_v5, %v10506_v12  ;;  %v10509_v20 = vpop.f32.mrb[58].mxu1 }
 0xbcb   : > { %v14784_v57 = vadd.f32 %v10499_v62, %v8341_v58  ;;  %v10460_v48 = vpop.f32.mrb[52].mxu0  ;;  %v10510_v36 = vpop.f32.mrb[59].mxu1 }
 0xbcc   : > { %v10461_v53 = vpop.f32.mrb[53].mxu0  ;;  %v10511_v54 = vadd.f32 %v10510_v36, %v10509_v20 }
 0xbcd   : > { %v10462_v37 = vadd.f32 %v10461_v53, %v10460_v48  ;;  %v10463_v33 = vpop.f32.mrb[54].mxu0 }
 0xbce   : > { %v10464_v41 = vpop.f32.mrb[55].mxu0 }
 0xbcf   : > { %v8346_v60 = vadd.f32 %v10462_v37, %v8281_v61  ;;  %v10465_v27 = vadd.f32 %v10464_v41, %v10463_v33 }
 0xbd0   : > { %v10512_v6 = vpop.f32.mrb[60].mxu1 }
 0xbd1   : > { %v14786_v0 = vadd.f32 %v10502_v7, %v8346_v60  ;;  %v8349_v47 = vadd.f32 %v10465_v27, %v8284_v52  ;;  %v10513_v29 = vpop.f32.mrb[61].mxu1 }
 0xbd2   : > { %v10514_v31 = vadd.f32 %v10513_v29, %v10512_v6  ;;  %v10515_v55 = vpop.f32.mrb[62].mxu1 }
 0xbd3   : > { %v14788_v2 = vadd.f32 %v10505_v59, %v8349_v47  ;;  %v10466_v35 = vpop.f32.mrb[56].mxu0  ;;  %v10516_v22 = vpop.f32.mrb[63].mxu1 }
 0xbd4   : > { %v10467_v13 = vpop.f32.mrb[57].mxu0  ;;  %v10517_v16 = vadd.f32 %v10516_v22, %v10515_v55 }
 0xbd5   : > { %v10468_v40 = vadd.f32 %v10467_v13, %v10466_v35  ;;  %v10469_v19 = vpop.f32.mrb[58].mxu0 }
 0xbd6   : > { %v10470_v8 = vpop.f32.mrb[59].mxu0 }
 0xbd7   : > { %v8354_v18 = vadd.f32 %v10468_v40, %v8289_v21  ;;  %v10471_v17 = vadd.f32 %v10470_v8, %v10469_v19 }
 0xbd9   : > { %v14790_v61 = vadd.f32 %v10508_v49, %v8354_v18  ;;  %v8357_v25 = vadd.f32 %v10471_v17, %v8292_v24  ;;  %v10574_v56 = vpop.f32.mrb[64].mxu1 }
 0xbda   : > { %v10575_v15 = vpop.f32.mrb[65].mxu1 }
 0xbdb   : > { %v14792_v52 = vadd.f32 %v10511_v54, %v8357_v25  ;;  %v10472_v42 = vpop.f32.mrb[60].mxu0  ;;  %v10576_v45 = vadd.f32 %v10575_v15, %v10574_v56  ;;  %v10577_v1 = vpop.f32.mrb[66].mxu1 }
 0xbdc   : > { %v10473_v62 = vpop.f32.mrb[61].mxu0  ;;  %v10578_v44 = vpop.f32.mrb[67].mxu1 }
 0xbdd   : > { %v10474_v26 = vadd.f32 %v10473_v62, %v10472_v42  ;;  %v10475_v9 = vpop.f32.mrb[62].mxu0  ;;  %v10579_v30 = vadd.f32 %v10578_v44, %v10577_v1 }
 0xbde   : > { %v10476_v3 = vpop.f32.mrb[63].mxu0 }
 0xbdf   : > { %v8362_v50 = vadd.f32 %v10474_v26, %v8297_v10  ;;  %v10477_v28 = vadd.f32 %v10476_v3, %v10475_v9 }
 0xbe1   : > { %v14794_v21 = vadd.f32 %v10514_v31, %v8362_v50  ;;  %v8365_v46 = vadd.f32 %v10477_v28, %v8300_v32  ;;  %v10580_v7 = vpop.f32.mrb[68].mxu1 }
 0xbe2   : > { %v10581_v24 = vpop.f32.mrb[69].mxu1 }
 0xbe3   : > { %v14796_v34 = vadd.f32 %v10517_v16, %v8365_v46  ;;  %v10534_v11 = vpop.f32.mrb[64].mxu0  ;;  %v10582_v4 = vadd.f32 %v10581_v24, %v10580_v7  ;;  %v10583_v23 = vpop.f32.mrb[70].mxu1 }
 0xbe4   : > { %v10535_v59 = vpop.f32.mrb[65].mxu0  ;;  %v10584_v43 = vpop.f32.mrb[71].mxu1 }
 0xbe5   : > { %v10536_v14 = vadd.f32 %v10535_v59, %v10534_v11  ;;  %v10537_v63 = vpop.f32.mrb[66].mxu0  ;;  %v10585_v38 = vadd.f32 %v10584_v43, %v10583_v23 }
 0xbe6   : > { %v10538_v39 = vpop.f32.mrb[67].mxu0 }
 0xbe7   : > { %v14798_v12 = vadd.f32 %v10576_v45, %v10536_v14  ;;  %v10539_v10 = vadd.f32 %v10538_v39, %v10537_v63 }
 0xbe9   : > { %v14800_v58 = vadd.f32 %v10579_v30, %v10539_v10  ;;  %v10586_v5 = vpop.f32.mrb[72].mxu1 }
 0xbea   : > { %v10587_v32 = vpop.f32.mrb[73].mxu1 }
 0xbeb   : > { %v10540_v49 = vpop.f32.mrb[68].mxu0  ;;  %v10588_v20 = vadd.f32 %v10587_v32, %v10586_v5  ;;  %v10589_v48 = vpop.f32.mrb[74].mxu1 }
 0xbec   : > { %v10541_v36 = vpop.f32.mrb[69].mxu0  ;;  %v10590_v53 = vpop.f32.mrb[75].mxu1 }
 0xbed   : > { %v10542_v54 = vadd.f32 %v10541_v36, %v10540_v49  ;;  %v10543_v37 = vpop.f32.mrb[70].mxu0  ;;  %v10591_v33 = vadd.f32 %v10590_v53, %v10589_v48 }
 0xbee   : > { %v10544_v41 = vpop.f32.mrb[71].mxu0 }
 0xbef   : > { %v14802_v60 = vadd.f32 %v10582_v4, %v10542_v54  ;;  %v10545_v27 = vadd.f32 %v10544_v41, %v10543_v37 }
 0xbf1   : > { %v14804_v6 = vadd.f32 %v10585_v38, %v10545_v27  ;;  %v10592_v47 = vpop.f32.mrb[76].mxu1 }
 0xbf2   : > { %v10593_v29 = vpop.f32.mrb[77].mxu1 }
 0xbf3   : > { %v10546_v31 = vpop.f32.mrb[72].mxu0  ;;  %v10594_v55 = vadd.f32 %v10593_v29, %v10592_v47  ;;  %v10595_v35 = vpop.f32.mrb[78].mxu1 }
 0xbf4   : > { %v10547_v22 = vpop.f32.mrb[73].mxu0  ;;  %v10596_v13 = vpop.f32.mrb[79].mxu1 }
 0xbf5   : > { %v10548_v16 = vadd.f32 %v10547_v22, %v10546_v31  ;;  %v10549_v40 = vpop.f32.mrb[74].mxu0  ;;  %v10597_v19 = vadd.f32 %v10596_v13, %v10595_v35 }
 0xbf6   : > { %v10550_v8 = vpop.f32.mrb[75].mxu0 }
 0xbf7   : > { %v8945_v18 = vadd.f32 %v10588_v20, %v10548_v16  ;;  %v10551_v17 = vadd.f32 %v10550_v8, %v10549_v40 }
 0xbf9   : > { %v8948_v25 = vadd.f32 %v10591_v33, %v10551_v17  ;;  %v10626_v56 = vpop.f32.mrb[80].mxu1 }
 0xbfa   : > { %v10627_v15 = vpop.f32.mrb[81].mxu1 }
 0xbfb   : > { %v10552_v42 = vpop.f32.mrb[76].mxu0  ;;  %v10628_v45 = vadd.f32 %v10627_v15, %v10626_v56  ;;  %v10629_v1 = vpop.f32.mrb[82].mxu1 }
 0xbfc   : > { %v10553_v62 = vpop.f32.mrb[77].mxu0  ;;  %v10630_v44 = vpop.f32.mrb[83].mxu1 }
 0xbfd   : > { %v9010_v26 = vadd.f32 %v10628_v45, %v8945_v18  ;;  %v10554_v9 = vadd.f32 %v10553_v62, %v10552_v42  ;;  %v10555_v30 = vpop.f32.mrb[78].mxu0  ;;  %v10631_v3 = vadd.f32 %v10630_v44, %v10629_v1 }
 0xbfe   : > { %v10556_v50 = vpop.f32.mrb[79].mxu0 }
 0xbff   : > { %v9028_v28 = vadd.f32 %v9010_v26, %v14790_v61  ;;  %v8953_v46 = vadd.f32 %v10594_v55, %v10554_v9  ;;  %v9013_v7 = vadd.f32 %v10631_v3, %v8948_v25  ;;  %v10557_v24 = vadd.f32 %v10556_v50, %v10555_v30 }
 0xc01   : > { %v9036_v11 = vmax.f32 %v9028_v28, 0.0  ;;  %v9029_v4 = vadd.f32 %v9013_v7, %v14792_v52  ;;  %v8956_v23 = vadd.f32 %v10597_v19, %v10557_v24  ;;  %v10632_v59 = vpop.f32.mrb[84].mxu1 }
 0xc02   : > { %v10633_v43 = vpop.f32.mrb[85].mxu1 }
 0xc03   : > { %9044 = vst [vmem:[%s13407_s27 + $0x20] sm:$0xff] %v9036_v11  ;;  %v9037_v14 = vmax.f32 %v9029_v4, 0.0  ;;  %v10614_v63 = vpop.f32.mrb[80].mxu0  ;;  %v10634_v38 = vadd.f32 %v10633_v43, %v10632_v59  ;;  %v10635_v39 = vpop.f32.mrb[86].mxu1 }
 0xc04   : > { %v10615_v10 = vpop.f32.mrb[81].mxu0  ;;  %v10636_v5 = vpop.f32.mrb[87].mxu1 }
 0xc05   : > { %9045 = vst [vmem:[%s13407_s27 + $0x28] sm:$0xff] %v9037_v14  ;;  %v9018_v61 = vadd.f32 %v10634_v38, %v8953_v46  ;;  %v10616_v32 = vadd.f32 %v10615_v10, %v10614_v63  ;;  %v10617_v49 = vpop.f32.mrb[82].mxu0  ;;  %v10637_v20 = vadd.f32 %v10636_v5, %v10635_v39 }
 0xc06   : > { %v10618_v48 = vpop.f32.mrb[83].mxu0 }
 0xc07   : > { %v9030_v52 = vadd.f32 %v9018_v61, %v14794_v21  ;;  %v8994_v36 = vadd.f32 %v10616_v32, %v14798_v12  ;;  %v9021_v53 = vadd.f32 %v10637_v20, %v8956_v23  ;;  %v10619_v54 = vadd.f32 %v10618_v48, %v10617_v49 }
 0xc09   : > { %v9038_v37 = vmax.f32 %v9030_v52, 0.0  ;;  %v9024_v33 = vadd.f32 %v8994_v36, %v14782_v51  ;;  %v9031_v41 = vadd.f32 %v9021_v53, %v14796_v34  ;;  %v8997_v27 = vadd.f32 %v10619_v54, %v14800_v58 }
 0xc0b   : > { %9046 = vst [vmem:[%s13407_s27 + $0x30] sm:$0xff] %v9038_v37  ;;  %v9032_v47 = vmax.f32 %v9024_v33, 0.0  ;;  %v9039_v29 = vmax.f32 %v9031_v41, 0.0  ;;  %v9025_v31 = vadd.f32 %v8997_v27, %v14784_v57  ;;  %v10620_v21 = vpop.f32.mrb[84].mxu0 }
 0xc0c   : > { %v10621_v55 = vpop.f32.mrb[85].mxu0 }
 0xc0d   : > { %9040 = vst [vmem:[%s13407_s27] sm:$0xff] %v9032_v47  ;;  %9047 = vst [vmem:[%s13407_s27 + $0x38] sm:$0xff] %v9039_v29  ;;  %v9033_v12 = vmax.f32 %v9025_v31, 0.0  ;;  %v10622_v35 = vadd.f32 %v10621_v55, %v10620_v21  ;;  %v10623_v51 = vpop.f32.mrb[86].mxu0 }
 0xc0e   : > { %v10624_v34 = vpop.f32.mrb[87].mxu0 }
 0xc0f   : > { %9041 = vst [vmem:[%s13407_s27 + $0x8] sm:$0xff] %v9033_v12  ;;  %v9002_v58 = vadd.f32 %v10622_v35, %v14802_v60  ;;  %v10625_v22 = vadd.f32 %v10624_v34, %v10623_v51 }
 0xc11   : > { %v9026_v13 = vadd.f32 %v9002_v58, %v14786_v0  ;;  %v9005_v57 = vadd.f32 %v10625_v22, %v14804_v6 }
 0xc13   : > { %v9034_v16 = vmax.f32 %v9026_v13, 0.0  ;;  %v9027_v40 = vadd.f32 %v9005_v57, %v14788_v2 }
 0xc15   : > { %9042 = vst [vmem:[%s13407_s27 + $0x10] sm:$0xff] %v9034_v16  ;;  %v9035_v60 = vmax.f32 %v9027_v40, 0.0 }
 0xc17   : > { %9043 = vst [vmem:[%s13407_s27 + $0x18] sm:$0xff] %v9035_v60 }
 0xc18   : > { %12568 = shalt.err (!%p12565_p0)
}
 0xc19   : > { %s12569_s27 = scalar_lea.hbm %s14829_s2, 1024  ;;  %s12573_s13 = scalar_lea.hbm %s15104_s10, 2048 }
 0xc1a   : > { %p12570_p5 = scmp.ne.s32.totalorder %s14829_s2, %s12569_s27  ;;  %p12574_p10 = scmp.lt.u32.totalorder %s14829_s2, %s15104_s10 }
 0xc1b   : > { %p12575_p1 = scmp.lt.u32.totalorder %s12573_s13, %s12569_s27  ;;  %p12577_p12 = scmp.lt.u32.totalorder %s12569_s27, %s14829_s2 }
 0xc1c   : > { %p12571_p2 = pnand %p12570_p5, %p15105_p13 }
 0xc1d   : > { %p12576_p11 = por %p12575_p1, %p12574_p10 }
 0xc1e   : > { %p12572_p7 = pneg %p12571_p2 }
 0xc1f   : > { %p12578_p8 = por %p12577_p12, %p12576_p11 }
 0xc21   : > { %p12579_p6 = pnand %p12578_p8, %p12572_p7 }
 0xc23   : > { %12582 = shalt.err (!%p12579_p6)
}
 0xc24   : > { %s12668_s15 = smov 128   ;;  %s12669_s24 = smov 8  }
 0xc25   : > { %10916 = dma.vmem_to_hbm [thread:$0]  (%p15105_p13), %s14831_s14, 1024, %s14829_s2, %s9049_s26, %s12668_s15, %s12668_s15, %s12669_s24  }
 0xc26 PF: > { %s9077_s28 = sand.u32 1, %s12633_s19   ;;  %p15106_p9 = scmp.ne.s32.totalorder %s14986_s18, 0 }
 0xc27   : > { %p15107_p4 = scmp.ge.s32.totalorder %s12645_s22, 2  ;;  %s9078_s12 = scalar_lea.sflag [#allocation7], %s9077_s28 }
 0xc29   : > { %p10951_p3 = pnand %p15107_p4, %p15106_p9 }
 0xc2b   : > { %12628 = dma.done.wait (!%p10951_p3), %s9078_s12, 1024  }
 0xc2c   : > { %12630 = vsyncadd (!%p10951_p3), %s9078_s12, 4294966272  ;;  %p30_p0 = scmp.ge.s32.totalorder %s12986_s17, 4   ;;  %s15108_s19 = smov %s12637_s20 }
 0xc2d   : > { %s15109_s20 = smov %s12641_s21  ;;  %s15110_s21 = smov %s12998_s30 }
 0xc2e   : > { %s15111_s22 = smov %s12986_s17  ;;  %32 = sbr.rel (!%p30_p0) target bundleno = 15 (0xf), region = 163 }
 0xc35   :  { %9083 = vsyncpa [#allocation6], 1 }
 0xc36   :  { %9085 = vsyncpa [#allocation6 + $0x1], 1 }
 0xc37   :  { %9086 = vsyncpa [#allocation9], 1 }
 0xc38   :  { %9087 = vsyncpa [#allocation12], 1 }
 0xc39   :  { %9088 = vsyncpa [#allocation15], 1 }
 0xc3a   :  { %9089 = vsyncpa [#allocation18], 1 }
 0xc3b   :  { %9090 = vsyncpa [#allocation21], 1 }
 0xc3c   :  { %9091 = vsyncpa [#allocation7], 1 }
 0xc3d   :  { %9093 = vsyncpa [#allocation7 + $0x1], 1 }

</bundles_post_ra>
